<compile_context>
chip_gen: v6e
topology: v6e:2x2x1
jax: 0.10.0
libtpu: 0.0.40
codegen_flags: <defaults>
</compile_context>

<pallas_src>
import functools

import jax
import jax.numpy as jnp
from jax.experimental import pallas as pl
from jax.experimental.pallas import tpu as pltpu


def _round_up(x, m):
    return ((x + m - 1) // m) * m


# ---------------------------------------------------------------------------
# Fused Pallas kernel
# ---------------------------------------------------------------------------
def _fused_policy_kernel(wc_ref, bc_ref, slabs_ref, wfc_ref, bfc_ref,
                         w1_ref, b1_ref, w2_ref, b2_ref, out_ref,
                         *, kc, c_out, s_dim):
    """conv -> ReLU -> fc -> ReLU -> Linear -> ReLU -> Linear, fully fused.

    wc_ref   : SMEM (kc*c_out,) f32   conv weight, row order (ci,di,dj), col c_out
    bc_ref   : SMEM (c_out,)    f32   conv bias
    slabs_ref: VMEM (kc, TB, S) bf16  shifted-image slabs (spatial on lanes)
    wfc_ref  : VMEM (c_out, S, Hp) bf16  CNN fc weight (permuted + zero-padded)
    bfc_ref  : VMEM (1, Hp) f32
    w1_ref   : VMEM (Hp, Hp) bf16 ;  b1_ref (1, Hp) f32
    w2_ref   : VMEM (Hp, Ap) bf16 ;  b2_ref (1, Ap) f32
    out_ref  : VMEM (TB, Ap) f32   gumbel-softmax logits (lane padded)
    """
    tile_b = slabs_ref.shape[1]
    h_pad = wfc_ref.shape[2]

    h0 = jnp.zeros((tile_b, h_pad), jnp.float32)
    for c in range(c_out):
        # Direct convolution for output channel c on the VPU: batch on sublanes,
        # spatial positions on lanes -> no reshape/relayout anywhere in-kernel.
        acc = jnp.zeros((tile_b, s_dim), jnp.float32)
        for k in range(kc):
            acc = acc + slabs_ref[k].astype(jnp.float32) * wc_ref[k * c_out + c]
        conv_c = jnp.maximum(acc + bc_ref[c], 0.0).astype(jnp.bfloat16)
        # CNN fc layer, contracted per conv output channel on the MXU.
        h0 = h0 + jnp.dot(conv_c, wfc_ref[c], preferred_element_type=jnp.float32)

    h0 = jnp.maximum(h0 + bfc_ref[...], 0.0).astype(jnp.bfloat16)
    h1 = jnp.dot(h0, w1_ref[...], preferred_element_type=jnp.float32)
    h1 = jnp.maximum(h1 + b1_ref[...], 0.0).astype(jnp.bfloat16)
    out = jnp.dot(h1, w2_ref[...], preferred_element_type=jnp.float32)
    out_ref[...] = out + b2_ref[...]


def _build_forward(state_shape, action_shape, k, c_out, h_pad, a_pad, act_dim,
                   tile_b_max=64):
    c_in, H, W = state_shape
    kc = c_in * k * k
    s_dim = H * W

    def forward(params, s):
        wc_flat, bc, wfc, bfc, w1, b1, w2, b2 = params
        x = jnp.asarray(s, jnp.float32).reshape((-1,) + tuple(state_shape))
        b = x.shape[0]

        if b <= tile_b_max:
            tile_b = max(8, _round_up(b, 8))
            b_pad = tile_b
        else:
            tile_b = tile_b_max
            b_pad = _round_up(b, tile_b)
        if b_pad != b:
            x = jnp.pad(x, ((0, b_pad - b), (0, 0), (0, 0), (0, 0)))

        # im2col as kc "shifted image" slabs: (kc, B, H*W), feature order
        # (ci, di, dj).  Only the small raw input is transposed; everything else
        # is slicing plus free row-major reshapes.  Invalid (boundary) spatial
        # positions are neutralized by zero rows in the fc weight, not by any
        # activation-side masking or compaction.
        xt = jnp.transpose(x, (1, 0, 2, 3))                          # (C, Bp, H, W)
        xt = jnp.pad(xt, ((0, 0), (0, 0), (0, k - 1), (0, k - 1)))
        slabs = jnp.stack([xt[:, :, di:di + H, dj:dj + W]
                           for di in range(k) for dj in range(k)],
                          axis=1)                                    # (C, k*k, Bp, H, W)
        slabs = slabs.reshape(kc, b_pad, s_dim).astype(jnp.bfloat16)

        kernel = functools.partial(_fused_policy_kernel, kc=kc, c_out=c_out,
                                   s_dim=s_dim)
        out = pl.pallas_call(
            kernel,
            out_shape=jax.ShapeDtypeStruct((b_pad, a_pad), jnp.float32),
            grid=(b_pad // tile_b,),
            in_specs=[
                pl.BlockSpec(memory_space=pltpu.MemorySpace.SMEM),        # wc_flat
                pl.BlockSpec(memory_space=pltpu.MemorySpace.SMEM),        # bc
                pl.BlockSpec((kc, tile_b, s_dim), lambda i: (0, i, 0)),   # slabs
                pl.BlockSpec((c_out, s_dim, h_pad), lambda i: (0, 0, 0)), # wfc
                pl.BlockSpec((1, h_pad), lambda i: (0, 0)),               # bfc
                pl.BlockSpec((h_pad, h_pad), lambda i: (0, 0)),           # w1
                pl.BlockSpec((1, h_pad), lambda i: (0, 0)),               # b1
                pl.BlockSpec((h_pad, a_pad), lambda i: (0, 0)),           # w2
                pl.BlockSpec((1, a_pad), lambda i: (0, 0)),               # b2
            ],
            out_specs=pl.BlockSpec((tile_b, a_pad), lambda i: (i, 0)),
            compiler_params=pltpu.CompilerParams(
                dimension_semantics=("parallel",)),
        )(wc_flat, bc, slabs, wfc, bfc, w1, b1, w2, b2)

        out = out[:b, :act_dim]
        return out.reshape((-1,) + tuple(action_shape))

    return forward


# ---------------------------------------------------------------------------
# Module wrapper
# ---------------------------------------------------------------------------
class DiscreteDeterministicPolicyNetworkPallas:
    """Forward pass of DiscreteDeterministicPolicyNetwork (3D state path)."""

    def __init__(self, state_shape, action_shape, hidden_dims=(32,),
                 conv_layers=((8, 3),), key=None):
        assert len(state_shape) == 3, "this implementation covers the 3D (CNN) path"
        assert len(conv_layers) == 1, "single conv layer, matching default config"
        assert len(hidden_dims) == 1, "single hidden layer, matching default config"
        self.state_shape = tuple(int(d) for d in state_shape)
        self.action_shape = tuple(int(d) for d in action_shape)
        self.hidden = int(hidden_dims[0])
        self.c_out, self.k = int(conv_layers[0][0]), int(conv_layers[0][1])

        c_in, h, w = self.state_shape
        self.h_out = h - self.k + 1
        self.w_out = w - self.k + 1
        flat = self.c_out * self.h_out * self.w_out
        act_dim = 1
        for d in self.action_shape:
            act_dim *= int(d)
        self.act_dim = act_dim

        # Lane padding for the narrow feature dims (32 -> 128, 6 -> 128).
        self.h_pad = max(128, _round_up(self.hidden, 128))
        self.a_pad = max(128, _round_up(self.act_dim, 128))

        key = jax.random.PRNGKey(0) if key is None else key
        ks = jax.random.split(key, 8)
        sc = 0.1
        # Raw f32 parameters (PyTorch layout) -- kept for the reference check.
        self.w_conv = sc * jax.random.normal(ks[0], (self.c_out, c_in, self.k, self.k), jnp.float32)
        self.b_conv = sc * jax.random.normal(ks[1], (self.c_out,), jnp.float32)
        self.w_fc = sc * jax.random.normal(ks[2], (flat, self.hidden), jnp.float32)
        self.b_fc = sc * jax.random.normal(ks[3], (self.hidden,), jnp.float32)
        self.w1 = sc * jax.random.normal(ks[4], (self.hidden, self.hidden), jnp.float32)
        self.b1 = sc * jax.random.normal(ks[5], (self.hidden,), jnp.float32)
        self.w2 = sc * jax.random.normal(ks[6], (self.hidden, self.act_dim), jnp.float32)
        self.b2 = sc * jax.random.normal(ks[7], (self.act_dim,), jnp.float32)

        # ---- One-time weight packing: every permutation / zero-pad the kernel
        # ---- layout needs is folded into the weights here (free at inference).
        kc = c_in * self.k * self.k
        s_dim = h * w
        # Conv weight rows in (ci, di, dj) order to match the slab ordering.
        wc_mat = jnp.transpose(self.w_conv, (1, 2, 3, 0)).reshape(kc, self.c_out)
        wc_flat = wc_mat.reshape(-1).astype(jnp.float32)
        bc = self.b_conv.astype(jnp.float32)
        # CNN fc weight: from torch (c, i, j) flatten order to the kernel's padded
        # (c, i_full, j_full) order; invalid spatial positions get zero rows.
        wfc = self.w_fc.reshape(self.c_out, self.h_out, self.w_out, self.hidden)
        wfc = jnp.pad(wfc, ((0, 0), (0, h - self.h_out), (0, w - self.w_out),
                            (0, self.h_pad - self.hidden)))
        wfc = wfc.reshape(self.c_out, s_dim, self.h_pad).astype(jnp.bfloat16)
        bfc = jnp.pad(self.b_fc, (0, self.h_pad - self.hidden)).reshape(1, -1)
        w1p = jnp.zeros((self.h_pad, self.h_pad), jnp.float32)
        w1p = w1p.at[:self.hidden, :self.hidden].set(self.w1).astype(jnp.bfloat16)
        b1p = jnp.pad(self.b1, (0, self.h_pad - self.hidden)).reshape(1, -1)
        w2p = jnp.zeros((self.h_pad, self.a_pad), jnp.float32)
        w2p = w2p.at[:self.hidden, :self.act_dim].set(self.w2).astype(jnp.bfloat16)
        b2p = jnp.pad(self.b2, (0, self.a_pad - self.act_dim)).reshape(1, -1)
        self._params = (wc_flat, bc, wfc, bfc, w1p, b1p, w2p, b2p)

        self._forward = jax.jit(_build_forward(
            self.state_shape, self.action_shape, self.k, self.c_out,
            self.h_pad, self.a_pad, self.act_dim))

    def __call__(self, s):
        return self._forward(self._params, s)


# ---------------------------------------------------------------------------
# Pure-JAX f32 reference for a correctness sanity check
# ---------------------------------------------------------------------------
def _reference_forward(net, s):
    x = jnp.asarray(s, jnp.float32).reshape((-1,) + net.state_shape)
    y = jax.lax.conv_general_dilated(
        x, net.w_conv, window_strides=(1, 1), padding="VALID",
        dimension_numbers=("NCHW", "OIHW", "NCHW"))
    y = jax.nn.relu(y + net.b_conv.reshape(1, -1, 1, 1))
    y = y.reshape(y.shape[0], -1)
    y = jax.nn.relu(y @ net.w_fc + net.b_fc)
    y = jax.nn.relu(y @ net.w1 + net.b1)
    y = y @ net.w2 + net.b2
    return y.reshape((-1,) + net.action_shape)


if __name__ == "__main__":
    key = jax.random.PRNGKey(0)
    k_s, k_p = jax.random.split(key)

    state_shape = (4, 16, 16)     # (C, H, W)
    action_shape = (6,)
    batch = 2

    net = DiscreteDeterministicPolicyNetworkPallas(
        state_shape, action_shape, hidden_dims=(32,), conv_layers=((8, 3),), key=k_p)

    s = jax.random.normal(k_s, (batch,) + state_shape, jnp.float32)

    out = jax.block_until_ready(net(s))
    ref = jax.block_until_ready(_reference_forward(net, s))

    assert out.shape == (batch,) + action_shape, out.shape
    max_err = float(jnp.max(jnp.abs(out - ref)))
    # bf16 matmul inputs (f32 accumulation) -> loose-but-meaningful tolerance.
    assert max_err < 3e-2, max_err

    print("KERNEL_OK")
</pallas_src>

<mosaic_0001>
module attributes {stable_mosaic.version = 11 : i64} {
  func.func @_fused_policy_kernel(%arg0: i32, %arg1: memref<288xf32, #tpu.memory_space<smem>>, %arg2: memref<8xf32, #tpu.memory_space<smem>>, %arg3: memref<36x8x256xbf16, #tpu.memory_space<vmem>>, %arg4: memref<8x256x128xbf16, #tpu.memory_space<vmem>>, %arg5: memref<1x128xf32, #tpu.memory_space<vmem>>, %arg6: memref<128x128xbf16, #tpu.memory_space<vmem>>, %arg7: memref<1x128xf32, #tpu.memory_space<vmem>>, %arg8: memref<128x128xbf16, #tpu.memory_space<vmem>>, %arg9: memref<1x128xf32, #tpu.memory_space<vmem>>, %arg10: memref<8x128xf32, #tpu.memory_space<vmem>>) attributes {dimension_semantics = [#tpu.dimension_semantics<parallel>], iteration_bounds = array<i64: 1>, scalar_prefetch = 0 : i64, scratch_operands = 0 : i64, tpu.core_type = #tpu.core_type<tc>, window_params = [{transform_indices = @transform_0, window_bounds = array<i64: 288>}, {transform_indices = @transform_1, window_bounds = array<i64: 8>}, {transform_indices = @transform_2, window_bounds = array<i64: 36, 8, 256>}, {pipeline_mode = #tpu.pipeline_mode<synchronous>, transform_indices = @transform_3, window_bounds = array<i64: 8, 256, 128>}, {pipeline_mode = #tpu.pipeline_mode<synchronous>, transform_indices = @transform_4, window_bounds = array<i64: 1, 128>}, {pipeline_mode = #tpu.pipeline_mode<synchronous>, transform_indices = @transform_5, window_bounds = array<i64: 128, 128>}, {pipeline_mode = #tpu.pipeline_mode<synchronous>, transform_indices = @transform_6, window_bounds = array<i64: 1, 128>}, {pipeline_mode = #tpu.pipeline_mode<synchronous>, transform_indices = @transform_7, window_bounds = array<i64: 128, 128>}, {pipeline_mode = #tpu.pipeline_mode<synchronous>, transform_indices = @transform_8, window_bounds = array<i64: 1, 128>}, {transform_indices = @transform_9, window_bounds = array<i64: 8, 128>}]} {
    %cst = arith.constant 0.000000e+00 : f32
    %0 = vector.broadcast %cst : f32 to vector<8x128xf32>
    %cst_0 = arith.constant 0.000000e+00 : f32
    %1 = vector.broadcast %cst_0 : f32 to vector<8x256xf32>
    %c0 = arith.constant 0 : index
    %c0_1 = arith.constant 0 : index
    %c0_2 = arith.constant 0 : index
    %2 = vector.load %arg3[%c0, %c0_1, %c0_2] : memref<36x8x256xbf16, #tpu.memory_space<vmem>>, vector<1x8x256xbf16>
    %3 = vector.shape_cast %2 : vector<1x8x256xbf16> to vector<8x256xbf16>
    %4 = arith.extf %3 : vector<8x256xbf16> to vector<8x256xf32>
    %c0_3 = arith.constant 0 : index
    %5 = memref.load %arg1[%c0_3] : memref<288xf32, #tpu.memory_space<smem>>
    %6 = vector.broadcast %5 : f32 to vector<8x256xf32>
    %7 = arith.mulf %4, %6 : vector<8x256xf32>
    %8 = arith.addf %1, %7 : vector<8x256xf32>
    %c1 = arith.constant 1 : index
    %c0_4 = arith.constant 0 : index
    %c0_5 = arith.constant 0 : index
    %9 = vector.load %arg3[%c1, %c0_4, %c0_5] : memref<36x8x256xbf16, #tpu.memory_space<vmem>>, vector<1x8x256xbf16>
    %10 = vector.shape_cast %9 : vector<1x8x256xbf16> to vector<8x256xbf16>
    %11 = arith.extf %10 : vector<8x256xbf16> to vector<8x256xf32>
    %c8 = arith.constant 8 : index
    %12 = memref.load %arg1[%c8] : memref<288xf32, #tpu.memory_space<smem>>
    %13 = vector.broadcast %12 : f32 to vector<8x256xf32>
    %14 = arith.mulf %11, %13 : vector<8x256xf32>
    %15 = arith.addf %8, %14 : vector<8x256xf32>
    %c2 = arith.constant 2 : index
    %c0_6 = arith.constant 0 : index
    %c0_7 = arith.constant 0 : index
    %16 = vector.load %arg3[%c2, %c0_6, %c0_7] : memref<36x8x256xbf16, #tpu.memory_space<vmem>>, vector<1x8x256xbf16>
    %17 = vector.shape_cast %16 : vector<1x8x256xbf16> to vector<8x256xbf16>
    %18 = arith.extf %17 : vector<8x256xbf16> to vector<8x256xf32>
    %c16 = arith.constant 16 : index
    %19 = memref.load %arg1[%c16] : memref<288xf32, #tpu.memory_space<smem>>
    %20 = vector.broadcast %19 : f32 to vector<8x256xf32>
    %21 = arith.mulf %18, %20 : vector<8x256xf32>
    %22 = arith.addf %15, %21 : vector<8x256xf32>
    %c3 = arith.constant 3 : index
    %c0_8 = arith.constant 0 : index
    %c0_9 = arith.constant 0 : index
    %23 = vector.load %arg3[%c3, %c0_8, %c0_9] : memref<36x8x256xbf16, #tpu.memory_space<vmem>>, vector<1x8x256xbf16>
    %24 = vector.shape_cast %23 : vector<1x8x256xbf16> to vector<8x256xbf16>
    %25 = arith.extf %24 : vector<8x256xbf16> to vector<8x256xf32>
    %c24 = arith.constant 24 : index
    %26 = memref.load %arg1[%c24] : memref<288xf32, #tpu.memory_space<smem>>
    %27 = vector.broadcast %26 : f32 to vector<8x256xf32>
    %28 = arith.mulf %25, %27 : vector<8x256xf32>
    %29 = arith.addf %22, %28 : vector<8x256xf32>
    %c4 = arith.constant 4 : index
    %c0_10 = arith.constant 0 : index
    %c0_11 = arith.constant 0 : index
    %30 = vector.load %arg3[%c4, %c0_10, %c0_11] : memref<36x8x256xbf16, #tpu.memory_space<vmem>>, vector<1x8x256xbf16>
    %31 = vector.shape_cast %30 : vector<1x8x256xbf16> to vector<8x256xbf16>
    %32 = arith.extf %31 : vector<8x256xbf16> to vector<8x256xf32>
    %c32 = arith.constant 32 : index
    %33 = memref.load %arg1[%c32] : memref<288xf32, #tpu.memory_space<smem>>
    %34 = vector.broadcast %33 : f32 to vector<8x256xf32>
    %35 = arith.mulf %32, %34 : vector<8x256xf32>
    %36 = arith.addf %29, %35 : vector<8x256xf32>
    %c5 = arith.constant 5 : index
    %c0_12 = arith.constant 0 : index
    %c0_13 = arith.constant 0 : index
    %37 = vector.load %arg3[%c5, %c0_12, %c0_13] : memref<36x8x256xbf16, #tpu.memory_space<vmem>>, vector<1x8x256xbf16>
    %38 = vector.shape_cast %37 : vector<1x8x256xbf16> to vector<8x256xbf16>
    %39 = arith.extf %38 : vector<8x256xbf16> to vector<8x256xf32>
    %c40 = arith.constant 40 : index
    %40 = memref.load %arg1[%c40] : memref<288xf32, #tpu.memory_space<smem>>
    %41 = vector.broadcast %40 : f32 to vector<8x256xf32>
    %42 = arith.mulf %39, %41 : vector<8x256xf32>
    %43 = arith.addf %36, %42 : vector<8x256xf32>
    %c6 = arith.constant 6 : index
    %c0_14 = arith.constant 0 : index
    %c0_15 = arith.constant 0 : index
    %44 = vector.load %arg3[%c6, %c0_14, %c0_15] : memref<36x8x256xbf16, #tpu.memory_space<vmem>>, vector<1x8x256xbf16>
    %45 = vector.shape_cast %44 : vector<1x8x256xbf16> to vector<8x256xbf16>
    %46 = arith.extf %45 : vector<8x256xbf16> to vector<8x256xf32>
    %c48 = arith.constant 48 : index
    %47 = memref.load %arg1[%c48] : memref<288xf32, #tpu.memory_space<smem>>
    %48 = vector.broadcast %47 : f32 to vector<8x256xf32>
    %49 = arith.mulf %46, %48 : vector<8x256xf32>
    %50 = arith.addf %43, %49 : vector<8x256xf32>
    %c7 = arith.constant 7 : index
    %c0_16 = arith.constant 0 : index
    %c0_17 = arith.constant 0 : index
    %51 = vector.load %arg3[%c7, %c0_16, %c0_17] : memref<36x8x256xbf16, #tpu.memory_space<vmem>>, vector<1x8x256xbf16>
    %52 = vector.shape_cast %51 : vector<1x8x256xbf16> to vector<8x256xbf16>
    %53 = arith.extf %52 : vector<8x256xbf16> to vector<8x256xf32>
    %c56 = arith.constant 56 : index
    %54 = memref.load %arg1[%c56] : memref<288xf32, #tpu.memory_space<smem>>
    %55 = vector.broadcast %54 : f32 to vector<8x256xf32>
    %56 = arith.mulf %53, %55 : vector<8x256xf32>
    %57 = arith.addf %50, %56 : vector<8x256xf32>
    %c8_18 = arith.constant 8 : index
    %c0_19 = arith.constant 0 : index
    %c0_20 = arith.constant 0 : index
    %58 = vector.load %arg3[%c8_18, %c0_19, %c0_20] : memref<36x8x256xbf16, #tpu.memory_space<vmem>>, vector<1x8x256xbf16>
    %59 = vector.shape_cast %58 : vector<1x8x256xbf16> to vector<8x256xbf16>
    %60 = arith.extf %59 : vector<8x256xbf16> to vector<8x256xf32>
    %c64 = arith.constant 64 : index
    %61 = memref.load %arg1[%c64] : memref<288xf32, #tpu.memory_space<smem>>
    %62 = vector.broadcast %61 : f32 to vector<8x256xf32>
    %63 = arith.mulf %60, %62 : vector<8x256xf32>
    %64 = arith.addf %57, %63 : vector<8x256xf32>
    %c9 = arith.constant 9 : index
    %c0_21 = arith.constant 0 : index
    %c0_22 = arith.constant 0 : index
    %65 = vector.load %arg3[%c9, %c0_21, %c0_22] : memref<36x8x256xbf16, #tpu.memory_space<vmem>>, vector<1x8x256xbf16>
    %66 = vector.shape_cast %65 : vector<1x8x256xbf16> to vector<8x256xbf16>
    %67 = arith.extf %66 : vector<8x256xbf16> to vector<8x256xf32>
    %c72 = arith.constant 72 : index
    %68 = memref.load %arg1[%c72] : memref<288xf32, #tpu.memory_space<smem>>
    %69 = vector.broadcast %68 : f32 to vector<8x256xf32>
    %70 = arith.mulf %67, %69 : vector<8x256xf32>
    %71 = arith.addf %64, %70 : vector<8x256xf32>
    %c10 = arith.constant 10 : index
    %c0_23 = arith.constant 0 : index
    %c0_24 = arith.constant 0 : index
    %72 = vector.load %arg3[%c10, %c0_23, %c0_24] : memref<36x8x256xbf16, #tpu.memory_space<vmem>>, vector<1x8x256xbf16>
    %73 = vector.shape_cast %72 : vector<1x8x256xbf16> to vector<8x256xbf16>
    %74 = arith.extf %73 : vector<8x256xbf16> to vector<8x256xf32>
    %c80 = arith.constant 80 : index
    %75 = memref.load %arg1[%c80] : memref<288xf32, #tpu.memory_space<smem>>
    %76 = vector.broadcast %75 : f32 to vector<8x256xf32>
    %77 = arith.mulf %74, %76 : vector<8x256xf32>
    %78 = arith.addf %71, %77 : vector<8x256xf32>
    %c11 = arith.constant 11 : index
    %c0_25 = arith.constant 0 : index
    %c0_26 = arith.constant 0 : index
    %79 = vector.load %arg3[%c11, %c0_25, %c0_26] : memref<36x8x256xbf16, #tpu.memory_space<vmem>>, vector<1x8x256xbf16>
    %80 = vector.shape_cast %79 : vector<1x8x256xbf16> to vector<8x256xbf16>
    %81 = arith.extf %80 : vector<8x256xbf16> to vector<8x256xf32>
    %c88 = arith.constant 88 : index
    %82 = memref.load %arg1[%c88] : memref<288xf32, #tpu.memory_space<smem>>
    %83 = vector.broadcast %82 : f32 to vector<8x256xf32>
    %84 = arith.mulf %81, %83 : vector<8x256xf32>
    %85 = arith.addf %78, %84 : vector<8x256xf32>
    %c12 = arith.constant 12 : index
    %c0_27 = arith.constant 0 : index
    %c0_28 = arith.constant 0 : index
    %86 = vector.load %arg3[%c12, %c0_27, %c0_28] : memref<36x8x256xbf16, #tpu.memory_space<vmem>>, vector<1x8x256xbf16>
    %87 = vector.shape_cast %86 : vector<1x8x256xbf16> to vector<8x256xbf16>
    %88 = arith.extf %87 : vector<8x256xbf16> to vector<8x256xf32>
    %c96 = arith.constant 96 : index
    %89 = memref.load %arg1[%c96] : memref<288xf32, #tpu.memory_space<smem>>
    %90 = vector.broadcast %89 : f32 to vector<8x256xf32>
    %91 = arith.mulf %88, %90 : vector<8x256xf32>
    %92 = arith.addf %85, %91 : vector<8x256xf32>
    %c13 = arith.constant 13 : index
    %c0_29 = arith.constant 0 : index
    %c0_30 = arith.constant 0 : index
    %93 = vector.load %arg3[%c13, %c0_29, %c0_30] : memref<36x8x256xbf16, #tpu.memory_space<vmem>>, vector<1x8x256xbf16>
    %94 = vector.shape_cast %93 : vector<1x8x256xbf16> to vector<8x256xbf16>
    %95 = arith.extf %94 : vector<8x256xbf16> to vector<8x256xf32>
    %c104 = arith.constant 104 : index
    %96 = memref.load %arg1[%c104] : memref<288xf32, #tpu.memory_space<smem>>
    %97 = vector.broadcast %96 : f32 to vector<8x256xf32>
    %98 = arith.mulf %95, %97 : vector<8x256xf32>
    %99 = arith.addf %92, %98 : vector<8x256xf32>
    %c14 = arith.constant 14 : index
    %c0_31 = arith.constant 0 : index
    %c0_32 = arith.constant 0 : index
    %100 = vector.load %arg3[%c14, %c0_31, %c0_32] : memref<36x8x256xbf16, #tpu.memory_space<vmem>>, vector<1x8x256xbf16>
    %101 = vector.shape_cast %100 : vector<1x8x256xbf16> to vector<8x256xbf16>
    %102 = arith.extf %101 : vector<8x256xbf16> to vector<8x256xf32>
    %c112 = arith.constant 112 : index
    %103 = memref.load %arg1[%c112] : memref<288xf32, #tpu.memory_space<smem>>
    %104 = vector.broadcast %103 : f32 to vector<8x256xf32>
    %105 = arith.mulf %102, %104 : vector<8x256xf32>
    %106 = arith.addf %99, %105 : vector<8x256xf32>
    %c15 = arith.constant 15 : index
    %c0_33 = arith.constant 0 : index
    %c0_34 = arith.constant 0 : index
    %107 = vector.load %arg3[%c15, %c0_33, %c0_34] : memref<36x8x256xbf16, #tpu.memory_space<vmem>>, vector<1x8x256xbf16>
    %108 = vector.shape_cast %107 : vector<1x8x256xbf16> to vector<8x256xbf16>
    %109 = arith.extf %108 : vector<8x256xbf16> to vector<8x256xf32>
    %c120 = arith.constant 120 : index
    %110 = memref.load %arg1[%c120] : memref<288xf32, #tpu.memory_space<smem>>
    %111 = vector.broadcast %110 : f32 to vector<8x256xf32>
    %112 = arith.mulf %109, %111 : vector<8x256xf32>
    %113 = arith.addf %106, %112 : vector<8x256xf32>
    %c16_35 = arith.constant 16 : index
    %c0_36 = arith.constant 0 : index
    %c0_37 = arith.constant 0 : index
    %114 = vector.load %arg3[%c16_35, %c0_36, %c0_37] : memref<36x8x256xbf16, #tpu.memory_space<vmem>>, vector<1x8x256xbf16>
    %115 = vector.shape_cast %114 : vector<1x8x256xbf16> to vector<8x256xbf16>
    %116 = arith.extf %115 : vector<8x256xbf16> to vector<8x256xf32>
    %c128 = arith.constant 128 : index
    %117 = memref.load %arg1[%c128] : memref<288xf32, #tpu.memory_space<smem>>
    %118 = vector.broadcast %117 : f32 to vector<8x256xf32>
    %119 = arith.mulf %116, %118 : vector<8x256xf32>
    %120 = arith.addf %113, %119 : vector<8x256xf32>
    %c17 = arith.constant 17 : index
    %c0_38 = arith.constant 0 : index
    %c0_39 = arith.constant 0 : index
    %121 = vector.load %arg3[%c17, %c0_38, %c0_39] : memref<36x8x256xbf16, #tpu.memory_space<vmem>>, vector<1x8x256xbf16>
    %122 = vector.shape_cast %121 : vector<1x8x256xbf16> to vector<8x256xbf16>
    %123 = arith.extf %122 : vector<8x256xbf16> to vector<8x256xf32>
    %c136 = arith.constant 136 : index
    %124 = memref.load %arg1[%c136] : memref<288xf32, #tpu.memory_space<smem>>
    %125 = vector.broadcast %124 : f32 to vector<8x256xf32>
    %126 = arith.mulf %123, %125 : vector<8x256xf32>
    %127 = arith.addf %120, %126 : vector<8x256xf32>
    %c18 = arith.constant 18 : index
    %c0_40 = arith.constant 0 : index
    %c0_41 = arith.constant 0 : index
    %128 = vector.load %arg3[%c18, %c0_40, %c0_41] : memref<36x8x256xbf16, #tpu.memory_space<vmem>>, vector<1x8x256xbf16>
    %129 = vector.shape_cast %128 : vector<1x8x256xbf16> to vector<8x256xbf16>
    %130 = arith.extf %129 : vector<8x256xbf16> to vector<8x256xf32>
    %c144 = arith.constant 144 : index
    %131 = memref.load %arg1[%c144] : memref<288xf32, #tpu.memory_space<smem>>
    %132 = vector.broadcast %131 : f32 to vector<8x256xf32>
    %133 = arith.mulf %130, %132 : vector<8x256xf32>
    %134 = arith.addf %127, %133 : vector<8x256xf32>
    %c19 = arith.constant 19 : index
    %c0_42 = arith.constant 0 : index
    %c0_43 = arith.constant 0 : index
    %135 = vector.load %arg3[%c19, %c0_42, %c0_43] : memref<36x8x256xbf16, #tpu.memory_space<vmem>>, vector<1x8x256xbf16>
    %136 = vector.shape_cast %135 : vector<1x8x256xbf16> to vector<8x256xbf16>
    %137 = arith.extf %136 : vector<8x256xbf16> to vector<8x256xf32>
    %c152 = arith.constant 152 : index
    %138 = memref.load %arg1[%c152] : memref<288xf32, #tpu.memory_space<smem>>
    %139 = vector.broadcast %138 : f32 to vector<8x256xf32>
    %140 = arith.mulf %137, %139 : vector<8x256xf32>
    %141 = arith.addf %134, %140 : vector<8x256xf32>
    %c20 = arith.constant 20 : index
    %c0_44 = arith.constant 0 : index
    %c0_45 = arith.constant 0 : index
    %142 = vector.load %arg3[%c20, %c0_44, %c0_45] : memref<36x8x256xbf16, #tpu.memory_space<vmem>>, vector<1x8x256xbf16>
    %143 = vector.shape_cast %142 : vector<1x8x256xbf16> to vector<8x256xbf16>
    %144 = arith.extf %143 : vector<8x256xbf16> to vector<8x256xf32>
    %c160 = arith.constant 160 : index
    %145 = memref.load %arg1[%c160] : memref<288xf32, #tpu.memory_space<smem>>
    %146 = vector.broadcast %145 : f32 to vector<8x256xf32>
    %147 = arith.mulf %144, %146 : vector<8x256xf32>
    %148 = arith.addf %141, %147 : vector<8x256xf32>
    %c21 = arith.constant 21 : index
    %c0_46 = arith.constant 0 : index
    %c0_47 = arith.constant 0 : index
    %149 = vector.load %arg3[%c21, %c0_46, %c0_47] : memref<36x8x256xbf16, #tpu.memory_space<vmem>>, vector<1x8x256xbf16>
    %150 = vector.shape_cast %149 : vector<1x8x256xbf16> to vector<8x256xbf16>
    %151 = arith.extf %150 : vector<8x256xbf16> to vector<8x256xf32>
    %c168 = arith.constant 168 : index
    %152 = memref.load %arg1[%c168] : memref<288xf32, #tpu.memory_space<smem>>
    %153 = vector.broadcast %152 : f32 to vector<8x256xf32>
    %154 = arith.mulf %151, %153 : vector<8x256xf32>
    %155 = arith.addf %148, %154 : vector<8x256xf32>
    %c22 = arith.constant 22 : index
    %c0_48 = arith.constant 0 : index
    %c0_49 = arith.constant 0 : index
    %156 = vector.load %arg3[%c22, %c0_48, %c0_49] : memref<36x8x256xbf16, #tpu.memory_space<vmem>>, vector<1x8x256xbf16>
    %157 = vector.shape_cast %156 : vector<1x8x256xbf16> to vector<8x256xbf16>
    %158 = arith.extf %157 : vector<8x256xbf16> to vector<8x256xf32>
    %c176 = arith.constant 176 : index
    %159 = memref.load %arg1[%c176] : memref<288xf32, #tpu.memory_space<smem>>
    %160 = vector.broadcast %159 : f32 to vector<8x256xf32>
    %161 = arith.mulf %158, %160 : vector<8x256xf32>
    %162 = arith.addf %155, %161 : vector<8x256xf32>
    %c23 = arith.constant 23 : index
    %c0_50 = arith.constant 0 : index
    %c0_51 = arith.constant 0 : index
    %163 = vector.load %arg3[%c23, %c0_50, %c0_51] : memref<36x8x256xbf16, #tpu.memory_space<vmem>>, vector<1x8x256xbf16>
    %164 = vector.shape_cast %163 : vector<1x8x256xbf16> to vector<8x256xbf16>
    %165 = arith.extf %164 : vector<8x256xbf16> to vector<8x256xf32>
    %c184 = arith.constant 184 : index
    %166 = memref.load %arg1[%c184] : memref<288xf32, #tpu.memory_space<smem>>
    %167 = vector.broadcast %166 : f32 to vector<8x256xf32>
    %168 = arith.mulf %165, %167 : vector<8x256xf32>
    %169 = arith.addf %162, %168 : vector<8x256xf32>
    %c24_52 = arith.constant 24 : index
    %c0_53 = arith.constant 0 : index
    %c0_54 = arith.constant 0 : index
    %170 = vector.load %arg3[%c24_52, %c0_53, %c0_54] : memref<36x8x256xbf16, #tpu.memory_space<vmem>>, vector<1x8x256xbf16>
    %171 = vector.shape_cast %170 : vector<1x8x256xbf16> to vector<8x256xbf16>
    %172 = arith.extf %171 : vector<8x256xbf16> to vector<8x256xf32>
    %c192 = arith.constant 192 : index
    %173 = memref.load %arg1[%c192] : memref<288xf32, #tpu.memory_space<smem>>
    %174 = vector.broadcast %173 : f32 to vector<8x256xf32>
    %175 = arith.mulf %172, %174 : vector<8x256xf32>
    %176 = arith.addf %169, %175 : vector<8x256xf32>
    %c25 = arith.constant 25 : index
    %c0_55 = arith.constant 0 : index
    %c0_56 = arith.constant 0 : index
    %177 = vector.load %arg3[%c25, %c0_55, %c0_56] : memref<36x8x256xbf16, #tpu.memory_space<vmem>>, vector<1x8x256xbf16>
    %178 = vector.shape_cast %177 : vector<1x8x256xbf16> to vector<8x256xbf16>
    %179 = arith.extf %178 : vector<8x256xbf16> to vector<8x256xf32>
    %c200 = arith.constant 200 : index
    %180 = memref.load %arg1[%c200] : memref<288xf32, #tpu.memory_space<smem>>
    %181 = vector.broadcast %180 : f32 to vector<8x256xf32>
    %182 = arith.mulf %179, %181 : vector<8x256xf32>
    %183 = arith.addf %176, %182 : vector<8x256xf32>
    %c26 = arith.constant 26 : index
    %c0_57 = arith.constant 0 : index
    %c0_58 = arith.constant 0 : index
    %184 = vector.load %arg3[%c26, %c0_57, %c0_58] : memref<36x8x256xbf16, #tpu.memory_space<vmem>>, vector<1x8x256xbf16>
    %185 = vector.shape_cast %184 : vector<1x8x256xbf16> to vector<8x256xbf16>
    %186 = arith.extf %185 : vector<8x256xbf16> to vector<8x256xf32>
    %c208 = arith.constant 208 : index
    %187 = memref.load %arg1[%c208] : memref<288xf32, #tpu.memory_space<smem>>
    %188 = vector.broadcast %187 : f32 to vector<8x256xf32>
    %189 = arith.mulf %186, %188 : vector<8x256xf32>
    %190 = arith.addf %183, %189 : vector<8x256xf32>
    %c27 = arith.constant 27 : index
    %c0_59 = arith.constant 0 : index
    %c0_60 = arith.constant 0 : index
    %191 = vector.load %arg3[%c27, %c0_59, %c0_60] : memref<36x8x256xbf16, #tpu.memory_space<vmem>>, vector<1x8x256xbf16>
    %192 = vector.shape_cast %191 : vector<1x8x256xbf16> to vector<8x256xbf16>
    %193 = arith.extf %192 : vector<8x256xbf16> to vector<8x256xf32>
    %c216 = arith.constant 216 : index
    %194 = memref.load %arg1[%c216] : memref<288xf32, #tpu.memory_space<smem>>
    %195 = vector.broadcast %194 : f32 to vector<8x256xf32>
    %196 = arith.mulf %193, %195 : vector<8x256xf32>
    %197 = arith.addf %190, %196 : vector<8x256xf32>
    %c28 = arith.constant 28 : index
    %c0_61 = arith.constant 0 : index
    %c0_62 = arith.constant 0 : index
    %198 = vector.load %arg3[%c28, %c0_61, %c0_62] : memref<36x8x256xbf16, #tpu.memory_space<vmem>>, vector<1x8x256xbf16>
    %199 = vector.shape_cast %198 : vector<1x8x256xbf16> to vector<8x256xbf16>
    %200 = arith.extf %199 : vector<8x256xbf16> to vector<8x256xf32>
    %c224 = arith.constant 224 : index
    %201 = memref.load %arg1[%c224] : memref<288xf32, #tpu.memory_space<smem>>
    %202 = vector.broadcast %201 : f32 to vector<8x256xf32>
    %203 = arith.mulf %200, %202 : vector<8x256xf32>
    %204 = arith.addf %197, %203 : vector<8x256xf32>
    %c29 = arith.constant 29 : index
    %c0_63 = arith.constant 0 : index
    %c0_64 = arith.constant 0 : index
    %205 = vector.load %arg3[%c29, %c0_63, %c0_64] : memref<36x8x256xbf16, #tpu.memory_space<vmem>>, vector<1x8x256xbf16>
    %206 = vector.shape_cast %205 : vector<1x8x256xbf16> to vector<8x256xbf16>
    %207 = arith.extf %206 : vector<8x256xbf16> to vector<8x256xf32>
    %c232 = arith.constant 232 : index
    %208 = memref.load %arg1[%c232] : memref<288xf32, #tpu.memory_space<smem>>
    %209 = vector.broadcast %208 : f32 to vector<8x256xf32>
    %210 = arith.mulf %207, %209 : vector<8x256xf32>
    %211 = arith.addf %204, %210 : vector<8x256xf32>
    %c30 = arith.constant 30 : index
    %c0_65 = arith.constant 0 : index
    %c0_66 = arith.constant 0 : index
    %212 = vector.load %arg3[%c30, %c0_65, %c0_66] : memref<36x8x256xbf16, #tpu.memory_space<vmem>>, vector<1x8x256xbf16>
    %213 = vector.shape_cast %212 : vector<1x8x256xbf16> to vector<8x256xbf16>
    %214 = arith.extf %213 : vector<8x256xbf16> to vector<8x256xf32>
    %c240 = arith.constant 240 : index
    %215 = memref.load %arg1[%c240] : memref<288xf32, #tpu.memory_space<smem>>
    %216 = vector.broadcast %215 : f32 to vector<8x256xf32>
    %217 = arith.mulf %214, %216 : vector<8x256xf32>
    %218 = arith.addf %211, %217 : vector<8x256xf32>
    %c31 = arith.constant 31 : index
    %c0_67 = arith.constant 0 : index
    %c0_68 = arith.constant 0 : index
    %219 = vector.load %arg3[%c31, %c0_67, %c0_68] : memref<36x8x256xbf16, #tpu.memory_space<vmem>>, vector<1x8x256xbf16>
    %220 = vector.shape_cast %219 : vector<1x8x256xbf16> to vector<8x256xbf16>
    %221 = arith.extf %220 : vector<8x256xbf16> to vector<8x256xf32>
    %c248 = arith.constant 248 : index
    %222 = memref.load %arg1[%c248] : memref<288xf32, #tpu.memory_space<smem>>
    %223 = vector.broadcast %222 : f32 to vector<8x256xf32>
    %224 = arith.mulf %221, %223 : vector<8x256xf32>
    %225 = arith.addf %218, %224 : vector<8x256xf32>
    %c32_69 = arith.constant 32 : index
    %c0_70 = arith.constant 0 : index
    %c0_71 = arith.constant 0 : index
    %226 = vector.load %arg3[%c32_69, %c0_70, %c0_71] : memref<36x8x256xbf16, #tpu.memory_space<vmem>>, vector<1x8x256xbf16>
    %227 = vector.shape_cast %226 : vector<1x8x256xbf16> to vector<8x256xbf16>
    %228 = arith.extf %227 : vector<8x256xbf16> to vector<8x256xf32>
    %c256 = arith.constant 256 : index
    %229 = memref.load %arg1[%c256] : memref<288xf32, #tpu.memory_space<smem>>
    %230 = vector.broadcast %229 : f32 to vector<8x256xf32>
    %231 = arith.mulf %228, %230 : vector<8x256xf32>
    %232 = arith.addf %225, %231 : vector<8x256xf32>
    %c33 = arith.constant 33 : index
    %c0_72 = arith.constant 0 : index
    %c0_73 = arith.constant 0 : index
    %233 = vector.load %arg3[%c33, %c0_72, %c0_73] : memref<36x8x256xbf16, #tpu.memory_space<vmem>>, vector<1x8x256xbf16>
    %234 = vector.shape_cast %233 : vector<1x8x256xbf16> to vector<8x256xbf16>
    %235 = arith.extf %234 : vector<8x256xbf16> to vector<8x256xf32>
    %c264 = arith.constant 264 : index
    %236 = memref.load %arg1[%c264] : memref<288xf32, #tpu.memory_space<smem>>
    %237 = vector.broadcast %236 : f32 to vector<8x256xf32>
    %238 = arith.mulf %235, %237 : vector<8x256xf32>
    %239 = arith.addf %232, %238 : vector<8x256xf32>
    %c34 = arith.constant 34 : index
    %c0_74 = arith.constant 0 : index
    %c0_75 = arith.constant 0 : index
    %240 = vector.load %arg3[%c34, %c0_74, %c0_75] : memref<36x8x256xbf16, #tpu.memory_space<vmem>>, vector<1x8x256xbf16>
    %241 = vector.shape_cast %240 : vector<1x8x256xbf16> to vector<8x256xbf16>
    %242 = arith.extf %241 : vector<8x256xbf16> to vector<8x256xf32>
    %c272 = arith.constant 272 : index
    %243 = memref.load %arg1[%c272] : memref<288xf32, #tpu.memory_space<smem>>
    %244 = vector.broadcast %243 : f32 to vector<8x256xf32>
    %245 = arith.mulf %242, %244 : vector<8x256xf32>
    %246 = arith.addf %239, %245 : vector<8x256xf32>
    %c35 = arith.constant 35 : index
    %c0_76 = arith.constant 0 : index
    %c0_77 = arith.constant 0 : index
    %247 = vector.load %arg3[%c35, %c0_76, %c0_77] : memref<36x8x256xbf16, #tpu.memory_space<vmem>>, vector<1x8x256xbf16>
    %248 = vector.shape_cast %247 : vector<1x8x256xbf16> to vector<8x256xbf16>
    %249 = arith.extf %248 : vector<8x256xbf16> to vector<8x256xf32>
    %c280 = arith.constant 280 : index
    %250 = memref.load %arg1[%c280] : memref<288xf32, #tpu.memory_space<smem>>
    %251 = vector.broadcast %250 : f32 to vector<8x256xf32>
    %252 = arith.mulf %249, %251 : vector<8x256xf32>
    %253 = arith.addf %246, %252 : vector<8x256xf32>
    %c0_78 = arith.constant 0 : index
    %254 = memref.load %arg2[%c0_78] : memref<8xf32, #tpu.memory_space<smem>>
    %255 = vector.broadcast %254 : f32 to vector<8x256xf32>
    %256 = arith.addf %253, %255 : vector<8x256xf32>
    %cst_79 = arith.constant 0.000000e+00 : f32
    %257 = vector.broadcast %cst_79 : f32 to vector<8x256xf32>
    %258 = arith.maximumf %256, %257 : vector<8x256xf32>
    %259 = arith.truncf %258 : vector<8x256xf32> to vector<8x256xbf16>
    %c0_80 = arith.constant 0 : index
    %c0_81 = arith.constant 0 : index
    %c0_82 = arith.constant 0 : index
    %260 = vector.load %arg4[%c0_80, %c0_81, %c0_82] : memref<8x256x128xbf16, #tpu.memory_space<vmem>>, vector<1x256x128xbf16>
    %261 = vector.shape_cast %260 : vector<1x256x128xbf16> to vector<256x128xbf16>
    %cst_83 = arith.constant dense<0.000000e+00> : vector<8x128xf32>
    %262 = tpu.matmul %259, %261, %cst_83 {dimension_numbers = #tpu.dot_dimension_numbers<[1], [0], [0], [1], [0, 0, 1, 1], [], []>} : vector<8x256xbf16>, vector<256x128xbf16>, vector<8x128xf32> -> vector<8x128xf32>
    %263 = arith.addf %0, %262 : vector<8x128xf32>
    %cst_84 = arith.constant 0.000000e+00 : f32
    %264 = vector.broadcast %cst_84 : f32 to vector<8x256xf32>
    %c0_85 = arith.constant 0 : index
    %c0_86 = arith.constant 0 : index
    %c0_87 = arith.constant 0 : index
    %265 = vector.load %arg3[%c0_85, %c0_86, %c0_87] : memref<36x8x256xbf16, #tpu.memory_space<vmem>>, vector<1x8x256xbf16>
    %266 = vector.shape_cast %265 : vector<1x8x256xbf16> to vector<8x256xbf16>
    %267 = arith.extf %266 : vector<8x256xbf16> to vector<8x256xf32>
    %c1_88 = arith.constant 1 : index
    %268 = memref.load %arg1[%c1_88] : memref<288xf32, #tpu.memory_space<smem>>
    %269 = vector.broadcast %268 : f32 to vector<8x256xf32>
    %270 = arith.mulf %267, %269 : vector<8x256xf32>
    %271 = arith.addf %264, %270 : vector<8x256xf32>
    %c1_89 = arith.constant 1 : index
    %c0_90 = arith.constant 0 : index
    %c0_91 = arith.constant 0 : index
    %272 = vector.load %arg3[%c1_89, %c0_90, %c0_91] : memref<36x8x256xbf16, #tpu.memory_space<vmem>>, vector<1x8x256xbf16>
    %273 = vector.shape_cast %272 : vector<1x8x256xbf16> to vector<8x256xbf16>
    %274 = arith.extf %273 : vector<8x256xbf16> to vector<8x256xf32>
    %c9_92 = arith.constant 9 : index
    %275 = memref.load %arg1[%c9_92] : memref<288xf32, #tpu.memory_space<smem>>
    %276 = vector.broadcast %275 : f32 to vector<8x256xf32>
    %277 = arith.mulf %274, %276 : vector<8x256xf32>
    %278 = arith.addf %271, %277 : vector<8x256xf32>
    %c2_93 = arith.constant 2 : index
    %c0_94 = arith.constant 0 : index
    %c0_95 = arith.constant 0 : index
    %279 = vector.load %arg3[%c2_93, %c0_94, %c0_95] : memref<36x8x256xbf16, #tpu.memory_space<vmem>>, vector<1x8x256xbf16>
    %280 = vector.shape_cast %279 : vector<1x8x256xbf16> to vector<8x256xbf16>
    %281 = arith.extf %280 : vector<8x256xbf16> to vector<8x256xf32>
    %c17_96 = arith.constant 17 : index
    %282 = memref.load %arg1[%c17_96] : memref<288xf32, #tpu.memory_space<smem>>
    %283 = vector.broadcast %282 : f32 to vector<8x256xf32>
    %284 = arith.mulf %281, %283 : vector<8x256xf32>
    %285 = arith.addf %278, %284 : vector<8x256xf32>
    %c3_97 = arith.constant 3 : index
    %c0_98 = arith.constant 0 : index
    %c0_99 = arith.constant 0 : index
    %286 = vector.load %arg3[%c3_97, %c0_98, %c0_99] : memref<36x8x256xbf16, #tpu.memory_space<vmem>>, vector<1x8x256xbf16>
    %287 = vector.shape_cast %286 : vector<1x8x256xbf16> to vector<8x256xbf16>
    %288 = arith.extf %287 : vector<8x256xbf16> to vector<8x256xf32>
    %c25_100 = arith.constant 25 : index
    %289 = memref.load %arg1[%c25_100] : memref<288xf32, #tpu.memory_space<smem>>
    %290 = vector.broadcast %289 : f32 to vector<8x256xf32>
    %291 = arith.mulf %288, %290 : vector<8x256xf32>
    %292 = arith.addf %285, %291 : vector<8x256xf32>
    %c4_101 = arith.constant 4 : index
    %c0_102 = arith.constant 0 : index
    %c0_103 = arith.constant 0 : index
    %293 = vector.load %arg3[%c4_101, %c0_102, %c0_103] : memref<36x8x256xbf16, #tpu.memory_space<vmem>>, vector<1x8x256xbf16>
    %294 = vector.shape_cast %293 : vector<1x8x256xbf16> to vector<8x256xbf16>
    %295 = arith.extf %294 : vector<8x256xbf16> to vector<8x256xf32>
    %c33_104 = arith.constant 33 : index
    %296 = memref.load %arg1[%c33_104] : memref<288xf32, #tpu.memory_space<smem>>
    %297 = vector.broadcast %296 : f32 to vector<8x256xf32>
    %298 = arith.mulf %295, %297 : vector<8x256xf32>
    %299 = arith.addf %292, %298 : vector<8x256xf32>
    %c5_105 = arith.constant 5 : index
    %c0_106 = arith.constant 0 : index
    %c0_107 = arith.constant 0 : index
    %300 = vector.load %arg3[%c5_105, %c0_106, %c0_107] : memref<36x8x256xbf16, #tpu.memory_space<vmem>>, vector<1x8x256xbf16>
    %301 = vector.shape_cast %300 : vector<1x8x256xbf16> to vector<8x256xbf16>
    %302 = arith.extf %301 : vector<8x256xbf16> to vector<8x256xf32>
    %c41 = arith.constant 41 : index
    %303 = memref.load %arg1[%c41] : memref<288xf32, #tpu.memory_space<smem>>
    %304 = vector.broadcast %303 : f32 to vector<8x256xf32>
    %305 = arith.mulf %302, %304 : vector<8x256xf32>
    %306 = arith.addf %299, %305 : vector<8x256xf32>
    %c6_108 = arith.constant 6 : index
    %c0_109 = arith.constant 0 : index
    %c0_110 = arith.constant 0 : index
    %307 = vector.load %arg3[%c6_108, %c0_109, %c0_110] : memref<36x8x256xbf16, #tpu.memory_space<vmem>>, vector<1x8x256xbf16>
    %308 = vector.shape_cast %307 : vector<1x8x256xbf16> to vector<8x256xbf16>
    %309 = arith.extf %308 : vector<8x256xbf16> to vector<8x256xf32>
    %c49 = arith.constant 49 : index
    %310 = memref.load %arg1[%c49] : memref<288xf32, #tpu.memory_space<smem>>
    %311 = vector.broadcast %310 : f32 to vector<8x256xf32>
    %312 = arith.mulf %309, %311 : vector<8x256xf32>
    %313 = arith.addf %306, %312 : vector<8x256xf32>
    %c7_111 = arith.constant 7 : index
    %c0_112 = arith.constant 0 : index
    %c0_113 = arith.constant 0 : index
    %314 = vector.load %arg3[%c7_111, %c0_112, %c0_113] : memref<36x8x256xbf16, #tpu.memory_space<vmem>>, vector<1x8x256xbf16>
    %315 = vector.shape_cast %314 : vector<1x8x256xbf16> to vector<8x256xbf16>
    %316 = arith.extf %315 : vector<8x256xbf16> to vector<8x256xf32>
    %c57 = arith.constant 57 : index
    %317 = memref.load %arg1[%c57] : memref<288xf32, #tpu.memory_space<smem>>
    %318 = vector.broadcast %317 : f32 to vector<8x256xf32>
    %319 = arith.mulf %316, %318 : vector<8x256xf32>
    %320 = arith.addf %313, %319 : vector<8x256xf32>
    %c8_114 = arith.constant 8 : index
    %c0_115 = arith.constant 0 : index
    %c0_116 = arith.constant 0 : index
    %321 = vector.load %arg3[%c8_114, %c0_115, %c0_116] : memref<36x8x256xbf16, #tpu.memory_space<vmem>>, vector<1x8x256xbf16>
    %322 = vector.shape_cast %321 : vector<1x8x256xbf16> to vector<8x256xbf16>
    %323 = arith.extf %322 : vector<8x256xbf16> to vector<8x256xf32>
    %c65 = arith.constant 65 : index
    %324 = memref.load %arg1[%c65] : memref<288xf32, #tpu.memory_space<smem>>
    %325 = vector.broadcast %324 : f32 to vector<8x256xf32>
    %326 = arith.mulf %323, %325 : vector<8x256xf32>
    %327 = arith.addf %320, %326 : vector<8x256xf32>
    %c9_117 = arith.constant 9 : index
    %c0_118 = arith.constant 0 : index
    %c0_119 = arith.constant 0 : index
    %328 = vector.load %arg3[%c9_117, %c0_118, %c0_119] : memref<36x8x256xbf16, #tpu.memory_space<vmem>>, vector<1x8x256xbf16>
    %329 = vector.shape_cast %328 : vector<1x8x256xbf16> to vector<8x256xbf16>
    %330 = arith.extf %329 : vector<8x256xbf16> to vector<8x256xf32>
    %c73 = arith.constant 73 : index
    %331 = memref.load %arg1[%c73] : memref<288xf32, #tpu.memory_space<smem>>
    %332 = vector.broadcast %331 : f32 to vector<8x256xf32>
    %333 = arith.mulf %330, %332 : vector<8x256xf32>
    %334 = arith.addf %327, %333 : vector<8x256xf32>
    %c10_120 = arith.constant 10 : index
    %c0_121 = arith.constant 0 : index
    %c0_122 = arith.constant 0 : index
    %335 = vector.load %arg3[%c10_120, %c0_121, %c0_122] : memref<36x8x256xbf16, #tpu.memory_space<vmem>>, vector<1x8x256xbf16>
    %336 = vector.shape_cast %335 : vector<1x8x256xbf16> to vector<8x256xbf16>
    %337 = arith.extf %336 : vector<8x256xbf16> to vector<8x256xf32>
    %c81 = arith.constant 81 : index
    %338 = memref.load %arg1[%c81] : memref<288xf32, #tpu.memory_space<smem>>
    %339 = vector.broadcast %338 : f32 to vector<8x256xf32>
    %340 = arith.mulf %337, %339 : vector<8x256xf32>
    %341 = arith.addf %334, %340 : vector<8x256xf32>
    %c11_123 = arith.constant 11 : index
    %c0_124 = arith.constant 0 : index
    %c0_125 = arith.constant 0 : index
    %342 = vector.load %arg3[%c11_123, %c0_124, %c0_125] : memref<36x8x256xbf16, #tpu.memory_space<vmem>>, vector<1x8x256xbf16>
    %343 = vector.shape_cast %342 : vector<1x8x256xbf16> to vector<8x256xbf16>
    %344 = arith.extf %343 : vector<8x256xbf16> to vector<8x256xf32>
    %c89 = arith.constant 89 : index
    %345 = memref.load %arg1[%c89] : memref<288xf32, #tpu.memory_space<smem>>
    %346 = vector.broadcast %345 : f32 to vector<8x256xf32>
    %347 = arith.mulf %344, %346 : vector<8x256xf32>
    %348 = arith.addf %341, %347 : vector<8x256xf32>
    %c12_126 = arith.constant 12 : index
    %c0_127 = arith.constant 0 : index
    %c0_128 = arith.constant 0 : index
    %349 = vector.load %arg3[%c12_126, %c0_127, %c0_128] : memref<36x8x256xbf16, #tpu.memory_space<vmem>>, vector<1x8x256xbf16>
    %350 = vector.shape_cast %349 : vector<1x8x256xbf16> to vector<8x256xbf16>
    %351 = arith.extf %350 : vector<8x256xbf16> to vector<8x256xf32>
    %c97 = arith.constant 97 : index
    %352 = memref.load %arg1[%c97] : memref<288xf32, #tpu.memory_space<smem>>
    %353 = vector.broadcast %352 : f32 to vector<8x256xf32>
    %354 = arith.mulf %351, %353 : vector<8x256xf32>
    %355 = arith.addf %348, %354 : vector<8x256xf32>
    %c13_129 = arith.constant 13 : index
    %c0_130 = arith.constant 0 : index
    %c0_131 = arith.constant 0 : index
    %356 = vector.load %arg3[%c13_129, %c0_130, %c0_131] : memref<36x8x256xbf16, #tpu.memory_space<vmem>>, vector<1x8x256xbf16>
    %357 = vector.shape_cast %356 : vector<1x8x256xbf16> to vector<8x256xbf16>
    %358 = arith.extf %357 : vector<8x256xbf16> to vector<8x256xf32>
    %c105 = arith.constant 105 : index
    %359 = memref.load %arg1[%c105] : memref<288xf32, #tpu.memory_space<smem>>
    %360 = vector.broadcast %359 : f32 to vector<8x256xf32>
    %361 = arith.mulf %358, %360 : vector<8x256xf32>
    %362 = arith.addf %355, %361 : vector<8x256xf32>
    %c14_132 = arith.constant 14 : index
    %c0_133 = arith.constant 0 : index
    %c0_134 = arith.constant 0 : index
    %363 = vector.load %arg3[%c14_132, %c0_133, %c0_134] : memref<36x8x256xbf16, #tpu.memory_space<vmem>>, vector<1x8x256xbf16>
    %364 = vector.shape_cast %363 : vector<1x8x256xbf16> to vector<8x256xbf16>
    %365 = arith.extf %364 : vector<8x256xbf16> to vector<8x256xf32>
    %c113 = arith.constant 113 : index
    %366 = memref.load %arg1[%c113] : memref<288xf32, #tpu.memory_space<smem>>
    %367 = vector.broadcast %366 : f32 to vector<8x256xf32>
    %368 = arith.mulf %365, %367 : vector<8x256xf32>
    %369 = arith.addf %362, %368 : vector<8x256xf32>
    %c15_135 = arith.constant 15 : index
    %c0_136 = arith.constant 0 : index
    %c0_137 = arith.constant 0 : index
    %370 = vector.load %arg3[%c15_135, %c0_136, %c0_137] : memref<36x8x256xbf16, #tpu.memory_space<vmem>>, vector<1x8x256xbf16>
    %371 = vector.shape_cast %370 : vector<1x8x256xbf16> to vector<8x256xbf16>
    %372 = arith.extf %371 : vector<8x256xbf16> to vector<8x256xf32>
    %c121 = arith.constant 121 : index
    %373 = memref.load %arg1[%c121] : memref<288xf32, #tpu.memory_space<smem>>
    %374 = vector.broadcast %373 : f32 to vector<8x256xf32>
    %375 = arith.mulf %372, %374 : vector<8x256xf32>
    %376 = arith.addf %369, %375 : vector<8x256xf32>
    %c16_138 = arith.constant 16 : index
    %c0_139 = arith.constant 0 : index
    %c0_140 = arith.constant 0 : index
    %377 = vector.load %arg3[%c16_138, %c0_139, %c0_140] : memref<36x8x256xbf16, #tpu.memory_space<vmem>>, vector<1x8x256xbf16>
    %378 = vector.shape_cast %377 : vector<1x8x256xbf16> to vector<8x256xbf16>
    %379 = arith.extf %378 : vector<8x256xbf16> to vector<8x256xf32>
    %c129 = arith.constant 129 : index
    %380 = memref.load %arg1[%c129] : memref<288xf32, #tpu.memory_space<smem>>
    %381 = vector.broadcast %380 : f32 to vector<8x256xf32>
    %382 = arith.mulf %379, %381 : vector<8x256xf32>
    %383 = arith.addf %376, %382 : vector<8x256xf32>
    %c17_141 = arith.constant 17 : index
    %c0_142 = arith.constant 0 : index
    %c0_143 = arith.constant 0 : index
    %384 = vector.load %arg3[%c17_141, %c0_142, %c0_143] : memref<36x8x256xbf16, #tpu.memory_space<vmem>>, vector<1x8x256xbf16>
    %385 = vector.shape_cast %384 : vector<1x8x256xbf16> to vector<8x256xbf16>
    %386 = arith.extf %385 : vector<8x256xbf16> to vector<8x256xf32>
    %c137 = arith.constant 137 : index
    %387 = memref.load %arg1[%c137] : memref<288xf32, #tpu.memory_space<smem>>
    %388 = vector.broadcast %387 : f32 to vector<8x256xf32>
    %389 = arith.mulf %386, %388 : vector<8x256xf32>
    %390 = arith.addf %383, %389 : vector<8x256xf32>
    %c18_144 = arith.constant 18 : index
    %c0_145 = arith.constant 0 : index
    %c0_146 = arith.constant 0 : index
    %391 = vector.load %arg3[%c18_144, %c0_145, %c0_146] : memref<36x8x256xbf16, #tpu.memory_space<vmem>>, vector<1x8x256xbf16>
    %392 = vector.shape_cast %391 : vector<1x8x256xbf16> to vector<8x256xbf16>
    %393 = arith.extf %392 : vector<8x256xbf16> to vector<8x256xf32>
    %c145 = arith.constant 145 : index
    %394 = memref.load %arg1[%c145] : memref<288xf32, #tpu.memory_space<smem>>
    %395 = vector.broadcast %394 : f32 to vector<8x256xf32>
    %396 = arith.mulf %393, %395 : vector<8x256xf32>
    %397 = arith.addf %390, %396 : vector<8x256xf32>
    %c19_147 = arith.constant 19 : index
    %c0_148 = arith.constant 0 : index
    %c0_149 = arith.constant 0 : index
    %398 = vector.load %arg3[%c19_147, %c0_148, %c0_149] : memref<36x8x256xbf16, #tpu.memory_space<vmem>>, vector<1x8x256xbf16>
    %399 = vector.shape_cast %398 : vector<1x8x256xbf16> to vector<8x256xbf16>
    %400 = arith.extf %399 : vector<8x256xbf16> to vector<8x256xf32>
    %c153 = arith.constant 153 : index
    %401 = memref.load %arg1[%c153] : memref<288xf32, #tpu.memory_space<smem>>
    %402 = vector.broadcast %401 : f32 to vector<8x256xf32>
    %403 = arith.mulf %400, %402 : vector<8x256xf32>
    %404 = arith.addf %397, %403 : vector<8x256xf32>
    %c20_150 = arith.constant 20 : index
    %c0_151 = arith.constant 0 : index
    %c0_152 = arith.constant 0 : index
    %405 = vector.load %arg3[%c20_150, %c0_151, %c0_152] : memref<36x8x256xbf16, #tpu.memory_space<vmem>>, vector<1x8x256xbf16>
    %406 = vector.shape_cast %405 : vector<1x8x256xbf16> to vector<8x256xbf16>
    %407 = arith.extf %406 : vector<8x256xbf16> to vector<8x256xf32>
    %c161 = arith.constant 161 : index
    %408 = memref.load %arg1[%c161] : memref<288xf32, #tpu.memory_space<smem>>
    %409 = vector.broadcast %408 : f32 to vector<8x256xf32>
    %410 = arith.mulf %407, %409 : vector<8x256xf32>
    %411 = arith.addf %404, %410 : vector<8x256xf32>
    %c21_153 = arith.constant 21 : index
    %c0_154 = arith.constant 0 : index
    %c0_155 = arith.constant 0 : index
    %412 = vector.load %arg3[%c21_153, %c0_154, %c0_155] : memref<36x8x256xbf16, #tpu.memory_space<vmem>>, vector<1x8x256xbf16>
    %413 = vector.shape_cast %412 : vector<1x8x256xbf16> to vector<8x256xbf16>
    %414 = arith.extf %413 : vector<8x256xbf16> to vector<8x256xf32>
    %c169 = arith.constant 169 : index
    %415 = memref.load %arg1[%c169] : memref<288xf32, #tpu.memory_space<smem>>
    %416 = vector.broadcast %415 : f32 to vector<8x256xf32>
    %417 = arith.mulf %414, %416 : vector<8x256xf32>
    %418 = arith.addf %411, %417 : vector<8x256xf32>
    %c22_156 = arith.constant 22 : index
    %c0_157 = arith.constant 0 : index
    %c0_158 = arith.constant 0 : index
    %419 = vector.load %arg3[%c22_156, %c0_157, %c0_158] : memref<36x8x256xbf16, #tpu.memory_space<vmem>>, vector<1x8x256xbf16>
    %420 = vector.shape_cast %419 : vector<1x8x256xbf16> to vector<8x256xbf16>
    %421 = arith.extf %420 : vector<8x256xbf16> to vector<8x256xf32>
    %c177 = arith.constant 177 : index
    %422 = memref.load %arg1[%c177] : memref<288xf32, #tpu.memory_space<smem>>
    %423 = vector.broadcast %422 : f32 to vector<8x256xf32>
    %424 = arith.mulf %421, %423 : vector<8x256xf32>
    %425 = arith.addf %418, %424 : vector<8x256xf32>
    %c23_159 = arith.constant 23 : index
    %c0_160 = arith.constant 0 : index
    %c0_161 = arith.constant 0 : index
    %426 = vector.load %arg3[%c23_159, %c0_160, %c0_161] : memref<36x8x256xbf16, #tpu.memory_space<vmem>>, vector<1x8x256xbf16>
    %427 = vector.shape_cast %426 : vector<1x8x256xbf16> to vector<8x256xbf16>
    %428 = arith.extf %427 : vector<8x256xbf16> to vector<8x256xf32>
    %c185 = arith.constant 185 : index
    %429 = memref.load %arg1[%c185] : memref<288xf32, #tpu.memory_space<smem>>
    %430 = vector.broadcast %429 : f32 to vector<8x256xf32>
    %431 = arith.mulf %428, %430 : vector<8x256xf32>
    %432 = arith.addf %425, %431 : vector<8x256xf32>
    %c24_162 = arith.constant 24 : index
    %c0_163 = arith.constant 0 : index
    %c0_164 = arith.constant 0 : index
    %433 = vector.load %arg3[%c24_162, %c0_163, %c0_164] : memref<36x8x256xbf16, #tpu.memory_space<vmem>>, vector<1x8x256xbf16>
    %434 = vector.shape_cast %433 : vector<1x8x256xbf16> to vector<8x256xbf16>
    %435 = arith.extf %434 : vector<8x256xbf16> to vector<8x256xf32>
    %c193 = arith.constant 193 : index
    %436 = memref.load %arg1[%c193] : memref<288xf32, #tpu.memory_space<smem>>
    %437 = vector.broadcast %436 : f32 to vector<8x256xf32>
    %438 = arith.mulf %435, %437 : vector<8x256xf32>
    %439 = arith.addf %432, %438 : vector<8x256xf32>
    %c25_165 = arith.constant 25 : index
    %c0_166 = arith.constant 0 : index
    %c0_167 = arith.constant 0 : index
    %440 = vector.load %arg3[%c25_165, %c0_166, %c0_167] : memref<36x8x256xbf16, #tpu.memory_space<vmem>>, vector<1x8x256xbf16>
    %441 = vector.shape_cast %440 : vector<1x8x256xbf16> to vector<8x256xbf16>
    %442 = arith.extf %441 : vector<8x256xbf16> to vector<8x256xf32>
    %c201 = arith.constant 201 : index
    %443 = memref.load %arg1[%c201] : memref<288xf32, #tpu.memory_space<smem>>
    %444 = vector.broadcast %443 : f32 to vector<8x256xf32>
    %445 = arith.mulf %442, %444 : vector<8x256xf32>
    %446 = arith.addf %439, %445 : vector<8x256xf32>
    %c26_168 = arith.constant 26 : index
    %c0_169 = arith.constant 0 : index
    %c0_170 = arith.constant 0 : index
    %447 = vector.load %arg3[%c26_168, %c0_169, %c0_170] : memref<36x8x256xbf16, #tpu.memory_space<vmem>>, vector<1x8x256xbf16>
    %448 = vector.shape_cast %447 : vector<1x8x256xbf16> to vector<8x256xbf16>
    %449 = arith.extf %448 : vector<8x256xbf16> to vector<8x256xf32>
    %c209 = arith.constant 209 : index
    %450 = memref.load %arg1[%c209] : memref<288xf32, #tpu.memory_space<smem>>
    %451 = vector.broadcast %450 : f32 to vector<8x256xf32>
    %452 = arith.mulf %449, %451 : vector<8x256xf32>
    %453 = arith.addf %446, %452 : vector<8x256xf32>
    %c27_171 = arith.constant 27 : index
    %c0_172 = arith.constant 0 : index
    %c0_173 = arith.constant 0 : index
    %454 = vector.load %arg3[%c27_171, %c0_172, %c0_173] : memref<36x8x256xbf16, #tpu.memory_space<vmem>>, vector<1x8x256xbf16>
    %455 = vector.shape_cast %454 : vector<1x8x256xbf16> to vector<8x256xbf16>
    %456 = arith.extf %455 : vector<8x256xbf16> to vector<8x256xf32>
    %c217 = arith.constant 217 : index
    %457 = memref.load %arg1[%c217] : memref<288xf32, #tpu.memory_space<smem>>
    %458 = vector.broadcast %457 : f32 to vector<8x256xf32>
    %459 = arith.mulf %456, %458 : vector<8x256xf32>
    %460 = arith.addf %453, %459 : vector<8x256xf32>
    %c28_174 = arith.constant 28 : index
    %c0_175 = arith.constant 0 : index
    %c0_176 = arith.constant 0 : index
    %461 = vector.load %arg3[%c28_174, %c0_175, %c0_176] : memref<36x8x256xbf16, #tpu.memory_space<vmem>>, vector<1x8x256xbf16>
    %462 = vector.shape_cast %461 : vector<1x8x256xbf16> to vector<8x256xbf16>
    %463 = arith.extf %462 : vector<8x256xbf16> to vector<8x256xf32>
    %c225 = arith.constant 225 : index
    %464 = memref.load %arg1[%c225] : memref<288xf32, #tpu.memory_space<smem>>
    %465 = vector.broadcast %464 : f32 to vector<8x256xf32>
    %466 = arith.mulf %463, %465 : vector<8x256xf32>
    %467 = arith.addf %460, %466 : vector<8x256xf32>
    %c29_177 = arith.constant 29 : index
    %c0_178 = arith.constant 0 : index
    %c0_179 = arith.constant 0 : index
    %468 = vector.load %arg3[%c29_177, %c0_178, %c0_179] : memref<36x8x256xbf16, #tpu.memory_space<vmem>>, vector<1x8x256xbf16>
    %469 = vector.shape_cast %468 : vector<1x8x256xbf16> to vector<8x256xbf16>
    %470 = arith.extf %469 : vector<8x256xbf16> to vector<8x256xf32>
    %c233 = arith.constant 233 : index
    %471 = memref.load %arg1[%c233] : memref<288xf32, #tpu.memory_space<smem>>
    %472 = vector.broadcast %471 : f32 to vector<8x256xf32>
    %473 = arith.mulf %470, %472 : vector<8x256xf32>
    %474 = arith.addf %467, %473 : vector<8x256xf32>
    %c30_180 = arith.constant 30 : index
    %c0_181 = arith.constant 0 : index
    %c0_182 = arith.constant 0 : index
    %475 = vector.load %arg3[%c30_180, %c0_181, %c0_182] : memref<36x8x256xbf16, #tpu.memory_space<vmem>>, vector<1x8x256xbf16>
    %476 = vector.shape_cast %475 : vector<1x8x256xbf16> to vector<8x256xbf16>
    %477 = arith.extf %476 : vector<8x256xbf16> to vector<8x256xf32>
    %c241 = arith.constant 241 : index
    %478 = memref.load %arg1[%c241] : memref<288xf32, #tpu.memory_space<smem>>
    %479 = vector.broadcast %478 : f32 to vector<8x256xf32>
    %480 = arith.mulf %477, %479 : vector<8x256xf32>
    %481 = arith.addf %474, %480 : vector<8x256xf32>
    %c31_183 = arith.constant 31 : index
    %c0_184 = arith.constant 0 : index
    %c0_185 = arith.constant 0 : index
    %482 = vector.load %arg3[%c31_183, %c0_184, %c0_185] : memref<36x8x256xbf16, #tpu.memory_space<vmem>>, vector<1x8x256xbf16>
    %483 = vector.shape_cast %482 : vector<1x8x256xbf16> to vector<8x256xbf16>
    %484 = arith.extf %483 : vector<8x256xbf16> to vector<8x256xf32>
    %c249 = arith.constant 249 : index
    %485 = memref.load %arg1[%c249] : memref<288xf32, #tpu.memory_space<smem>>
    %486 = vector.broadcast %485 : f32 to vector<8x256xf32>
    %487 = arith.mulf %484, %486 : vector<8x256xf32>
    %488 = arith.addf %481, %487 : vector<8x256xf32>
    %c32_186 = arith.constant 32 : index
    %c0_187 = arith.constant 0 : index
    %c0_188 = arith.constant 0 : index
    %489 = vector.load %arg3[%c32_186, %c0_187, %c0_188] : memref<36x8x256xbf16, #tpu.memory_space<vmem>>, vector<1x8x256xbf16>
    %490 = vector.shape_cast %489 : vector<1x8x256xbf16> to vector<8x256xbf16>
    %491 = arith.extf %490 : vector<8x256xbf16> to vector<8x256xf32>
    %c257 = arith.constant 257 : index
    %492 = memref.load %arg1[%c257] : memref<288xf32, #tpu.memory_space<smem>>
    %493 = vector.broadcast %492 : f32 to vector<8x256xf32>
    %494 = arith.mulf %491, %493 : vector<8x256xf32>
    %495 = arith.addf %488, %494 : vector<8x256xf32>
    %c33_189 = arith.constant 33 : index
    %c0_190 = arith.constant 0 : index
    %c0_191 = arith.constant 0 : index
    %496 = vector.load %arg3[%c33_189, %c0_190, %c0_191] : memref<36x8x256xbf16, #tpu.memory_space<vmem>>, vector<1x8x256xbf16>
    %497 = vector.shape_cast %496 : vector<1x8x256xbf16> to vector<8x256xbf16>
    %498 = arith.extf %497 : vector<8x256xbf16> to vector<8x256xf32>
    %c265 = arith.constant 265 : index
    %499 = memref.load %arg1[%c265] : memref<288xf32, #tpu.memory_space<smem>>
    %500 = vector.broadcast %499 : f32 to vector<8x256xf32>
    %501 = arith.mulf %498, %500 : vector<8x256xf32>
    %502 = arith.addf %495, %501 : vector<8x256xf32>
    %c34_192 = arith.constant 34 : index
    %c0_193 = arith.constant 0 : index
    %c0_194 = arith.constant 0 : index
    %503 = vector.load %arg3[%c34_192, %c0_193, %c0_194] : memref<36x8x256xbf16, #tpu.memory_space<vmem>>, vector<1x8x256xbf16>
    %504 = vector.shape_cast %503 : vector<1x8x256xbf16> to vector<8x256xbf16>
    %505 = arith.extf %504 : vector<8x256xbf16> to vector<8x256xf32>
    %c273 = arith.constant 273 : index
    %506 = memref.load %arg1[%c273] : memref<288xf32, #tpu.memory_space<smem>>
    %507 = vector.broadcast %506 : f32 to vector<8x256xf32>
    %508 = arith.mulf %505, %507 : vector<8x256xf32>
    %509 = arith.addf %502, %508 : vector<8x256xf32>
    %c35_195 = arith.constant 35 : index
    %c0_196 = arith.constant 0 : index
    %c0_197 = arith.constant 0 : index
    %510 = vector.load %arg3[%c35_195, %c0_196, %c0_197] : memref<36x8x256xbf16, #tpu.memory_space<vmem>>, vector<1x8x256xbf16>
    %511 = vector.shape_cast %510 : vector<1x8x256xbf16> to vector<8x256xbf16>
    %512 = arith.extf %511 : vector<8x256xbf16> to vector<8x256xf32>
    %c281 = arith.constant 281 : index
    %513 = memref.load %arg1[%c281] : memref<288xf32, #tpu.memory_space<smem>>
    %514 = vector.broadcast %513 : f32 to vector<8x256xf32>
    %515 = arith.mulf %512, %514 : vector<8x256xf32>
    %516 = arith.addf %509, %515 : vector<8x256xf32>
    %c1_198 = arith.constant 1 : index
    %517 = memref.load %arg2[%c1_198] : memref<8xf32, #tpu.memory_space<smem>>
    %518 = vector.broadcast %517 : f32 to vector<8x256xf32>
    %519 = arith.addf %516, %518 : vector<8x256xf32>
    %cst_199 = arith.constant 0.000000e+00 : f32
    %520 = vector.broadcast %cst_199 : f32 to vector<8x256xf32>
    %521 = arith.maximumf %519, %520 : vector<8x256xf32>
    %522 = arith.truncf %521 : vector<8x256xf32> to vector<8x256xbf16>
    %c1_200 = arith.constant 1 : index
    %c0_201 = arith.constant 0 : index
    %c0_202 = arith.constant 0 : index
    %523 = vector.load %arg4[%c1_200, %c0_201, %c0_202] : memref<8x256x128xbf16, #tpu.memory_space<vmem>>, vector<1x256x128xbf16>
    %524 = vector.shape_cast %523 : vector<1x256x128xbf16> to vector<256x128xbf16>
    %cst_203 = arith.constant dense<0.000000e+00> : vector<8x128xf32>
    %525 = tpu.matmul %522, %524, %cst_203 {dimension_numbers = #tpu.dot_dimension_numbers<[1], [0], [0], [1], [0, 0, 1, 1], [], []>} : vector<8x256xbf16>, vector<256x128xbf16>, vector<8x128xf32> -> vector<8x128xf32>
    %526 = arith.addf %263, %525 : vector<8x128xf32>
    %cst_204 = arith.constant 0.000000e+00 : f32
    %527 = vector.broadcast %cst_204 : f32 to vector<8x256xf32>
    %c0_205 = arith.constant 0 : index
    %c0_206 = arith.constant 0 : index
    %c0_207 = arith.constant 0 : index
    %528 = vector.load %arg3[%c0_205, %c0_206, %c0_207] : memref<36x8x256xbf16, #tpu.memory_space<vmem>>, vector<1x8x256xbf16>
    %529 = vector.shape_cast %528 : vector<1x8x256xbf16> to vector<8x256xbf16>
    %530 = arith.extf %529 : vector<8x256xbf16> to vector<8x256xf32>
    %c2_208 = arith.constant 2 : index
    %531 = memref.load %arg1[%c2_208] : memref<288xf32, #tpu.memory_space<smem>>
    %532 = vector.broadcast %531 : f32 to vector<8x256xf32>
    %533 = arith.mulf %530, %532 : vector<8x256xf32>
    %534 = arith.addf %527, %533 : vector<8x256xf32>
    %c1_209 = arith.constant 1 : index
    %c0_210 = arith.constant 0 : index
    %c0_211 = arith.constant 0 : index
    %535 = vector.load %arg3[%c1_209, %c0_210, %c0_211] : memref<36x8x256xbf16, #tpu.memory_space<vmem>>, vector<1x8x256xbf16>
    %536 = vector.shape_cast %535 : vector<1x8x256xbf16> to vector<8x256xbf16>
    %537 = arith.extf %536 : vector<8x256xbf16> to vector<8x256xf32>
    %c10_212 = arith.constant 10 : index
    %538 = memref.load %arg1[%c10_212] : memref<288xf32, #tpu.memory_space<smem>>
    %539 = vector.broadcast %538 : f32 to vector<8x256xf32>
    %540 = arith.mulf %537, %539 : vector<8x256xf32>
    %541 = arith.addf %534, %540 : vector<8x256xf32>
    %c2_213 = arith.constant 2 : index
    %c0_214 = arith.constant 0 : index
    %c0_215 = arith.constant 0 : index
    %542 = vector.load %arg3[%c2_213, %c0_214, %c0_215] : memref<36x8x256xbf16, #tpu.memory_space<vmem>>, vector<1x8x256xbf16>
    %543 = vector.shape_cast %542 : vector<1x8x256xbf16> to vector<8x256xbf16>
    %544 = arith.extf %543 : vector<8x256xbf16> to vector<8x256xf32>
    %c18_216 = arith.constant 18 : index
    %545 = memref.load %arg1[%c18_216] : memref<288xf32, #tpu.memory_space<smem>>
    %546 = vector.broadcast %545 : f32 to vector<8x256xf32>
    %547 = arith.mulf %544, %546 : vector<8x256xf32>
    %548 = arith.addf %541, %547 : vector<8x256xf32>
    %c3_217 = arith.constant 3 : index
    %c0_218 = arith.constant 0 : index
    %c0_219 = arith.constant 0 : index
    %549 = vector.load %arg3[%c3_217, %c0_218, %c0_219] : memref<36x8x256xbf16, #tpu.memory_space<vmem>>, vector<1x8x256xbf16>
    %550 = vector.shape_cast %549 : vector<1x8x256xbf16> to vector<8x256xbf16>
    %551 = arith.extf %550 : vector<8x256xbf16> to vector<8x256xf32>
    %c26_220 = arith.constant 26 : index
    %552 = memref.load %arg1[%c26_220] : memref<288xf32, #tpu.memory_space<smem>>
    %553 = vector.broadcast %552 : f32 to vector<8x256xf32>
    %554 = arith.mulf %551, %553 : vector<8x256xf32>
    %555 = arith.addf %548, %554 : vector<8x256xf32>
    %c4_221 = arith.constant 4 : index
    %c0_222 = arith.constant 0 : index
    %c0_223 = arith.constant 0 : index
    %556 = vector.load %arg3[%c4_221, %c0_222, %c0_223] : memref<36x8x256xbf16, #tpu.memory_space<vmem>>, vector<1x8x256xbf16>
    %557 = vector.shape_cast %556 : vector<1x8x256xbf16> to vector<8x256xbf16>
    %558 = arith.extf %557 : vector<8x256xbf16> to vector<8x256xf32>
    %c34_224 = arith.constant 34 : index
    %559 = memref.load %arg1[%c34_224] : memref<288xf32, #tpu.memory_space<smem>>
    %560 = vector.broadcast %559 : f32 to vector<8x256xf32>
    %561 = arith.mulf %558, %560 : vector<8x256xf32>
    %562 = arith.addf %555, %561 : vector<8x256xf32>
    %c5_225 = arith.constant 5 : index
    %c0_226 = arith.constant 0 : index
    %c0_227 = arith.constant 0 : index
    %563 = vector.load %arg3[%c5_225, %c0_226, %c0_227] : memref<36x8x256xbf16, #tpu.memory_space<vmem>>, vector<1x8x256xbf16>
    %564 = vector.shape_cast %563 : vector<1x8x256xbf16> to vector<8x256xbf16>
    %565 = arith.extf %564 : vector<8x256xbf16> to vector<8x256xf32>
    %c42 = arith.constant 42 : index
    %566 = memref.load %arg1[%c42] : memref<288xf32, #tpu.memory_space<smem>>
    %567 = vector.broadcast %566 : f32 to vector<8x256xf32>
    %568 = arith.mulf %565, %567 : vector<8x256xf32>
    %569 = arith.addf %562, %568 : vector<8x256xf32>
    %c6_228 = arith.constant 6 : index
    %c0_229 = arith.constant 0 : index
    %c0_230 = arith.constant 0 : index
    %570 = vector.load %arg3[%c6_228, %c0_229, %c0_230] : memref<36x8x256xbf16, #tpu.memory_space<vmem>>, vector<1x8x256xbf16>
    %571 = vector.shape_cast %570 : vector<1x8x256xbf16> to vector<8x256xbf16>
    %572 = arith.extf %571 : vector<8x256xbf16> to vector<8x256xf32>
    %c50 = arith.constant 50 : index
    %573 = memref.load %arg1[%c50] : memref<288xf32, #tpu.memory_space<smem>>
    %574 = vector.broadcast %573 : f32 to vector<8x256xf32>
    %575 = arith.mulf %572, %574 : vector<8x256xf32>
    %576 = arith.addf %569, %575 : vector<8x256xf32>
    %c7_231 = arith.constant 7 : index
    %c0_232 = arith.constant 0 : index
    %c0_233 = arith.constant 0 : index
    %577 = vector.load %arg3[%c7_231, %c0_232, %c0_233] : memref<36x8x256xbf16, #tpu.memory_space<vmem>>, vector<1x8x256xbf16>
    %578 = vector.shape_cast %577 : vector<1x8x256xbf16> to vector<8x256xbf16>
    %579 = arith.extf %578 : vector<8x256xbf16> to vector<8x256xf32>
    %c58 = arith.constant 58 : index
    %580 = memref.load %arg1[%c58] : memref<288xf32, #tpu.memory_space<smem>>
    %581 = vector.broadcast %580 : f32 to vector<8x256xf32>
    %582 = arith.mulf %579, %581 : vector<8x256xf32>
    %583 = arith.addf %576, %582 : vector<8x256xf32>
    %c8_234 = arith.constant 8 : index
    %c0_235 = arith.constant 0 : index
    %c0_236 = arith.constant 0 : index
    %584 = vector.load %arg3[%c8_234, %c0_235, %c0_236] : memref<36x8x256xbf16, #tpu.memory_space<vmem>>, vector<1x8x256xbf16>
    %585 = vector.shape_cast %584 : vector<1x8x256xbf16> to vector<8x256xbf16>
    %586 = arith.extf %585 : vector<8x256xbf16> to vector<8x256xf32>
    %c66 = arith.constant 66 : index
    %587 = memref.load %arg1[%c66] : memref<288xf32, #tpu.memory_space<smem>>
    %588 = vector.broadcast %587 : f32 to vector<8x256xf32>
    %589 = arith.mulf %586, %588 : vector<8x256xf32>
    %590 = arith.addf %583, %589 : vector<8x256xf32>
    %c9_237 = arith.constant 9 : index
    %c0_238 = arith.constant 0 : index
    %c0_239 = arith.constant 0 : index
    %591 = vector.load %arg3[%c9_237, %c0_238, %c0_239] : memref<36x8x256xbf16, #tpu.memory_space<vmem>>, vector<1x8x256xbf16>
    %592 = vector.shape_cast %591 : vector<1x8x256xbf16> to vector<8x256xbf16>
    %593 = arith.extf %592 : vector<8x256xbf16> to vector<8x256xf32>
    %c74 = arith.constant 74 : index
    %594 = memref.load %arg1[%c74] : memref<288xf32, #tpu.memory_space<smem>>
    %595 = vector.broadcast %594 : f32 to vector<8x256xf32>
    %596 = arith.mulf %593, %595 : vector<8x256xf32>
    %597 = arith.addf %590, %596 : vector<8x256xf32>
    %c10_240 = arith.constant 10 : index
    %c0_241 = arith.constant 0 : index
    %c0_242 = arith.constant 0 : index
    %598 = vector.load %arg3[%c10_240, %c0_241, %c0_242] : memref<36x8x256xbf16, #tpu.memory_space<vmem>>, vector<1x8x256xbf16>
    %599 = vector.shape_cast %598 : vector<1x8x256xbf16> to vector<8x256xbf16>
    %600 = arith.extf %599 : vector<8x256xbf16> to vector<8x256xf32>
    %c82 = arith.constant 82 : index
    %601 = memref.load %arg1[%c82] : memref<288xf32, #tpu.memory_space<smem>>
    %602 = vector.broadcast %601 : f32 to vector<8x256xf32>
    %603 = arith.mulf %600, %602 : vector<8x256xf32>
    %604 = arith.addf %597, %603 : vector<8x256xf32>
    %c11_243 = arith.constant 11 : index
    %c0_244 = arith.constant 0 : index
    %c0_245 = arith.constant 0 : index
    %605 = vector.load %arg3[%c11_243, %c0_244, %c0_245] : memref<36x8x256xbf16, #tpu.memory_space<vmem>>, vector<1x8x256xbf16>
    %606 = vector.shape_cast %605 : vector<1x8x256xbf16> to vector<8x256xbf16>
    %607 = arith.extf %606 : vector<8x256xbf16> to vector<8x256xf32>
    %c90 = arith.constant 90 : index
    %608 = memref.load %arg1[%c90] : memref<288xf32, #tpu.memory_space<smem>>
    %609 = vector.broadcast %608 : f32 to vector<8x256xf32>
    %610 = arith.mulf %607, %609 : vector<8x256xf32>
    %611 = arith.addf %604, %610 : vector<8x256xf32>
    %c12_246 = arith.constant 12 : index
    %c0_247 = arith.constant 0 : index
    %c0_248 = arith.constant 0 : index
    %612 = vector.load %arg3[%c12_246, %c0_247, %c0_248] : memref<36x8x256xbf16, #tpu.memory_space<vmem>>, vector<1x8x256xbf16>
    %613 = vector.shape_cast %612 : vector<1x8x256xbf16> to vector<8x256xbf16>
    %614 = arith.extf %613 : vector<8x256xbf16> to vector<8x256xf32>
    %c98 = arith.constant 98 : index
    %615 = memref.load %arg1[%c98] : memref<288xf32, #tpu.memory_space<smem>>
    %616 = vector.broadcast %615 : f32 to vector<8x256xf32>
    %617 = arith.mulf %614, %616 : vector<8x256xf32>
    %618 = arith.addf %611, %617 : vector<8x256xf32>
    %c13_249 = arith.constant 13 : index
    %c0_250 = arith.constant 0 : index
    %c0_251 = arith.constant 0 : index
    %619 = vector.load %arg3[%c13_249, %c0_250, %c0_251] : memref<36x8x256xbf16, #tpu.memory_space<vmem>>, vector<1x8x256xbf16>
    %620 = vector.shape_cast %619 : vector<1x8x256xbf16> to vector<8x256xbf16>
    %621 = arith.extf %620 : vector<8x256xbf16> to vector<8x256xf32>
    %c106 = arith.constant 106 : index
    %622 = memref.load %arg1[%c106] : memref<288xf32, #tpu.memory_space<smem>>
    %623 = vector.broadcast %622 : f32 to vector<8x256xf32>
    %624 = arith.mulf %621, %623 : vector<8x256xf32>
    %625 = arith.addf %618, %624 : vector<8x256xf32>
    %c14_252 = arith.constant 14 : index
    %c0_253 = arith.constant 0 : index
    %c0_254 = arith.constant 0 : index
    %626 = vector.load %arg3[%c14_252, %c0_253, %c0_254] : memref<36x8x256xbf16, #tpu.memory_space<vmem>>, vector<1x8x256xbf16>
    %627 = vector.shape_cast %626 : vector<1x8x256xbf16> to vector<8x256xbf16>
    %628 = arith.extf %627 : vector<8x256xbf16> to vector<8x256xf32>
    %c114 = arith.constant 114 : index
    %629 = memref.load %arg1[%c114] : memref<288xf32, #tpu.memory_space<smem>>
    %630 = vector.broadcast %629 : f32 to vector<8x256xf32>
    %631 = arith.mulf %628, %630 : vector<8x256xf32>
    %632 = arith.addf %625, %631 : vector<8x256xf32>
    %c15_255 = arith.constant 15 : index
    %c0_256 = arith.constant 0 : index
    %c0_257 = arith.constant 0 : index
    %633 = vector.load %arg3[%c15_255, %c0_256, %c0_257] : memref<36x8x256xbf16, #tpu.memory_space<vmem>>, vector<1x8x256xbf16>
    %634 = vector.shape_cast %633 : vector<1x8x256xbf16> to vector<8x256xbf16>
    %635 = arith.extf %634 : vector<8x256xbf16> to vector<8x256xf32>
    %c122 = arith.constant 122 : index
    %636 = memref.load %arg1[%c122] : memref<288xf32, #tpu.memory_space<smem>>
    %637 = vector.broadcast %636 : f32 to vector<8x256xf32>
    %638 = arith.mulf %635, %637 : vector<8x256xf32>
    %639 = arith.addf %632, %638 : vector<8x256xf32>
    %c16_258 = arith.constant 16 : index
    %c0_259 = arith.constant 0 : index
    %c0_260 = arith.constant 0 : index
    %640 = vector.load %arg3[%c16_258, %c0_259, %c0_260] : memref<36x8x256xbf16, #tpu.memory_space<vmem>>, vector<1x8x256xbf16>
    %641 = vector.shape_cast %640 : vector<1x8x256xbf16> to vector<8x256xbf16>
    %642 = arith.extf %641 : vector<8x256xbf16> to vector<8x256xf32>
    %c130 = arith.constant 130 : index
    %643 = memref.load %arg1[%c130] : memref<288xf32, #tpu.memory_space<smem>>
    %644 = vector.broadcast %643 : f32 to vector<8x256xf32>
    %645 = arith.mulf %642, %644 : vector<8x256xf32>
    %646 = arith.addf %639, %645 : vector<8x256xf32>
    %c17_261 = arith.constant 17 : index
    %c0_262 = arith.constant 0 : index
    %c0_263 = arith.constant 0 : index
    %647 = vector.load %arg3[%c17_261, %c0_262, %c0_263] : memref<36x8x256xbf16, #tpu.memory_space<vmem>>, vector<1x8x256xbf16>
    %648 = vector.shape_cast %647 : vector<1x8x256xbf16> to vector<8x256xbf16>
    %649 = arith.extf %648 : vector<8x256xbf16> to vector<8x256xf32>
    %c138 = arith.constant 138 : index
    %650 = memref.load %arg1[%c138] : memref<288xf32, #tpu.memory_space<smem>>
    %651 = vector.broadcast %650 : f32 to vector<8x256xf32>
    %652 = arith.mulf %649, %651 : vector<8x256xf32>
    %653 = arith.addf %646, %652 : vector<8x256xf32>
    %c18_264 = arith.constant 18 : index
    %c0_265 = arith.constant 0 : index
    %c0_266 = arith.constant 0 : index
    %654 = vector.load %arg3[%c18_264, %c0_265, %c0_266] : memref<36x8x256xbf16, #tpu.memory_space<vmem>>, vector<1x8x256xbf16>
    %655 = vector.shape_cast %654 : vector<1x8x256xbf16> to vector<8x256xbf16>
    %656 = arith.extf %655 : vector<8x256xbf16> to vector<8x256xf32>
    %c146 = arith.constant 146 : index
    %657 = memref.load %arg1[%c146] : memref<288xf32, #tpu.memory_space<smem>>
    %658 = vector.broadcast %657 : f32 to vector<8x256xf32>
    %659 = arith.mulf %656, %658 : vector<8x256xf32>
    %660 = arith.addf %653, %659 : vector<8x256xf32>
    %c19_267 = arith.constant 19 : index
    %c0_268 = arith.constant 0 : index
    %c0_269 = arith.constant 0 : index
    %661 = vector.load %arg3[%c19_267, %c0_268, %c0_269] : memref<36x8x256xbf16, #tpu.memory_space<vmem>>, vector<1x8x256xbf16>
    %662 = vector.shape_cast %661 : vector<1x8x256xbf16> to vector<8x256xbf16>
    %663 = arith.extf %662 : vector<8x256xbf16> to vector<8x256xf32>
    %c154 = arith.constant 154 : index
    %664 = memref.load %arg1[%c154] : memref<288xf32, #tpu.memory_space<smem>>
    %665 = vector.broadcast %664 : f32 to vector<8x256xf32>
    %666 = arith.mulf %663, %665 : vector<8x256xf32>
    %667 = arith.addf %660, %666 : vector<8x256xf32>
    %c20_270 = arith.constant 20 : index
    %c0_271 = arith.constant 0 : index
    %c0_272 = arith.constant 0 : index
    %668 = vector.load %arg3[%c20_270, %c0_271, %c0_272] : memref<36x8x256xbf16, #tpu.memory_space<vmem>>, vector<1x8x256xbf16>
    %669 = vector.shape_cast %668 : vector<1x8x256xbf16> to vector<8x256xbf16>
    %670 = arith.extf %669 : vector<8x256xbf16> to vector<8x256xf32>
    %c162 = arith.constant 162 : index
    %671 = memref.load %arg1[%c162] : memref<288xf32, #tpu.memory_space<smem>>
    %672 = vector.broadcast %671 : f32 to vector<8x256xf32>
    %673 = arith.mulf %670, %672 : vector<8x256xf32>
    %674 = arith.addf %667, %673 : vector<8x256xf32>
    %c21_273 = arith.constant 21 : index
    %c0_274 = arith.constant 0 : index
    %c0_275 = arith.constant 0 : index
    %675 = vector.load %arg3[%c21_273, %c0_274, %c0_275] : memref<36x8x256xbf16, #tpu.memory_space<vmem>>, vector<1x8x256xbf16>
    %676 = vector.shape_cast %675 : vector<1x8x256xbf16> to vector<8x256xbf16>
    %677 = arith.extf %676 : vector<8x256xbf16> to vector<8x256xf32>
    %c170 = arith.constant 170 : index
    %678 = memref.load %arg1[%c170] : memref<288xf32, #tpu.memory_space<smem>>
    %679 = vector.broadcast %678 : f32 to vector<8x256xf32>
    %680 = arith.mulf %677, %679 : vector<8x256xf32>
    %681 = arith.addf %674, %680 : vector<8x256xf32>
    %c22_276 = arith.constant 22 : index
    %c0_277 = arith.constant 0 : index
    %c0_278 = arith.constant 0 : index
    %682 = vector.load %arg3[%c22_276, %c0_277, %c0_278] : memref<36x8x256xbf16, #tpu.memory_space<vmem>>, vector<1x8x256xbf16>
    %683 = vector.shape_cast %682 : vector<1x8x256xbf16> to vector<8x256xbf16>
    %684 = arith.extf %683 : vector<8x256xbf16> to vector<8x256xf32>
    %c178 = arith.constant 178 : index
    %685 = memref.load %arg1[%c178] : memref<288xf32, #tpu.memory_space<smem>>
    %686 = vector.broadcast %685 : f32 to vector<8x256xf32>
    %687 = arith.mulf %684, %686 : vector<8x256xf32>
    %688 = arith.addf %681, %687 : vector<8x256xf32>
    %c23_279 = arith.constant 23 : index
    %c0_280 = arith.constant 0 : index
    %c0_281 = arith.constant 0 : index
    %689 = vector.load %arg3[%c23_279, %c0_280, %c0_281] : memref<36x8x256xbf16, #tpu.memory_space<vmem>>, vector<1x8x256xbf16>
    %690 = vector.shape_cast %689 : vector<1x8x256xbf16> to vector<8x256xbf16>
    %691 = arith.extf %690 : vector<8x256xbf16> to vector<8x256xf32>
    %c186 = arith.constant 186 : index
    %692 = memref.load %arg1[%c186] : memref<288xf32, #tpu.memory_space<smem>>
    %693 = vector.broadcast %692 : f32 to vector<8x256xf32>
    %694 = arith.mulf %691, %693 : vector<8x256xf32>
    %695 = arith.addf %688, %694 : vector<8x256xf32>
    %c24_282 = arith.constant 24 : index
    %c0_283 = arith.constant 0 : index
    %c0_284 = arith.constant 0 : index
    %696 = vector.load %arg3[%c24_282, %c0_283, %c0_284] : memref<36x8x256xbf16, #tpu.memory_space<vmem>>, vector<1x8x256xbf16>
    %697 = vector.shape_cast %696 : vector<1x8x256xbf16> to vector<8x256xbf16>
    %698 = arith.extf %697 : vector<8x256xbf16> to vector<8x256xf32>
    %c194 = arith.constant 194 : index
    %699 = memref.load %arg1[%c194] : memref<288xf32, #tpu.memory_space<smem>>
    %700 = vector.broadcast %699 : f32 to vector<8x256xf32>
    %701 = arith.mulf %698, %700 : vector<8x256xf32>
    %702 = arith.addf %695, %701 : vector<8x256xf32>
    %c25_285 = arith.constant 25 : index
    %c0_286 = arith.constant 0 : index
    %c0_287 = arith.constant 0 : index
    %703 = vector.load %arg3[%c25_285, %c0_286, %c0_287] : memref<36x8x256xbf16, #tpu.memory_space<vmem>>, vector<1x8x256xbf16>
    %704 = vector.shape_cast %703 : vector<1x8x256xbf16> to vector<8x256xbf16>
    %705 = arith.extf %704 : vector<8x256xbf16> to vector<8x256xf32>
    %c202 = arith.constant 202 : index
    %706 = memref.load %arg1[%c202] : memref<288xf32, #tpu.memory_space<smem>>
    %707 = vector.broadcast %706 : f32 to vector<8x256xf32>
    %708 = arith.mulf %705, %707 : vector<8x256xf32>
    %709 = arith.addf %702, %708 : vector<8x256xf32>
    %c26_288 = arith.constant 26 : index
    %c0_289 = arith.constant 0 : index
    %c0_290 = arith.constant 0 : index
    %710 = vector.load %arg3[%c26_288, %c0_289, %c0_290] : memref<36x8x256xbf16, #tpu.memory_space<vmem>>, vector<1x8x256xbf16>
    %711 = vector.shape_cast %710 : vector<1x8x256xbf16> to vector<8x256xbf16>
    %712 = arith.extf %711 : vector<8x256xbf16> to vector<8x256xf32>
    %c210 = arith.constant 210 : index
    %713 = memref.load %arg1[%c210] : memref<288xf32, #tpu.memory_space<smem>>
    %714 = vector.broadcast %713 : f32 to vector<8x256xf32>
    %715 = arith.mulf %712, %714 : vector<8x256xf32>
    %716 = arith.addf %709, %715 : vector<8x256xf32>
    %c27_291 = arith.constant 27 : index
    %c0_292 = arith.constant 0 : index
    %c0_293 = arith.constant 0 : index
    %717 = vector.load %arg3[%c27_291, %c0_292, %c0_293] : memref<36x8x256xbf16, #tpu.memory_space<vmem>>, vector<1x8x256xbf16>
    %718 = vector.shape_cast %717 : vector<1x8x256xbf16> to vector<8x256xbf16>
    %719 = arith.extf %718 : vector<8x256xbf16> to vector<8x256xf32>
    %c218 = arith.constant 218 : index
    %720 = memref.load %arg1[%c218] : memref<288xf32, #tpu.memory_space<smem>>
    %721 = vector.broadcast %720 : f32 to vector<8x256xf32>
    %722 = arith.mulf %719, %721 : vector<8x256xf32>
    %723 = arith.addf %716, %722 : vector<8x256xf32>
    %c28_294 = arith.constant 28 : index
    %c0_295 = arith.constant 0 : index
    %c0_296 = arith.constant 0 : index
    %724 = vector.load %arg3[%c28_294, %c0_295, %c0_296] : memref<36x8x256xbf16, #tpu.memory_space<vmem>>, vector<1x8x256xbf16>
    %725 = vector.shape_cast %724 : vector<1x8x256xbf16> to vector<8x256xbf16>
    %726 = arith.extf %725 : vector<8x256xbf16> to vector<8x256xf32>
    %c226 = arith.constant 226 : index
    %727 = memref.load %arg1[%c226] : memref<288xf32, #tpu.memory_space<smem>>
    %728 = vector.broadcast %727 : f32 to vector<8x256xf32>
    %729 = arith.mulf %726, %728 : vector<8x256xf32>
    %730 = arith.addf %723, %729 : vector<8x256xf32>
    %c29_297 = arith.constant 29 : index
    %c0_298 = arith.constant 0 : index
    %c0_299 = arith.constant 0 : index
    %731 = vector.load %arg3[%c29_297, %c0_298, %c0_299] : memref<36x8x256xbf16, #tpu.memory_space<vmem>>, vector<1x8x256xbf16>
    %732 = vector.shape_cast %731 : vector<1x8x256xbf16> to vector<8x256xbf16>
    %733 = arith.extf %732 : vector<8x256xbf16> to vector<8x256xf32>
    %c234 = arith.constant 234 : index
    %734 = memref.load %arg1[%c234] : memref<288xf32, #tpu.memory_space<smem>>
    %735 = vector.broadcast %734 : f32 to vector<8x256xf32>
    %736 = arith.mulf %733, %735 : vector<8x256xf32>
    %737 = arith.addf %730, %736 : vector<8x256xf32>
    %c30_300 = arith.constant 30 : index
    %c0_301 = arith.constant 0 : index
    %c0_302 = arith.constant 0 : index
    %738 = vector.load %arg3[%c30_300, %c0_301, %c0_302] : memref<36x8x256xbf16, #tpu.memory_space<vmem>>, vector<1x8x256xbf16>
    %739 = vector.shape_cast %738 : vector<1x8x256xbf16> to vector<8x256xbf16>
    %740 = arith.extf %739 : vector<8x256xbf16> to vector<8x256xf32>
    %c242 = arith.constant 242 : index
    %741 = memref.load %arg1[%c242] : memref<288xf32, #tpu.memory_space<smem>>
    %742 = vector.broadcast %741 : f32 to vector<8x256xf32>
    %743 = arith.mulf %740, %742 : vector<8x256xf32>
    %744 = arith.addf %737, %743 : vector<8x256xf32>
    %c31_303 = arith.constant 31 : index
    %c0_304 = arith.constant 0 : index
    %c0_305 = arith.constant 0 : index
    %745 = vector.load %arg3[%c31_303, %c0_304, %c0_305] : memref<36x8x256xbf16, #tpu.memory_space<vmem>>, vector<1x8x256xbf16>
    %746 = vector.shape_cast %745 : vector<1x8x256xbf16> to vector<8x256xbf16>
    %747 = arith.extf %746 : vector<8x256xbf16> to vector<8x256xf32>
    %c250 = arith.constant 250 : index
    %748 = memref.load %arg1[%c250] : memref<288xf32, #tpu.memory_space<smem>>
    %749 = vector.broadcast %748 : f32 to vector<8x256xf32>
    %750 = arith.mulf %747, %749 : vector<8x256xf32>
    %751 = arith.addf %744, %750 : vector<8x256xf32>
    %c32_306 = arith.constant 32 : index
    %c0_307 = arith.constant 0 : index
    %c0_308 = arith.constant 0 : index
    %752 = vector.load %arg3[%c32_306, %c0_307, %c0_308] : memref<36x8x256xbf16, #tpu.memory_space<vmem>>, vector<1x8x256xbf16>
    %753 = vector.shape_cast %752 : vector<1x8x256xbf16> to vector<8x256xbf16>
    %754 = arith.extf %753 : vector<8x256xbf16> to vector<8x256xf32>
    %c258 = arith.constant 258 : index
    %755 = memref.load %arg1[%c258] : memref<288xf32, #tpu.memory_space<smem>>
    %756 = vector.broadcast %755 : f32 to vector<8x256xf32>
    %757 = arith.mulf %754, %756 : vector<8x256xf32>
    %758 = arith.addf %751, %757 : vector<8x256xf32>
    %c33_309 = arith.constant 33 : index
    %c0_310 = arith.constant 0 : index
    %c0_311 = arith.constant 0 : index
    %759 = vector.load %arg3[%c33_309, %c0_310, %c0_311] : memref<36x8x256xbf16, #tpu.memory_space<vmem>>, vector<1x8x256xbf16>
    %760 = vector.shape_cast %759 : vector<1x8x256xbf16> to vector<8x256xbf16>
    %761 = arith.extf %760 : vector<8x256xbf16> to vector<8x256xf32>
    %c266 = arith.constant 266 : index
    %762 = memref.load %arg1[%c266] : memref<288xf32, #tpu.memory_space<smem>>
    %763 = vector.broadcast %762 : f32 to vector<8x256xf32>
    %764 = arith.mulf %761, %763 : vector<8x256xf32>
    %765 = arith.addf %758, %764 : vector<8x256xf32>
    %c34_312 = arith.constant 34 : index
    %c0_313 = arith.constant 0 : index
    %c0_314 = arith.constant 0 : index
    %766 = vector.load %arg3[%c34_312, %c0_313, %c0_314] : memref<36x8x256xbf16, #tpu.memory_space<vmem>>, vector<1x8x256xbf16>
    %767 = vector.shape_cast %766 : vector<1x8x256xbf16> to vector<8x256xbf16>
    %768 = arith.extf %767 : vector<8x256xbf16> to vector<8x256xf32>
    %c274 = arith.constant 274 : index
    %769 = memref.load %arg1[%c274] : memref<288xf32, #tpu.memory_space<smem>>
    %770 = vector.broadcast %769 : f32 to vector<8x256xf32>
    %771 = arith.mulf %768, %770 : vector<8x256xf32>
    %772 = arith.addf %765, %771 : vector<8x256xf32>
    %c35_315 = arith.constant 35 : index
    %c0_316 = arith.constant 0 : index
    %c0_317 = arith.constant 0 : index
    %773 = vector.load %arg3[%c35_315, %c0_316, %c0_317] : memref<36x8x256xbf16, #tpu.memory_space<vmem>>, vector<1x8x256xbf16>
    %774 = vector.shape_cast %773 : vector<1x8x256xbf16> to vector<8x256xbf16>
    %775 = arith.extf %774 : vector<8x256xbf16> to vector<8x256xf32>
    %c282 = arith.constant 282 : index
    %776 = memref.load %arg1[%c282] : memref<288xf32, #tpu.memory_space<smem>>
    %777 = vector.broadcast %776 : f32 to vector<8x256xf32>
    %778 = arith.mulf %775, %777 : vector<8x256xf32>
    %779 = arith.addf %772, %778 : vector<8x256xf32>
    %c2_318 = arith.constant 2 : index
    %780 = memref.load %arg2[%c2_318] : memref<8xf32, #tpu.memory_space<smem>>
    %781 = vector.broadcast %780 : f32 to vector<8x256xf32>
    %782 = arith.addf %779, %781 : vector<8x256xf32>
    %cst_319 = arith.constant 0.000000e+00 : f32
    %783 = vector.broadcast %cst_319 : f32 to vector<8x256xf32>
    %784 = arith.maximumf %782, %783 : vector<8x256xf32>
    %785 = arith.truncf %784 : vector<8x256xf32> to vector<8x256xbf16>
    %c2_320 = arith.constant 2 : index
    %c0_321 = arith.constant 0 : index
    %c0_322 = arith.constant 0 : index
    %786 = vector.load %arg4[%c2_320, %c0_321, %c0_322] : memref<8x256x128xbf16, #tpu.memory_space<vmem>>, vector<1x256x128xbf16>
    %787 = vector.shape_cast %786 : vector<1x256x128xbf16> to vector<256x128xbf16>
    %cst_323 = arith.constant dense<0.000000e+00> : vector<8x128xf32>
    %788 = tpu.matmul %785, %787, %cst_323 {dimension_numbers = #tpu.dot_dimension_numbers<[1], [0], [0], [1], [0, 0, 1, 1], [], []>} : vector<8x256xbf16>, vector<256x128xbf16>, vector<8x128xf32> -> vector<8x128xf32>
    %789 = arith.addf %526, %788 : vector<8x128xf32>
    %cst_324 = arith.constant 0.000000e+00 : f32
    %790 = vector.broadcast %cst_324 : f32 to vector<8x256xf32>
    %c0_325 = arith.constant 0 : index
    %c0_326 = arith.constant 0 : index
    %c0_327 = arith.constant 0 : index
    %791 = vector.load %arg3[%c0_325, %c0_326, %c0_327] : memref<36x8x256xbf16, #tpu.memory_space<vmem>>, vector<1x8x256xbf16>
    %792 = vector.shape_cast %791 : vector<1x8x256xbf16> to vector<8x256xbf16>
    %793 = arith.extf %792 : vector<8x256xbf16> to vector<8x256xf32>
    %c3_328 = arith.constant 3 : index
    %794 = memref.load %arg1[%c3_328] : memref<288xf32, #tpu.memory_space<smem>>
    %795 = vector.broadcast %794 : f32 to vector<8x256xf32>
    %796 = arith.mulf %793, %795 : vector<8x256xf32>
    %797 = arith.addf %790, %796 : vector<8x256xf32>
    %c1_329 = arith.constant 1 : index
    %c0_330 = arith.constant 0 : index
    %c0_331 = arith.constant 0 : index
    %798 = vector.load %arg3[%c1_329, %c0_330, %c0_331] : memref<36x8x256xbf16, #tpu.memory_space<vmem>>, vector<1x8x256xbf16>
    %799 = vector.shape_cast %798 : vector<1x8x256xbf16> to vector<8x256xbf16>
    %800 = arith.extf %799 : vector<8x256xbf16> to vector<8x256xf32>
    %c11_332 = arith.constant 11 : index
    %801 = memref.load %arg1[%c11_332] : memref<288xf32, #tpu.memory_space<smem>>
    %802 = vector.broadcast %801 : f32 to vector<8x256xf32>
    %803 = arith.mulf %800, %802 : vector<8x256xf32>
    %804 = arith.addf %797, %803 : vector<8x256xf32>
    %c2_333 = arith.constant 2 : index
    %c0_334 = arith.constant 0 : index
    %c0_335 = arith.constant 0 : index
    %805 = vector.load %arg3[%c2_333, %c0_334, %c0_335] : memref<36x8x256xbf16, #tpu.memory_space<vmem>>, vector<1x8x256xbf16>
    %806 = vector.shape_cast %805 : vector<1x8x256xbf16> to vector<8x256xbf16>
    %807 = arith.extf %806 : vector<8x256xbf16> to vector<8x256xf32>
    %c19_336 = arith.constant 19 : index
    %808 = memref.load %arg1[%c19_336] : memref<288xf32, #tpu.memory_space<smem>>
    %809 = vector.broadcast %808 : f32 to vector<8x256xf32>
    %810 = arith.mulf %807, %809 : vector<8x256xf32>
    %811 = arith.addf %804, %810 : vector<8x256xf32>
    %c3_337 = arith.constant 3 : index
    %c0_338 = arith.constant 0 : index
    %c0_339 = arith.constant 0 : index
    %812 = vector.load %arg3[%c3_337, %c0_338, %c0_339] : memref<36x8x256xbf16, #tpu.memory_space<vmem>>, vector<1x8x256xbf16>
    %813 = vector.shape_cast %812 : vector<1x8x256xbf16> to vector<8x256xbf16>
    %814 = arith.extf %813 : vector<8x256xbf16> to vector<8x256xf32>
    %c27_340 = arith.constant 27 : index
    %815 = memref.load %arg1[%c27_340] : memref<288xf32, #tpu.memory_space<smem>>
    %816 = vector.broadcast %815 : f32 to vector<8x256xf32>
    %817 = arith.mulf %814, %816 : vector<8x256xf32>
    %818 = arith.addf %811, %817 : vector<8x256xf32>
    %c4_341 = arith.constant 4 : index
    %c0_342 = arith.constant 0 : index
    %c0_343 = arith.constant 0 : index
    %819 = vector.load %arg3[%c4_341, %c0_342, %c0_343] : memref<36x8x256xbf16, #tpu.memory_space<vmem>>, vector<1x8x256xbf16>
    %820 = vector.shape_cast %819 : vector<1x8x256xbf16> to vector<8x256xbf16>
    %821 = arith.extf %820 : vector<8x256xbf16> to vector<8x256xf32>
    %c35_344 = arith.constant 35 : index
    %822 = memref.load %arg1[%c35_344] : memref<288xf32, #tpu.memory_space<smem>>
    %823 = vector.broadcast %822 : f32 to vector<8x256xf32>
    %824 = arith.mulf %821, %823 : vector<8x256xf32>
    %825 = arith.addf %818, %824 : vector<8x256xf32>
    %c5_345 = arith.constant 5 : index
    %c0_346 = arith.constant 0 : index
    %c0_347 = arith.constant 0 : index
    %826 = vector.load %arg3[%c5_345, %c0_346, %c0_347] : memref<36x8x256xbf16, #tpu.memory_space<vmem>>, vector<1x8x256xbf16>
    %827 = vector.shape_cast %826 : vector<1x8x256xbf16> to vector<8x256xbf16>
    %828 = arith.extf %827 : vector<8x256xbf16> to vector<8x256xf32>
    %c43 = arith.constant 43 : index
    %829 = memref.load %arg1[%c43] : memref<288xf32, #tpu.memory_space<smem>>
    %830 = vector.broadcast %829 : f32 to vector<8x256xf32>
    %831 = arith.mulf %828, %830 : vector<8x256xf32>
    %832 = arith.addf %825, %831 : vector<8x256xf32>
    %c6_348 = arith.constant 6 : index
    %c0_349 = arith.constant 0 : index
    %c0_350 = arith.constant 0 : index
    %833 = vector.load %arg3[%c6_348, %c0_349, %c0_350] : memref<36x8x256xbf16, #tpu.memory_space<vmem>>, vector<1x8x256xbf16>
    %834 = vector.shape_cast %833 : vector<1x8x256xbf16> to vector<8x256xbf16>
    %835 = arith.extf %834 : vector<8x256xbf16> to vector<8x256xf32>
    %c51 = arith.constant 51 : index
    %836 = memref.load %arg1[%c51] : memref<288xf32, #tpu.memory_space<smem>>
    %837 = vector.broadcast %836 : f32 to vector<8x256xf32>
    %838 = arith.mulf %835, %837 : vector<8x256xf32>
    %839 = arith.addf %832, %838 : vector<8x256xf32>
    %c7_351 = arith.constant 7 : index
    %c0_352 = arith.constant 0 : index
    %c0_353 = arith.constant 0 : index
    %840 = vector.load %arg3[%c7_351, %c0_352, %c0_353] : memref<36x8x256xbf16, #tpu.memory_space<vmem>>, vector<1x8x256xbf16>
    %841 = vector.shape_cast %840 : vector<1x8x256xbf16> to vector<8x256xbf16>
    %842 = arith.extf %841 : vector<8x256xbf16> to vector<8x256xf32>
    %c59 = arith.constant 59 : index
    %843 = memref.load %arg1[%c59] : memref<288xf32, #tpu.memory_space<smem>>
    %844 = vector.broadcast %843 : f32 to vector<8x256xf32>
    %845 = arith.mulf %842, %844 : vector<8x256xf32>
    %846 = arith.addf %839, %845 : vector<8x256xf32>
    %c8_354 = arith.constant 8 : index
    %c0_355 = arith.constant 0 : index
    %c0_356 = arith.constant 0 : index
    %847 = vector.load %arg3[%c8_354, %c0_355, %c0_356] : memref<36x8x256xbf16, #tpu.memory_space<vmem>>, vector<1x8x256xbf16>
    %848 = vector.shape_cast %847 : vector<1x8x256xbf16> to vector<8x256xbf16>
    %849 = arith.extf %848 : vector<8x256xbf16> to vector<8x256xf32>
    %c67 = arith.constant 67 : index
    %850 = memref.load %arg1[%c67] : memref<288xf32, #tpu.memory_space<smem>>
    %851 = vector.broadcast %850 : f32 to vector<8x256xf32>
    %852 = arith.mulf %849, %851 : vector<8x256xf32>
    %853 = arith.addf %846, %852 : vector<8x256xf32>
    %c9_357 = arith.constant 9 : index
    %c0_358 = arith.constant 0 : index
    %c0_359 = arith.constant 0 : index
    %854 = vector.load %arg3[%c9_357, %c0_358, %c0_359] : memref<36x8x256xbf16, #tpu.memory_space<vmem>>, vector<1x8x256xbf16>
    %855 = vector.shape_cast %854 : vector<1x8x256xbf16> to vector<8x256xbf16>
    %856 = arith.extf %855 : vector<8x256xbf16> to vector<8x256xf32>
    %c75 = arith.constant 75 : index
    %857 = memref.load %arg1[%c75] : memref<288xf32, #tpu.memory_space<smem>>
    %858 = vector.broadcast %857 : f32 to vector<8x256xf32>
    %859 = arith.mulf %856, %858 : vector<8x256xf32>
    %860 = arith.addf %853, %859 : vector<8x256xf32>
    %c10_360 = arith.constant 10 : index
    %c0_361 = arith.constant 0 : index
    %c0_362 = arith.constant 0 : index
    %861 = vector.load %arg3[%c10_360, %c0_361, %c0_362] : memref<36x8x256xbf16, #tpu.memory_space<vmem>>, vector<1x8x256xbf16>
    %862 = vector.shape_cast %861 : vector<1x8x256xbf16> to vector<8x256xbf16>
    %863 = arith.extf %862 : vector<8x256xbf16> to vector<8x256xf32>
    %c83 = arith.constant 83 : index
    %864 = memref.load %arg1[%c83] : memref<288xf32, #tpu.memory_space<smem>>
    %865 = vector.broadcast %864 : f32 to vector<8x256xf32>
    %866 = arith.mulf %863, %865 : vector<8x256xf32>
    %867 = arith.addf %860, %866 : vector<8x256xf32>
    %c11_363 = arith.constant 11 : index
    %c0_364 = arith.constant 0 : index
    %c0_365 = arith.constant 0 : index
    %868 = vector.load %arg3[%c11_363, %c0_364, %c0_365] : memref<36x8x256xbf16, #tpu.memory_space<vmem>>, vector<1x8x256xbf16>
    %869 = vector.shape_cast %868 : vector<1x8x256xbf16> to vector<8x256xbf16>
    %870 = arith.extf %869 : vector<8x256xbf16> to vector<8x256xf32>
    %c91 = arith.constant 91 : index
    %871 = memref.load %arg1[%c91] : memref<288xf32, #tpu.memory_space<smem>>
    %872 = vector.broadcast %871 : f32 to vector<8x256xf32>
    %873 = arith.mulf %870, %872 : vector<8x256xf32>
    %874 = arith.addf %867, %873 : vector<8x256xf32>
    %c12_366 = arith.constant 12 : index
    %c0_367 = arith.constant 0 : index
    %c0_368 = arith.constant 0 : index
    %875 = vector.load %arg3[%c12_366, %c0_367, %c0_368] : memref<36x8x256xbf16, #tpu.memory_space<vmem>>, vector<1x8x256xbf16>
    %876 = vector.shape_cast %875 : vector<1x8x256xbf16> to vector<8x256xbf16>
    %877 = arith.extf %876 : vector<8x256xbf16> to vector<8x256xf32>
    %c99 = arith.constant 99 : index
    %878 = memref.load %arg1[%c99] : memref<288xf32, #tpu.memory_space<smem>>
    %879 = vector.broadcast %878 : f32 to vector<8x256xf32>
    %880 = arith.mulf %877, %879 : vector<8x256xf32>
    %881 = arith.addf %874, %880 : vector<8x256xf32>
    %c13_369 = arith.constant 13 : index
    %c0_370 = arith.constant 0 : index
    %c0_371 = arith.constant 0 : index
    %882 = vector.load %arg3[%c13_369, %c0_370, %c0_371] : memref<36x8x256xbf16, #tpu.memory_space<vmem>>, vector<1x8x256xbf16>
    %883 = vector.shape_cast %882 : vector<1x8x256xbf16> to vector<8x256xbf16>
    %884 = arith.extf %883 : vector<8x256xbf16> to vector<8x256xf32>
    %c107 = arith.constant 107 : index
    %885 = memref.load %arg1[%c107] : memref<288xf32, #tpu.memory_space<smem>>
    %886 = vector.broadcast %885 : f32 to vector<8x256xf32>
    %887 = arith.mulf %884, %886 : vector<8x256xf32>
    %888 = arith.addf %881, %887 : vector<8x256xf32>
    %c14_372 = arith.constant 14 : index
    %c0_373 = arith.constant 0 : index
    %c0_374 = arith.constant 0 : index
    %889 = vector.load %arg3[%c14_372, %c0_373, %c0_374] : memref<36x8x256xbf16, #tpu.memory_space<vmem>>, vector<1x8x256xbf16>
    %890 = vector.shape_cast %889 : vector<1x8x256xbf16> to vector<8x256xbf16>
    %891 = arith.extf %890 : vector<8x256xbf16> to vector<8x256xf32>
    %c115 = arith.constant 115 : index
    %892 = memref.load %arg1[%c115] : memref<288xf32, #tpu.memory_space<smem>>
    %893 = vector.broadcast %892 : f32 to vector<8x256xf32>
    %894 = arith.mulf %891, %893 : vector<8x256xf32>
    %895 = arith.addf %888, %894 : vector<8x256xf32>
    %c15_375 = arith.constant 15 : index
    %c0_376 = arith.constant 0 : index
    %c0_377 = arith.constant 0 : index
    %896 = vector.load %arg3[%c15_375, %c0_376, %c0_377] : memref<36x8x256xbf16, #tpu.memory_space<vmem>>, vector<1x8x256xbf16>
    %897 = vector.shape_cast %896 : vector<1x8x256xbf16> to vector<8x256xbf16>
    %898 = arith.extf %897 : vector<8x256xbf16> to vector<8x256xf32>
    %c123 = arith.constant 123 : index
    %899 = memref.load %arg1[%c123] : memref<288xf32, #tpu.memory_space<smem>>
    %900 = vector.broadcast %899 : f32 to vector<8x256xf32>
    %901 = arith.mulf %898, %900 : vector<8x256xf32>
    %902 = arith.addf %895, %901 : vector<8x256xf32>
    %c16_378 = arith.constant 16 : index
    %c0_379 = arith.constant 0 : index
    %c0_380 = arith.constant 0 : index
    %903 = vector.load %arg3[%c16_378, %c0_379, %c0_380] : memref<36x8x256xbf16, #tpu.memory_space<vmem>>, vector<1x8x256xbf16>
    %904 = vector.shape_cast %903 : vector<1x8x256xbf16> to vector<8x256xbf16>
    %905 = arith.extf %904 : vector<8x256xbf16> to vector<8x256xf32>
    %c131 = arith.constant 131 : index
    %906 = memref.load %arg1[%c131] : memref<288xf32, #tpu.memory_space<smem>>
    %907 = vector.broadcast %906 : f32 to vector<8x256xf32>
    %908 = arith.mulf %905, %907 : vector<8x256xf32>
    %909 = arith.addf %902, %908 : vector<8x256xf32>
    %c17_381 = arith.constant 17 : index
    %c0_382 = arith.constant 0 : index
    %c0_383 = arith.constant 0 : index
    %910 = vector.load %arg3[%c17_381, %c0_382, %c0_383] : memref<36x8x256xbf16, #tpu.memory_space<vmem>>, vector<1x8x256xbf16>
    %911 = vector.shape_cast %910 : vector<1x8x256xbf16> to vector<8x256xbf16>
    %912 = arith.extf %911 : vector<8x256xbf16> to vector<8x256xf32>
    %c139 = arith.constant 139 : index
    %913 = memref.load %arg1[%c139] : memref<288xf32, #tpu.memory_space<smem>>
    %914 = vector.broadcast %913 : f32 to vector<8x256xf32>
    %915 = arith.mulf %912, %914 : vector<8x256xf32>
    %916 = arith.addf %909, %915 : vector<8x256xf32>
    %c18_384 = arith.constant 18 : index
    %c0_385 = arith.constant 0 : index
    %c0_386 = arith.constant 0 : index
    %917 = vector.load %arg3[%c18_384, %c0_385, %c0_386] : memref<36x8x256xbf16, #tpu.memory_space<vmem>>, vector<1x8x256xbf16>
    %918 = vector.shape_cast %917 : vector<1x8x256xbf16> to vector<8x256xbf16>
    %919 = arith.extf %918 : vector<8x256xbf16> to vector<8x256xf32>
    %c147 = arith.constant 147 : index
    %920 = memref.load %arg1[%c147] : memref<288xf32, #tpu.memory_space<smem>>
    %921 = vector.broadcast %920 : f32 to vector<8x256xf32>
    %922 = arith.mulf %919, %921 : vector<8x256xf32>
    %923 = arith.addf %916, %922 : vector<8x256xf32>
    %c19_387 = arith.constant 19 : index
    %c0_388 = arith.constant 0 : index
    %c0_389 = arith.constant 0 : index
    %924 = vector.load %arg3[%c19_387, %c0_388, %c0_389] : memref<36x8x256xbf16, #tpu.memory_space<vmem>>, vector<1x8x256xbf16>
    %925 = vector.shape_cast %924 : vector<1x8x256xbf16> to vector<8x256xbf16>
    %926 = arith.extf %925 : vector<8x256xbf16> to vector<8x256xf32>
    %c155 = arith.constant 155 : index
    %927 = memref.load %arg1[%c155] : memref<288xf32, #tpu.memory_space<smem>>
    %928 = vector.broadcast %927 : f32 to vector<8x256xf32>
    %929 = arith.mulf %926, %928 : vector<8x256xf32>
    %930 = arith.addf %923, %929 : vector<8x256xf32>
    %c20_390 = arith.constant 20 : index
    %c0_391 = arith.constant 0 : index
    %c0_392 = arith.constant 0 : index
    %931 = vector.load %arg3[%c20_390, %c0_391, %c0_392] : memref<36x8x256xbf16, #tpu.memory_space<vmem>>, vector<1x8x256xbf16>
    %932 = vector.shape_cast %931 : vector<1x8x256xbf16> to vector<8x256xbf16>
    %933 = arith.extf %932 : vector<8x256xbf16> to vector<8x256xf32>
    %c163 = arith.constant 163 : index
    %934 = memref.load %arg1[%c163] : memref<288xf32, #tpu.memory_space<smem>>
    %935 = vector.broadcast %934 : f32 to vector<8x256xf32>
    %936 = arith.mulf %933, %935 : vector<8x256xf32>
    %937 = arith.addf %930, %936 : vector<8x256xf32>
    %c21_393 = arith.constant 21 : index
    %c0_394 = arith.constant 0 : index
    %c0_395 = arith.constant 0 : index
    %938 = vector.load %arg3[%c21_393, %c0_394, %c0_395] : memref<36x8x256xbf16, #tpu.memory_space<vmem>>, vector<1x8x256xbf16>
    %939 = vector.shape_cast %938 : vector<1x8x256xbf16> to vector<8x256xbf16>
    %940 = arith.extf %939 : vector<8x256xbf16> to vector<8x256xf32>
    %c171 = arith.constant 171 : index
    %941 = memref.load %arg1[%c171] : memref<288xf32, #tpu.memory_space<smem>>
    %942 = vector.broadcast %941 : f32 to vector<8x256xf32>
    %943 = arith.mulf %940, %942 : vector<8x256xf32>
    %944 = arith.addf %937, %943 : vector<8x256xf32>
    %c22_396 = arith.constant 22 : index
    %c0_397 = arith.constant 0 : index
    %c0_398 = arith.constant 0 : index
    %945 = vector.load %arg3[%c22_396, %c0_397, %c0_398] : memref<36x8x256xbf16, #tpu.memory_space<vmem>>, vector<1x8x256xbf16>
    %946 = vector.shape_cast %945 : vector<1x8x256xbf16> to vector<8x256xbf16>
    %947 = arith.extf %946 : vector<8x256xbf16> to vector<8x256xf32>
    %c179 = arith.constant 179 : index
    %948 = memref.load %arg1[%c179] : memref<288xf32, #tpu.memory_space<smem>>
    %949 = vector.broadcast %948 : f32 to vector<8x256xf32>
    %950 = arith.mulf %947, %949 : vector<8x256xf32>
    %951 = arith.addf %944, %950 : vector<8x256xf32>
    %c23_399 = arith.constant 23 : index
    %c0_400 = arith.constant 0 : index
    %c0_401 = arith.constant 0 : index
    %952 = vector.load %arg3[%c23_399, %c0_400, %c0_401] : memref<36x8x256xbf16, #tpu.memory_space<vmem>>, vector<1x8x256xbf16>
    %953 = vector.shape_cast %952 : vector<1x8x256xbf16> to vector<8x256xbf16>
    %954 = arith.extf %953 : vector<8x256xbf16> to vector<8x256xf32>
    %c187 = arith.constant 187 : index
    %955 = memref.load %arg1[%c187] : memref<288xf32, #tpu.memory_space<smem>>
    %956 = vector.broadcast %955 : f32 to vector<8x256xf32>
    %957 = arith.mulf %954, %956 : vector<8x256xf32>
    %958 = arith.addf %951, %957 : vector<8x256xf32>
    %c24_402 = arith.constant 24 : index
    %c0_403 = arith.constant 0 : index
    %c0_404 = arith.constant 0 : index
    %959 = vector.load %arg3[%c24_402, %c0_403, %c0_404] : memref<36x8x256xbf16, #tpu.memory_space<vmem>>, vector<1x8x256xbf16>
    %960 = vector.shape_cast %959 : vector<1x8x256xbf16> to vector<8x256xbf16>
    %961 = arith.extf %960 : vector<8x256xbf16> to vector<8x256xf32>
    %c195 = arith.constant 195 : index
    %962 = memref.load %arg1[%c195] : memref<288xf32, #tpu.memory_space<smem>>
    %963 = vector.broadcast %962 : f32 to vector<8x256xf32>
    %964 = arith.mulf %961, %963 : vector<8x256xf32>
    %965 = arith.addf %958, %964 : vector<8x256xf32>
    %c25_405 = arith.constant 25 : index
    %c0_406 = arith.constant 0 : index
    %c0_407 = arith.constant 0 : index
    %966 = vector.load %arg3[%c25_405, %c0_406, %c0_407] : memref<36x8x256xbf16, #tpu.memory_space<vmem>>, vector<1x8x256xbf16>
    %967 = vector.shape_cast %966 : vector<1x8x256xbf16> to vector<8x256xbf16>
    %968 = arith.extf %967 : vector<8x256xbf16> to vector<8x256xf32>
    %c203 = arith.constant 203 : index
    %969 = memref.load %arg1[%c203] : memref<288xf32, #tpu.memory_space<smem>>
    %970 = vector.broadcast %969 : f32 to vector<8x256xf32>
    %971 = arith.mulf %968, %970 : vector<8x256xf32>
    %972 = arith.addf %965, %971 : vector<8x256xf32>
    %c26_408 = arith.constant 26 : index
    %c0_409 = arith.constant 0 : index
    %c0_410 = arith.constant 0 : index
    %973 = vector.load %arg3[%c26_408, %c0_409, %c0_410] : memref<36x8x256xbf16, #tpu.memory_space<vmem>>, vector<1x8x256xbf16>
    %974 = vector.shape_cast %973 : vector<1x8x256xbf16> to vector<8x256xbf16>
    %975 = arith.extf %974 : vector<8x256xbf16> to vector<8x256xf32>
    %c211 = arith.constant 211 : index
    %976 = memref.load %arg1[%c211] : memref<288xf32, #tpu.memory_space<smem>>
    %977 = vector.broadcast %976 : f32 to vector<8x256xf32>
    %978 = arith.mulf %975, %977 : vector<8x256xf32>
    %979 = arith.addf %972, %978 : vector<8x256xf32>
    %c27_411 = arith.constant 27 : index
    %c0_412 = arith.constant 0 : index
    %c0_413 = arith.constant 0 : index
    %980 = vector.load %arg3[%c27_411, %c0_412, %c0_413] : memref<36x8x256xbf16, #tpu.memory_space<vmem>>, vector<1x8x256xbf16>
    %981 = vector.shape_cast %980 : vector<1x8x256xbf16> to vector<8x256xbf16>
    %982 = arith.extf %981 : vector<8x256xbf16> to vector<8x256xf32>
    %c219 = arith.constant 219 : index
    %983 = memref.load %arg1[%c219] : memref<288xf32, #tpu.memory_space<smem>>
    %984 = vector.broadcast %983 : f32 to vector<8x256xf32>
    %985 = arith.mulf %982, %984 : vector<8x256xf32>
    %986 = arith.addf %979, %985 : vector<8x256xf32>
    %c28_414 = arith.constant 28 : index
    %c0_415 = arith.constant 0 : index
    %c0_416 = arith.constant 0 : index
    %987 = vector.load %arg3[%c28_414, %c0_415, %c0_416] : memref<36x8x256xbf16, #tpu.memory_space<vmem>>, vector<1x8x256xbf16>
    %988 = vector.shape_cast %987 : vector<1x8x256xbf16> to vector<8x256xbf16>
    %989 = arith.extf %988 : vector<8x256xbf16> to vector<8x256xf32>
    %c227 = arith.constant 227 : index
    %990 = memref.load %arg1[%c227] : memref<288xf32, #tpu.memory_space<smem>>
    %991 = vector.broadcast %990 : f32 to vector<8x256xf32>
    %992 = arith.mulf %989, %991 : vector<8x256xf32>
    %993 = arith.addf %986, %992 : vector<8x256xf32>
    %c29_417 = arith.constant 29 : index
    %c0_418 = arith.constant 0 : index
    %c0_419 = arith.constant 0 : index
    %994 = vector.load %arg3[%c29_417, %c0_418, %c0_419] : memref<36x8x256xbf16, #tpu.memory_space<vmem>>, vector<1x8x256xbf16>
    %995 = vector.shape_cast %994 : vector<1x8x256xbf16> to vector<8x256xbf16>
    %996 = arith.extf %995 : vector<8x256xbf16> to vector<8x256xf32>
    %c235 = arith.constant 235 : index
    %997 = memref.load %arg1[%c235] : memref<288xf32, #tpu.memory_space<smem>>
    %998 = vector.broadcast %997 : f32 to vector<8x256xf32>
    %999 = arith.mulf %996, %998 : vector<8x256xf32>
    %1000 = arith.addf %993, %999 : vector<8x256xf32>
    %c30_420 = arith.constant 30 : index
    %c0_421 = arith.constant 0 : index
    %c0_422 = arith.constant 0 : index
    %1001 = vector.load %arg3[%c30_420, %c0_421, %c0_422] : memref<36x8x256xbf16, #tpu.memory_space<vmem>>, vector<1x8x256xbf16>
    %1002 = vector.shape_cast %1001 : vector<1x8x256xbf16> to vector<8x256xbf16>
    %1003 = arith.extf %1002 : vector<8x256xbf16> to vector<8x256xf32>
    %c243 = arith.constant 243 : index
    %1004 = memref.load %arg1[%c243] : memref<288xf32, #tpu.memory_space<smem>>
    %1005 = vector.broadcast %1004 : f32 to vector<8x256xf32>
    %1006 = arith.mulf %1003, %1005 : vector<8x256xf32>
    %1007 = arith.addf %1000, %1006 : vector<8x256xf32>
    %c31_423 = arith.constant 31 : index
    %c0_424 = arith.constant 0 : index
    %c0_425 = arith.constant 0 : index
    %1008 = vector.load %arg3[%c31_423, %c0_424, %c0_425] : memref<36x8x256xbf16, #tpu.memory_space<vmem>>, vector<1x8x256xbf16>
    %1009 = vector.shape_cast %1008 : vector<1x8x256xbf16> to vector<8x256xbf16>
    %1010 = arith.extf %1009 : vector<8x256xbf16> to vector<8x256xf32>
    %c251 = arith.constant 251 : index
    %1011 = memref.load %arg1[%c251] : memref<288xf32, #tpu.memory_space<smem>>
    %1012 = vector.broadcast %1011 : f32 to vector<8x256xf32>
    %1013 = arith.mulf %1010, %1012 : vector<8x256xf32>
    %1014 = arith.addf %1007, %1013 : vector<8x256xf32>
    %c32_426 = arith.constant 32 : index
    %c0_427 = arith.constant 0 : index
    %c0_428 = arith.constant 0 : index
    %1015 = vector.load %arg3[%c32_426, %c0_427, %c0_428] : memref<36x8x256xbf16, #tpu.memory_space<vmem>>, vector<1x8x256xbf16>
    %1016 = vector.shape_cast %1015 : vector<1x8x256xbf16> to vector<8x256xbf16>
    %1017 = arith.extf %1016 : vector<8x256xbf16> to vector<8x256xf32>
    %c259 = arith.constant 259 : index
    %1018 = memref.load %arg1[%c259] : memref<288xf32, #tpu.memory_space<smem>>
    %1019 = vector.broadcast %1018 : f32 to vector<8x256xf32>
    %1020 = arith.mulf %1017, %1019 : vector<8x256xf32>
    %1021 = arith.addf %1014, %1020 : vector<8x256xf32>
    %c33_429 = arith.constant 33 : index
    %c0_430 = arith.constant 0 : index
    %c0_431 = arith.constant 0 : index
    %1022 = vector.load %arg3[%c33_429, %c0_430, %c0_431] : memref<36x8x256xbf16, #tpu.memory_space<vmem>>, vector<1x8x256xbf16>
    %1023 = vector.shape_cast %1022 : vector<1x8x256xbf16> to vector<8x256xbf16>
    %1024 = arith.extf %1023 : vector<8x256xbf16> to vector<8x256xf32>
    %c267 = arith.constant 267 : index
    %1025 = memref.load %arg1[%c267] : memref<288xf32, #tpu.memory_space<smem>>
    %1026 = vector.broadcast %1025 : f32 to vector<8x256xf32>
    %1027 = arith.mulf %1024, %1026 : vector<8x256xf32>
    %1028 = arith.addf %1021, %1027 : vector<8x256xf32>
    %c34_432 = arith.constant 34 : index
    %c0_433 = arith.constant 0 : index
    %c0_434 = arith.constant 0 : index
    %1029 = vector.load %arg3[%c34_432, %c0_433, %c0_434] : memref<36x8x256xbf16, #tpu.memory_space<vmem>>, vector<1x8x256xbf16>
    %1030 = vector.shape_cast %1029 : vector<1x8x256xbf16> to vector<8x256xbf16>
    %1031 = arith.extf %1030 : vector<8x256xbf16> to vector<8x256xf32>
    %c275 = arith.constant 275 : index
    %1032 = memref.load %arg1[%c275] : memref<288xf32, #tpu.memory_space<smem>>
    %1033 = vector.broadcast %1032 : f32 to vector<8x256xf32>
    %1034 = arith.mulf %1031, %1033 : vector<8x256xf32>
    %1035 = arith.addf %1028, %1034 : vector<8x256xf32>
    %c35_435 = arith.constant 35 : index
    %c0_436 = arith.constant 0 : index
    %c0_437 = arith.constant 0 : index
    %1036 = vector.load %arg3[%c35_435, %c0_436, %c0_437] : memref<36x8x256xbf16, #tpu.memory_space<vmem>>, vector<1x8x256xbf16>
    %1037 = vector.shape_cast %1036 : vector<1x8x256xbf16> to vector<8x256xbf16>
    %1038 = arith.extf %1037 : vector<8x256xbf16> to vector<8x256xf32>
    %c283 = arith.constant 283 : index
    %1039 = memref.load %arg1[%c283] : memref<288xf32, #tpu.memory_space<smem>>
    %1040 = vector.broadcast %1039 : f32 to vector<8x256xf32>
    %1041 = arith.mulf %1038, %1040 : vector<8x256xf32>
    %1042 = arith.addf %1035, %1041 : vector<8x256xf32>
    %c3_438 = arith.constant 3 : index
    %1043 = memref.load %arg2[%c3_438] : memref<8xf32, #tpu.memory_space<smem>>
    %1044 = vector.broadcast %1043 : f32 to vector<8x256xf32>
    %1045 = arith.addf %1042, %1044 : vector<8x256xf32>
    %cst_439 = arith.constant 0.000000e+00 : f32
    %1046 = vector.broadcast %cst_439 : f32 to vector<8x256xf32>
    %1047 = arith.maximumf %1045, %1046 : vector<8x256xf32>
    %1048 = arith.truncf %1047 : vector<8x256xf32> to vector<8x256xbf16>
    %c3_440 = arith.constant 3 : index
    %c0_441 = arith.constant 0 : index
    %c0_442 = arith.constant 0 : index
    %1049 = vector.load %arg4[%c3_440, %c0_441, %c0_442] : memref<8x256x128xbf16, #tpu.memory_space<vmem>>, vector<1x256x128xbf16>
    %1050 = vector.shape_cast %1049 : vector<1x256x128xbf16> to vector<256x128xbf16>
    %cst_443 = arith.constant dense<0.000000e+00> : vector<8x128xf32>
    %1051 = tpu.matmul %1048, %1050, %cst_443 {dimension_numbers = #tpu.dot_dimension_numbers<[1], [0], [0], [1], [0, 0, 1, 1], [], []>} : vector<8x256xbf16>, vector<256x128xbf16>, vector<8x128xf32> -> vector<8x128xf32>
    %1052 = arith.addf %789, %1051 : vector<8x128xf32>
    %cst_444 = arith.constant 0.000000e+00 : f32
    %1053 = vector.broadcast %cst_444 : f32 to vector<8x256xf32>
    %c0_445 = arith.constant 0 : index
    %c0_446 = arith.constant 0 : index
    %c0_447 = arith.constant 0 : index
    %1054 = vector.load %arg3[%c0_445, %c0_446, %c0_447] : memref<36x8x256xbf16, #tpu.memory_space<vmem>>, vector<1x8x256xbf16>
    %1055 = vector.shape_cast %1054 : vector<1x8x256xbf16> to vector<8x256xbf16>
    %1056 = arith.extf %1055 : vector<8x256xbf16> to vector<8x256xf32>
    %c4_448 = arith.constant 4 : index
    %1057 = memref.load %arg1[%c4_448] : memref<288xf32, #tpu.memory_space<smem>>
    %1058 = vector.broadcast %1057 : f32 to vector<8x256xf32>
    %1059 = arith.mulf %1056, %1058 : vector<8x256xf32>
    %1060 = arith.addf %1053, %1059 : vector<8x256xf32>
    %c1_449 = arith.constant 1 : index
    %c0_450 = arith.constant 0 : index
    %c0_451 = arith.constant 0 : index
    %1061 = vector.load %arg3[%c1_449, %c0_450, %c0_451] : memref<36x8x256xbf16, #tpu.memory_space<vmem>>, vector<1x8x256xbf16>
    %1062 = vector.shape_cast %1061 : vector<1x8x256xbf16> to vector<8x256xbf16>
    %1063 = arith.extf %1062 : vector<8x256xbf16> to vector<8x256xf32>
    %c12_452 = arith.constant 12 : index
    %1064 = memref.load %arg1[%c12_452] : memref<288xf32, #tpu.memory_space<smem>>
    %1065 = vector.broadcast %1064 : f32 to vector<8x256xf32>
    %1066 = arith.mulf %1063, %1065 : vector<8x256xf32>
    %1067 = arith.addf %1060, %1066 : vector<8x256xf32>
    %c2_453 = arith.constant 2 : index
    %c0_454 = arith.constant 0 : index
    %c0_455 = arith.constant 0 : index
    %1068 = vector.load %arg3[%c2_453, %c0_454, %c0_455] : memref<36x8x256xbf16, #tpu.memory_space<vmem>>, vector<1x8x256xbf16>
    %1069 = vector.shape_cast %1068 : vector<1x8x256xbf16> to vector<8x256xbf16>
    %1070 = arith.extf %1069 : vector<8x256xbf16> to vector<8x256xf32>
    %c20_456 = arith.constant 20 : index
    %1071 = memref.load %arg1[%c20_456] : memref<288xf32, #tpu.memory_space<smem>>
    %1072 = vector.broadcast %1071 : f32 to vector<8x256xf32>
    %1073 = arith.mulf %1070, %1072 : vector<8x256xf32>
    %1074 = arith.addf %1067, %1073 : vector<8x256xf32>
    %c3_457 = arith.constant 3 : index
    %c0_458 = arith.constant 0 : index
    %c0_459 = arith.constant 0 : index
    %1075 = vector.load %arg3[%c3_457, %c0_458, %c0_459] : memref<36x8x256xbf16, #tpu.memory_space<vmem>>, vector<1x8x256xbf16>
    %1076 = vector.shape_cast %1075 : vector<1x8x256xbf16> to vector<8x256xbf16>
    %1077 = arith.extf %1076 : vector<8x256xbf16> to vector<8x256xf32>
    %c28_460 = arith.constant 28 : index
    %1078 = memref.load %arg1[%c28_460] : memref<288xf32, #tpu.memory_space<smem>>
    %1079 = vector.broadcast %1078 : f32 to vector<8x256xf32>
    %1080 = arith.mulf %1077, %1079 : vector<8x256xf32>
    %1081 = arith.addf %1074, %1080 : vector<8x256xf32>
    %c4_461 = arith.constant 4 : index
    %c0_462 = arith.constant 0 : index
    %c0_463 = arith.constant 0 : index
    %1082 = vector.load %arg3[%c4_461, %c0_462, %c0_463] : memref<36x8x256xbf16, #tpu.memory_space<vmem>>, vector<1x8x256xbf16>
    %1083 = vector.shape_cast %1082 : vector<1x8x256xbf16> to vector<8x256xbf16>
    %1084 = arith.extf %1083 : vector<8x256xbf16> to vector<8x256xf32>
    %c36 = arith.constant 36 : index
    %1085 = memref.load %arg1[%c36] : memref<288xf32, #tpu.memory_space<smem>>
    %1086 = vector.broadcast %1085 : f32 to vector<8x256xf32>
    %1087 = arith.mulf %1084, %1086 : vector<8x256xf32>
    %1088 = arith.addf %1081, %1087 : vector<8x256xf32>
    %c5_464 = arith.constant 5 : index
    %c0_465 = arith.constant 0 : index
    %c0_466 = arith.constant 0 : index
    %1089 = vector.load %arg3[%c5_464, %c0_465, %c0_466] : memref<36x8x256xbf16, #tpu.memory_space<vmem>>, vector<1x8x256xbf16>
    %1090 = vector.shape_cast %1089 : vector<1x8x256xbf16> to vector<8x256xbf16>
    %1091 = arith.extf %1090 : vector<8x256xbf16> to vector<8x256xf32>
    %c44 = arith.constant 44 : index
    %1092 = memref.load %arg1[%c44] : memref<288xf32, #tpu.memory_space<smem>>
    %1093 = vector.broadcast %1092 : f32 to vector<8x256xf32>
    %1094 = arith.mulf %1091, %1093 : vector<8x256xf32>
    %1095 = arith.addf %1088, %1094 : vector<8x256xf32>
    %c6_467 = arith.constant 6 : index
    %c0_468 = arith.constant 0 : index
    %c0_469 = arith.constant 0 : index
    %1096 = vector.load %arg3[%c6_467, %c0_468, %c0_469] : memref<36x8x256xbf16, #tpu.memory_space<vmem>>, vector<1x8x256xbf16>
    %1097 = vector.shape_cast %1096 : vector<1x8x256xbf16> to vector<8x256xbf16>
    %1098 = arith.extf %1097 : vector<8x256xbf16> to vector<8x256xf32>
    %c52 = arith.constant 52 : index
    %1099 = memref.load %arg1[%c52] : memref<288xf32, #tpu.memory_space<smem>>
    %1100 = vector.broadcast %1099 : f32 to vector<8x256xf32>
    %1101 = arith.mulf %1098, %1100 : vector<8x256xf32>
    %1102 = arith.addf %1095, %1101 : vector<8x256xf32>
    %c7_470 = arith.constant 7 : index
    %c0_471 = arith.constant 0 : index
    %c0_472 = arith.constant 0 : index
    %1103 = vector.load %arg3[%c7_470, %c0_471, %c0_472] : memref<36x8x256xbf16, #tpu.memory_space<vmem>>, vector<1x8x256xbf16>
    %1104 = vector.shape_cast %1103 : vector<1x8x256xbf16> to vector<8x256xbf16>
    %1105 = arith.extf %1104 : vector<8x256xbf16> to vector<8x256xf32>
    %c60 = arith.constant 60 : index
    %1106 = memref.load %arg1[%c60] : memref<288xf32, #tpu.memory_space<smem>>
    %1107 = vector.broadcast %1106 : f32 to vector<8x256xf32>
    %1108 = arith.mulf %1105, %1107 : vector<8x256xf32>
    %1109 = arith.addf %1102, %1108 : vector<8x256xf32>
    %c8_473 = arith.constant 8 : index
    %c0_474 = arith.constant 0 : index
    %c0_475 = arith.constant 0 : index
    %1110 = vector.load %arg3[%c8_473, %c0_474, %c0_475] : memref<36x8x256xbf16, #tpu.memory_space<vmem>>, vector<1x8x256xbf16>
    %1111 = vector.shape_cast %1110 : vector<1x8x256xbf16> to vector<8x256xbf16>
    %1112 = arith.extf %1111 : vector<8x256xbf16> to vector<8x256xf32>
    %c68 = arith.constant 68 : index
    %1113 = memref.load %arg1[%c68] : memref<288xf32, #tpu.memory_space<smem>>
    %1114 = vector.broadcast %1113 : f32 to vector<8x256xf32>
    %1115 = arith.mulf %1112, %1114 : vector<8x256xf32>
    %1116 = arith.addf %1109, %1115 : vector<8x256xf32>
    %c9_476 = arith.constant 9 : index
    %c0_477 = arith.constant 0 : index
    %c0_478 = arith.constant 0 : index
    %1117 = vector.load %arg3[%c9_476, %c0_477, %c0_478] : memref<36x8x256xbf16, #tpu.memory_space<vmem>>, vector<1x8x256xbf16>
    %1118 = vector.shape_cast %1117 : vector<1x8x256xbf16> to vector<8x256xbf16>
    %1119 = arith.extf %1118 : vector<8x256xbf16> to vector<8x256xf32>
    %c76 = arith.constant 76 : index
    %1120 = memref.load %arg1[%c76] : memref<288xf32, #tpu.memory_space<smem>>
    %1121 = vector.broadcast %1120 : f32 to vector<8x256xf32>
    %1122 = arith.mulf %1119, %1121 : vector<8x256xf32>
    %1123 = arith.addf %1116, %1122 : vector<8x256xf32>
    %c10_479 = arith.constant 10 : index
    %c0_480 = arith.constant 0 : index
    %c0_481 = arith.constant 0 : index
    %1124 = vector.load %arg3[%c10_479, %c0_480, %c0_481] : memref<36x8x256xbf16, #tpu.memory_space<vmem>>, vector<1x8x256xbf16>
    %1125 = vector.shape_cast %1124 : vector<1x8x256xbf16> to vector<8x256xbf16>
    %1126 = arith.extf %1125 : vector<8x256xbf16> to vector<8x256xf32>
    %c84 = arith.constant 84 : index
    %1127 = memref.load %arg1[%c84] : memref<288xf32, #tpu.memory_space<smem>>
    %1128 = vector.broadcast %1127 : f32 to vector<8x256xf32>
    %1129 = arith.mulf %1126, %1128 : vector<8x256xf32>
    %1130 = arith.addf %1123, %1129 : vector<8x256xf32>
    %c11_482 = arith.constant 11 : index
    %c0_483 = arith.constant 0 : index
    %c0_484 = arith.constant 0 : index
    %1131 = vector.load %arg3[%c11_482, %c0_483, %c0_484] : memref<36x8x256xbf16, #tpu.memory_space<vmem>>, vector<1x8x256xbf16>
    %1132 = vector.shape_cast %1131 : vector<1x8x256xbf16> to vector<8x256xbf16>
    %1133 = arith.extf %1132 : vector<8x256xbf16> to vector<8x256xf32>
    %c92 = arith.constant 92 : index
    %1134 = memref.load %arg1[%c92] : memref<288xf32, #tpu.memory_space<smem>>
    %1135 = vector.broadcast %1134 : f32 to vector<8x256xf32>
    %1136 = arith.mulf %1133, %1135 : vector<8x256xf32>
    %1137 = arith.addf %1130, %1136 : vector<8x256xf32>
    %c12_485 = arith.constant 12 : index
    %c0_486 = arith.constant 0 : index
    %c0_487 = arith.constant 0 : index
    %1138 = vector.load %arg3[%c12_485, %c0_486, %c0_487] : memref<36x8x256xbf16, #tpu.memory_space<vmem>>, vector<1x8x256xbf16>
    %1139 = vector.shape_cast %1138 : vector<1x8x256xbf16> to vector<8x256xbf16>
    %1140 = arith.extf %1139 : vector<8x256xbf16> to vector<8x256xf32>
    %c100 = arith.constant 100 : index
    %1141 = memref.load %arg1[%c100] : memref<288xf32, #tpu.memory_space<smem>>
    %1142 = vector.broadcast %1141 : f32 to vector<8x256xf32>
    %1143 = arith.mulf %1140, %1142 : vector<8x256xf32>
    %1144 = arith.addf %1137, %1143 : vector<8x256xf32>
    %c13_488 = arith.constant 13 : index
    %c0_489 = arith.constant 0 : index
    %c0_490 = arith.constant 0 : index
    %1145 = vector.load %arg3[%c13_488, %c0_489, %c0_490] : memref<36x8x256xbf16, #tpu.memory_space<vmem>>, vector<1x8x256xbf16>
    %1146 = vector.shape_cast %1145 : vector<1x8x256xbf16> to vector<8x256xbf16>
    %1147 = arith.extf %1146 : vector<8x256xbf16> to vector<8x256xf32>
    %c108 = arith.constant 108 : index
    %1148 = memref.load %arg1[%c108] : memref<288xf32, #tpu.memory_space<smem>>
    %1149 = vector.broadcast %1148 : f32 to vector<8x256xf32>
    %1150 = arith.mulf %1147, %1149 : vector<8x256xf32>
    %1151 = arith.addf %1144, %1150 : vector<8x256xf32>
    %c14_491 = arith.constant 14 : index
    %c0_492 = arith.constant 0 : index
    %c0_493 = arith.constant 0 : index
    %1152 = vector.load %arg3[%c14_491, %c0_492, %c0_493] : memref<36x8x256xbf16, #tpu.memory_space<vmem>>, vector<1x8x256xbf16>
    %1153 = vector.shape_cast %1152 : vector<1x8x256xbf16> to vector<8x256xbf16>
    %1154 = arith.extf %1153 : vector<8x256xbf16> to vector<8x256xf32>
    %c116 = arith.constant 116 : index
    %1155 = memref.load %arg1[%c116] : memref<288xf32, #tpu.memory_space<smem>>
    %1156 = vector.broadcast %1155 : f32 to vector<8x256xf32>
    %1157 = arith.mulf %1154, %1156 : vector<8x256xf32>
    %1158 = arith.addf %1151, %1157 : vector<8x256xf32>
    %c15_494 = arith.constant 15 : index
    %c0_495 = arith.constant 0 : index
    %c0_496 = arith.constant 0 : index
    %1159 = vector.load %arg3[%c15_494, %c0_495, %c0_496] : memref<36x8x256xbf16, #tpu.memory_space<vmem>>, vector<1x8x256xbf16>
    %1160 = vector.shape_cast %1159 : vector<1x8x256xbf16> to vector<8x256xbf16>
    %1161 = arith.extf %1160 : vector<8x256xbf16> to vector<8x256xf32>
    %c124 = arith.constant 124 : index
    %1162 = memref.load %arg1[%c124] : memref<288xf32, #tpu.memory_space<smem>>
    %1163 = vector.broadcast %1162 : f32 to vector<8x256xf32>
    %1164 = arith.mulf %1161, %1163 : vector<8x256xf32>
    %1165 = arith.addf %1158, %1164 : vector<8x256xf32>
    %c16_497 = arith.constant 16 : index
    %c0_498 = arith.constant 0 : index
    %c0_499 = arith.constant 0 : index
    %1166 = vector.load %arg3[%c16_497, %c0_498, %c0_499] : memref<36x8x256xbf16, #tpu.memory_space<vmem>>, vector<1x8x256xbf16>
    %1167 = vector.shape_cast %1166 : vector<1x8x256xbf16> to vector<8x256xbf16>
    %1168 = arith.extf %1167 : vector<8x256xbf16> to vector<8x256xf32>
    %c132 = arith.constant 132 : index
    %1169 = memref.load %arg1[%c132] : memref<288xf32, #tpu.memory_space<smem>>
    %1170 = vector.broadcast %1169 : f32 to vector<8x256xf32>
    %1171 = arith.mulf %1168, %1170 : vector<8x256xf32>
    %1172 = arith.addf %1165, %1171 : vector<8x256xf32>
    %c17_500 = arith.constant 17 : index
    %c0_501 = arith.constant 0 : index
    %c0_502 = arith.constant 0 : index
    %1173 = vector.load %arg3[%c17_500, %c0_501, %c0_502] : memref<36x8x256xbf16, #tpu.memory_space<vmem>>, vector<1x8x256xbf16>
    %1174 = vector.shape_cast %1173 : vector<1x8x256xbf16> to vector<8x256xbf16>
    %1175 = arith.extf %1174 : vector<8x256xbf16> to vector<8x256xf32>
    %c140 = arith.constant 140 : index
    %1176 = memref.load %arg1[%c140] : memref<288xf32, #tpu.memory_space<smem>>
    %1177 = vector.broadcast %1176 : f32 to vector<8x256xf32>
    %1178 = arith.mulf %1175, %1177 : vector<8x256xf32>
    %1179 = arith.addf %1172, %1178 : vector<8x256xf32>
    %c18_503 = arith.constant 18 : index
    %c0_504 = arith.constant 0 : index
    %c0_505 = arith.constant 0 : index
    %1180 = vector.load %arg3[%c18_503, %c0_504, %c0_505] : memref<36x8x256xbf16, #tpu.memory_space<vmem>>, vector<1x8x256xbf16>
    %1181 = vector.shape_cast %1180 : vector<1x8x256xbf16> to vector<8x256xbf16>
    %1182 = arith.extf %1181 : vector<8x256xbf16> to vector<8x256xf32>
    %c148 = arith.constant 148 : index
    %1183 = memref.load %arg1[%c148] : memref<288xf32, #tpu.memory_space<smem>>
    %1184 = vector.broadcast %1183 : f32 to vector<8x256xf32>
    %1185 = arith.mulf %1182, %1184 : vector<8x256xf32>
    %1186 = arith.addf %1179, %1185 : vector<8x256xf32>
    %c19_506 = arith.constant 19 : index
    %c0_507 = arith.constant 0 : index
    %c0_508 = arith.constant 0 : index
    %1187 = vector.load %arg3[%c19_506, %c0_507, %c0_508] : memref<36x8x256xbf16, #tpu.memory_space<vmem>>, vector<1x8x256xbf16>
    %1188 = vector.shape_cast %1187 : vector<1x8x256xbf16> to vector<8x256xbf16>
    %1189 = arith.extf %1188 : vector<8x256xbf16> to vector<8x256xf32>
    %c156 = arith.constant 156 : index
    %1190 = memref.load %arg1[%c156] : memref<288xf32, #tpu.memory_space<smem>>
    %1191 = vector.broadcast %1190 : f32 to vector<8x256xf32>
    %1192 = arith.mulf %1189, %1191 : vector<8x256xf32>
    %1193 = arith.addf %1186, %1192 : vector<8x256xf32>
    %c20_509 = arith.constant 20 : index
    %c0_510 = arith.constant 0 : index
    %c0_511 = arith.constant 0 : index
    %1194 = vector.load %arg3[%c20_509, %c0_510, %c0_511] : memref<36x8x256xbf16, #tpu.memory_space<vmem>>, vector<1x8x256xbf16>
    %1195 = vector.shape_cast %1194 : vector<1x8x256xbf16> to vector<8x256xbf16>
    %1196 = arith.extf %1195 : vector<8x256xbf16> to vector<8x256xf32>
    %c164 = arith.constant 164 : index
    %1197 = memref.load %arg1[%c164] : memref<288xf32, #tpu.memory_space<smem>>
    %1198 = vector.broadcast %1197 : f32 to vector<8x256xf32>
    %1199 = arith.mulf %1196, %1198 : vector<8x256xf32>
    %1200 = arith.addf %1193, %1199 : vector<8x256xf32>
    %c21_512 = arith.constant 21 : index
    %c0_513 = arith.constant 0 : index
    %c0_514 = arith.constant 0 : index
    %1201 = vector.load %arg3[%c21_512, %c0_513, %c0_514] : memref<36x8x256xbf16, #tpu.memory_space<vmem>>, vector<1x8x256xbf16>
    %1202 = vector.shape_cast %1201 : vector<1x8x256xbf16> to vector<8x256xbf16>
    %1203 = arith.extf %1202 : vector<8x256xbf16> to vector<8x256xf32>
    %c172 = arith.constant 172 : index
    %1204 = memref.load %arg1[%c172] : memref<288xf32, #tpu.memory_space<smem>>
    %1205 = vector.broadcast %1204 : f32 to vector<8x256xf32>
    %1206 = arith.mulf %1203, %1205 : vector<8x256xf32>
    %1207 = arith.addf %1200, %1206 : vector<8x256xf32>
    %c22_515 = arith.constant 22 : index
    %c0_516 = arith.constant 0 : index
    %c0_517 = arith.constant 0 : index
    %1208 = vector.load %arg3[%c22_515, %c0_516, %c0_517] : memref<36x8x256xbf16, #tpu.memory_space<vmem>>, vector<1x8x256xbf16>
    %1209 = vector.shape_cast %1208 : vector<1x8x256xbf16> to vector<8x256xbf16>
    %1210 = arith.extf %1209 : vector<8x256xbf16> to vector<8x256xf32>
    %c180 = arith.constant 180 : index
    %1211 = memref.load %arg1[%c180] : memref<288xf32, #tpu.memory_space<smem>>
    %1212 = vector.broadcast %1211 : f32 to vector<8x256xf32>
    %1213 = arith.mulf %1210, %1212 : vector<8x256xf32>
    %1214 = arith.addf %1207, %1213 : vector<8x256xf32>
    %c23_518 = arith.constant 23 : index
    %c0_519 = arith.constant 0 : index
    %c0_520 = arith.constant 0 : index
    %1215 = vector.load %arg3[%c23_518, %c0_519, %c0_520] : memref<36x8x256xbf16, #tpu.memory_space<vmem>>, vector<1x8x256xbf16>
    %1216 = vector.shape_cast %1215 : vector<1x8x256xbf16> to vector<8x256xbf16>
    %1217 = arith.extf %1216 : vector<8x256xbf16> to vector<8x256xf32>
    %c188 = arith.constant 188 : index
    %1218 = memref.load %arg1[%c188] : memref<288xf32, #tpu.memory_space<smem>>
    %1219 = vector.broadcast %1218 : f32 to vector<8x256xf32>
    %1220 = arith.mulf %1217, %1219 : vector<8x256xf32>
    %1221 = arith.addf %1214, %1220 : vector<8x256xf32>
    %c24_521 = arith.constant 24 : index
    %c0_522 = arith.constant 0 : index
    %c0_523 = arith.constant 0 : index
    %1222 = vector.load %arg3[%c24_521, %c0_522, %c0_523] : memref<36x8x256xbf16, #tpu.memory_space<vmem>>, vector<1x8x256xbf16>
    %1223 = vector.shape_cast %1222 : vector<1x8x256xbf16> to vector<8x256xbf16>
    %1224 = arith.extf %1223 : vector<8x256xbf16> to vector<8x256xf32>
    %c196 = arith.constant 196 : index
    %1225 = memref.load %arg1[%c196] : memref<288xf32, #tpu.memory_space<smem>>
    %1226 = vector.broadcast %1225 : f32 to vector<8x256xf32>
    %1227 = arith.mulf %1224, %1226 : vector<8x256xf32>
    %1228 = arith.addf %1221, %1227 : vector<8x256xf32>
    %c25_524 = arith.constant 25 : index
    %c0_525 = arith.constant 0 : index
    %c0_526 = arith.constant 0 : index
    %1229 = vector.load %arg3[%c25_524, %c0_525, %c0_526] : memref<36x8x256xbf16, #tpu.memory_space<vmem>>, vector<1x8x256xbf16>
    %1230 = vector.shape_cast %1229 : vector<1x8x256xbf16> to vector<8x256xbf16>
    %1231 = arith.extf %1230 : vector<8x256xbf16> to vector<8x256xf32>
    %c204 = arith.constant 204 : index
    %1232 = memref.load %arg1[%c204] : memref<288xf32, #tpu.memory_space<smem>>
    %1233 = vector.broadcast %1232 : f32 to vector<8x256xf32>
    %1234 = arith.mulf %1231, %1233 : vector<8x256xf32>
    %1235 = arith.addf %1228, %1234 : vector<8x256xf32>
    %c26_527 = arith.constant 26 : index
    %c0_528 = arith.constant 0 : index
    %c0_529 = arith.constant 0 : index
    %1236 = vector.load %arg3[%c26_527, %c0_528, %c0_529] : memref<36x8x256xbf16, #tpu.memory_space<vmem>>, vector<1x8x256xbf16>
    %1237 = vector.shape_cast %1236 : vector<1x8x256xbf16> to vector<8x256xbf16>
    %1238 = arith.extf %1237 : vector<8x256xbf16> to vector<8x256xf32>
    %c212 = arith.constant 212 : index
    %1239 = memref.load %arg1[%c212] : memref<288xf32, #tpu.memory_space<smem>>
    %1240 = vector.broadcast %1239 : f32 to vector<8x256xf32>
    %1241 = arith.mulf %1238, %1240 : vector<8x256xf32>
    %1242 = arith.addf %1235, %1241 : vector<8x256xf32>
    %c27_530 = arith.constant 27 : index
    %c0_531 = arith.constant 0 : index
    %c0_532 = arith.constant 0 : index
    %1243 = vector.load %arg3[%c27_530, %c0_531, %c0_532] : memref<36x8x256xbf16, #tpu.memory_space<vmem>>, vector<1x8x256xbf16>
    %1244 = vector.shape_cast %1243 : vector<1x8x256xbf16> to vector<8x256xbf16>
    %1245 = arith.extf %1244 : vector<8x256xbf16> to vector<8x256xf32>
    %c220 = arith.constant 220 : index
    %1246 = memref.load %arg1[%c220] : memref<288xf32, #tpu.memory_space<smem>>
    %1247 = vector.broadcast %1246 : f32 to vector<8x256xf32>
    %1248 = arith.mulf %1245, %1247 : vector<8x256xf32>
    %1249 = arith.addf %1242, %1248 : vector<8x256xf32>
    %c28_533 = arith.constant 28 : index
    %c0_534 = arith.constant 0 : index
    %c0_535 = arith.constant 0 : index
    %1250 = vector.load %arg3[%c28_533, %c0_534, %c0_535] : memref<36x8x256xbf16, #tpu.memory_space<vmem>>, vector<1x8x256xbf16>
    %1251 = vector.shape_cast %1250 : vector<1x8x256xbf16> to vector<8x256xbf16>
    %1252 = arith.extf %1251 : vector<8x256xbf16> to vector<8x256xf32>
    %c228 = arith.constant 228 : index
    %1253 = memref.load %arg1[%c228] : memref<288xf32, #tpu.memory_space<smem>>
    %1254 = vector.broadcast %1253 : f32 to vector<8x256xf32>
    %1255 = arith.mulf %1252, %1254 : vector<8x256xf32>
    %1256 = arith.addf %1249, %1255 : vector<8x256xf32>
    %c29_536 = arith.constant 29 : index
    %c0_537 = arith.constant 0 : index
    %c0_538 = arith.constant 0 : index
    %1257 = vector.load %arg3[%c29_536, %c0_537, %c0_538] : memref<36x8x256xbf16, #tpu.memory_space<vmem>>, vector<1x8x256xbf16>
    %1258 = vector.shape_cast %1257 : vector<1x8x256xbf16> to vector<8x256xbf16>
    %1259 = arith.extf %1258 : vector<8x256xbf16> to vector<8x256xf32>
    %c236 = arith.constant 236 : index
    %1260 = memref.load %arg1[%c236] : memref<288xf32, #tpu.memory_space<smem>>
    %1261 = vector.broadcast %1260 : f32 to vector<8x256xf32>
    %1262 = arith.mulf %1259, %1261 : vector<8x256xf32>
    %1263 = arith.addf %1256, %1262 : vector<8x256xf32>
    %c30_539 = arith.constant 30 : index
    %c0_540 = arith.constant 0 : index
    %c0_541 = arith.constant 0 : index
    %1264 = vector.load %arg3[%c30_539, %c0_540, %c0_541] : memref<36x8x256xbf16, #tpu.memory_space<vmem>>, vector<1x8x256xbf16>
    %1265 = vector.shape_cast %1264 : vector<1x8x256xbf16> to vector<8x256xbf16>
    %1266 = arith.extf %1265 : vector<8x256xbf16> to vector<8x256xf32>
    %c244 = arith.constant 244 : index
    %1267 = memref.load %arg1[%c244] : memref<288xf32, #tpu.memory_space<smem>>
    %1268 = vector.broadcast %1267 : f32 to vector<8x256xf32>
    %1269 = arith.mulf %1266, %1268 : vector<8x256xf32>
    %1270 = arith.addf %1263, %1269 : vector<8x256xf32>
    %c31_542 = arith.constant 31 : index
    %c0_543 = arith.constant 0 : index
    %c0_544 = arith.constant 0 : index
    %1271 = vector.load %arg3[%c31_542, %c0_543, %c0_544] : memref<36x8x256xbf16, #tpu.memory_space<vmem>>, vector<1x8x256xbf16>
    %1272 = vector.shape_cast %1271 : vector<1x8x256xbf16> to vector<8x256xbf16>
    %1273 = arith.extf %1272 : vector<8x256xbf16> to vector<8x256xf32>
    %c252 = arith.constant 252 : index
    %1274 = memref.load %arg1[%c252] : memref<288xf32, #tpu.memory_space<smem>>
    %1275 = vector.broadcast %1274 : f32 to vector<8x256xf32>
    %1276 = arith.mulf %1273, %1275 : vector<8x256xf32>
    %1277 = arith.addf %1270, %1276 : vector<8x256xf32>
    %c32_545 = arith.constant 32 : index
    %c0_546 = arith.constant 0 : index
    %c0_547 = arith.constant 0 : index
    %1278 = vector.load %arg3[%c32_545, %c0_546, %c0_547] : memref<36x8x256xbf16, #tpu.memory_space<vmem>>, vector<1x8x256xbf16>
    %1279 = vector.shape_cast %1278 : vector<1x8x256xbf16> to vector<8x256xbf16>
    %1280 = arith.extf %1279 : vector<8x256xbf16> to vector<8x256xf32>
    %c260 = arith.constant 260 : index
    %1281 = memref.load %arg1[%c260] : memref<288xf32, #tpu.memory_space<smem>>
    %1282 = vector.broadcast %1281 : f32 to vector<8x256xf32>
    %1283 = arith.mulf %1280, %1282 : vector<8x256xf32>
    %1284 = arith.addf %1277, %1283 : vector<8x256xf32>
    %c33_548 = arith.constant 33 : index
    %c0_549 = arith.constant 0 : index
    %c0_550 = arith.constant 0 : index
    %1285 = vector.load %arg3[%c33_548, %c0_549, %c0_550] : memref<36x8x256xbf16, #tpu.memory_space<vmem>>, vector<1x8x256xbf16>
    %1286 = vector.shape_cast %1285 : vector<1x8x256xbf16> to vector<8x256xbf16>
    %1287 = arith.extf %1286 : vector<8x256xbf16> to vector<8x256xf32>
    %c268 = arith.constant 268 : index
    %1288 = memref.load %arg1[%c268] : memref<288xf32, #tpu.memory_space<smem>>
    %1289 = vector.broadcast %1288 : f32 to vector<8x256xf32>
    %1290 = arith.mulf %1287, %1289 : vector<8x256xf32>
    %1291 = arith.addf %1284, %1290 : vector<8x256xf32>
    %c34_551 = arith.constant 34 : index
    %c0_552 = arith.constant 0 : index
    %c0_553 = arith.constant 0 : index
    %1292 = vector.load %arg3[%c34_551, %c0_552, %c0_553] : memref<36x8x256xbf16, #tpu.memory_space<vmem>>, vector<1x8x256xbf16>
    %1293 = vector.shape_cast %1292 : vector<1x8x256xbf16> to vector<8x256xbf16>
    %1294 = arith.extf %1293 : vector<8x256xbf16> to vector<8x256xf32>
    %c276 = arith.constant 276 : index
    %1295 = memref.load %arg1[%c276] : memref<288xf32, #tpu.memory_space<smem>>
    %1296 = vector.broadcast %1295 : f32 to vector<8x256xf32>
    %1297 = arith.mulf %1294, %1296 : vector<8x256xf32>
    %1298 = arith.addf %1291, %1297 : vector<8x256xf32>
    %c35_554 = arith.constant 35 : index
    %c0_555 = arith.constant 0 : index
    %c0_556 = arith.constant 0 : index
    %1299 = vector.load %arg3[%c35_554, %c0_555, %c0_556] : memref<36x8x256xbf16, #tpu.memory_space<vmem>>, vector<1x8x256xbf16>
    %1300 = vector.shape_cast %1299 : vector<1x8x256xbf16> to vector<8x256xbf16>
    %1301 = arith.extf %1300 : vector<8x256xbf16> to vector<8x256xf32>
    %c284 = arith.constant 284 : index
    %1302 = memref.load %arg1[%c284] : memref<288xf32, #tpu.memory_space<smem>>
    %1303 = vector.broadcast %1302 : f32 to vector<8x256xf32>
    %1304 = arith.mulf %1301, %1303 : vector<8x256xf32>
    %1305 = arith.addf %1298, %1304 : vector<8x256xf32>
    %c4_557 = arith.constant 4 : index
    %1306 = memref.load %arg2[%c4_557] : memref<8xf32, #tpu.memory_space<smem>>
    %1307 = vector.broadcast %1306 : f32 to vector<8x256xf32>
    %1308 = arith.addf %1305, %1307 : vector<8x256xf32>
    %cst_558 = arith.constant 0.000000e+00 : f32
    %1309 = vector.broadcast %cst_558 : f32 to vector<8x256xf32>
    %1310 = arith.maximumf %1308, %1309 : vector<8x256xf32>
    %1311 = arith.truncf %1310 : vector<8x256xf32> to vector<8x256xbf16>
    %c4_559 = arith.constant 4 : index
    %c0_560 = arith.constant 0 : index
    %c0_561 = arith.constant 0 : index
    %1312 = vector.load %arg4[%c4_559, %c0_560, %c0_561] : memref<8x256x128xbf16, #tpu.memory_space<vmem>>, vector<1x256x128xbf16>
    %1313 = vector.shape_cast %1312 : vector<1x256x128xbf16> to vector<256x128xbf16>
    %cst_562 = arith.constant dense<0.000000e+00> : vector<8x128xf32>
    %1314 = tpu.matmul %1311, %1313, %cst_562 {dimension_numbers = #tpu.dot_dimension_numbers<[1], [0], [0], [1], [0, 0, 1, 1], [], []>} : vector<8x256xbf16>, vector<256x128xbf16>, vector<8x128xf32> -> vector<8x128xf32>
    %1315 = arith.addf %1052, %1314 : vector<8x128xf32>
    %cst_563 = arith.constant 0.000000e+00 : f32
    %1316 = vector.broadcast %cst_563 : f32 to vector<8x256xf32>
    %c0_564 = arith.constant 0 : index
    %c0_565 = arith.constant 0 : index
    %c0_566 = arith.constant 0 : index
    %1317 = vector.load %arg3[%c0_564, %c0_565, %c0_566] : memref<36x8x256xbf16, #tpu.memory_space<vmem>>, vector<1x8x256xbf16>
    %1318 = vector.shape_cast %1317 : vector<1x8x256xbf16> to vector<8x256xbf16>
    %1319 = arith.extf %1318 : vector<8x256xbf16> to vector<8x256xf32>
    %c5_567 = arith.constant 5 : index
    %1320 = memref.load %arg1[%c5_567] : memref<288xf32, #tpu.memory_space<smem>>
    %1321 = vector.broadcast %1320 : f32 to vector<8x256xf32>
    %1322 = arith.mulf %1319, %1321 : vector<8x256xf32>
    %1323 = arith.addf %1316, %1322 : vector<8x256xf32>
    %c1_568 = arith.constant 1 : index
    %c0_569 = arith.constant 0 : index
    %c0_570 = arith.constant 0 : index
    %1324 = vector.load %arg3[%c1_568, %c0_569, %c0_570] : memref<36x8x256xbf16, #tpu.memory_space<vmem>>, vector<1x8x256xbf16>
    %1325 = vector.shape_cast %1324 : vector<1x8x256xbf16> to vector<8x256xbf16>
    %1326 = arith.extf %1325 : vector<8x256xbf16> to vector<8x256xf32>
    %c13_571 = arith.constant 13 : index
    %1327 = memref.load %arg1[%c13_571] : memref<288xf32, #tpu.memory_space<smem>>
    %1328 = vector.broadcast %1327 : f32 to vector<8x256xf32>
    %1329 = arith.mulf %1326, %1328 : vector<8x256xf32>
    %1330 = arith.addf %1323, %1329 : vector<8x256xf32>
    %c2_572 = arith.constant 2 : index
    %c0_573 = arith.constant 0 : index
    %c0_574 = arith.constant 0 : index
    %1331 = vector.load %arg3[%c2_572, %c0_573, %c0_574] : memref<36x8x256xbf16, #tpu.memory_space<vmem>>, vector<1x8x256xbf16>
    %1332 = vector.shape_cast %1331 : vector<1x8x256xbf16> to vector<8x256xbf16>
    %1333 = arith.extf %1332 : vector<8x256xbf16> to vector<8x256xf32>
    %c21_575 = arith.constant 21 : index
    %1334 = memref.load %arg1[%c21_575] : memref<288xf32, #tpu.memory_space<smem>>
    %1335 = vector.broadcast %1334 : f32 to vector<8x256xf32>
    %1336 = arith.mulf %1333, %1335 : vector<8x256xf32>
    %1337 = arith.addf %1330, %1336 : vector<8x256xf32>
    %c3_576 = arith.constant 3 : index
    %c0_577 = arith.constant 0 : index
    %c0_578 = arith.constant 0 : index
    %1338 = vector.load %arg3[%c3_576, %c0_577, %c0_578] : memref<36x8x256xbf16, #tpu.memory_space<vmem>>, vector<1x8x256xbf16>
    %1339 = vector.shape_cast %1338 : vector<1x8x256xbf16> to vector<8x256xbf16>
    %1340 = arith.extf %1339 : vector<8x256xbf16> to vector<8x256xf32>
    %c29_579 = arith.constant 29 : index
    %1341 = memref.load %arg1[%c29_579] : memref<288xf32, #tpu.memory_space<smem>>
    %1342 = vector.broadcast %1341 : f32 to vector<8x256xf32>
    %1343 = arith.mulf %1340, %1342 : vector<8x256xf32>
    %1344 = arith.addf %1337, %1343 : vector<8x256xf32>
    %c4_580 = arith.constant 4 : index
    %c0_581 = arith.constant 0 : index
    %c0_582 = arith.constant 0 : index
    %1345 = vector.load %arg3[%c4_580, %c0_581, %c0_582] : memref<36x8x256xbf16, #tpu.memory_space<vmem>>, vector<1x8x256xbf16>
    %1346 = vector.shape_cast %1345 : vector<1x8x256xbf16> to vector<8x256xbf16>
    %1347 = arith.extf %1346 : vector<8x256xbf16> to vector<8x256xf32>
    %c37 = arith.constant 37 : index
    %1348 = memref.load %arg1[%c37] : memref<288xf32, #tpu.memory_space<smem>>
    %1349 = vector.broadcast %1348 : f32 to vector<8x256xf32>
    %1350 = arith.mulf %1347, %1349 : vector<8x256xf32>
    %1351 = arith.addf %1344, %1350 : vector<8x256xf32>
    %c5_583 = arith.constant 5 : index
    %c0_584 = arith.constant 0 : index
    %c0_585 = arith.constant 0 : index
    %1352 = vector.load %arg3[%c5_583, %c0_584, %c0_585] : memref<36x8x256xbf16, #tpu.memory_space<vmem>>, vector<1x8x256xbf16>
    %1353 = vector.shape_cast %1352 : vector<1x8x256xbf16> to vector<8x256xbf16>
    %1354 = arith.extf %1353 : vector<8x256xbf16> to vector<8x256xf32>
    %c45 = arith.constant 45 : index
    %1355 = memref.load %arg1[%c45] : memref<288xf32, #tpu.memory_space<smem>>
    %1356 = vector.broadcast %1355 : f32 to vector<8x256xf32>
    %1357 = arith.mulf %1354, %1356 : vector<8x256xf32>
    %1358 = arith.addf %1351, %1357 : vector<8x256xf32>
    %c6_586 = arith.constant 6 : index
    %c0_587 = arith.constant 0 : index
    %c0_588 = arith.constant 0 : index
    %1359 = vector.load %arg3[%c6_586, %c0_587, %c0_588] : memref<36x8x256xbf16, #tpu.memory_space<vmem>>, vector<1x8x256xbf16>
    %1360 = vector.shape_cast %1359 : vector<1x8x256xbf16> to vector<8x256xbf16>
    %1361 = arith.extf %1360 : vector<8x256xbf16> to vector<8x256xf32>
    %c53 = arith.constant 53 : index
    %1362 = memref.load %arg1[%c53] : memref<288xf32, #tpu.memory_space<smem>>
    %1363 = vector.broadcast %1362 : f32 to vector<8x256xf32>
    %1364 = arith.mulf %1361, %1363 : vector<8x256xf32>
    %1365 = arith.addf %1358, %1364 : vector<8x256xf32>
    %c7_589 = arith.constant 7 : index
    %c0_590 = arith.constant 0 : index
    %c0_591 = arith.constant 0 : index
    %1366 = vector.load %arg3[%c7_589, %c0_590, %c0_591] : memref<36x8x256xbf16, #tpu.memory_space<vmem>>, vector<1x8x256xbf16>
    %1367 = vector.shape_cast %1366 : vector<1x8x256xbf16> to vector<8x256xbf16>
    %1368 = arith.extf %1367 : vector<8x256xbf16> to vector<8x256xf32>
    %c61 = arith.constant 61 : index
    %1369 = memref.load %arg1[%c61] : memref<288xf32, #tpu.memory_space<smem>>
    %1370 = vector.broadcast %1369 : f32 to vector<8x256xf32>
    %1371 = arith.mulf %1368, %1370 : vector<8x256xf32>
    %1372 = arith.addf %1365, %1371 : vector<8x256xf32>
    %c8_592 = arith.constant 8 : index
    %c0_593 = arith.constant 0 : index
    %c0_594 = arith.constant 0 : index
    %1373 = vector.load %arg3[%c8_592, %c0_593, %c0_594] : memref<36x8x256xbf16, #tpu.memory_space<vmem>>, vector<1x8x256xbf16>
    %1374 = vector.shape_cast %1373 : vector<1x8x256xbf16> to vector<8x256xbf16>
    %1375 = arith.extf %1374 : vector<8x256xbf16> to vector<8x256xf32>
    %c69 = arith.constant 69 : index
    %1376 = memref.load %arg1[%c69] : memref<288xf32, #tpu.memory_space<smem>>
    %1377 = vector.broadcast %1376 : f32 to vector<8x256xf32>
    %1378 = arith.mulf %1375, %1377 : vector<8x256xf32>
    %1379 = arith.addf %1372, %1378 : vector<8x256xf32>
    %c9_595 = arith.constant 9 : index
    %c0_596 = arith.constant 0 : index
    %c0_597 = arith.constant 0 : index
    %1380 = vector.load %arg3[%c9_595, %c0_596, %c0_597] : memref<36x8x256xbf16, #tpu.memory_space<vmem>>, vector<1x8x256xbf16>
    %1381 = vector.shape_cast %1380 : vector<1x8x256xbf16> to vector<8x256xbf16>
    %1382 = arith.extf %1381 : vector<8x256xbf16> to vector<8x256xf32>
    %c77 = arith.constant 77 : index
    %1383 = memref.load %arg1[%c77] : memref<288xf32, #tpu.memory_space<smem>>
    %1384 = vector.broadcast %1383 : f32 to vector<8x256xf32>
    %1385 = arith.mulf %1382, %1384 : vector<8x256xf32>
    %1386 = arith.addf %1379, %1385 : vector<8x256xf32>
    %c10_598 = arith.constant 10 : index
    %c0_599 = arith.constant 0 : index
    %c0_600 = arith.constant 0 : index
    %1387 = vector.load %arg3[%c10_598, %c0_599, %c0_600] : memref<36x8x256xbf16, #tpu.memory_space<vmem>>, vector<1x8x256xbf16>
    %1388 = vector.shape_cast %1387 : vector<1x8x256xbf16> to vector<8x256xbf16>
    %1389 = arith.extf %1388 : vector<8x256xbf16> to vector<8x256xf32>
    %c85 = arith.constant 85 : index
    %1390 = memref.load %arg1[%c85] : memref<288xf32, #tpu.memory_space<smem>>
    %1391 = vector.broadcast %1390 : f32 to vector<8x256xf32>
    %1392 = arith.mulf %1389, %1391 : vector<8x256xf32>
    %1393 = arith.addf %1386, %1392 : vector<8x256xf32>
    %c11_601 = arith.constant 11 : index
    %c0_602 = arith.constant 0 : index
    %c0_603 = arith.constant 0 : index
    %1394 = vector.load %arg3[%c11_601, %c0_602, %c0_603] : memref<36x8x256xbf16, #tpu.memory_space<vmem>>, vector<1x8x256xbf16>
    %1395 = vector.shape_cast %1394 : vector<1x8x256xbf16> to vector<8x256xbf16>
    %1396 = arith.extf %1395 : vector<8x256xbf16> to vector<8x256xf32>
    %c93 = arith.constant 93 : index
    %1397 = memref.load %arg1[%c93] : memref<288xf32, #tpu.memory_space<smem>>
    %1398 = vector.broadcast %1397 : f32 to vector<8x256xf32>
    %1399 = arith.mulf %1396, %1398 : vector<8x256xf32>
    %1400 = arith.addf %1393, %1399 : vector<8x256xf32>
    %c12_604 = arith.constant 12 : index
    %c0_605 = arith.constant 0 : index
    %c0_606 = arith.constant 0 : index
    %1401 = vector.load %arg3[%c12_604, %c0_605, %c0_606] : memref<36x8x256xbf16, #tpu.memory_space<vmem>>, vector<1x8x256xbf16>
    %1402 = vector.shape_cast %1401 : vector<1x8x256xbf16> to vector<8x256xbf16>
    %1403 = arith.extf %1402 : vector<8x256xbf16> to vector<8x256xf32>
    %c101 = arith.constant 101 : index
    %1404 = memref.load %arg1[%c101] : memref<288xf32, #tpu.memory_space<smem>>
    %1405 = vector.broadcast %1404 : f32 to vector<8x256xf32>
    %1406 = arith.mulf %1403, %1405 : vector<8x256xf32>
    %1407 = arith.addf %1400, %1406 : vector<8x256xf32>
    %c13_607 = arith.constant 13 : index
    %c0_608 = arith.constant 0 : index
    %c0_609 = arith.constant 0 : index
    %1408 = vector.load %arg3[%c13_607, %c0_608, %c0_609] : memref<36x8x256xbf16, #tpu.memory_space<vmem>>, vector<1x8x256xbf16>
    %1409 = vector.shape_cast %1408 : vector<1x8x256xbf16> to vector<8x256xbf16>
    %1410 = arith.extf %1409 : vector<8x256xbf16> to vector<8x256xf32>
    %c109 = arith.constant 109 : index
    %1411 = memref.load %arg1[%c109] : memref<288xf32, #tpu.memory_space<smem>>
    %1412 = vector.broadcast %1411 : f32 to vector<8x256xf32>
    %1413 = arith.mulf %1410, %1412 : vector<8x256xf32>
    %1414 = arith.addf %1407, %1413 : vector<8x256xf32>
    %c14_610 = arith.constant 14 : index
    %c0_611 = arith.constant 0 : index
    %c0_612 = arith.constant 0 : index
    %1415 = vector.load %arg3[%c14_610, %c0_611, %c0_612] : memref<36x8x256xbf16, #tpu.memory_space<vmem>>, vector<1x8x256xbf16>
    %1416 = vector.shape_cast %1415 : vector<1x8x256xbf16> to vector<8x256xbf16>
    %1417 = arith.extf %1416 : vector<8x256xbf16> to vector<8x256xf32>
    %c117 = arith.constant 117 : index
    %1418 = memref.load %arg1[%c117] : memref<288xf32, #tpu.memory_space<smem>>
    %1419 = vector.broadcast %1418 : f32 to vector<8x256xf32>
    %1420 = arith.mulf %1417, %1419 : vector<8x256xf32>
    %1421 = arith.addf %1414, %1420 : vector<8x256xf32>
    %c15_613 = arith.constant 15 : index
    %c0_614 = arith.constant 0 : index
    %c0_615 = arith.constant 0 : index
    %1422 = vector.load %arg3[%c15_613, %c0_614, %c0_615] : memref<36x8x256xbf16, #tpu.memory_space<vmem>>, vector<1x8x256xbf16>
    %1423 = vector.shape_cast %1422 : vector<1x8x256xbf16> to vector<8x256xbf16>
    %1424 = arith.extf %1423 : vector<8x256xbf16> to vector<8x256xf32>
    %c125 = arith.constant 125 : index
    %1425 = memref.load %arg1[%c125] : memref<288xf32, #tpu.memory_space<smem>>
    %1426 = vector.broadcast %1425 : f32 to vector<8x256xf32>
    %1427 = arith.mulf %1424, %1426 : vector<8x256xf32>
    %1428 = arith.addf %1421, %1427 : vector<8x256xf32>
    %c16_616 = arith.constant 16 : index
    %c0_617 = arith.constant 0 : index
    %c0_618 = arith.constant 0 : index
    %1429 = vector.load %arg3[%c16_616, %c0_617, %c0_618] : memref<36x8x256xbf16, #tpu.memory_space<vmem>>, vector<1x8x256xbf16>
    %1430 = vector.shape_cast %1429 : vector<1x8x256xbf16> to vector<8x256xbf16>
    %1431 = arith.extf %1430 : vector<8x256xbf16> to vector<8x256xf32>
    %c133 = arith.constant 133 : index
    %1432 = memref.load %arg1[%c133] : memref<288xf32, #tpu.memory_space<smem>>
    %1433 = vector.broadcast %1432 : f32 to vector<8x256xf32>
    %1434 = arith.mulf %1431, %1433 : vector<8x256xf32>
    %1435 = arith.addf %1428, %1434 : vector<8x256xf32>
    %c17_619 = arith.constant 17 : index
    %c0_620 = arith.constant 0 : index
    %c0_621 = arith.constant 0 : index
    %1436 = vector.load %arg3[%c17_619, %c0_620, %c0_621] : memref<36x8x256xbf16, #tpu.memory_space<vmem>>, vector<1x8x256xbf16>
    %1437 = vector.shape_cast %1436 : vector<1x8x256xbf16> to vector<8x256xbf16>
    %1438 = arith.extf %1437 : vector<8x256xbf16> to vector<8x256xf32>
    %c141 = arith.constant 141 : index
    %1439 = memref.load %arg1[%c141] : memref<288xf32, #tpu.memory_space<smem>>
    %1440 = vector.broadcast %1439 : f32 to vector<8x256xf32>
    %1441 = arith.mulf %1438, %1440 : vector<8x256xf32>
    %1442 = arith.addf %1435, %1441 : vector<8x256xf32>
    %c18_622 = arith.constant 18 : index
    %c0_623 = arith.constant 0 : index
    %c0_624 = arith.constant 0 : index
    %1443 = vector.load %arg3[%c18_622, %c0_623, %c0_624] : memref<36x8x256xbf16, #tpu.memory_space<vmem>>, vector<1x8x256xbf16>
    %1444 = vector.shape_cast %1443 : vector<1x8x256xbf16> to vector<8x256xbf16>
    %1445 = arith.extf %1444 : vector<8x256xbf16> to vector<8x256xf32>
    %c149 = arith.constant 149 : index
    %1446 = memref.load %arg1[%c149] : memref<288xf32, #tpu.memory_space<smem>>
    %1447 = vector.broadcast %1446 : f32 to vector<8x256xf32>
    %1448 = arith.mulf %1445, %1447 : vector<8x256xf32>
    %1449 = arith.addf %1442, %1448 : vector<8x256xf32>
    %c19_625 = arith.constant 19 : index
    %c0_626 = arith.constant 0 : index
    %c0_627 = arith.constant 0 : index
    %1450 = vector.load %arg3[%c19_625, %c0_626, %c0_627] : memref<36x8x256xbf16, #tpu.memory_space<vmem>>, vector<1x8x256xbf16>
    %1451 = vector.shape_cast %1450 : vector<1x8x256xbf16> to vector<8x256xbf16>
    %1452 = arith.extf %1451 : vector<8x256xbf16> to vector<8x256xf32>
    %c157 = arith.constant 157 : index
    %1453 = memref.load %arg1[%c157] : memref<288xf32, #tpu.memory_space<smem>>
    %1454 = vector.broadcast %1453 : f32 to vector<8x256xf32>
    %1455 = arith.mulf %1452, %1454 : vector<8x256xf32>
    %1456 = arith.addf %1449, %1455 : vector<8x256xf32>
    %c20_628 = arith.constant 20 : index
    %c0_629 = arith.constant 0 : index
    %c0_630 = arith.constant 0 : index
    %1457 = vector.load %arg3[%c20_628, %c0_629, %c0_630] : memref<36x8x256xbf16, #tpu.memory_space<vmem>>, vector<1x8x256xbf16>
    %1458 = vector.shape_cast %1457 : vector<1x8x256xbf16> to vector<8x256xbf16>
    %1459 = arith.extf %1458 : vector<8x256xbf16> to vector<8x256xf32>
    %c165 = arith.constant 165 : index
    %1460 = memref.load %arg1[%c165] : memref<288xf32, #tpu.memory_space<smem>>
    %1461 = vector.broadcast %1460 : f32 to vector<8x256xf32>
    %1462 = arith.mulf %1459, %1461 : vector<8x256xf32>
    %1463 = arith.addf %1456, %1462 : vector<8x256xf32>
    %c21_631 = arith.constant 21 : index
    %c0_632 = arith.constant 0 : index
    %c0_633 = arith.constant 0 : index
    %1464 = vector.load %arg3[%c21_631, %c0_632, %c0_633] : memref<36x8x256xbf16, #tpu.memory_space<vmem>>, vector<1x8x256xbf16>
    %1465 = vector.shape_cast %1464 : vector<1x8x256xbf16> to vector<8x256xbf16>
    %1466 = arith.extf %1465 : vector<8x256xbf16> to vector<8x256xf32>
    %c173 = arith.constant 173 : index
    %1467 = memref.load %arg1[%c173] : memref<288xf32, #tpu.memory_space<smem>>
    %1468 = vector.broadcast %1467 : f32 to vector<8x256xf32>
    %1469 = arith.mulf %1466, %1468 : vector<8x256xf32>
    %1470 = arith.addf %1463, %1469 : vector<8x256xf32>
    %c22_634 = arith.constant 22 : index
    %c0_635 = arith.constant 0 : index
    %c0_636 = arith.constant 0 : index
    %1471 = vector.load %arg3[%c22_634, %c0_635, %c0_636] : memref<36x8x256xbf16, #tpu.memory_space<vmem>>, vector<1x8x256xbf16>
    %1472 = vector.shape_cast %1471 : vector<1x8x256xbf16> to vector<8x256xbf16>
    %1473 = arith.extf %1472 : vector<8x256xbf16> to vector<8x256xf32>
    %c181 = arith.constant 181 : index
    %1474 = memref.load %arg1[%c181] : memref<288xf32, #tpu.memory_space<smem>>
    %1475 = vector.broadcast %1474 : f32 to vector<8x256xf32>
    %1476 = arith.mulf %1473, %1475 : vector<8x256xf32>
    %1477 = arith.addf %1470, %1476 : vector<8x256xf32>
    %c23_637 = arith.constant 23 : index
    %c0_638 = arith.constant 0 : index
    %c0_639 = arith.constant 0 : index
    %1478 = vector.load %arg3[%c23_637, %c0_638, %c0_639] : memref<36x8x256xbf16, #tpu.memory_space<vmem>>, vector<1x8x256xbf16>
    %1479 = vector.shape_cast %1478 : vector<1x8x256xbf16> to vector<8x256xbf16>
    %1480 = arith.extf %1479 : vector<8x256xbf16> to vector<8x256xf32>
    %c189 = arith.constant 189 : index
    %1481 = memref.load %arg1[%c189] : memref<288xf32, #tpu.memory_space<smem>>
    %1482 = vector.broadcast %1481 : f32 to vector<8x256xf32>
    %1483 = arith.mulf %1480, %1482 : vector<8x256xf32>
    %1484 = arith.addf %1477, %1483 : vector<8x256xf32>
    %c24_640 = arith.constant 24 : index
    %c0_641 = arith.constant 0 : index
    %c0_642 = arith.constant 0 : index
    %1485 = vector.load %arg3[%c24_640, %c0_641, %c0_642] : memref<36x8x256xbf16, #tpu.memory_space<vmem>>, vector<1x8x256xbf16>
    %1486 = vector.shape_cast %1485 : vector<1x8x256xbf16> to vector<8x256xbf16>
    %1487 = arith.extf %1486 : vector<8x256xbf16> to vector<8x256xf32>
    %c197 = arith.constant 197 : index
    %1488 = memref.load %arg1[%c197] : memref<288xf32, #tpu.memory_space<smem>>
    %1489 = vector.broadcast %1488 : f32 to vector<8x256xf32>
    %1490 = arith.mulf %1487, %1489 : vector<8x256xf32>
    %1491 = arith.addf %1484, %1490 : vector<8x256xf32>
    %c25_643 = arith.constant 25 : index
    %c0_644 = arith.constant 0 : index
    %c0_645 = arith.constant 0 : index
    %1492 = vector.load %arg3[%c25_643, %c0_644, %c0_645] : memref<36x8x256xbf16, #tpu.memory_space<vmem>>, vector<1x8x256xbf16>
    %1493 = vector.shape_cast %1492 : vector<1x8x256xbf16> to vector<8x256xbf16>
    %1494 = arith.extf %1493 : vector<8x256xbf16> to vector<8x256xf32>
    %c205 = arith.constant 205 : index
    %1495 = memref.load %arg1[%c205] : memref<288xf32, #tpu.memory_space<smem>>
    %1496 = vector.broadcast %1495 : f32 to vector<8x256xf32>
    %1497 = arith.mulf %1494, %1496 : vector<8x256xf32>
    %1498 = arith.addf %1491, %1497 : vector<8x256xf32>
    %c26_646 = arith.constant 26 : index
    %c0_647 = arith.constant 0 : index
    %c0_648 = arith.constant 0 : index
    %1499 = vector.load %arg3[%c26_646, %c0_647, %c0_648] : memref<36x8x256xbf16, #tpu.memory_space<vmem>>, vector<1x8x256xbf16>
    %1500 = vector.shape_cast %1499 : vector<1x8x256xbf16> to vector<8x256xbf16>
    %1501 = arith.extf %1500 : vector<8x256xbf16> to vector<8x256xf32>
    %c213 = arith.constant 213 : index
    %1502 = memref.load %arg1[%c213] : memref<288xf32, #tpu.memory_space<smem>>
    %1503 = vector.broadcast %1502 : f32 to vector<8x256xf32>
    %1504 = arith.mulf %1501, %1503 : vector<8x256xf32>
    %1505 = arith.addf %1498, %1504 : vector<8x256xf32>
    %c27_649 = arith.constant 27 : index
    %c0_650 = arith.constant 0 : index
    %c0_651 = arith.constant 0 : index
    %1506 = vector.load %arg3[%c27_649, %c0_650, %c0_651] : memref<36x8x256xbf16, #tpu.memory_space<vmem>>, vector<1x8x256xbf16>
    %1507 = vector.shape_cast %1506 : vector<1x8x256xbf16> to vector<8x256xbf16>
    %1508 = arith.extf %1507 : vector<8x256xbf16> to vector<8x256xf32>
    %c221 = arith.constant 221 : index
    %1509 = memref.load %arg1[%c221] : memref<288xf32, #tpu.memory_space<smem>>
    %1510 = vector.broadcast %1509 : f32 to vector<8x256xf32>
    %1511 = arith.mulf %1508, %1510 : vector<8x256xf32>
    %1512 = arith.addf %1505, %1511 : vector<8x256xf32>
    %c28_652 = arith.constant 28 : index
    %c0_653 = arith.constant 0 : index
    %c0_654 = arith.constant 0 : index
    %1513 = vector.load %arg3[%c28_652, %c0_653, %c0_654] : memref<36x8x256xbf16, #tpu.memory_space<vmem>>, vector<1x8x256xbf16>
    %1514 = vector.shape_cast %1513 : vector<1x8x256xbf16> to vector<8x256xbf16>
    %1515 = arith.extf %1514 : vector<8x256xbf16> to vector<8x256xf32>
    %c229 = arith.constant 229 : index
    %1516 = memref.load %arg1[%c229] : memref<288xf32, #tpu.memory_space<smem>>
    %1517 = vector.broadcast %1516 : f32 to vector<8x256xf32>
    %1518 = arith.mulf %1515, %1517 : vector<8x256xf32>
    %1519 = arith.addf %1512, %1518 : vector<8x256xf32>
    %c29_655 = arith.constant 29 : index
    %c0_656 = arith.constant 0 : index
    %c0_657 = arith.constant 0 : index
    %1520 = vector.load %arg3[%c29_655, %c0_656, %c0_657] : memref<36x8x256xbf16, #tpu.memory_space<vmem>>, vector<1x8x256xbf16>
    %1521 = vector.shape_cast %1520 : vector<1x8x256xbf16> to vector<8x256xbf16>
    %1522 = arith.extf %1521 : vector<8x256xbf16> to vector<8x256xf32>
    %c237 = arith.constant 237 : index
    %1523 = memref.load %arg1[%c237] : memref<288xf32, #tpu.memory_space<smem>>
    %1524 = vector.broadcast %1523 : f32 to vector<8x256xf32>
    %1525 = arith.mulf %1522, %1524 : vector<8x256xf32>
    %1526 = arith.addf %1519, %1525 : vector<8x256xf32>
    %c30_658 = arith.constant 30 : index
    %c0_659 = arith.constant 0 : index
    %c0_660 = arith.constant 0 : index
    %1527 = vector.load %arg3[%c30_658, %c0_659, %c0_660] : memref<36x8x256xbf16, #tpu.memory_space<vmem>>, vector<1x8x256xbf16>
    %1528 = vector.shape_cast %1527 : vector<1x8x256xbf16> to vector<8x256xbf16>
    %1529 = arith.extf %1528 : vector<8x256xbf16> to vector<8x256xf32>
    %c245 = arith.constant 245 : index
    %1530 = memref.load %arg1[%c245] : memref<288xf32, #tpu.memory_space<smem>>
    %1531 = vector.broadcast %1530 : f32 to vector<8x256xf32>
    %1532 = arith.mulf %1529, %1531 : vector<8x256xf32>
    %1533 = arith.addf %1526, %1532 : vector<8x256xf32>
    %c31_661 = arith.constant 31 : index
    %c0_662 = arith.constant 0 : index
    %c0_663 = arith.constant 0 : index
    %1534 = vector.load %arg3[%c31_661, %c0_662, %c0_663] : memref<36x8x256xbf16, #tpu.memory_space<vmem>>, vector<1x8x256xbf16>
    %1535 = vector.shape_cast %1534 : vector<1x8x256xbf16> to vector<8x256xbf16>
    %1536 = arith.extf %1535 : vector<8x256xbf16> to vector<8x256xf32>
    %c253 = arith.constant 253 : index
    %1537 = memref.load %arg1[%c253] : memref<288xf32, #tpu.memory_space<smem>>
    %1538 = vector.broadcast %1537 : f32 to vector<8x256xf32>
    %1539 = arith.mulf %1536, %1538 : vector<8x256xf32>
    %1540 = arith.addf %1533, %1539 : vector<8x256xf32>
    %c32_664 = arith.constant 32 : index
    %c0_665 = arith.constant 0 : index
    %c0_666 = arith.constant 0 : index
    %1541 = vector.load %arg3[%c32_664, %c0_665, %c0_666] : memref<36x8x256xbf16, #tpu.memory_space<vmem>>, vector<1x8x256xbf16>
    %1542 = vector.shape_cast %1541 : vector<1x8x256xbf16> to vector<8x256xbf16>
    %1543 = arith.extf %1542 : vector<8x256xbf16> to vector<8x256xf32>
    %c261 = arith.constant 261 : index
    %1544 = memref.load %arg1[%c261] : memref<288xf32, #tpu.memory_space<smem>>
    %1545 = vector.broadcast %1544 : f32 to vector<8x256xf32>
    %1546 = arith.mulf %1543, %1545 : vector<8x256xf32>
    %1547 = arith.addf %1540, %1546 : vector<8x256xf32>
    %c33_667 = arith.constant 33 : index
    %c0_668 = arith.constant 0 : index
    %c0_669 = arith.constant 0 : index
    %1548 = vector.load %arg3[%c33_667, %c0_668, %c0_669] : memref<36x8x256xbf16, #tpu.memory_space<vmem>>, vector<1x8x256xbf16>
    %1549 = vector.shape_cast %1548 : vector<1x8x256xbf16> to vector<8x256xbf16>
    %1550 = arith.extf %1549 : vector<8x256xbf16> to vector<8x256xf32>
    %c269 = arith.constant 269 : index
    %1551 = memref.load %arg1[%c269] : memref<288xf32, #tpu.memory_space<smem>>
    %1552 = vector.broadcast %1551 : f32 to vector<8x256xf32>
    %1553 = arith.mulf %1550, %1552 : vector<8x256xf32>
    %1554 = arith.addf %1547, %1553 : vector<8x256xf32>
    %c34_670 = arith.constant 34 : index
    %c0_671 = arith.constant 0 : index
    %c0_672 = arith.constant 0 : index
    %1555 = vector.load %arg3[%c34_670, %c0_671, %c0_672] : memref<36x8x256xbf16, #tpu.memory_space<vmem>>, vector<1x8x256xbf16>
    %1556 = vector.shape_cast %1555 : vector<1x8x256xbf16> to vector<8x256xbf16>
    %1557 = arith.extf %1556 : vector<8x256xbf16> to vector<8x256xf32>
    %c277 = arith.constant 277 : index
    %1558 = memref.load %arg1[%c277] : memref<288xf32, #tpu.memory_space<smem>>
    %1559 = vector.broadcast %1558 : f32 to vector<8x256xf32>
    %1560 = arith.mulf %1557, %1559 : vector<8x256xf32>
    %1561 = arith.addf %1554, %1560 : vector<8x256xf32>
    %c35_673 = arith.constant 35 : index
    %c0_674 = arith.constant 0 : index
    %c0_675 = arith.constant 0 : index
    %1562 = vector.load %arg3[%c35_673, %c0_674, %c0_675] : memref<36x8x256xbf16, #tpu.memory_space<vmem>>, vector<1x8x256xbf16>
    %1563 = vector.shape_cast %1562 : vector<1x8x256xbf16> to vector<8x256xbf16>
    %1564 = arith.extf %1563 : vector<8x256xbf16> to vector<8x256xf32>
    %c285 = arith.constant 285 : index
    %1565 = memref.load %arg1[%c285] : memref<288xf32, #tpu.memory_space<smem>>
    %1566 = vector.broadcast %1565 : f32 to vector<8x256xf32>
    %1567 = arith.mulf %1564, %1566 : vector<8x256xf32>
    %1568 = arith.addf %1561, %1567 : vector<8x256xf32>
    %c5_676 = arith.constant 5 : index
    %1569 = memref.load %arg2[%c5_676] : memref<8xf32, #tpu.memory_space<smem>>
    %1570 = vector.broadcast %1569 : f32 to vector<8x256xf32>
    %1571 = arith.addf %1568, %1570 : vector<8x256xf32>
    %cst_677 = arith.constant 0.000000e+00 : f32
    %1572 = vector.broadcast %cst_677 : f32 to vector<8x256xf32>
    %1573 = arith.maximumf %1571, %1572 : vector<8x256xf32>
    %1574 = arith.truncf %1573 : vector<8x256xf32> to vector<8x256xbf16>
    %c5_678 = arith.constant 5 : index
    %c0_679 = arith.constant 0 : index
    %c0_680 = arith.constant 0 : index
    %1575 = vector.load %arg4[%c5_678, %c0_679, %c0_680] : memref<8x256x128xbf16, #tpu.memory_space<vmem>>, vector<1x256x128xbf16>
    %1576 = vector.shape_cast %1575 : vector<1x256x128xbf16> to vector<256x128xbf16>
    %cst_681 = arith.constant dense<0.000000e+00> : vector<8x128xf32>
    %1577 = tpu.matmul %1574, %1576, %cst_681 {dimension_numbers = #tpu.dot_dimension_numbers<[1], [0], [0], [1], [0, 0, 1, 1], [], []>} : vector<8x256xbf16>, vector<256x128xbf16>, vector<8x128xf32> -> vector<8x128xf32>
    %1578 = arith.addf %1315, %1577 : vector<8x128xf32>
    %cst_682 = arith.constant 0.000000e+00 : f32
    %1579 = vector.broadcast %cst_682 : f32 to vector<8x256xf32>
    %c0_683 = arith.constant 0 : index
    %c0_684 = arith.constant 0 : index
    %c0_685 = arith.constant 0 : index
    %1580 = vector.load %arg3[%c0_683, %c0_684, %c0_685] : memref<36x8x256xbf16, #tpu.memory_space<vmem>>, vector<1x8x256xbf16>
    %1581 = vector.shape_cast %1580 : vector<1x8x256xbf16> to vector<8x256xbf16>
    %1582 = arith.extf %1581 : vector<8x256xbf16> to vector<8x256xf32>
    %c6_686 = arith.constant 6 : index
    %1583 = memref.load %arg1[%c6_686] : memref<288xf32, #tpu.memory_space<smem>>
    %1584 = vector.broadcast %1583 : f32 to vector<8x256xf32>
    %1585 = arith.mulf %1582, %1584 : vector<8x256xf32>
    %1586 = arith.addf %1579, %1585 : vector<8x256xf32>
    %c1_687 = arith.constant 1 : index
    %c0_688 = arith.constant 0 : index
    %c0_689 = arith.constant 0 : index
    %1587 = vector.load %arg3[%c1_687, %c0_688, %c0_689] : memref<36x8x256xbf16, #tpu.memory_space<vmem>>, vector<1x8x256xbf16>
    %1588 = vector.shape_cast %1587 : vector<1x8x256xbf16> to vector<8x256xbf16>
    %1589 = arith.extf %1588 : vector<8x256xbf16> to vector<8x256xf32>
    %c14_690 = arith.constant 14 : index
    %1590 = memref.load %arg1[%c14_690] : memref<288xf32, #tpu.memory_space<smem>>
    %1591 = vector.broadcast %1590 : f32 to vector<8x256xf32>
    %1592 = arith.mulf %1589, %1591 : vector<8x256xf32>
    %1593 = arith.addf %1586, %1592 : vector<8x256xf32>
    %c2_691 = arith.constant 2 : index
    %c0_692 = arith.constant 0 : index
    %c0_693 = arith.constant 0 : index
    %1594 = vector.load %arg3[%c2_691, %c0_692, %c0_693] : memref<36x8x256xbf16, #tpu.memory_space<vmem>>, vector<1x8x256xbf16>
    %1595 = vector.shape_cast %1594 : vector<1x8x256xbf16> to vector<8x256xbf16>
    %1596 = arith.extf %1595 : vector<8x256xbf16> to vector<8x256xf32>
    %c22_694 = arith.constant 22 : index
    %1597 = memref.load %arg1[%c22_694] : memref<288xf32, #tpu.memory_space<smem>>
    %1598 = vector.broadcast %1597 : f32 to vector<8x256xf32>
    %1599 = arith.mulf %1596, %1598 : vector<8x256xf32>
    %1600 = arith.addf %1593, %1599 : vector<8x256xf32>
    %c3_695 = arith.constant 3 : index
    %c0_696 = arith.constant 0 : index
    %c0_697 = arith.constant 0 : index
    %1601 = vector.load %arg3[%c3_695, %c0_696, %c0_697] : memref<36x8x256xbf16, #tpu.memory_space<vmem>>, vector<1x8x256xbf16>
    %1602 = vector.shape_cast %1601 : vector<1x8x256xbf16> to vector<8x256xbf16>
    %1603 = arith.extf %1602 : vector<8x256xbf16> to vector<8x256xf32>
    %c30_698 = arith.constant 30 : index
    %1604 = memref.load %arg1[%c30_698] : memref<288xf32, #tpu.memory_space<smem>>
    %1605 = vector.broadcast %1604 : f32 to vector<8x256xf32>
    %1606 = arith.mulf %1603, %1605 : vector<8x256xf32>
    %1607 = arith.addf %1600, %1606 : vector<8x256xf32>
    %c4_699 = arith.constant 4 : index
    %c0_700 = arith.constant 0 : index
    %c0_701 = arith.constant 0 : index
    %1608 = vector.load %arg3[%c4_699, %c0_700, %c0_701] : memref<36x8x256xbf16, #tpu.memory_space<vmem>>, vector<1x8x256xbf16>
    %1609 = vector.shape_cast %1608 : vector<1x8x256xbf16> to vector<8x256xbf16>
    %1610 = arith.extf %1609 : vector<8x256xbf16> to vector<8x256xf32>
    %c38 = arith.constant 38 : index
    %1611 = memref.load %arg1[%c38] : memref<288xf32, #tpu.memory_space<smem>>
    %1612 = vector.broadcast %1611 : f32 to vector<8x256xf32>
    %1613 = arith.mulf %1610, %1612 : vector<8x256xf32>
    %1614 = arith.addf %1607, %1613 : vector<8x256xf32>
    %c5_702 = arith.constant 5 : index
    %c0_703 = arith.constant 0 : index
    %c0_704 = arith.constant 0 : index
    %1615 = vector.load %arg3[%c5_702, %c0_703, %c0_704] : memref<36x8x256xbf16, #tpu.memory_space<vmem>>, vector<1x8x256xbf16>
    %1616 = vector.shape_cast %1615 : vector<1x8x256xbf16> to vector<8x256xbf16>
    %1617 = arith.extf %1616 : vector<8x256xbf16> to vector<8x256xf32>
    %c46 = arith.constant 46 : index
    %1618 = memref.load %arg1[%c46] : memref<288xf32, #tpu.memory_space<smem>>
    %1619 = vector.broadcast %1618 : f32 to vector<8x256xf32>
    %1620 = arith.mulf %1617, %1619 : vector<8x256xf32>
    %1621 = arith.addf %1614, %1620 : vector<8x256xf32>
    %c6_705 = arith.constant 6 : index
    %c0_706 = arith.constant 0 : index
    %c0_707 = arith.constant 0 : index
    %1622 = vector.load %arg3[%c6_705, %c0_706, %c0_707] : memref<36x8x256xbf16, #tpu.memory_space<vmem>>, vector<1x8x256xbf16>
    %1623 = vector.shape_cast %1622 : vector<1x8x256xbf16> to vector<8x256xbf16>
    %1624 = arith.extf %1623 : vector<8x256xbf16> to vector<8x256xf32>
    %c54 = arith.constant 54 : index
    %1625 = memref.load %arg1[%c54] : memref<288xf32, #tpu.memory_space<smem>>
    %1626 = vector.broadcast %1625 : f32 to vector<8x256xf32>
    %1627 = arith.mulf %1624, %1626 : vector<8x256xf32>
    %1628 = arith.addf %1621, %1627 : vector<8x256xf32>
    %c7_708 = arith.constant 7 : index
    %c0_709 = arith.constant 0 : index
    %c0_710 = arith.constant 0 : index
    %1629 = vector.load %arg3[%c7_708, %c0_709, %c0_710] : memref<36x8x256xbf16, #tpu.memory_space<vmem>>, vector<1x8x256xbf16>
    %1630 = vector.shape_cast %1629 : vector<1x8x256xbf16> to vector<8x256xbf16>
    %1631 = arith.extf %1630 : vector<8x256xbf16> to vector<8x256xf32>
    %c62 = arith.constant 62 : index
    %1632 = memref.load %arg1[%c62] : memref<288xf32, #tpu.memory_space<smem>>
    %1633 = vector.broadcast %1632 : f32 to vector<8x256xf32>
    %1634 = arith.mulf %1631, %1633 : vector<8x256xf32>
    %1635 = arith.addf %1628, %1634 : vector<8x256xf32>
    %c8_711 = arith.constant 8 : index
    %c0_712 = arith.constant 0 : index
    %c0_713 = arith.constant 0 : index
    %1636 = vector.load %arg3[%c8_711, %c0_712, %c0_713] : memref<36x8x256xbf16, #tpu.memory_space<vmem>>, vector<1x8x256xbf16>
    %1637 = vector.shape_cast %1636 : vector<1x8x256xbf16> to vector<8x256xbf16>
    %1638 = arith.extf %1637 : vector<8x256xbf16> to vector<8x256xf32>
    %c70 = arith.constant 70 : index
    %1639 = memref.load %arg1[%c70] : memref<288xf32, #tpu.memory_space<smem>>
    %1640 = vector.broadcast %1639 : f32 to vector<8x256xf32>
    %1641 = arith.mulf %1638, %1640 : vector<8x256xf32>
    %1642 = arith.addf %1635, %1641 : vector<8x256xf32>
    %c9_714 = arith.constant 9 : index
    %c0_715 = arith.constant 0 : index
    %c0_716 = arith.constant 0 : index
    %1643 = vector.load %arg3[%c9_714, %c0_715, %c0_716] : memref<36x8x256xbf16, #tpu.memory_space<vmem>>, vector<1x8x256xbf16>
    %1644 = vector.shape_cast %1643 : vector<1x8x256xbf16> to vector<8x256xbf16>
    %1645 = arith.extf %1644 : vector<8x256xbf16> to vector<8x256xf32>
    %c78 = arith.constant 78 : index
    %1646 = memref.load %arg1[%c78] : memref<288xf32, #tpu.memory_space<smem>>
    %1647 = vector.broadcast %1646 : f32 to vector<8x256xf32>
    %1648 = arith.mulf %1645, %1647 : vector<8x256xf32>
    %1649 = arith.addf %1642, %1648 : vector<8x256xf32>
    %c10_717 = arith.constant 10 : index
    %c0_718 = arith.constant 0 : index
    %c0_719 = arith.constant 0 : index
    %1650 = vector.load %arg3[%c10_717, %c0_718, %c0_719] : memref<36x8x256xbf16, #tpu.memory_space<vmem>>, vector<1x8x256xbf16>
    %1651 = vector.shape_cast %1650 : vector<1x8x256xbf16> to vector<8x256xbf16>
    %1652 = arith.extf %1651 : vector<8x256xbf16> to vector<8x256xf32>
    %c86 = arith.constant 86 : index
    %1653 = memref.load %arg1[%c86] : memref<288xf32, #tpu.memory_space<smem>>
    %1654 = vector.broadcast %1653 : f32 to vector<8x256xf32>
    %1655 = arith.mulf %1652, %1654 : vector<8x256xf32>
    %1656 = arith.addf %1649, %1655 : vector<8x256xf32>
    %c11_720 = arith.constant 11 : index
    %c0_721 = arith.constant 0 : index
    %c0_722 = arith.constant 0 : index
    %1657 = vector.load %arg3[%c11_720, %c0_721, %c0_722] : memref<36x8x256xbf16, #tpu.memory_space<vmem>>, vector<1x8x256xbf16>
    %1658 = vector.shape_cast %1657 : vector<1x8x256xbf16> to vector<8x256xbf16>
    %1659 = arith.extf %1658 : vector<8x256xbf16> to vector<8x256xf32>
    %c94 = arith.constant 94 : index
    %1660 = memref.load %arg1[%c94] : memref<288xf32, #tpu.memory_space<smem>>
    %1661 = vector.broadcast %1660 : f32 to vector<8x256xf32>
    %1662 = arith.mulf %1659, %1661 : vector<8x256xf32>
    %1663 = arith.addf %1656, %1662 : vector<8x256xf32>
    %c12_723 = arith.constant 12 : index
    %c0_724 = arith.constant 0 : index
    %c0_725 = arith.constant 0 : index
    %1664 = vector.load %arg3[%c12_723, %c0_724, %c0_725] : memref<36x8x256xbf16, #tpu.memory_space<vmem>>, vector<1x8x256xbf16>
    %1665 = vector.shape_cast %1664 : vector<1x8x256xbf16> to vector<8x256xbf16>
    %1666 = arith.extf %1665 : vector<8x256xbf16> to vector<8x256xf32>
    %c102 = arith.constant 102 : index
    %1667 = memref.load %arg1[%c102] : memref<288xf32, #tpu.memory_space<smem>>
    %1668 = vector.broadcast %1667 : f32 to vector<8x256xf32>
    %1669 = arith.mulf %1666, %1668 : vector<8x256xf32>
    %1670 = arith.addf %1663, %1669 : vector<8x256xf32>
    %c13_726 = arith.constant 13 : index
    %c0_727 = arith.constant 0 : index
    %c0_728 = arith.constant 0 : index
    %1671 = vector.load %arg3[%c13_726, %c0_727, %c0_728] : memref<36x8x256xbf16, #tpu.memory_space<vmem>>, vector<1x8x256xbf16>
    %1672 = vector.shape_cast %1671 : vector<1x8x256xbf16> to vector<8x256xbf16>
    %1673 = arith.extf %1672 : vector<8x256xbf16> to vector<8x256xf32>
    %c110 = arith.constant 110 : index
    %1674 = memref.load %arg1[%c110] : memref<288xf32, #tpu.memory_space<smem>>
    %1675 = vector.broadcast %1674 : f32 to vector<8x256xf32>
    %1676 = arith.mulf %1673, %1675 : vector<8x256xf32>
    %1677 = arith.addf %1670, %1676 : vector<8x256xf32>
    %c14_729 = arith.constant 14 : index
    %c0_730 = arith.constant 0 : index
    %c0_731 = arith.constant 0 : index
    %1678 = vector.load %arg3[%c14_729, %c0_730, %c0_731] : memref<36x8x256xbf16, #tpu.memory_space<vmem>>, vector<1x8x256xbf16>
    %1679 = vector.shape_cast %1678 : vector<1x8x256xbf16> to vector<8x256xbf16>
    %1680 = arith.extf %1679 : vector<8x256xbf16> to vector<8x256xf32>
    %c118 = arith.constant 118 : index
    %1681 = memref.load %arg1[%c118] : memref<288xf32, #tpu.memory_space<smem>>
    %1682 = vector.broadcast %1681 : f32 to vector<8x256xf32>
    %1683 = arith.mulf %1680, %1682 : vector<8x256xf32>
    %1684 = arith.addf %1677, %1683 : vector<8x256xf32>
    %c15_732 = arith.constant 15 : index
    %c0_733 = arith.constant 0 : index
    %c0_734 = arith.constant 0 : index
    %1685 = vector.load %arg3[%c15_732, %c0_733, %c0_734] : memref<36x8x256xbf16, #tpu.memory_space<vmem>>, vector<1x8x256xbf16>
    %1686 = vector.shape_cast %1685 : vector<1x8x256xbf16> to vector<8x256xbf16>
    %1687 = arith.extf %1686 : vector<8x256xbf16> to vector<8x256xf32>
    %c126 = arith.constant 126 : index
    %1688 = memref.load %arg1[%c126] : memref<288xf32, #tpu.memory_space<smem>>
    %1689 = vector.broadcast %1688 : f32 to vector<8x256xf32>
    %1690 = arith.mulf %1687, %1689 : vector<8x256xf32>
    %1691 = arith.addf %1684, %1690 : vector<8x256xf32>
    %c16_735 = arith.constant 16 : index
    %c0_736 = arith.constant 0 : index
    %c0_737 = arith.constant 0 : index
    %1692 = vector.load %arg3[%c16_735, %c0_736, %c0_737] : memref<36x8x256xbf16, #tpu.memory_space<vmem>>, vector<1x8x256xbf16>
    %1693 = vector.shape_cast %1692 : vector<1x8x256xbf16> to vector<8x256xbf16>
    %1694 = arith.extf %1693 : vector<8x256xbf16> to vector<8x256xf32>
    %c134 = arith.constant 134 : index
    %1695 = memref.load %arg1[%c134] : memref<288xf32, #tpu.memory_space<smem>>
    %1696 = vector.broadcast %1695 : f32 to vector<8x256xf32>
    %1697 = arith.mulf %1694, %1696 : vector<8x256xf32>
    %1698 = arith.addf %1691, %1697 : vector<8x256xf32>
    %c17_738 = arith.constant 17 : index
    %c0_739 = arith.constant 0 : index
    %c0_740 = arith.constant 0 : index
    %1699 = vector.load %arg3[%c17_738, %c0_739, %c0_740] : memref<36x8x256xbf16, #tpu.memory_space<vmem>>, vector<1x8x256xbf16>
    %1700 = vector.shape_cast %1699 : vector<1x8x256xbf16> to vector<8x256xbf16>
    %1701 = arith.extf %1700 : vector<8x256xbf16> to vector<8x256xf32>
    %c142 = arith.constant 142 : index
    %1702 = memref.load %arg1[%c142] : memref<288xf32, #tpu.memory_space<smem>>
    %1703 = vector.broadcast %1702 : f32 to vector<8x256xf32>
    %1704 = arith.mulf %1701, %1703 : vector<8x256xf32>
    %1705 = arith.addf %1698, %1704 : vector<8x256xf32>
    %c18_741 = arith.constant 18 : index
    %c0_742 = arith.constant 0 : index
    %c0_743 = arith.constant 0 : index
    %1706 = vector.load %arg3[%c18_741, %c0_742, %c0_743] : memref<36x8x256xbf16, #tpu.memory_space<vmem>>, vector<1x8x256xbf16>
    %1707 = vector.shape_cast %1706 : vector<1x8x256xbf16> to vector<8x256xbf16>
    %1708 = arith.extf %1707 : vector<8x256xbf16> to vector<8x256xf32>
    %c150 = arith.constant 150 : index
    %1709 = memref.load %arg1[%c150] : memref<288xf32, #tpu.memory_space<smem>>
    %1710 = vector.broadcast %1709 : f32 to vector<8x256xf32>
    %1711 = arith.mulf %1708, %1710 : vector<8x256xf32>
    %1712 = arith.addf %1705, %1711 : vector<8x256xf32>
    %c19_744 = arith.constant 19 : index
    %c0_745 = arith.constant 0 : index
    %c0_746 = arith.constant 0 : index
    %1713 = vector.load %arg3[%c19_744, %c0_745, %c0_746] : memref<36x8x256xbf16, #tpu.memory_space<vmem>>, vector<1x8x256xbf16>
    %1714 = vector.shape_cast %1713 : vector<1x8x256xbf16> to vector<8x256xbf16>
    %1715 = arith.extf %1714 : vector<8x256xbf16> to vector<8x256xf32>
    %c158 = arith.constant 158 : index
    %1716 = memref.load %arg1[%c158] : memref<288xf32, #tpu.memory_space<smem>>
    %1717 = vector.broadcast %1716 : f32 to vector<8x256xf32>
    %1718 = arith.mulf %1715, %1717 : vector<8x256xf32>
    %1719 = arith.addf %1712, %1718 : vector<8x256xf32>
    %c20_747 = arith.constant 20 : index
    %c0_748 = arith.constant 0 : index
    %c0_749 = arith.constant 0 : index
    %1720 = vector.load %arg3[%c20_747, %c0_748, %c0_749] : memref<36x8x256xbf16, #tpu.memory_space<vmem>>, vector<1x8x256xbf16>
    %1721 = vector.shape_cast %1720 : vector<1x8x256xbf16> to vector<8x256xbf16>
    %1722 = arith.extf %1721 : vector<8x256xbf16> to vector<8x256xf32>
    %c166 = arith.constant 166 : index
    %1723 = memref.load %arg1[%c166] : memref<288xf32, #tpu.memory_space<smem>>
    %1724 = vector.broadcast %1723 : f32 to vector<8x256xf32>
    %1725 = arith.mulf %1722, %1724 : vector<8x256xf32>
    %1726 = arith.addf %1719, %1725 : vector<8x256xf32>
    %c21_750 = arith.constant 21 : index
    %c0_751 = arith.constant 0 : index
    %c0_752 = arith.constant 0 : index
    %1727 = vector.load %arg3[%c21_750, %c0_751, %c0_752] : memref<36x8x256xbf16, #tpu.memory_space<vmem>>, vector<1x8x256xbf16>
    %1728 = vector.shape_cast %1727 : vector<1x8x256xbf16> to vector<8x256xbf16>
    %1729 = arith.extf %1728 : vector<8x256xbf16> to vector<8x256xf32>
    %c174 = arith.constant 174 : index
    %1730 = memref.load %arg1[%c174] : memref<288xf32, #tpu.memory_space<smem>>
    %1731 = vector.broadcast %1730 : f32 to vector<8x256xf32>
    %1732 = arith.mulf %1729, %1731 : vector<8x256xf32>
    %1733 = arith.addf %1726, %1732 : vector<8x256xf32>
    %c22_753 = arith.constant 22 : index
    %c0_754 = arith.constant 0 : index
    %c0_755 = arith.constant 0 : index
    %1734 = vector.load %arg3[%c22_753, %c0_754, %c0_755] : memref<36x8x256xbf16, #tpu.memory_space<vmem>>, vector<1x8x256xbf16>
    %1735 = vector.shape_cast %1734 : vector<1x8x256xbf16> to vector<8x256xbf16>
    %1736 = arith.extf %1735 : vector<8x256xbf16> to vector<8x256xf32>
    %c182 = arith.constant 182 : index
    %1737 = memref.load %arg1[%c182] : memref<288xf32, #tpu.memory_space<smem>>
    %1738 = vector.broadcast %1737 : f32 to vector<8x256xf32>
    %1739 = arith.mulf %1736, %1738 : vector<8x256xf32>
    %1740 = arith.addf %1733, %1739 : vector<8x256xf32>
    %c23_756 = arith.constant 23 : index
    %c0_757 = arith.constant 0 : index
    %c0_758 = arith.constant 0 : index
    %1741 = vector.load %arg3[%c23_756, %c0_757, %c0_758] : memref<36x8x256xbf16, #tpu.memory_space<vmem>>, vector<1x8x256xbf16>
    %1742 = vector.shape_cast %1741 : vector<1x8x256xbf16> to vector<8x256xbf16>
    %1743 = arith.extf %1742 : vector<8x256xbf16> to vector<8x256xf32>
    %c190 = arith.constant 190 : index
    %1744 = memref.load %arg1[%c190] : memref<288xf32, #tpu.memory_space<smem>>
    %1745 = vector.broadcast %1744 : f32 to vector<8x256xf32>
    %1746 = arith.mulf %1743, %1745 : vector<8x256xf32>
    %1747 = arith.addf %1740, %1746 : vector<8x256xf32>
    %c24_759 = arith.constant 24 : index
    %c0_760 = arith.constant 0 : index
    %c0_761 = arith.constant 0 : index
    %1748 = vector.load %arg3[%c24_759, %c0_760, %c0_761] : memref<36x8x256xbf16, #tpu.memory_space<vmem>>, vector<1x8x256xbf16>
    %1749 = vector.shape_cast %1748 : vector<1x8x256xbf16> to vector<8x256xbf16>
    %1750 = arith.extf %1749 : vector<8x256xbf16> to vector<8x256xf32>
    %c198 = arith.constant 198 : index
    %1751 = memref.load %arg1[%c198] : memref<288xf32, #tpu.memory_space<smem>>
    %1752 = vector.broadcast %1751 : f32 to vector<8x256xf32>
    %1753 = arith.mulf %1750, %1752 : vector<8x256xf32>
    %1754 = arith.addf %1747, %1753 : vector<8x256xf32>
    %c25_762 = arith.constant 25 : index
    %c0_763 = arith.constant 0 : index
    %c0_764 = arith.constant 0 : index
    %1755 = vector.load %arg3[%c25_762, %c0_763, %c0_764] : memref<36x8x256xbf16, #tpu.memory_space<vmem>>, vector<1x8x256xbf16>
    %1756 = vector.shape_cast %1755 : vector<1x8x256xbf16> to vector<8x256xbf16>
    %1757 = arith.extf %1756 : vector<8x256xbf16> to vector<8x256xf32>
    %c206 = arith.constant 206 : index
    %1758 = memref.load %arg1[%c206] : memref<288xf32, #tpu.memory_space<smem>>
    %1759 = vector.broadcast %1758 : f32 to vector<8x256xf32>
    %1760 = arith.mulf %1757, %1759 : vector<8x256xf32>
    %1761 = arith.addf %1754, %1760 : vector<8x256xf32>
    %c26_765 = arith.constant 26 : index
    %c0_766 = arith.constant 0 : index
    %c0_767 = arith.constant 0 : index
    %1762 = vector.load %arg3[%c26_765, %c0_766, %c0_767] : memref<36x8x256xbf16, #tpu.memory_space<vmem>>, vector<1x8x256xbf16>
    %1763 = vector.shape_cast %1762 : vector<1x8x256xbf16> to vector<8x256xbf16>
    %1764 = arith.extf %1763 : vector<8x256xbf16> to vector<8x256xf32>
    %c214 = arith.constant 214 : index
    %1765 = memref.load %arg1[%c214] : memref<288xf32, #tpu.memory_space<smem>>
    %1766 = vector.broadcast %1765 : f32 to vector<8x256xf32>
    %1767 = arith.mulf %1764, %1766 : vector<8x256xf32>
    %1768 = arith.addf %1761, %1767 : vector<8x256xf32>
    %c27_768 = arith.constant 27 : index
    %c0_769 = arith.constant 0 : index
    %c0_770 = arith.constant 0 : index
    %1769 = vector.load %arg3[%c27_768, %c0_769, %c0_770] : memref<36x8x256xbf16, #tpu.memory_space<vmem>>, vector<1x8x256xbf16>
    %1770 = vector.shape_cast %1769 : vector<1x8x256xbf16> to vector<8x256xbf16>
    %1771 = arith.extf %1770 : vector<8x256xbf16> to vector<8x256xf32>
    %c222 = arith.constant 222 : index
    %1772 = memref.load %arg1[%c222] : memref<288xf32, #tpu.memory_space<smem>>
    %1773 = vector.broadcast %1772 : f32 to vector<8x256xf32>
    %1774 = arith.mulf %1771, %1773 : vector<8x256xf32>
    %1775 = arith.addf %1768, %1774 : vector<8x256xf32>
    %c28_771 = arith.constant 28 : index
    %c0_772 = arith.constant 0 : index
    %c0_773 = arith.constant 0 : index
    %1776 = vector.load %arg3[%c28_771, %c0_772, %c0_773] : memref<36x8x256xbf16, #tpu.memory_space<vmem>>, vector<1x8x256xbf16>
    %1777 = vector.shape_cast %1776 : vector<1x8x256xbf16> to vector<8x256xbf16>
    %1778 = arith.extf %1777 : vector<8x256xbf16> to vector<8x256xf32>
    %c230 = arith.constant 230 : index
    %1779 = memref.load %arg1[%c230] : memref<288xf32, #tpu.memory_space<smem>>
    %1780 = vector.broadcast %1779 : f32 to vector<8x256xf32>
    %1781 = arith.mulf %1778, %1780 : vector<8x256xf32>
    %1782 = arith.addf %1775, %1781 : vector<8x256xf32>
    %c29_774 = arith.constant 29 : index
    %c0_775 = arith.constant 0 : index
    %c0_776 = arith.constant 0 : index
    %1783 = vector.load %arg3[%c29_774, %c0_775, %c0_776] : memref<36x8x256xbf16, #tpu.memory_space<vmem>>, vector<1x8x256xbf16>
    %1784 = vector.shape_cast %1783 : vector<1x8x256xbf16> to vector<8x256xbf16>
    %1785 = arith.extf %1784 : vector<8x256xbf16> to vector<8x256xf32>
    %c238 = arith.constant 238 : index
    %1786 = memref.load %arg1[%c238] : memref<288xf32, #tpu.memory_space<smem>>
    %1787 = vector.broadcast %1786 : f32 to vector<8x256xf32>
    %1788 = arith.mulf %1785, %1787 : vector<8x256xf32>
    %1789 = arith.addf %1782, %1788 : vector<8x256xf32>
    %c30_777 = arith.constant 30 : index
    %c0_778 = arith.constant 0 : index
    %c0_779 = arith.constant 0 : index
    %1790 = vector.load %arg3[%c30_777, %c0_778, %c0_779] : memref<36x8x256xbf16, #tpu.memory_space<vmem>>, vector<1x8x256xbf16>
    %1791 = vector.shape_cast %1790 : vector<1x8x256xbf16> to vector<8x256xbf16>
    %1792 = arith.extf %1791 : vector<8x256xbf16> to vector<8x256xf32>
    %c246 = arith.constant 246 : index
    %1793 = memref.load %arg1[%c246] : memref<288xf32, #tpu.memory_space<smem>>
    %1794 = vector.broadcast %1793 : f32 to vector<8x256xf32>
    %1795 = arith.mulf %1792, %1794 : vector<8x256xf32>
    %1796 = arith.addf %1789, %1795 : vector<8x256xf32>
    %c31_780 = arith.constant 31 : index
    %c0_781 = arith.constant 0 : index
    %c0_782 = arith.constant 0 : index
    %1797 = vector.load %arg3[%c31_780, %c0_781, %c0_782] : memref<36x8x256xbf16, #tpu.memory_space<vmem>>, vector<1x8x256xbf16>
    %1798 = vector.shape_cast %1797 : vector<1x8x256xbf16> to vector<8x256xbf16>
    %1799 = arith.extf %1798 : vector<8x256xbf16> to vector<8x256xf32>
    %c254 = arith.constant 254 : index
    %1800 = memref.load %arg1[%c254] : memref<288xf32, #tpu.memory_space<smem>>
    %1801 = vector.broadcast %1800 : f32 to vector<8x256xf32>
    %1802 = arith.mulf %1799, %1801 : vector<8x256xf32>
    %1803 = arith.addf %1796, %1802 : vector<8x256xf32>
    %c32_783 = arith.constant 32 : index
    %c0_784 = arith.constant 0 : index
    %c0_785 = arith.constant 0 : index
    %1804 = vector.load %arg3[%c32_783, %c0_784, %c0_785] : memref<36x8x256xbf16, #tpu.memory_space<vmem>>, vector<1x8x256xbf16>
    %1805 = vector.shape_cast %1804 : vector<1x8x256xbf16> to vector<8x256xbf16>
    %1806 = arith.extf %1805 : vector<8x256xbf16> to vector<8x256xf32>
    %c262 = arith.constant 262 : index
    %1807 = memref.load %arg1[%c262] : memref<288xf32, #tpu.memory_space<smem>>
    %1808 = vector.broadcast %1807 : f32 to vector<8x256xf32>
    %1809 = arith.mulf %1806, %1808 : vector<8x256xf32>
    %1810 = arith.addf %1803, %1809 : vector<8x256xf32>
    %c33_786 = arith.constant 33 : index
    %c0_787 = arith.constant 0 : index
    %c0_788 = arith.constant 0 : index
    %1811 = vector.load %arg3[%c33_786, %c0_787, %c0_788] : memref<36x8x256xbf16, #tpu.memory_space<vmem>>, vector<1x8x256xbf16>
    %1812 = vector.shape_cast %1811 : vector<1x8x256xbf16> to vector<8x256xbf16>
    %1813 = arith.extf %1812 : vector<8x256xbf16> to vector<8x256xf32>
    %c270 = arith.constant 270 : index
    %1814 = memref.load %arg1[%c270] : memref<288xf32, #tpu.memory_space<smem>>
    %1815 = vector.broadcast %1814 : f32 to vector<8x256xf32>
    %1816 = arith.mulf %1813, %1815 : vector<8x256xf32>
    %1817 = arith.addf %1810, %1816 : vector<8x256xf32>
    %c34_789 = arith.constant 34 : index
    %c0_790 = arith.constant 0 : index
    %c0_791 = arith.constant 0 : index
    %1818 = vector.load %arg3[%c34_789, %c0_790, %c0_791] : memref<36x8x256xbf16, #tpu.memory_space<vmem>>, vector<1x8x256xbf16>
    %1819 = vector.shape_cast %1818 : vector<1x8x256xbf16> to vector<8x256xbf16>
    %1820 = arith.extf %1819 : vector<8x256xbf16> to vector<8x256xf32>
    %c278 = arith.constant 278 : index
    %1821 = memref.load %arg1[%c278] : memref<288xf32, #tpu.memory_space<smem>>
    %1822 = vector.broadcast %1821 : f32 to vector<8x256xf32>
    %1823 = arith.mulf %1820, %1822 : vector<8x256xf32>
    %1824 = arith.addf %1817, %1823 : vector<8x256xf32>
    %c35_792 = arith.constant 35 : index
    %c0_793 = arith.constant 0 : index
    %c0_794 = arith.constant 0 : index
    %1825 = vector.load %arg3[%c35_792, %c0_793, %c0_794] : memref<36x8x256xbf16, #tpu.memory_space<vmem>>, vector<1x8x256xbf16>
    %1826 = vector.shape_cast %1825 : vector<1x8x256xbf16> to vector<8x256xbf16>
    %1827 = arith.extf %1826 : vector<8x256xbf16> to vector<8x256xf32>
    %c286 = arith.constant 286 : index
    %1828 = memref.load %arg1[%c286] : memref<288xf32, #tpu.memory_space<smem>>
    %1829 = vector.broadcast %1828 : f32 to vector<8x256xf32>
    %1830 = arith.mulf %1827, %1829 : vector<8x256xf32>
    %1831 = arith.addf %1824, %1830 : vector<8x256xf32>
    %c6_795 = arith.constant 6 : index
    %1832 = memref.load %arg2[%c6_795] : memref<8xf32, #tpu.memory_space<smem>>
    %1833 = vector.broadcast %1832 : f32 to vector<8x256xf32>
    %1834 = arith.addf %1831, %1833 : vector<8x256xf32>
    %cst_796 = arith.constant 0.000000e+00 : f32
    %1835 = vector.broadcast %cst_796 : f32 to vector<8x256xf32>
    %1836 = arith.maximumf %1834, %1835 : vector<8x256xf32>
    %1837 = arith.truncf %1836 : vector<8x256xf32> to vector<8x256xbf16>
    %c6_797 = arith.constant 6 : index
    %c0_798 = arith.constant 0 : index
    %c0_799 = arith.constant 0 : index
    %1838 = vector.load %arg4[%c6_797, %c0_798, %c0_799] : memref<8x256x128xbf16, #tpu.memory_space<vmem>>, vector<1x256x128xbf16>
    %1839 = vector.shape_cast %1838 : vector<1x256x128xbf16> to vector<256x128xbf16>
    %cst_800 = arith.constant dense<0.000000e+00> : vector<8x128xf32>
    %1840 = tpu.matmul %1837, %1839, %cst_800 {dimension_numbers = #tpu.dot_dimension_numbers<[1], [0], [0], [1], [0, 0, 1, 1], [], []>} : vector<8x256xbf16>, vector<256x128xbf16>, vector<8x128xf32> -> vector<8x128xf32>
    %1841 = arith.addf %1578, %1840 : vector<8x128xf32>
    %cst_801 = arith.constant 0.000000e+00 : f32
    %1842 = vector.broadcast %cst_801 : f32 to vector<8x256xf32>
    %c0_802 = arith.constant 0 : index
    %c0_803 = arith.constant 0 : index
    %c0_804 = arith.constant 0 : index
    %1843 = vector.load %arg3[%c0_802, %c0_803, %c0_804] : memref<36x8x256xbf16, #tpu.memory_space<vmem>>, vector<1x8x256xbf16>
    %1844 = vector.shape_cast %1843 : vector<1x8x256xbf16> to vector<8x256xbf16>
    %1845 = arith.extf %1844 : vector<8x256xbf16> to vector<8x256xf32>
    %c7_805 = arith.constant 7 : index
    %1846 = memref.load %arg1[%c7_805] : memref<288xf32, #tpu.memory_space<smem>>
    %1847 = vector.broadcast %1846 : f32 to vector<8x256xf32>
    %1848 = arith.mulf %1845, %1847 : vector<8x256xf32>
    %1849 = arith.addf %1842, %1848 : vector<8x256xf32>
    %c1_806 = arith.constant 1 : index
    %c0_807 = arith.constant 0 : index
    %c0_808 = arith.constant 0 : index
    %1850 = vector.load %arg3[%c1_806, %c0_807, %c0_808] : memref<36x8x256xbf16, #tpu.memory_space<vmem>>, vector<1x8x256xbf16>
    %1851 = vector.shape_cast %1850 : vector<1x8x256xbf16> to vector<8x256xbf16>
    %1852 = arith.extf %1851 : vector<8x256xbf16> to vector<8x256xf32>
    %c15_809 = arith.constant 15 : index
    %1853 = memref.load %arg1[%c15_809] : memref<288xf32, #tpu.memory_space<smem>>
    %1854 = vector.broadcast %1853 : f32 to vector<8x256xf32>
    %1855 = arith.mulf %1852, %1854 : vector<8x256xf32>
    %1856 = arith.addf %1849, %1855 : vector<8x256xf32>
    %c2_810 = arith.constant 2 : index
    %c0_811 = arith.constant 0 : index
    %c0_812 = arith.constant 0 : index
    %1857 = vector.load %arg3[%c2_810, %c0_811, %c0_812] : memref<36x8x256xbf16, #tpu.memory_space<vmem>>, vector<1x8x256xbf16>
    %1858 = vector.shape_cast %1857 : vector<1x8x256xbf16> to vector<8x256xbf16>
    %1859 = arith.extf %1858 : vector<8x256xbf16> to vector<8x256xf32>
    %c23_813 = arith.constant 23 : index
    %1860 = memref.load %arg1[%c23_813] : memref<288xf32, #tpu.memory_space<smem>>
    %1861 = vector.broadcast %1860 : f32 to vector<8x256xf32>
    %1862 = arith.mulf %1859, %1861 : vector<8x256xf32>
    %1863 = arith.addf %1856, %1862 : vector<8x256xf32>
    %c3_814 = arith.constant 3 : index
    %c0_815 = arith.constant 0 : index
    %c0_816 = arith.constant 0 : index
    %1864 = vector.load %arg3[%c3_814, %c0_815, %c0_816] : memref<36x8x256xbf16, #tpu.memory_space<vmem>>, vector<1x8x256xbf16>
    %1865 = vector.shape_cast %1864 : vector<1x8x256xbf16> to vector<8x256xbf16>
    %1866 = arith.extf %1865 : vector<8x256xbf16> to vector<8x256xf32>
    %c31_817 = arith.constant 31 : index
    %1867 = memref.load %arg1[%c31_817] : memref<288xf32, #tpu.memory_space<smem>>
    %1868 = vector.broadcast %1867 : f32 to vector<8x256xf32>
    %1869 = arith.mulf %1866, %1868 : vector<8x256xf32>
    %1870 = arith.addf %1863, %1869 : vector<8x256xf32>
    %c4_818 = arith.constant 4 : index
    %c0_819 = arith.constant 0 : index
    %c0_820 = arith.constant 0 : index
    %1871 = vector.load %arg3[%c4_818, %c0_819, %c0_820] : memref<36x8x256xbf16, #tpu.memory_space<vmem>>, vector<1x8x256xbf16>
    %1872 = vector.shape_cast %1871 : vector<1x8x256xbf16> to vector<8x256xbf16>
    %1873 = arith.extf %1872 : vector<8x256xbf16> to vector<8x256xf32>
    %c39 = arith.constant 39 : index
    %1874 = memref.load %arg1[%c39] : memref<288xf32, #tpu.memory_space<smem>>
    %1875 = vector.broadcast %1874 : f32 to vector<8x256xf32>
    %1876 = arith.mulf %1873, %1875 : vector<8x256xf32>
    %1877 = arith.addf %1870, %1876 : vector<8x256xf32>
    %c5_821 = arith.constant 5 : index
    %c0_822 = arith.constant 0 : index
    %c0_823 = arith.constant 0 : index
    %1878 = vector.load %arg3[%c5_821, %c0_822, %c0_823] : memref<36x8x256xbf16, #tpu.memory_space<vmem>>, vector<1x8x256xbf16>
    %1879 = vector.shape_cast %1878 : vector<1x8x256xbf16> to vector<8x256xbf16>
    %1880 = arith.extf %1879 : vector<8x256xbf16> to vector<8x256xf32>
    %c47 = arith.constant 47 : index
    %1881 = memref.load %arg1[%c47] : memref<288xf32, #tpu.memory_space<smem>>
    %1882 = vector.broadcast %1881 : f32 to vector<8x256xf32>
    %1883 = arith.mulf %1880, %1882 : vector<8x256xf32>
    %1884 = arith.addf %1877, %1883 : vector<8x256xf32>
    %c6_824 = arith.constant 6 : index
    %c0_825 = arith.constant 0 : index
    %c0_826 = arith.constant 0 : index
    %1885 = vector.load %arg3[%c6_824, %c0_825, %c0_826] : memref<36x8x256xbf16, #tpu.memory_space<vmem>>, vector<1x8x256xbf16>
    %1886 = vector.shape_cast %1885 : vector<1x8x256xbf16> to vector<8x256xbf16>
    %1887 = arith.extf %1886 : vector<8x256xbf16> to vector<8x256xf32>
    %c55 = arith.constant 55 : index
    %1888 = memref.load %arg1[%c55] : memref<288xf32, #tpu.memory_space<smem>>
    %1889 = vector.broadcast %1888 : f32 to vector<8x256xf32>
    %1890 = arith.mulf %1887, %1889 : vector<8x256xf32>
    %1891 = arith.addf %1884, %1890 : vector<8x256xf32>
    %c7_827 = arith.constant 7 : index
    %c0_828 = arith.constant 0 : index
    %c0_829 = arith.constant 0 : index
    %1892 = vector.load %arg3[%c7_827, %c0_828, %c0_829] : memref<36x8x256xbf16, #tpu.memory_space<vmem>>, vector<1x8x256xbf16>
    %1893 = vector.shape_cast %1892 : vector<1x8x256xbf16> to vector<8x256xbf16>
    %1894 = arith.extf %1893 : vector<8x256xbf16> to vector<8x256xf32>
    %c63 = arith.constant 63 : index
    %1895 = memref.load %arg1[%c63] : memref<288xf32, #tpu.memory_space<smem>>
    %1896 = vector.broadcast %1895 : f32 to vector<8x256xf32>
    %1897 = arith.mulf %1894, %1896 : vector<8x256xf32>
    %1898 = arith.addf %1891, %1897 : vector<8x256xf32>
    %c8_830 = arith.constant 8 : index
    %c0_831 = arith.constant 0 : index
    %c0_832 = arith.constant 0 : index
    %1899 = vector.load %arg3[%c8_830, %c0_831, %c0_832] : memref<36x8x256xbf16, #tpu.memory_space<vmem>>, vector<1x8x256xbf16>
    %1900 = vector.shape_cast %1899 : vector<1x8x256xbf16> to vector<8x256xbf16>
    %1901 = arith.extf %1900 : vector<8x256xbf16> to vector<8x256xf32>
    %c71 = arith.constant 71 : index
    %1902 = memref.load %arg1[%c71] : memref<288xf32, #tpu.memory_space<smem>>
    %1903 = vector.broadcast %1902 : f32 to vector<8x256xf32>
    %1904 = arith.mulf %1901, %1903 : vector<8x256xf32>
    %1905 = arith.addf %1898, %1904 : vector<8x256xf32>
    %c9_833 = arith.constant 9 : index
    %c0_834 = arith.constant 0 : index
    %c0_835 = arith.constant 0 : index
    %1906 = vector.load %arg3[%c9_833, %c0_834, %c0_835] : memref<36x8x256xbf16, #tpu.memory_space<vmem>>, vector<1x8x256xbf16>
    %1907 = vector.shape_cast %1906 : vector<1x8x256xbf16> to vector<8x256xbf16>
    %1908 = arith.extf %1907 : vector<8x256xbf16> to vector<8x256xf32>
    %c79 = arith.constant 79 : index
    %1909 = memref.load %arg1[%c79] : memref<288xf32, #tpu.memory_space<smem>>
    %1910 = vector.broadcast %1909 : f32 to vector<8x256xf32>
    %1911 = arith.mulf %1908, %1910 : vector<8x256xf32>
    %1912 = arith.addf %1905, %1911 : vector<8x256xf32>
    %c10_836 = arith.constant 10 : index
    %c0_837 = arith.constant 0 : index
    %c0_838 = arith.constant 0 : index
    %1913 = vector.load %arg3[%c10_836, %c0_837, %c0_838] : memref<36x8x256xbf16, #tpu.memory_space<vmem>>, vector<1x8x256xbf16>
    %1914 = vector.shape_cast %1913 : vector<1x8x256xbf16> to vector<8x256xbf16>
    %1915 = arith.extf %1914 : vector<8x256xbf16> to vector<8x256xf32>
    %c87 = arith.constant 87 : index
    %1916 = memref.load %arg1[%c87] : memref<288xf32, #tpu.memory_space<smem>>
    %1917 = vector.broadcast %1916 : f32 to vector<8x256xf32>
    %1918 = arith.mulf %1915, %1917 : vector<8x256xf32>
    %1919 = arith.addf %1912, %1918 : vector<8x256xf32>
    %c11_839 = arith.constant 11 : index
    %c0_840 = arith.constant 0 : index
    %c0_841 = arith.constant 0 : index
    %1920 = vector.load %arg3[%c11_839, %c0_840, %c0_841] : memref<36x8x256xbf16, #tpu.memory_space<vmem>>, vector<1x8x256xbf16>
    %1921 = vector.shape_cast %1920 : vector<1x8x256xbf16> to vector<8x256xbf16>
    %1922 = arith.extf %1921 : vector<8x256xbf16> to vector<8x256xf32>
    %c95 = arith.constant 95 : index
    %1923 = memref.load %arg1[%c95] : memref<288xf32, #tpu.memory_space<smem>>
    %1924 = vector.broadcast %1923 : f32 to vector<8x256xf32>
    %1925 = arith.mulf %1922, %1924 : vector<8x256xf32>
    %1926 = arith.addf %1919, %1925 : vector<8x256xf32>
    %c12_842 = arith.constant 12 : index
    %c0_843 = arith.constant 0 : index
    %c0_844 = arith.constant 0 : index
    %1927 = vector.load %arg3[%c12_842, %c0_843, %c0_844] : memref<36x8x256xbf16, #tpu.memory_space<vmem>>, vector<1x8x256xbf16>
    %1928 = vector.shape_cast %1927 : vector<1x8x256xbf16> to vector<8x256xbf16>
    %1929 = arith.extf %1928 : vector<8x256xbf16> to vector<8x256xf32>
    %c103 = arith.constant 103 : index
    %1930 = memref.load %arg1[%c103] : memref<288xf32, #tpu.memory_space<smem>>
    %1931 = vector.broadcast %1930 : f32 to vector<8x256xf32>
    %1932 = arith.mulf %1929, %1931 : vector<8x256xf32>
    %1933 = arith.addf %1926, %1932 : vector<8x256xf32>
    %c13_845 = arith.constant 13 : index
    %c0_846 = arith.constant 0 : index
    %c0_847 = arith.constant 0 : index
    %1934 = vector.load %arg3[%c13_845, %c0_846, %c0_847] : memref<36x8x256xbf16, #tpu.memory_space<vmem>>, vector<1x8x256xbf16>
    %1935 = vector.shape_cast %1934 : vector<1x8x256xbf16> to vector<8x256xbf16>
    %1936 = arith.extf %1935 : vector<8x256xbf16> to vector<8x256xf32>
    %c111 = arith.constant 111 : index
    %1937 = memref.load %arg1[%c111] : memref<288xf32, #tpu.memory_space<smem>>
    %1938 = vector.broadcast %1937 : f32 to vector<8x256xf32>
    %1939 = arith.mulf %1936, %1938 : vector<8x256xf32>
    %1940 = arith.addf %1933, %1939 : vector<8x256xf32>
    %c14_848 = arith.constant 14 : index
    %c0_849 = arith.constant 0 : index
    %c0_850 = arith.constant 0 : index
    %1941 = vector.load %arg3[%c14_848, %c0_849, %c0_850] : memref<36x8x256xbf16, #tpu.memory_space<vmem>>, vector<1x8x256xbf16>
    %1942 = vector.shape_cast %1941 : vector<1x8x256xbf16> to vector<8x256xbf16>
    %1943 = arith.extf %1942 : vector<8x256xbf16> to vector<8x256xf32>
    %c119 = arith.constant 119 : index
    %1944 = memref.load %arg1[%c119] : memref<288xf32, #tpu.memory_space<smem>>
    %1945 = vector.broadcast %1944 : f32 to vector<8x256xf32>
    %1946 = arith.mulf %1943, %1945 : vector<8x256xf32>
    %1947 = arith.addf %1940, %1946 : vector<8x256xf32>
    %c15_851 = arith.constant 15 : index
    %c0_852 = arith.constant 0 : index
    %c0_853 = arith.constant 0 : index
    %1948 = vector.load %arg3[%c15_851, %c0_852, %c0_853] : memref<36x8x256xbf16, #tpu.memory_space<vmem>>, vector<1x8x256xbf16>
    %1949 = vector.shape_cast %1948 : vector<1x8x256xbf16> to vector<8x256xbf16>
    %1950 = arith.extf %1949 : vector<8x256xbf16> to vector<8x256xf32>
    %c127 = arith.constant 127 : index
    %1951 = memref.load %arg1[%c127] : memref<288xf32, #tpu.memory_space<smem>>
    %1952 = vector.broadcast %1951 : f32 to vector<8x256xf32>
    %1953 = arith.mulf %1950, %1952 : vector<8x256xf32>
    %1954 = arith.addf %1947, %1953 : vector<8x256xf32>
    %c16_854 = arith.constant 16 : index
    %c0_855 = arith.constant 0 : index
    %c0_856 = arith.constant 0 : index
    %1955 = vector.load %arg3[%c16_854, %c0_855, %c0_856] : memref<36x8x256xbf16, #tpu.memory_space<vmem>>, vector<1x8x256xbf16>
    %1956 = vector.shape_cast %1955 : vector<1x8x256xbf16> to vector<8x256xbf16>
    %1957 = arith.extf %1956 : vector<8x256xbf16> to vector<8x256xf32>
    %c135 = arith.constant 135 : index
    %1958 = memref.load %arg1[%c135] : memref<288xf32, #tpu.memory_space<smem>>
    %1959 = vector.broadcast %1958 : f32 to vector<8x256xf32>
    %1960 = arith.mulf %1957, %1959 : vector<8x256xf32>
    %1961 = arith.addf %1954, %1960 : vector<8x256xf32>
    %c17_857 = arith.constant 17 : index
    %c0_858 = arith.constant 0 : index
    %c0_859 = arith.constant 0 : index
    %1962 = vector.load %arg3[%c17_857, %c0_858, %c0_859] : memref<36x8x256xbf16, #tpu.memory_space<vmem>>, vector<1x8x256xbf16>
    %1963 = vector.shape_cast %1962 : vector<1x8x256xbf16> to vector<8x256xbf16>
    %1964 = arith.extf %1963 : vector<8x256xbf16> to vector<8x256xf32>
    %c143 = arith.constant 143 : index
    %1965 = memref.load %arg1[%c143] : memref<288xf32, #tpu.memory_space<smem>>
    %1966 = vector.broadcast %1965 : f32 to vector<8x256xf32>
    %1967 = arith.mulf %1964, %1966 : vector<8x256xf32>
    %1968 = arith.addf %1961, %1967 : vector<8x256xf32>
    %c18_860 = arith.constant 18 : index
    %c0_861 = arith.constant 0 : index
    %c0_862 = arith.constant 0 : index
    %1969 = vector.load %arg3[%c18_860, %c0_861, %c0_862] : memref<36x8x256xbf16, #tpu.memory_space<vmem>>, vector<1x8x256xbf16>
    %1970 = vector.shape_cast %1969 : vector<1x8x256xbf16> to vector<8x256xbf16>
    %1971 = arith.extf %1970 : vector<8x256xbf16> to vector<8x256xf32>
    %c151 = arith.constant 151 : index
    %1972 = memref.load %arg1[%c151] : memref<288xf32, #tpu.memory_space<smem>>
    %1973 = vector.broadcast %1972 : f32 to vector<8x256xf32>
    %1974 = arith.mulf %1971, %1973 : vector<8x256xf32>
    %1975 = arith.addf %1968, %1974 : vector<8x256xf32>
    %c19_863 = arith.constant 19 : index
    %c0_864 = arith.constant 0 : index
    %c0_865 = arith.constant 0 : index
    %1976 = vector.load %arg3[%c19_863, %c0_864, %c0_865] : memref<36x8x256xbf16, #tpu.memory_space<vmem>>, vector<1x8x256xbf16>
    %1977 = vector.shape_cast %1976 : vector<1x8x256xbf16> to vector<8x256xbf16>
    %1978 = arith.extf %1977 : vector<8x256xbf16> to vector<8x256xf32>
    %c159 = arith.constant 159 : index
    %1979 = memref.load %arg1[%c159] : memref<288xf32, #tpu.memory_space<smem>>
    %1980 = vector.broadcast %1979 : f32 to vector<8x256xf32>
    %1981 = arith.mulf %1978, %1980 : vector<8x256xf32>
    %1982 = arith.addf %1975, %1981 : vector<8x256xf32>
    %c20_866 = arith.constant 20 : index
    %c0_867 = arith.constant 0 : index
    %c0_868 = arith.constant 0 : index
    %1983 = vector.load %arg3[%c20_866, %c0_867, %c0_868] : memref<36x8x256xbf16, #tpu.memory_space<vmem>>, vector<1x8x256xbf16>
    %1984 = vector.shape_cast %1983 : vector<1x8x256xbf16> to vector<8x256xbf16>
    %1985 = arith.extf %1984 : vector<8x256xbf16> to vector<8x256xf32>
    %c167 = arith.constant 167 : index
    %1986 = memref.load %arg1[%c167] : memref<288xf32, #tpu.memory_space<smem>>
    %1987 = vector.broadcast %1986 : f32 to vector<8x256xf32>
    %1988 = arith.mulf %1985, %1987 : vector<8x256xf32>
    %1989 = arith.addf %1982, %1988 : vector<8x256xf32>
    %c21_869 = arith.constant 21 : index
    %c0_870 = arith.constant 0 : index
    %c0_871 = arith.constant 0 : index
    %1990 = vector.load %arg3[%c21_869, %c0_870, %c0_871] : memref<36x8x256xbf16, #tpu.memory_space<vmem>>, vector<1x8x256xbf16>
    %1991 = vector.shape_cast %1990 : vector<1x8x256xbf16> to vector<8x256xbf16>
    %1992 = arith.extf %1991 : vector<8x256xbf16> to vector<8x256xf32>
    %c175 = arith.constant 175 : index
    %1993 = memref.load %arg1[%c175] : memref<288xf32, #tpu.memory_space<smem>>
    %1994 = vector.broadcast %1993 : f32 to vector<8x256xf32>
    %1995 = arith.mulf %1992, %1994 : vector<8x256xf32>
    %1996 = arith.addf %1989, %1995 : vector<8x256xf32>
    %c22_872 = arith.constant 22 : index
    %c0_873 = arith.constant 0 : index
    %c0_874 = arith.constant 0 : index
    %1997 = vector.load %arg3[%c22_872, %c0_873, %c0_874] : memref<36x8x256xbf16, #tpu.memory_space<vmem>>, vector<1x8x256xbf16>
    %1998 = vector.shape_cast %1997 : vector<1x8x256xbf16> to vector<8x256xbf16>
    %1999 = arith.extf %1998 : vector<8x256xbf16> to vector<8x256xf32>
    %c183 = arith.constant 183 : index
    %2000 = memref.load %arg1[%c183] : memref<288xf32, #tpu.memory_space<smem>>
    %2001 = vector.broadcast %2000 : f32 to vector<8x256xf32>
    %2002 = arith.mulf %1999, %2001 : vector<8x256xf32>
    %2003 = arith.addf %1996, %2002 : vector<8x256xf32>
    %c23_875 = arith.constant 23 : index
    %c0_876 = arith.constant 0 : index
    %c0_877 = arith.constant 0 : index
    %2004 = vector.load %arg3[%c23_875, %c0_876, %c0_877] : memref<36x8x256xbf16, #tpu.memory_space<vmem>>, vector<1x8x256xbf16>
    %2005 = vector.shape_cast %2004 : vector<1x8x256xbf16> to vector<8x256xbf16>
    %2006 = arith.extf %2005 : vector<8x256xbf16> to vector<8x256xf32>
    %c191 = arith.constant 191 : index
    %2007 = memref.load %arg1[%c191] : memref<288xf32, #tpu.memory_space<smem>>
    %2008 = vector.broadcast %2007 : f32 to vector<8x256xf32>
    %2009 = arith.mulf %2006, %2008 : vector<8x256xf32>
    %2010 = arith.addf %2003, %2009 : vector<8x256xf32>
    %c24_878 = arith.constant 24 : index
    %c0_879 = arith.constant 0 : index
    %c0_880 = arith.constant 0 : index
    %2011 = vector.load %arg3[%c24_878, %c0_879, %c0_880] : memref<36x8x256xbf16, #tpu.memory_space<vmem>>, vector<1x8x256xbf16>
    %2012 = vector.shape_cast %2011 : vector<1x8x256xbf16> to vector<8x256xbf16>
    %2013 = arith.extf %2012 : vector<8x256xbf16> to vector<8x256xf32>
    %c199 = arith.constant 199 : index
    %2014 = memref.load %arg1[%c199] : memref<288xf32, #tpu.memory_space<smem>>
    %2015 = vector.broadcast %2014 : f32 to vector<8x256xf32>
    %2016 = arith.mulf %2013, %2015 : vector<8x256xf32>
    %2017 = arith.addf %2010, %2016 : vector<8x256xf32>
    %c25_881 = arith.constant 25 : index
    %c0_882 = arith.constant 0 : index
    %c0_883 = arith.constant 0 : index
    %2018 = vector.load %arg3[%c25_881, %c0_882, %c0_883] : memref<36x8x256xbf16, #tpu.memory_space<vmem>>, vector<1x8x256xbf16>
    %2019 = vector.shape_cast %2018 : vector<1x8x256xbf16> to vector<8x256xbf16>
    %2020 = arith.extf %2019 : vector<8x256xbf16> to vector<8x256xf32>
    %c207 = arith.constant 207 : index
    %2021 = memref.load %arg1[%c207] : memref<288xf32, #tpu.memory_space<smem>>
    %2022 = vector.broadcast %2021 : f32 to vector<8x256xf32>
    %2023 = arith.mulf %2020, %2022 : vector<8x256xf32>
    %2024 = arith.addf %2017, %2023 : vector<8x256xf32>
    %c26_884 = arith.constant 26 : index
    %c0_885 = arith.constant 0 : index
    %c0_886 = arith.constant 0 : index
    %2025 = vector.load %arg3[%c26_884, %c0_885, %c0_886] : memref<36x8x256xbf16, #tpu.memory_space<vmem>>, vector<1x8x256xbf16>
    %2026 = vector.shape_cast %2025 : vector<1x8x256xbf16> to vector<8x256xbf16>
    %2027 = arith.extf %2026 : vector<8x256xbf16> to vector<8x256xf32>
    %c215 = arith.constant 215 : index
    %2028 = memref.load %arg1[%c215] : memref<288xf32, #tpu.memory_space<smem>>
    %2029 = vector.broadcast %2028 : f32 to vector<8x256xf32>
    %2030 = arith.mulf %2027, %2029 : vector<8x256xf32>
    %2031 = arith.addf %2024, %2030 : vector<8x256xf32>
    %c27_887 = arith.constant 27 : index
    %c0_888 = arith.constant 0 : index
    %c0_889 = arith.constant 0 : index
    %2032 = vector.load %arg3[%c27_887, %c0_888, %c0_889] : memref<36x8x256xbf16, #tpu.memory_space<vmem>>, vector<1x8x256xbf16>
    %2033 = vector.shape_cast %2032 : vector<1x8x256xbf16> to vector<8x256xbf16>
    %2034 = arith.extf %2033 : vector<8x256xbf16> to vector<8x256xf32>
    %c223 = arith.constant 223 : index
    %2035 = memref.load %arg1[%c223] : memref<288xf32, #tpu.memory_space<smem>>
    %2036 = vector.broadcast %2035 : f32 to vector<8x256xf32>
    %2037 = arith.mulf %2034, %2036 : vector<8x256xf32>
    %2038 = arith.addf %2031, %2037 : vector<8x256xf32>
    %c28_890 = arith.constant 28 : index
    %c0_891 = arith.constant 0 : index
    %c0_892 = arith.constant 0 : index
    %2039 = vector.load %arg3[%c28_890, %c0_891, %c0_892] : memref<36x8x256xbf16, #tpu.memory_space<vmem>>, vector<1x8x256xbf16>
    %2040 = vector.shape_cast %2039 : vector<1x8x256xbf16> to vector<8x256xbf16>
    %2041 = arith.extf %2040 : vector<8x256xbf16> to vector<8x256xf32>
    %c231 = arith.constant 231 : index
    %2042 = memref.load %arg1[%c231] : memref<288xf32, #tpu.memory_space<smem>>
    %2043 = vector.broadcast %2042 : f32 to vector<8x256xf32>
    %2044 = arith.mulf %2041, %2043 : vector<8x256xf32>
    %2045 = arith.addf %2038, %2044 : vector<8x256xf32>
    %c29_893 = arith.constant 29 : index
    %c0_894 = arith.constant 0 : index
    %c0_895 = arith.constant 0 : index
    %2046 = vector.load %arg3[%c29_893, %c0_894, %c0_895] : memref<36x8x256xbf16, #tpu.memory_space<vmem>>, vector<1x8x256xbf16>
    %2047 = vector.shape_cast %2046 : vector<1x8x256xbf16> to vector<8x256xbf16>
    %2048 = arith.extf %2047 : vector<8x256xbf16> to vector<8x256xf32>
    %c239 = arith.constant 239 : index
    %2049 = memref.load %arg1[%c239] : memref<288xf32, #tpu.memory_space<smem>>
    %2050 = vector.broadcast %2049 : f32 to vector<8x256xf32>
    %2051 = arith.mulf %2048, %2050 : vector<8x256xf32>
    %2052 = arith.addf %2045, %2051 : vector<8x256xf32>
    %c30_896 = arith.constant 30 : index
    %c0_897 = arith.constant 0 : index
    %c0_898 = arith.constant 0 : index
    %2053 = vector.load %arg3[%c30_896, %c0_897, %c0_898] : memref<36x8x256xbf16, #tpu.memory_space<vmem>>, vector<1x8x256xbf16>
    %2054 = vector.shape_cast %2053 : vector<1x8x256xbf16> to vector<8x256xbf16>
    %2055 = arith.extf %2054 : vector<8x256xbf16> to vector<8x256xf32>
    %c247 = arith.constant 247 : index
    %2056 = memref.load %arg1[%c247] : memref<288xf32, #tpu.memory_space<smem>>
    %2057 = vector.broadcast %2056 : f32 to vector<8x256xf32>
    %2058 = arith.mulf %2055, %2057 : vector<8x256xf32>
    %2059 = arith.addf %2052, %2058 : vector<8x256xf32>
    %c31_899 = arith.constant 31 : index
    %c0_900 = arith.constant 0 : index
    %c0_901 = arith.constant 0 : index
    %2060 = vector.load %arg3[%c31_899, %c0_900, %c0_901] : memref<36x8x256xbf16, #tpu.memory_space<vmem>>, vector<1x8x256xbf16>
    %2061 = vector.shape_cast %2060 : vector<1x8x256xbf16> to vector<8x256xbf16>
    %2062 = arith.extf %2061 : vector<8x256xbf16> to vector<8x256xf32>
    %c255 = arith.constant 255 : index
    %2063 = memref.load %arg1[%c255] : memref<288xf32, #tpu.memory_space<smem>>
    %2064 = vector.broadcast %2063 : f32 to vector<8x256xf32>
    %2065 = arith.mulf %2062, %2064 : vector<8x256xf32>
    %2066 = arith.addf %2059, %2065 : vector<8x256xf32>
    %c32_902 = arith.constant 32 : index
    %c0_903 = arith.constant 0 : index
    %c0_904 = arith.constant 0 : index
    %2067 = vector.load %arg3[%c32_902, %c0_903, %c0_904] : memref<36x8x256xbf16, #tpu.memory_space<vmem>>, vector<1x8x256xbf16>
    %2068 = vector.shape_cast %2067 : vector<1x8x256xbf16> to vector<8x256xbf16>
    %2069 = arith.extf %2068 : vector<8x256xbf16> to vector<8x256xf32>
    %c263 = arith.constant 263 : index
    %2070 = memref.load %arg1[%c263] : memref<288xf32, #tpu.memory_space<smem>>
    %2071 = vector.broadcast %2070 : f32 to vector<8x256xf32>
    %2072 = arith.mulf %2069, %2071 : vector<8x256xf32>
    %2073 = arith.addf %2066, %2072 : vector<8x256xf32>
    %c33_905 = arith.constant 33 : index
    %c0_906 = arith.constant 0 : index
    %c0_907 = arith.constant 0 : index
    %2074 = vector.load %arg3[%c33_905, %c0_906, %c0_907] : memref<36x8x256xbf16, #tpu.memory_space<vmem>>, vector<1x8x256xbf16>
    %2075 = vector.shape_cast %2074 : vector<1x8x256xbf16> to vector<8x256xbf16>
    %2076 = arith.extf %2075 : vector<8x256xbf16> to vector<8x256xf32>
    %c271 = arith.constant 271 : index
    %2077 = memref.load %arg1[%c271] : memref<288xf32, #tpu.memory_space<smem>>
    %2078 = vector.broadcast %2077 : f32 to vector<8x256xf32>
    %2079 = arith.mulf %2076, %2078 : vector<8x256xf32>
    %2080 = arith.addf %2073, %2079 : vector<8x256xf32>
    %c34_908 = arith.constant 34 : index
    %c0_909 = arith.constant 0 : index
    %c0_910 = arith.constant 0 : index
    %2081 = vector.load %arg3[%c34_908, %c0_909, %c0_910] : memref<36x8x256xbf16, #tpu.memory_space<vmem>>, vector<1x8x256xbf16>
    %2082 = vector.shape_cast %2081 : vector<1x8x256xbf16> to vector<8x256xbf16>
    %2083 = arith.extf %2082 : vector<8x256xbf16> to vector<8x256xf32>
    %c279 = arith.constant 279 : index
    %2084 = memref.load %arg1[%c279] : memref<288xf32, #tpu.memory_space<smem>>
    %2085 = vector.broadcast %2084 : f32 to vector<8x256xf32>
    %2086 = arith.mulf %2083, %2085 : vector<8x256xf32>
    %2087 = arith.addf %2080, %2086 : vector<8x256xf32>
    %c35_911 = arith.constant 35 : index
    %c0_912 = arith.constant 0 : index
    %c0_913 = arith.constant 0 : index
    %2088 = vector.load %arg3[%c35_911, %c0_912, %c0_913] : memref<36x8x256xbf16, #tpu.memory_space<vmem>>, vector<1x8x256xbf16>
    %2089 = vector.shape_cast %2088 : vector<1x8x256xbf16> to vector<8x256xbf16>
    %2090 = arith.extf %2089 : vector<8x256xbf16> to vector<8x256xf32>
    %c287 = arith.constant 287 : index
    %2091 = memref.load %arg1[%c287] : memref<288xf32, #tpu.memory_space<smem>>
    %2092 = vector.broadcast %2091 : f32 to vector<8x256xf32>
    %2093 = arith.mulf %2090, %2092 : vector<8x256xf32>
    %2094 = arith.addf %2087, %2093 : vector<8x256xf32>
    %c7_914 = arith.constant 7 : index
    %2095 = memref.load %arg2[%c7_914] : memref<8xf32, #tpu.memory_space<smem>>
    %2096 = vector.broadcast %2095 : f32 to vector<8x256xf32>
    %2097 = arith.addf %2094, %2096 : vector<8x256xf32>
    %cst_915 = arith.constant 0.000000e+00 : f32
    %2098 = vector.broadcast %cst_915 : f32 to vector<8x256xf32>
    %2099 = arith.maximumf %2097, %2098 : vector<8x256xf32>
    %2100 = arith.truncf %2099 : vector<8x256xf32> to vector<8x256xbf16>
    %c7_916 = arith.constant 7 : index
    %c0_917 = arith.constant 0 : index
    %c0_918 = arith.constant 0 : index
    %2101 = vector.load %arg4[%c7_916, %c0_917, %c0_918] : memref<8x256x128xbf16, #tpu.memory_space<vmem>>, vector<1x256x128xbf16>
    %2102 = vector.shape_cast %2101 : vector<1x256x128xbf16> to vector<256x128xbf16>
    %cst_919 = arith.constant dense<0.000000e+00> : vector<8x128xf32>
    %2103 = tpu.matmul %2100, %2102, %cst_919 {dimension_numbers = #tpu.dot_dimension_numbers<[1], [0], [0], [1], [0, 0, 1, 1], [], []>} : vector<8x256xbf16>, vector<256x128xbf16>, vector<8x128xf32> -> vector<8x128xf32>
    %2104 = arith.addf %1841, %2103 : vector<8x128xf32>
    %c0_920 = arith.constant 0 : index
    %c0_921 = arith.constant 0 : index
    %2105 = vector.load %arg5[%c0_920, %c0_921] : memref<1x128xf32, #tpu.memory_space<vmem>>, vector<1x128xf32>
    %2106 = vector.broadcast %2105 : vector<1x128xf32> to vector<8x128xf32>
    %2107 = arith.addf %2104, %2106 : vector<8x128xf32>
    %cst_922 = arith.constant 0.000000e+00 : f32
    %2108 = vector.broadcast %cst_922 : f32 to vector<8x128xf32>
    %2109 = arith.maximumf %2107, %2108 : vector<8x128xf32>
    %2110 = arith.truncf %2109 : vector<8x128xf32> to vector<8x128xbf16>
    %c0_923 = arith.constant 0 : index
    %c0_924 = arith.constant 0 : index
    %2111 = vector.load %arg6[%c0_923, %c0_924] : memref<128x128xbf16, #tpu.memory_space<vmem>>, vector<128x128xbf16>
    %cst_925 = arith.constant dense<0.000000e+00> : vector<8x128xf32>
    %2112 = tpu.matmul %2110, %2111, %cst_925 {dimension_numbers = #tpu.dot_dimension_numbers<[1], [0], [0], [1], [0, 0, 1, 1], [], []>} : vector<8x128xbf16>, vector<128x128xbf16>, vector<8x128xf32> -> vector<8x128xf32>
    %c0_926 = arith.constant 0 : index
    %c0_927 = arith.constant 0 : index
    %2113 = vector.load %arg7[%c0_926, %c0_927] : memref<1x128xf32, #tpu.memory_space<vmem>>, vector<1x128xf32>
    %2114 = vector.broadcast %2113 : vector<1x128xf32> to vector<8x128xf32>
    %2115 = arith.addf %2112, %2114 : vector<8x128xf32>
    %cst_928 = arith.constant 0.000000e+00 : f32
    %2116 = vector.broadcast %cst_928 : f32 to vector<8x128xf32>
    %2117 = arith.maximumf %2115, %2116 : vector<8x128xf32>
    %2118 = arith.truncf %2117 : vector<8x128xf32> to vector<8x128xbf16>
    %c0_929 = arith.constant 0 : index
    %c0_930 = arith.constant 0 : index
    %2119 = vector.load %arg8[%c0_929, %c0_930] : memref<128x128xbf16, #tpu.memory_space<vmem>>, vector<128x128xbf16>
    %cst_931 = arith.constant dense<0.000000e+00> : vector<8x128xf32>
    %2120 = tpu.matmul %2118, %2119, %cst_931 {dimension_numbers = #tpu.dot_dimension_numbers<[1], [0], [0], [1], [0, 0, 1, 1], [], []>} : vector<8x128xbf16>, vector<128x128xbf16>, vector<8x128xf32> -> vector<8x128xf32>
    %c0_932 = arith.constant 0 : index
    %c0_933 = arith.constant 0 : index
    %2121 = vector.load %arg9[%c0_932, %c0_933] : memref<1x128xf32, #tpu.memory_space<vmem>>, vector<1x128xf32>
    %2122 = vector.broadcast %2121 : vector<1x128xf32> to vector<8x128xf32>
    %2123 = arith.addf %2120, %2122 : vector<8x128xf32>
    %c0_934 = arith.constant 0 : index
    %c0_935 = arith.constant 0 : index
    %2124 = vector.load %arg10[%c0_934, %c0_935] : memref<8x128xf32, #tpu.memory_space<vmem>>, vector<8x128xf32>
    tpu.vector_store %arg10[%c0_934, %c0_935], %2123 {strides = array<i32>} : memref<8x128xf32, #tpu.memory_space<vmem>>, vector<8x128xf32>,
    return
  }
  func.func @transform_0(%arg0: i32) -> i32 {
    %c0_i32 = arith.constant 0 : i32
    %c0_i32_0 = arith.constant 0 : i32
    return %c0_i32 : i32
  }
  func.func @transform_1(%arg0: i32) -> i32 {
    %c0_i32 = arith.constant 0 : i32
    %c0_i32_0 = arith.constant 0 : i32
    return %c0_i32 : i32
  }
  func.func @transform_2(%arg0: i32) -> (i32, i32, i32) {
    %c0_i32 = arith.constant 0 : i32
    %c0_i32_0 = arith.constant 0 : i32
    %c0_i32_1 = arith.constant 0 : i32
    return %c0_i32, %arg0, %c0_i32_0 : i32, i32, i32
  }
  func.func @transform_3(%arg0: i32) -> (i32, i32, i32) {
    %c0_i32 = arith.constant 0 : i32
    %c0_i32_0 = arith.constant 0 : i32
    %c0_i32_1 = arith.constant 0 : i32
    %c0_i32_2 = arith.constant 0 : i32
    return %c0_i32, %c0_i32_0, %c0_i32_1 : i32, i32, i32
  }
  func.func @transform_4(%arg0: i32) -> (i32, i32) {
    %c0_i32 = arith.constant 0 : i32
    %c0_i32_0 = arith.constant 0 : i32
    %c0_i32_1 = arith.constant 0 : i32
    return %c0_i32, %c0_i32_0 : i32, i32
  }
  func.func @transform_5(%arg0: i32) -> (i32, i32) {
    %c0_i32 = arith.constant 0 : i32
    %c0_i32_0 = arith.constant 0 : i32
    %c0_i32_1 = arith.constant 0 : i32
    return %c0_i32, %c0_i32_0 : i32, i32
  }
  func.func @transform_6(%arg0: i32) -> (i32, i32) {
    %c0_i32 = arith.constant 0 : i32
    %c0_i32_0 = arith.constant 0 : i32
    %c0_i32_1 = arith.constant 0 : i32
    return %c0_i32, %c0_i32_0 : i32, i32
  }
  func.func @transform_7(%arg0: i32) -> (i32, i32) {
    %c0_i32 = arith.constant 0 : i32
    %c0_i32_0 = arith.constant 0 : i32
    %c0_i32_1 = arith.constant 0 : i32
    return %c0_i32, %c0_i32_0 : i32, i32
  }
  func.func @transform_8(%arg0: i32) -> (i32, i32) {
    %c0_i32 = arith.constant 0 : i32
    %c0_i32_0 = arith.constant 0 : i32
    %c0_i32_1 = arith.constant 0 : i32
    return %c0_i32, %c0_i32_0 : i32, i32
  }
  func.func @transform_9(%arg0: i32) -> (i32, i32) {
    %c0_i32 = arith.constant 0 : i32
    %c0_i32_0 = arith.constant 0 : i32
    return %arg0, %c0_i32 : i32, i32
  }
}

</mosaic_0001>

<bundles_post_ra>
// kernel: forward.1
= control target key start
LH: loop header
LB: loop body
LE: loop exit
PB: predicated region body
PF: predicated region fallthrough
CT: control target
= control target key end

     0   :  { %14 = vsyncpa [#allocation3], 0  ;;  %s7473_s0 = inlined_call_operand.vmem [shape: f32[288], index: 0, kind: input, shape index: {}]   ;;  %s7474_s1 = inlined_call_operand.vmem [shape: f32[8], index: 1, kind: input, shape index: {}]   ;;  %s7475_s2 = inlined_call_operand.vmem [shape: bf16[36,8,256], index: 2, kind: input, shape index: {}]   ;;  %s7476_s3 = inlined_call_operand.vmem [shape: bf16[8,256,128], index: 3, kind: input, shape index: {}]   ;;  %s7477_s4 = inlined_call_operand.vmem [shape: f32[1,128], index: 4, kind: input, shape index: {}]   ;;  %s7478_s5 = inlined_call_operand.vmem [shape: bf16[128,128], index: 5, kind: input, shape index: {}]   ;;  %s7479_s6 = inlined_call_operand.vmem [shape: f32[1,128], index: 6, kind: input, shape index: {}]   ;;  %s7480_s7 = inlined_call_operand.vmem [shape: bf16[128,128], index: 7, kind: input, shape index: {}]   ;;  %s7481_s8 = inlined_call_operand.vmem [shape: f32[1,128], index: 8, kind: input, shape index: {}]   ;;  %s7482_s9 = inlined_call_operand.vmem [shape: f32[8,128], index: 9, kind: output, shape index: {}]  }
   0x1   :  { %s22_s11 = sshll.u32 %s7473_s0, 4  ;;  %s23_s11 = int_to_ptr.vmem [resolvable:$true] %s22_s11 }
   0x2   :  { %15 = vsyncpa [#allocation5], 0  ;;  %s32_s14 = sshll.u32 %s7474_s1, 4  ;;  %s4673_s15 = scalar_lea.vmem %s23_s11, 48  ;;  %s33_s14 = int_to_ptr.vmem [resolvable:$true] %s32_s14 }
   0x3   :  { %p4674_p0 = scmp.ne.s32.totalorder %s23_s11, %s4673_s15  ;;  %s4677_s16 = scalar_lea.vmem %s23_s11, 64 }
   0x4   :  { %p4678_p1 = scmp.lt.s32.totalorder %s23_s11, %s23_s11  ;;  %p4679_p2 = scmp.lt.s32.totalorder %s4677_s16, %s4673_s15 }
   0x6   :  { %p4680_p3 = por %p4679_p2, %p4678_p1 }
   0x8   :  { %p4681_p4 = pnand %p4680_p3, %p4674_p0 }
   0xa   :  { %4684 = shalt.err (!%p4681_p4)
}
   0xb   :  { %s4701_s17 = smov [#allocation2]   ;;  %s4685_s18 = scalar_lea.vmem %s33_s14, 16 }
   0xc   :  { %25 = dma.vmem_to_smem %s23_s11, 48, %s4701_s17, [#allocation3]  }
   0xd   :  { %p4686_p5 = scmp.ne.s32.totalorder %s33_s14, %s4685_s18  ;;  %p4690_p6 = scmp.lt.s32.totalorder %s33_s14, %s33_s14 }
   0xe   :  { %p4691_p7 = scmp.lt.s32.totalorder %s4685_s18, %s4685_s18 }
  0x10   :  { %p4692_p8 = por %p4691_p7, %p4690_p6 }
  0x12   :  { %p4693_p9 = pnand %p4692_p8, %p4686_p5 }
  0x14   :  { %4696 = shalt.err (!%p4693_p9)
}
  0x15   :  { %s4702_s0 = smov [#allocation4]  }
  0x16   :  { %35 = dma.vmem_to_smem %s33_s14, 16, %s4702_s0, [#allocation5]  }
  0x17   :  { %4697 = dma.done.wait [#allocation3], 48  }
  0x18   :  { %4698 = vsyncadd [#allocation3], 4294967248 }
  0x19   :  { %4699 = dma.done.wait [#allocation5], 16  }
  0x1a   :  { %4700 = vsyncadd [#allocation5], 4294967280 }
  0x1b   :  { %56 = sfence }
  0x1c   :  { %v4529_v0 = vld [vmem:[%s7476_s3 + $0xf8] sm:$0xff]   ;;  %v4533_v4 = vld [vmem:[%s7476_s3 + $0xf0] sm:$0xff]   ;;  %v4537_v8 = vld [vmem:[%s7476_s3 + $0xe8] sm:$0xff]   ;;  %s4957_s26 = sld [smem:[#allocation2 + $0x1]]  ;;  %vm4704_vm0 = vmmov 0  }
  0x1d   :  { %v4530_v1 = vld [vmem:[%s7476_s3 + $0x78] sm:$0xff]   ;;  %4291 = vmatprep.subr.bf16.mxu0 %v4529_v0  ;;  %v4534_v5 = vld [vmem:[%s7476_s3 + $0x70] sm:$0xff]   ;;  %v4538_v9 = vld [vmem:[%s7476_s3 + $0x68] sm:$0xff]   ;;  %s4976_s12 = sld [smem:[#allocation2 + $0x9]] }
  0x1e   :  { %v4531_v2 = vld [vmem:[%s7476_s3 + $0xb8] sm:$0xff]   ;;  %4313 = vmatprep.subr.bf16.mxu1 %v4530_v1  ;;  %v4535_v6 = vld [vmem:[%s7476_s3 + $0xb0] sm:$0xff]   ;;  %v4539_v10 = vld [vmem:[%s7476_s3 + $0xa8] sm:$0xff]   ;;  %s4995_s0 = sld [smem:[#allocation2 + $0x11]] }
  0x1f   :  { %v4532_v3 = vld [vmem:[%s7476_s3 + $0x38] sm:$0xff]   ;;  %4292 = vmatpush3.bf16.msra.mxu0 %v4531_v2  ;;  %v4536_v7 = vld [vmem:[%s7476_s3 + $0x30] sm:$0xff]   ;;  %v4540_v11 = vld [vmem:[%s7476_s3 + $0x28] sm:$0xff]   ;;  %s5014_s24 = sld [smem:[#allocation2 + $0x19]] }
  0x20   :  { %4314 = vmatpush3.bf16.msra.mxu1 %v4532_v3  ;;  %4293 = vmatprep.subr.bf16.mxu0 %v4533_v4  ;;  %v4541_v12 = vld [vmem:[%s7476_s3 + $0xe0] sm:$0xff]   ;;  %v4545_v16 = vld [vmem:[%s7476_s3 + $0xd8] sm:$0xff]   ;;  %v4549_v20 = vld [vmem:[%s7476_s3 + $0xd0] sm:$0xff]   ;;  %s5033_s11 = sld [smem:[#allocation2 + $0x21]] }
  0x21   :  { %4315 = vmatprep.subr.bf16.mxu1 %v4534_v5  ;;  %v4542_v13 = vld [vmem:[%s7476_s3 + $0x60] sm:$0xff]   ;;  %v4546_v17 = vld [vmem:[%s7476_s3 + $0x58] sm:$0xff]   ;;  %v4550_v21 = vld [vmem:[%s7476_s3 + $0x50] sm:$0xff]   ;;  %s5054_s15 = sld [smem:[#allocation2 + $0x29]] }
  0x22   :  { %v4543_v14 = vld [vmem:[%s7476_s3 + $0xa0] sm:$0xff]   ;;  %v4547_v18 = vld [vmem:[%s7476_s3 + $0x98] sm:$0xff]   ;;  %v4551_v22 = vld [vmem:[%s7476_s3 + $0x90] sm:$0xff]   ;;  %s5087_s27 = sld [smem:[#allocation2 + $0x31]] }
  0x23   :  { %4294 = vmatpush3.bf16.msra.mxu0 %v4535_v6  ;;  %v4544_v15 = vld [vmem:[%s7476_s3 + $0x20] sm:$0xff]   ;;  %v4548_v19 = vld [vmem:[%s7476_s3 + $0x18] sm:$0xff]   ;;  %v4552_v23 = vld [vmem:[%s7476_s3 + $0x10] sm:$0xff]   ;;  %s5097_s28 = sld [smem:[#allocation2 + $0x39]] }
  0x24   :  { %4316 = vmatpush3.bf16.msra.mxu1 %v4536_v7  ;;  %4295 = vmatprep.subr.bf16.mxu0 %v4537_v8  ;;  %v4553_v24 = vld [vmem:[%s7476_s3 + $0xc8] sm:$0xff]   ;;  %v4557_v28 = vld [vmem:[%s7476_s3 + $0xc0] sm:$0xff]   ;;  %v3593_v34 = vld [vmem:[%s7475_s2 + $0x10] sm:$0xff]  ;;  %s5107_s29 = sld [smem:[#allocation2 + $0x41]] }
  0x25   :  { %4317 = vmatprep.subr.bf16.mxu1 %v4538_v9  ;;  %v4554_v25 = vld [vmem:[%s7476_s3 + $0x48] sm:$0xff]   ;;  %v4558_v29 = vld [vmem:[%s7476_s3 + $0x40] sm:$0xff]   ;;  %v3595_v35 = vld [vmem:[%s7475_s2 + $0x18] sm:$0xff]  ;;  %v4889_v44 = vunpack.c.l.bf16 %v3593_v34  ;;  %v4891_v45 = vunpack.c.h.bf16 %v3593_v34  ;;  %s5120_s13 = sld [smem:[#allocation2 + $0x49]] }
  0x26   :  { %v4555_v26 = vld [vmem:[%s7476_s3 + $0x88] sm:$0xff]   ;;  %v4559_v30 = vld [vmem:[%s7476_s3 + $0x80] sm:$0xff]   ;;  %v3601_v41 = vld [vmem:[%s7475_s2 + $0x30] sm:$0xff]  ;;  %v4893_v46 = vunpack.c.l.bf16 %v3595_v35  ;;  %v4901_v49 = vunpack.c.h.bf16 %v3595_v35  ;;  %s5126_s14 = sld [smem:[#allocation2 + $0x51]] }
  0x27   :  { %4296 = vmatpush3.bf16.msra.mxu0 %v4539_v10  ;;  %v4556_v27 = vld [vmem:[%s7476_s3 + $0x8] sm:$0xff]   ;;  %v4560_v31 = vld [vmem:[%s7476_s3] sm:$0xff]   ;;  %v3603_v42 = vld [vmem:[%s7475_s2 + $0x38] sm:$0xff]  ;;  %7610 = vst [vmem:[#allocation12_spill] sm:$0xff] %v4889_v44  ;;  %v4917_v56 = vunpack.c.l.bf16 %v3601_v41  ;;  %v4919_v57 = vunpack.c.h.bf16 %v3601_v41  ;;  %s5132_s16 = sld [smem:[#allocation2 + $0x59]] }
  0x28   :  { %4318 = vmatpush3.bf16.msra.mxu1 %v4540_v11  ;;  %4297 = vmatprep.subr.bf16.mxu0 %v4541_v12  ;;  %v58_v32 = vld [vmem:[%s7475_s2] sm:$0xff]  ;;  %v3591_v33 = vld [vmem:[%s7475_s2 + $0x8] sm:$0xff]  ;;  %7611 = vst [vmem:[#allocation13_spill] sm:$0xff] %v4891_v45  ;;  %7612 = vst [vmem:[#allocation14_spill] sm:$0xff] %v4893_v46  ;;  %v4921_v58 = vunpack.c.l.bf16 %v3603_v42  ;;  %v4929_v61 = vunpack.c.h.bf16 %v3603_v42  ;;  %s5180_s1 = sld [smem:[#allocation2 + $0x99]] }
  0x29   :  { %4319 = vmatprep.subr.bf16.mxu1 %v4542_v13  ;;  %v3597_v36 = vld [vmem:[%s7475_s2 + $0x20] sm:$0xff]  ;;  %v3599_v37 = vld [vmem:[%s7475_s2 + $0x28] sm:$0xff]  ;;  %v4875_v38 = vunpack.c.l.bf16 %v58_v32  ;;  %v4877_v39 = vunpack.c.h.bf16 %v58_v32  ;;  %v4879_v40 = vunpack.c.l.bf16 %v3591_v33  ;;  %v4887_v43 = vunpack.c.h.bf16 %v3591_v33  ;;  %7613 = vst [vmem:[#allocation15_spill] sm:$0xff] %v4901_v49  ;;  %v3609_v53 = vld [vmem:[%s7475_s2 + $0x50] sm:$0xff]  ;;  %s5186_s19 = sld [smem:[#allocation2 + $0xa1]] }
  0x2a   :  { %v3605_v47 = vld [vmem:[%s7475_s2 + $0x40] sm:$0xff]  ;;  %v3607_v48 = vld [vmem:[%s7475_s2 + $0x48] sm:$0xff]  ;;  %v4903_v50 = vunpack.c.l.bf16 %v3597_v36  ;;  %v4905_v51 = vunpack.c.h.bf16 %v3597_v36  ;;  %v4907_v52 = vunpack.c.l.bf16 %v3599_v37  ;;  %v3611_v54 = vld [vmem:[%s7475_s2 + $0x58] sm:$0xff]  ;;  %v4915_v55 = vunpack.c.h.bf16 %v3599_v37  ;;  %7616 = vst [vmem:[#allocation18_spill] sm:$0xff] %v4921_v58  ;;  %s5190_s20 = sld [smem:[#allocation2 + $0xa9]] }
  0x2b   :  { %4298 = vmatpush3.bf16.msra.mxu0 %v4543_v14  ;;  %7606 = vst [vmem:[#allocation8_spill] sm:$0xff] %v4875_v38  ;;  %7607 = vst [vmem:[#allocation9_spill] sm:$0xff] %v4877_v39  ;;  %v3613_v59 = vld [vmem:[%s7475_s2 + $0x60] sm:$0xff]  ;;  %v3615_v60 = vld [vmem:[%s7475_s2 + $0x68] sm:$0xff]  ;;  %v4931_v62 = vunpack.c.l.bf16 %v3605_v47  ;;  %v4933_v63 = vunpack.c.h.bf16 %v3605_v47  ;;  %v4935_v0 = vunpack.c.l.bf16 %v3607_v48  ;;  %v4943_v3 = vunpack.c.h.bf16 %v3607_v48  ;;  %s5196_s21 = sld [smem:[#allocation2 + $0xb1]] }
  0x2c   :  { %4320 = vmatpush3.bf16.msra.mxu1 %v4544_v15  ;;  %4299 = vmatprep.subr.bf16.mxu0 %v4545_v16  ;;  %7608 = vst [vmem:[#allocation10_spill] sm:$0xff] %v4879_v40  ;;  %7609 = vst [vmem:[#allocation11_spill] sm:$0xff] %v4887_v43  ;;  %v3617_v1 = vld [vmem:[%s7475_s2 + $0x70] sm:$0xff]  ;;  %v3619_v2 = vld [vmem:[%s7475_s2 + $0x78] sm:$0xff]  ;;  %v4945_v4 = vunpack.c.l.bf16 %v3609_v53  ;;  %v4947_v5 = vunpack.c.h.bf16 %v3609_v53  ;;  %v4949_v6 = vunpack.c.l.bf16 %v3611_v54  ;;  %v4959_v9 = vunpack.c.h.bf16 %v3611_v54  ;;  %s5200_s22 = sld [smem:[#allocation2 + $0xb9]] }
  0x2d   :  { %4321 = vmatprep.subr.bf16.mxu1 %v4546_v17  ;;  %7614 = vst [vmem:[#allocation16_spill] sm:$0xff] %v4903_v50  ;;  %7615 = vst [vmem:[#allocation17_spill] sm:$0xff] %v4905_v51  ;;  %v3621_v7 = vld [vmem:[%s7475_s2 + $0x80] sm:$0xff]  ;;  %v3623_v8 = vld [vmem:[%s7475_s2 + $0x88] sm:$0xff]  ;;  %v4961_v10 = vunpack.c.l.bf16 %v3613_v59  ;;  %v4963_v11 = vunpack.c.h.bf16 %v3613_v59  ;;  %v4965_v12 = vunpack.c.l.bf16 %v3615_v60  ;;  %v4978_v16 = vunpack.c.h.bf16 %v3615_v60  ;;  %s5206_s23 = sld [smem:[#allocation2 + $0xc1]] }
  0x2e   :  { %7617 = vst [vmem:[#allocation19_spill] sm:$0xff] %v4933_v63  ;;  %7618 = vst [vmem:[#allocation20_spill] sm:$0xff] %v4935_v0  ;;  %v3625_v13 = vld [vmem:[%s7475_s2 + $0x90] sm:$0xff]  ;;  %v3627_v14 = vld [vmem:[%s7475_s2 + $0x98] sm:$0xff]  ;;  %v4980_v17 = vunpack.c.l.bf16 %v3617_v1  ;;  %s5210_s25 = sld [smem:[#allocation2 + $0xc9]] }
  0x2f   :  { %4300 = vmatpush3.bf16.msra.mxu0 %v4547_v18  ;;  %7619 = vst [vmem:[#allocation21_spill] sm:$0xff] %v4947_v5  ;;  %7620 = vst [vmem:[#allocation22_spill] sm:$0xff] %v4949_v6  ;;  %v3629_v15 = vld [vmem:[%s7475_s2 + $0xa0] sm:$0xff]  ;;  %v4982_v18 = vunpack.c.h.bf16 %v3617_v1  ;;  %v5020_v32 = vunpack.c.h.bf16 %v3625_v13  ;;  %v5022_v33 = vunpack.c.l.bf16 %v3627_v14  ;;  %v3643_v34 = vld [vmem:[%s7475_s2 + $0xd8] sm:$0xff]  ;;  %v5035_v37 = vunpack.c.h.bf16 %v3627_v14  ;;  %s5244_s30 = sld [smem:[#allocation2 + $0xe9]] }
  0x30   :  { %4322 = vmatpush3.bf16.msra.mxu1 %v4548_v19  ;;  %4301 = vmatprep.subr.bf16.mxu0 %v4549_v20  ;;  %7621 = vst [vmem:[#allocation23_spill] sm:$0xff] %v4959_v9  ;;  %7622 = vst [vmem:[#allocation24_spill] sm:$0xff] %v4961_v10  ;;  %v4984_v19 = vunpack.c.l.bf16 %v3619_v2  ;;  %v3631_v20 = vld [vmem:[%s7475_s2 + $0xa8] sm:$0xff]  ;;  %v3645_v35 = vld [vmem:[%s7475_s2 + $0xe0] sm:$0xff]  ;;  %v5037_v41 = vunpack.c.l.bf16 %v3629_v15  ;;  %v5039_v42 = vunpack.c.h.bf16 %v3629_v15  ;;  %s5258_s10 = sld [smem:[#allocation2 + $0xf1]] }
  0x31   :  { %4323 = vmatprep.subr.bf16.mxu1 %v4550_v21  ;;  %7623 = vst [vmem:[#allocation25_spill] sm:$0xff] %v4963_v11  ;;  %7624 = vst [vmem:[#allocation26_spill] sm:$0xff] %v4965_v12  ;;  %v3633_v21 = vld [vmem:[%s7475_s2 + $0xb0] sm:$0xff]  ;;  %v3647_v36 = vld [vmem:[%s7475_s2 + $0xe8] sm:$0xff]  ;;  %v5041_v47 = vunpack.c.l.bf16 %v3631_v20  ;;  %v5046_v53 = vunpack.c.h.bf16 %v3631_v20  ;;  %s5294_s17 = sld [smem:[#allocation2 + $0x111]] }
  0x32   :  { %7625 = vst [vmem:[#allocation27_spill] sm:$0xff] %v4978_v16  ;;  %7626 = vst [vmem:[#allocation28_spill] sm:$0xff] %v4980_v17  ;;  %v3649_v48 = vld [vmem:[%s7475_s2 + $0xf0] sm:$0xff]  ;;  %v5048_v54 = vunpack.c.l.bf16 %v3633_v21  ;;  %v5050_v59 = vunpack.c.h.bf16 %v3633_v21  ;;  %v4561_v1 = vld [vmem:[%s7476_s3 + $0x178] sm:$0xff]   ;;  %s5298_s18 = sld [smem:[#allocation2 + $0x119]] }
  0x33   :  { %4302 = vmatpush3.bf16.msra.mxu0 %v4551_v22  ;;  %7627 = vst [vmem:[#allocation29_spill] sm:$0xff] %v4982_v18  ;;  %7628 = vst [vmem:[#allocation30_spill] sm:$0xff] %v4984_v19  ;;  %v3635_v22 = vld [vmem:[%s7475_s2 + $0xb8] sm:$0xff] }
  0x34   :  { %4324 = vmatpush3.bf16.msra.mxu1 %v4552_v23  ;;  %4303 = vmatprep.subr.bf16.mxu0 %v4553_v24  ;;  %v4997_v23 = vunpack.c.h.bf16 %v3619_v2  ;;  %v4999_v24 = vunpack.c.l.bf16 %v3621_v7  ;;  %7635 = vst [vmem:[#allocation37_spill] sm:$0xff] %v5020_v32  ;;  %7636 = vst [vmem:[#allocation38_spill] sm:$0xff] %v5022_v33  ;;  %v5052_v60 = vunpack.c.l.bf16 %v3635_v22  ;;  %v4562_v2 = vld [vmem:[%s7476_s3 + $0x1f8] sm:$0xff]  }
  0x35   :  { %4325 = vmatprep.subr.bf16.mxu1 %v4554_v25  ;;  %v5001_v25 = vunpack.c.h.bf16 %v3621_v7  ;;  %7637 = vst [vmem:[#allocation39_spill] sm:$0xff] %v5035_v37  ;;  %7638 = vst [vmem:[#allocation40_spill] sm:$0xff] %v5037_v41  ;;  %v5062_v7 = vunpack.c.h.bf16 %v3635_v22  ;;  %v3651_v15 = vld [vmem:[%s7475_s2 + $0xf8] sm:$0xff]  ;;  %v3653_v22 = vld [vmem:[%s7475_s2 + $0x100] sm:$0xff] }
  0x36   :  { %7629 = vst [vmem:[#allocation31_spill] sm:$0xff] %v4997_v23  ;;  %7630 = vst [vmem:[#allocation32_spill] sm:$0xff] %v4999_v24 }
  0x37   :  { %4304 = vmatpush3.bf16.msra.mxu0 %v4555_v26  ;;  %7631 = vst [vmem:[#allocation33_spill] sm:$0xff] %v5001_v25  ;;  %v5003_v26 = vunpack.c.l.bf16 %v3623_v8  ;;  %7639 = vst [vmem:[#allocation41_spill] sm:$0xff] %v5039_v42 }
  0x38   :  { %4326 = vmatpush3.bf16.msra.mxu1 %v4556_v27  ;;  %4305 = vmatprep.subr.bf16.mxu0 %v4557_v28  ;;  %v3637_v27 = vld [vmem:[%s7475_s2 + $0xc0] sm:$0xff]  ;;  %v3639_v28 = vld [vmem:[%s7475_s2 + $0xc8] sm:$0xff]  ;;  %7640 = vst [vmem:[#allocation42_spill] sm:$0xff] %v5041_v47  ;;  %7641 = vst [vmem:[#allocation43_spill] sm:$0xff] %v5046_v53 }
  0x39   :  { %4327 = vmatprep.subr.bf16.mxu1 %v4558_v29  ;;  %7632 = vst [vmem:[#allocation34_spill] sm:$0xff] %v5003_v26  ;;  %v3641_v29 = vld [vmem:[%s7475_s2 + $0xd0] sm:$0xff]  ;;  %7642 = vst [vmem:[#allocation44_spill] sm:$0xff] %v5048_v54  ;;  %v5068_v14 = vunpack.c.l.bf16 %v3639_v28  ;;  %v5073_v20 = vunpack.c.h.bf16 %v3639_v28  ;;  %v5089_v28 = vunpack.c.h.bf16 %v3643_v34 }
  0x3a   :  { %7643 = vst [vmem:[#allocation45_spill] sm:$0xff] %v5050_v59  ;;  %7644 = vst [vmem:[#allocation46_spill] sm:$0xff] %v5052_v60  ;;  %v5075_v21 = vunpack.c.l.bf16 %v3641_v29  ;;  %v5077_v60 = vunpack.c.h.bf16 %v3641_v29  ;;  %v5079_v59 = vunpack.c.l.bf16 %v3643_v34  ;;  %v5093_v29 = vunpack.c.h.bf16 %v3645_v35 }
  0x3b   :  { %4306 = vmatpush3.bf16.msra.mxu0 %v4559_v30  ;;  %v5016_v30 = vunpack.c.h.bf16 %v3623_v8  ;;  %7645 = vst [vmem:[#allocation47_spill] sm:$0xff] %v5062_v7  ;;  %v5064_v8 = vunpack.c.l.bf16 %v3637_v27  ;;  %7648 = vst [vmem:[#allocation50_spill] sm:$0xff] %v5068_v14  ;;  %v5105_v34 = vunpack.c.l.bf16 %v3651_v15 }
  0x3c   :  { %4328 = vmatpush3.bf16.msra.mxu1 %v4560_v31  ;;  %v5018_v31 = vunpack.c.l.bf16 %v3625_v13  ;;  %v5066_v13 = vunpack.c.h.bf16 %v3637_v27  ;;  %7649 = vst [vmem:[#allocation51_spill] sm:$0xff] %v5073_v20  ;;  %7650 = vst [vmem:[#allocation52_spill] sm:$0xff] %v5075_v21  ;;  %v3655_v27 = vld [vmem:[%s7475_s2 + $0x108] sm:$0xff]  ;;  %4335 = vmatprep.subr.bf16.mxu0 %v4561_v1  ;;  %v5091_v21 = vunpack.c.l.bf16 %v3645_v35  ;;  %v5101_v20 = vunpack.c.l.bf16 %v3649_v48 }
  0x3d   :  { %7633 = vst [vmem:[#allocation35_spill] sm:$0xff] %v5016_v30  ;;  %7646 = vst [vmem:[#allocation48_spill] sm:$0xff] %v5064_v8  ;;  %4357 = vmatprep.subr.bf16.mxu1 %v4562_v2  ;;  %v5103_v1 = vunpack.c.h.bf16 %v3649_v48  ;;  %v5109_v2 = vunpack.c.h.bf16 %v3651_v15  ;;  %v5111_v35 = vunpack.c.l.bf16 %v3653_v22  ;;  %v458_v48 = vstv %s4957_s26  ;;  %s5141_s26 = sld [smem:[#allocation2 + $0x61]] }
  0x3e   :  { %7634 = vst [vmem:[#allocation36_spill] sm:$0xff] %v5018_v31  ;;  %7647 = vst [vmem:[#allocation49_spill] sm:$0xff] %v5066_v13  ;;  %v459_v15 = vmul.f32 %v458_v48, %v4875_v38  ;;  %v5147_v38 = vunpack.c.h.bf16 %v3655_v27 }
  0x3f   :  { %7651 = vst [vmem:[#allocation53_spill] sm:$0xff] %v5077_v60  ;;  %7652 = vst [vmem:[#allocation54_spill] sm:$0xff] %v5079_v59  ;;  %v5095_v59 = vunpack.c.l.bf16 %v3647_v36  ;;  %v5099_v60 = vunpack.c.h.bf16 %v3647_v36  ;;  %v3657_v36 = vld [vmem:[%s7475_s2 + $0x110] sm:$0xff] }
  0x40   :  { %7653 = vst [vmem:[#allocation55_spill] sm:$0xff] %v5089_v28  ;;  %7654 = vst [vmem:[#allocation56_spill] sm:$0xff] %v5091_v21  ;;  %v5149_v28 = vunpack.c.l.bf16 %v3657_v36 }
  0x41   :  { %7655 = vst [vmem:[#allocation57_spill] sm:$0xff] %v5093_v29  ;;  %7656 = vst [vmem:[#allocation58_spill] sm:$0xff] %v5095_v59  ;;  %v5113_v29 = vunpack.c.h.bf16 %v3653_v22  ;;  %v5115_v59 = vunpack.c.l.bf16 %v3655_v27  ;;  %v460_v22 = vmul.f32 %v458_v48, %v4877_v39  ;;  %v488_v39 = vstv %s5054_s15  ;;  %s5176_s15 = sld [smem:[#allocation2 + $0x91]] }
  0x42   :  { %7657 = vst [vmem:[#allocation59_spill] sm:$0xff] %v5099_v60  ;;  %7658 = vst [vmem:[#allocation60_spill] sm:$0xff] %v5101_v20  ;;  %v470_v20 = vstv %s4995_s0  ;;  %s5157_s0 = sld [smem:[#allocation2 + $0x79]] }
  0x43   :  { %7659 = vst [vmem:[#allocation61_spill] sm:$0xff] %v5103_v1  ;;  %7660 = vst [vmem:[#allocation62_spill] sm:$0xff] %v5105_v34  ;;  %v464_v1 = vstv %s4976_s12  ;;  %v476_v34 = vstv %s5014_s24  ;;  %v472_v60 = vmul.f32 %v470_v20, %v4891_v45  ;;  %s5145_s12 = sld [smem:[#allocation2 + $0x69]] }
  0x44   :  { %7661 = vst [vmem:[#allocation63_spill] sm:$0xff] %v5109_v2  ;;  %7662 = vst [vmem:[#allocation64_spill] sm:$0xff] %v5111_v35  ;;  %v3659_v35 = vld [vmem:[%s7475_s2 + $0x118] sm:$0xff]  ;;  %v471_v2 = vmul.f32 %v470_v20, %v4889_v44  ;;  %v477_v21 = vmul.f32 %v476_v34, %v4893_v46  ;;  %v478_v48 = vmul.f32 %v476_v34, %v4901_v49  ;;  %s5153_s2 = sld [smem:[#allocation2 + $0x71]] }
  0x45   :  { %7663 = vst [vmem:[#allocation65_spill] sm:$0xff] %v5113_v29  ;;  %7664 = vst [vmem:[#allocation66_spill] sm:$0xff] %v5115_v59  ;;  %v465_v59 = vmul.f32 %v464_v1, %v4879_v40  ;;  %v466_v29 = vmul.f32 %v464_v1, %v4887_v43  ;;  %v482_v43 = vstv %s5033_s11  ;;  %v5161_v27 = vunpack.c.l.bf16 %v3659_v35  ;;  %s5165_s24 = sld [smem:[#allocation2 + $0x81]] }
  0x46   :  { %7665 = vst [vmem:[#allocation67_spill] sm:$0xff] %v5147_v38  ;;  %7666 = vst [vmem:[#allocation68_spill] sm:$0xff] %v5149_v28  ;;  %v483_v20 = vmul.f32 %v482_v43, %v4903_v50  ;;  %v484_v46 = vmul.f32 %v482_v43, %v4905_v51  ;;  %v490_v28 = vmul.f32 %v488_v39, %v4915_v55  ;;  %s5169_s11 = sld [smem:[#allocation2 + $0x89]] }
  0x47   :  { %v467_v40 = vadd.f32 %v465_v59, %v459_v15  ;;  %v468_v1 = vadd.f32 %v466_v29, %v460_v22  ;;  %v494_v59 = vstv %s5087_s27  ;;  %v500_v29 = vstv %s5097_s28  ;;  %7668 = vst [vmem:[#allocation70_spill] sm:$0xff] %v5161_v27  ;;  %s5222_s27 = sld [smem:[#allocation2 + $0xd1]] }
  0x48   :  { %v5159_v15 = vunpack.c.h.bf16 %v3657_v36  ;;  %v489_v22 = vmul.f32 %v488_v39, %v4907_v52  ;;  %v495_v36 = vmul.f32 %v494_v59, %v4917_v56  ;;  %v501_v27 = vmul.f32 %v500_v29, %v4921_v58  ;;  %s5226_s28 = sld [smem:[#allocation2 + $0xd9]] }
  0x49   :  { %v473_v34 = vadd.f32 %v471_v2, %v467_v40  ;;  %v474_v49 = vadd.f32 %v472_v60, %v468_v1  ;;  %v506_v40 = vstv %s5107_s29  ;;  %v512_v60 = vstv %s5120_s13  ;;  %s5240_s29 = sld [smem:[#allocation2 + $0xe1]] }
  0x4a   :  { %7667 = vst [vmem:[#allocation69_spill] sm:$0xff] %v5159_v15  ;;  %v5171_v2 = vunpack.c.h.bf16 %v3659_v35  ;;  %v496_v1 = vmul.f32 %v494_v59, %v4919_v57  ;;  %v507_v35 = vmul.f32 %v506_v40, %v4931_v62  ;;  %v513_v59 = vmul.f32 %v512_v60, %v4935_v0  ;;  %s5262_s13 = sld [smem:[#allocation2 + $0xf9]] }
  0x4b   :  { %v479_v43 = vadd.f32 %v477_v21, %v473_v34  ;;  %v480_v51 = vadd.f32 %v478_v48, %v474_v49  ;;  %v518_v21 = vstv %s5126_s14  ;;  %v524_v49 = vstv %s5132_s16  ;;  %s5276_s14 = sld [smem:[#allocation2 + $0x101]] }
  0x4c   :  { %7669 = vst [vmem:[#allocation71_spill] sm:$0xff] %v5171_v2  ;;  %v502_v48 = vmul.f32 %v500_v29, %v4929_v61  ;;  %v508_v34 = vmul.f32 %v506_v40, %v4933_v63  ;;  %v519_v29 = vmul.f32 %v518_v21, %v4945_v4  ;;  %v525_v40 = vmul.f32 %v524_v49, %v4949_v6  ;;  %s5280_s16 = sld [smem:[#allocation2 + $0x109]] }
  0x4d   :  { %v485_v39 = vadd.f32 %v483_v20, %v479_v43  ;;  %v486_v15 = vadd.f32 %v484_v46, %v480_v51  ;;  %v530_v20 = vstv %s5141_s26  ;;  %v536_v46 = vstv %s5145_s12  ;;  %s5312_s26 = sld [smem:[#allocation2]] }
  0x4e   :  { %v514_v51 = vmul.f32 %v512_v60, %v4943_v3  ;;  %v520_v43 = vmul.f32 %v518_v21, %v4947_v5  ;;  %v531_v60 = vmul.f32 %v530_v20, %v4961_v10  ;;  %v537_v21 = vmul.f32 %v536_v46, %v4965_v12  ;;  %s5316_s12 = sld [smem:[#allocation2 + $0x8]] }
  0x4f   :  { %v491_v2 = vadd.f32 %v489_v22, %v485_v39  ;;  %v492_v58 = vadd.f32 %v490_v28, %v486_v15  ;;  %v542_v22 = vstv %s5153_s2  ;;  %v548_v28 = vstv %s5157_s0  ;;  %s5330_s2 = sld [smem:[#allocation2 + $0x10]] }
  0x50   :  { %v526_v15 = vmul.f32 %v524_v49, %v4959_v9  ;;  %v532_v39 = vmul.f32 %v530_v20, %v4963_v11  ;;  %v5217_v49 = vmul.f32 %v542_v22, %v4982_v18  ;;  %v5220_v20 = vmul.f32 %v548_v28, %v4984_v19  ;;  %s5336_s0 = sld [smem:[#allocation2 + $0x18]] }
  0x51   :  { %v497_v0 = vadd.f32 %v495_v36, %v491_v2  ;;  %v498_v63 = vadd.f32 %v496_v1, %v492_v58  ;;  %v554_v2 = vstv %s5165_s24  ;;  %v560_v58 = vstv %s5169_s11  ;;  %s5350_s24 = sld [smem:[#allocation2 + $0x20]] }
  0x52   :  { %v538_v36 = vmul.f32 %v536_v46, %v4978_v16  ;;  %v5214_v1 = vmul.f32 %v542_v22, %v4980_v17  ;;  %v5229_v46 = vmul.f32 %v548_v28, %v4997_v23  ;;  %v5232_v17 = vmul.f32 %v554_v2, %v4999_v24  ;;  %s5356_s11 = sld [smem:[#allocation2 + $0x28]] }
  0x53   :  { %v503_v6 = vadd.f32 %v501_v27, %v497_v0  ;;  %v504_v5 = vadd.f32 %v502_v48, %v498_v63  ;;  %v566_v27 = vstv %s5176_s15  ;;  %v572_v48 = vstv %s5180_s1  ;;  %s5370_s15 = sld [smem:[#allocation2 + $0x30]] }
  0x54   :  { %v5235_v22 = vmul.f32 %v554_v2, %v5001_v25  ;;  %v5238_v19 = vmul.f32 %v560_v58, %v5003_v26  ;;  %v5247_v28 = vmul.f32 %v560_v58, %v5016_v30  ;;  %v5250_v24 = vmul.f32 %v566_v27, %v5018_v31  ;;  %v7683_v25 = vld [vmem:[#allocation62_spill] sm:$0xff]  ;;  %s5380_s1 = sld [smem:[#allocation2 + $0x38]] }
  0x55   :  { %v509_v63 = vadd.f32 %v507_v35, %v503_v6  ;;  %v510_v0 = vadd.f32 %v508_v34, %v504_v5  ;;  %v578_v35 = vstv %s5186_s19  ;;  %v584_v34 = vstv %s5190_s20  ;;  %s5392_s19 = sld [smem:[#allocation2 + $0x40]] }
  0x56   :  { %v5253_v2 = vmul.f32 %v566_v27, %v5020_v32  ;;  %v5256_v26 = vmul.f32 %v572_v48, %v5022_v33  ;;  %v5265_v58 = vmul.f32 %v572_v48, %v5035_v37  ;;  %v5268_v31 = vmul.f32 %v578_v35, %v5037_v41  ;;  %s5412_s20 = sld [smem:[#allocation2 + $0x48]] }
  0x57   :  { %v515_v5 = vadd.f32 %v513_v59, %v509_v63  ;;  %v516_v6 = vadd.f32 %v514_v51, %v510_v0  ;;  %v590_v63 = vstv %s5196_s21  ;;  %v596_v0 = vstv %s5200_s22  ;;  %s5418_s21 = sld [smem:[#allocation2 + $0x50]] }
  0x58   :  { %v5271_v27 = vmul.f32 %v578_v35, %v5039_v42  ;;  %v5274_v33 = vmul.f32 %v584_v34, %v5041_v47  ;;  %v5283_v48 = vmul.f32 %v584_v34, %v5046_v53  ;;  %v5286_v41 = vmul.f32 %v590_v63, %v5048_v54  ;;  %v7670_v35 = vld [vmem:[#allocation45_spill] sm:$0xff]  ;;  %v7671_v47 = vld [vmem:[#allocation46_spill] sm:$0xff]  ;;  %s5426_s22 = sld [smem:[#allocation2 + $0x58]] }
  0x59   :  { %v521_v59 = vadd.f32 %v519_v29, %v515_v5  ;;  %v522_v51 = vadd.f32 %v520_v43, %v516_v6  ;;  %v602_v5 = vstv %s5206_s23  ;;  %v608_v6 = vstv %s5210_s25  ;;  %s5434_s23 = sld [smem:[#allocation2 + $0x60]] }
  0x5a   :  { %v5289_v42 = vmul.f32 %v590_v63, %v7670_v35  ;;  %v5292_v37 = vmul.f32 %v596_v0, %v7671_v47  ;;  %v5301_v34 = vmul.f32 %v596_v0, %v5062_v7  ;;  %v5304_v54 = vmul.f32 %v602_v5, %v5064_v8  ;;  %v7672_v0 = vld [vmem:[#allocation51_spill] sm:$0xff]  ;;  %v7673_v8 = vld [vmem:[#allocation52_spill] sm:$0xff]  ;;  %s5438_s25 = sld [smem:[#allocation2 + $0x68]] }
  0x5b   :  { %v527_v29 = vadd.f32 %v525_v40, %v521_v59  ;;  %v528_v43 = vadd.f32 %v526_v15, %v522_v51  ;;  %v614_v59 = vstv %s5222_s27  ;;  %v620_v51 = vstv %s5226_s28  ;;  %s5448_s27 = sld [smem:[#allocation2 + $0x70]] }
  0x5c   :  { %v5307_v63 = vmul.f32 %v602_v5, %v5066_v13  ;;  %v5310_v47 = vmul.f32 %v608_v6, %v5068_v14  ;;  %v5319_v7 = vmul.f32 %v608_v6, %v7672_v0  ;;  %v5322_v35 = vmul.f32 %v614_v59, %v7673_v8  ;;  %v7674_v5 = vld [vmem:[#allocation53_spill] sm:$0xff]  ;;  %v7675_v14 = vld [vmem:[#allocation54_spill] sm:$0xff]  ;;  %v7677_v0 = vld [vmem:[#allocation56_spill] sm:$0xff]  ;;  %s5452_s28 = sld [smem:[#allocation4 + $0x1]] }
  0x5d   :  { %v533_v40 = vadd.f32 %v531_v60, %v527_v29  ;;  %v534_v15 = vadd.f32 %v532_v39, %v528_v43  ;;  %v626_v29 = vstv %s5240_s29  ;;  %v632_v43 = vstv %s5244_s30  ;;  %s5458_s29 = sld [smem:[#allocation2 + $0x78]] }
  0x5e   :  { %v5325_v13 = vmul.f32 %v614_v59, %v7674_v5  ;;  %v5328_v53 = vmul.f32 %v620_v51, %v7675_v14  ;;  %v644_v6 = vstv %s5262_s13  ;;  %v5342_v59 = vmul.f32 %v626_v29, %v7677_v0  ;;  %v7678_v5 = vld [vmem:[#allocation57_spill] sm:$0xff]  ;;  %v7679_v14 = vld [vmem:[#allocation58_spill] sm:$0xff]  ;;  %s5470_s30 = sld [smem:[#allocation2 + $0x80]] }
  0x5f   :  { %v539_v60 = vadd.f32 %v537_v21, %v533_v40  ;;  %v540_v39 = vadd.f32 %v538_v36, %v534_v15  ;;  %v638_v40 = vstv %s5258_s10  ;;  %v7676_v15 = vld [vmem:[#allocation55_spill] sm:$0xff]  ;;  %v5345_v32 = vmul.f32 %v626_v29, %v7678_v5  ;;  %v7682_v5 = vld [vmem:[#allocation61_spill] sm:$0xff]  ;;  %s5474_s10 = sld [smem:[#allocation2 + $0x88]] }
  0x60   :  { %v5339_v8 = vmul.f32 %v620_v51, %v7676_v15  ;;  %v5348_v30 = vmul.f32 %v632_v43, %v7679_v14  ;;  %v7680_v51 = vld [vmem:[#allocation59_spill] sm:$0xff]  ;;  %v7681_v15 = vld [vmem:[#allocation60_spill] sm:$0xff]  ;;  %v5365_v14 = vmul.f32 %v638_v40, %v7682_v5  ;;  %s5484_s13 = sld [smem:[#allocation2 + $0x90]] }
  0x61   :  { %v545_v21 = vadd.f32 %v5214_v1, %v539_v60  ;;  %v546_v36 = vadd.f32 %v5217_v49, %v540_v39  ;;  %v650_v60 = vstv %s5276_s14  ;;  %v656_v39 = vstv %s5280_s16  ;;  %s5492_s14 = sld [smem:[#allocation2 + $0x98]] }
  0x62   :  { %v5359_v0 = vmul.f32 %v632_v43, %v7680_v51  ;;  %v5362_v29 = vmul.f32 %v638_v40, %v7681_v15  ;;  %v7685_v43 = vld [vmem:[#allocation63_spill] sm:$0xff]  ;;  %v7687_v15 = vld [vmem:[#allocation64_spill] sm:$0xff]  ;;  %v7689_v40 = vld [vmem:[#allocation65_spill] sm:$0xff]  ;;  %s5500_s16 = sld [smem:[#allocation2 + $0xa0]] }
  0x63   :  { %v551_v1 = vadd.f32 %v5220_v20, %v545_v21  ;;  %v552_v49 = vadd.f32 %v5229_v46, %v546_v36  ;;  %v5368_v20 = vmul.f32 %v644_v6, %v7683_v25  ;;  %v5375_v36 = vmul.f32 %v644_v6, %v7685_v43  ;;  %v7691_v25 = vld [vmem:[#allocation66_spill] sm:$0xff]  ;;  %v7694_v43 = vld [vmem:[#allocation8_spill] sm:$0xff] }
  0x64   :  { %v5378_v51 = vmul.f32 %v650_v60, %v7687_v15  ;;  %v5383_v5 = vmul.f32 %v650_v60, %v7689_v40  ;;  %v62_v15 = vstv %s5312_s26  ;;  %v7695_v40 = vld [vmem:[#allocation9_spill] sm:$0xff]  ;;  %s5518_s26 = sld [smem:[#allocation2 + $0xb8]] }
  0x65   :  { %7684 = vst [vmem:[#allocation72_spill] sm:$0xff] %v5368_v20  ;;  %v557_v46 = vadd.f32 %v5232_v17, %v551_v1  ;;  %v558_v21 = vadd.f32 %v5235_v22, %v552_v49  ;;  %7686 = vst [vmem:[#allocation73_spill] sm:$0xff] %v5375_v36  ;;  %v5386_v20 = vmul.f32 %v656_v39, %v7691_v25  ;;  %v662_v1 = vstv %s5294_s17  ;;  %v7697_v36 = vld [vmem:[#allocation11_spill] sm:$0xff]  ;;  %s5504_s17 = sld [smem:[#allocation2 + $0xa8]] }
  0x66   :  { %7688 = vst [vmem:[#allocation74_spill] sm:$0xff] %v5378_v51  ;;  %7690 = vst [vmem:[#allocation75_spill] sm:$0xff] %v5383_v5  ;;  %v5389_v17 = vmul.f32 %v656_v39, %v5147_v38  ;;  %v63_v60 = vmul.f32 %v62_v15, %v7694_v43  ;;  %v64_v5 = vmul.f32 %v62_v15, %v7695_v40  ;;  %v72_v25 = vstv %s5316_s12  ;;  %s5526_s12 = sld [smem:[#allocation2 + $0xc0]] }
  0x67   :  { %7692 = vst [vmem:[#allocation76_spill] sm:$0xff] %v5386_v20  ;;  %v563_v22 = vadd.f32 %v5238_v19, %v557_v46  ;;  %v564_v6 = vadd.f32 %v5247_v28, %v558_v21  ;;  %v82_v20 = vstv %s5330_s2  ;;  %v74_v23 = vmul.f32 %v72_v25, %v7697_v36  ;;  %s5534_s2 = sld [smem:[#allocation2 + $0xc8]] }
  0x68   :  { %7693 = vst [vmem:[#allocation77_spill] sm:$0xff] %v5389_v17  ;;  %v7696_v17 = vld [vmem:[#allocation10_spill] sm:$0xff]  ;;  %v83_v19 = vmul.f32 %v82_v20, %v4889_v44  ;;  %v84_v28 = vmul.f32 %v82_v20, %v4891_v45  ;;  %v92_v46 = vstv %s5336_s0  ;;  %v102_v21 = vstv %s5350_s24  ;;  %v7700_v45 = vld [vmem:[#allocation17_spill] sm:$0xff]  ;;  %s5538_s0 = sld [smem:[#allocation2 + $0xd0]] }
  0x69   :  { %v569_v39 = vadd.f32 %v5250_v24, %v563_v22  ;;  %v570_v38 = vadd.f32 %v5253_v2, %v564_v6  ;;  %v73_v51 = vmul.f32 %v72_v25, %v7696_v17  ;;  %v76_v2 = vadd.f32 %v74_v23, %v64_v5  ;;  %v7698_v22 = vld [vmem:[#allocation14_spill] sm:$0xff]  ;;  %v7699_v6 = vld [vmem:[#allocation15_spill] sm:$0xff]  ;;  %s5544_s24 = sld [smem:[#allocation2 + $0xd8]] }
  0x6a   :  { %v93_v25 = vmul.f32 %v92_v46, %v7698_v22  ;;  %v94_v44 = vmul.f32 %v92_v46, %v7699_v6  ;;  %v103_v20 = vmul.f32 %v102_v21, %v4903_v50  ;;  %v104_v36 = vmul.f32 %v102_v21, %v7700_v45 }
  0x6b   :  { %v575_v15 = vadd.f32 %v5256_v26, %v569_v39  ;;  %v576_v49 = vadd.f32 %v5265_v58, %v570_v38  ;;  %v75_v24 = vadd.f32 %v73_v51, %v63_v60  ;;  %v86_v58 = vadd.f32 %v84_v28, %v76_v2 }
  0x6c   :  { %v112_v51 = vstv %s5356_s11  ;;  %v122_v23 = vstv %s5370_s15  ;;  %v132_v5 = vstv %s5380_s1  ;;  %v142_v60 = vstv %s5392_s19  ;;  %s5548_s11 = sld [smem:[#allocation2 + $0xe0]] }
  0x6d   :  { %v581_v26 = vadd.f32 %v5268_v31, %v575_v15  ;;  %v582_v39 = vadd.f32 %v5271_v27, %v576_v49  ;;  %v85_v38 = vadd.f32 %v83_v19, %v75_v24  ;;  %v96_v21 = vadd.f32 %v94_v44, %v86_v58  ;;  %v7701_v44 = vld [vmem:[#allocation68_spill] sm:$0xff]  ;;  %v7702_v24 = vld [vmem:[#allocation69_spill] sm:$0xff]  ;;  %s5554_s15 = sld [smem:[#allocation2 + $0xe8]] }
  0x6e   :  { %v113_v45 = vmul.f32 %v112_v51, %v4907_v52  ;;  %v114_v31 = vmul.f32 %v112_v51, %v4915_v55  ;;  %v123_v27 = vmul.f32 %v122_v23, %v4917_v56  ;;  %v124_v49 = vmul.f32 %v122_v23, %v4919_v57  ;;  %s5558_s1 = sld [smem:[#allocation2 + $0xf0]] }
  0x6f   :  { %v587_v46 = vadd.f32 %v5274_v33, %v581_v26  ;;  %v588_v50 = vadd.f32 %v5283_v48, %v582_v39  ;;  %v95_v6 = vadd.f32 %v93_v25, %v85_v38  ;;  %v106_v48 = vadd.f32 %v104_v36, %v96_v21  ;;  %v7703_v25 = vld [vmem:[#allocation18_spill] sm:$0xff]  ;;  %v7707_v21 = vld [vmem:[#allocation20_spill] sm:$0xff]  ;;  %s5564_s19 = sld [smem:[#allocation2 + $0xf8]] }
  0x70   :  { %v5441_v15 = vmul.f32 %v662_v1, %v7701_v44  ;;  %v5444_v2 = vmul.f32 %v662_v1, %v7702_v24  ;;  %v133_v26 = vmul.f32 %v132_v5, %v7703_v25  ;;  %v134_v39 = vmul.f32 %v132_v5, %v4929_v61  ;;  %v7704_v1 = vld [vmem:[#allocation19_spill] sm:$0xff]  ;;  %v7705_v5 = vld [vmem:[#allocation70_spill] sm:$0xff] }
  0x71   :  { %v593_v19 = vadd.f32 %v5286_v41, %v587_v46  ;;  %v594_v28 = vadd.f32 %v5289_v42, %v588_v50  ;;  %v105_v33 = vadd.f32 %v103_v20, %v95_v6  ;;  %v116_v36 = vadd.f32 %v114_v31, %v106_v48 }
  0x72   :  { %v143_v6 = vmul.f32 %v142_v60, %v4931_v62  ;;  %v144_v20 = vmul.f32 %v142_v60, %v7704_v1  ;;  %v152_v38 = vstv %s5412_s20  ;;  %v162_v58 = vstv %s5418_s21  ;;  %s5568_s20 = sld [smem:[#allocation2 + $0x100]] }
  0x73   :  { %v599_v50 = vadd.f32 %v5292_v37, %v593_v19  ;;  %v600_v41 = vadd.f32 %v5301_v34, %v594_v28  ;;  %v115_v42 = vadd.f32 %v113_v45, %v105_v33  ;;  %v126_v23 = vadd.f32 %v124_v49, %v116_v36  ;;  %v7708_v49 = vld [vmem:[#allocation71_spill] sm:$0xff]  ;;  %s5574_s21 = sld [smem:[#allocation2 + $0x108]] }
  0x74   :  { %v7706_v46 = vstv %s5298_s18  ;;  %v153_v31 = vmul.f32 %v152_v38, %v7707_v21  ;;  %v154_v60 = vmul.f32 %v152_v38, %v4943_v3  ;;  %v172_v19 = vstv %s5426_s22  ;;  %v7711_v38 = vld [vmem:[#allocation22_spill] sm:$0xff]  ;;  %s5510_s18 = sld [smem:[#allocation2 + $0xb0]] }
  0x75   :  { %v605_v51 = vadd.f32 %v5304_v54, %v599_v50  ;;  %v606_v37 = vadd.f32 %v5307_v63, %v600_v41  ;;  %v125_v34 = vadd.f32 %v123_v27, %v115_v42  ;;  %v5465_v45 = vmul.f32 %v7706_v46, %v7705_v5  ;;  %v7710_v41 = vld [vmem:[#allocation21_spill] sm:$0xff]  ;;  %s5579_s22 = sld [smem:[#allocation2 + $0x110]] }
  0x76   :  { %v136_v27 = vadd.f32 %v134_v39, %v126_v23  ;;  %v7709_v33 = vmov %v7706_v46  ;;  %v163_v50 = vmul.f32 %v162_v58, %v4945_v4  ;;  %v164_v42 = vmul.f32 %v162_v58, %v7710_v41 }
  0x77   :  { %v611_v28 = vadd.f32 %v5310_v47, %v605_v51  ;;  %v612_v54 = vadd.f32 %v5319_v7, %v606_v37  ;;  %v135_v63 = vadd.f32 %v133_v26, %v125_v34  ;;  %v5479_v48 = vmul.f32 %v7709_v33, %v7708_v49 }
  0x78   :  { %v182_v36 = vstv %s5434_s23  ;;  %v146_v39 = vadd.f32 %v144_v20, %v136_v27  ;;  %v173_v51 = vmul.f32 %v172_v19, %v7711_v38  ;;  %v174_v37 = vmul.f32 %v172_v19, %v4959_v9  ;;  %s5586_s23 = sld [smem:[#allocation2 + $0x118]] }
  0x79   :  { %v617_v47 = vadd.f32 %v5322_v35, %v611_v28  ;;  %v618_v7 = vadd.f32 %v5325_v13, %v612_v54  ;;  %v145_v26 = vadd.f32 %v143_v6, %v135_v63  ;;  %v192_v34 = vstv %s5438_s25  ;;  %v7718_v28 = vld [vmem:[#allocation73_spill] sm:$0xff]  ;;  %s5589_s25 = sld [smem:[#allocation2 + $0x2]] }
  0x7a   :  { %v202_v23 = vstv %s5448_s27  ;;  %v156_v35 = vadd.f32 %v154_v60, %v146_v39  ;;  %v183_v13 = vmul.f32 %v182_v36, %v4961_v10  ;;  %v184_v6 = vmul.f32 %v182_v36, %v4963_v11  ;;  %v7712_v60 = vld [vmem:[#allocation28_spill] sm:$0xff]  ;;  %s5599_s27 = sld [smem:[#allocation2 + $0xa]] }
  0x7b   :  { %v623_v58 = vadd.f32 %v5328_v53, %v617_v47  ;;  %v624_v46 = vadd.f32 %v5339_v8, %v618_v7  ;;  %v155_v33 = vadd.f32 %v153_v31, %v145_v26  ;;  %v212_v20 = vstv %s5458_s29  ;;  %s5615_s29 = sld [smem:[#allocation2 + $0x1a]] }
  0x7c   :  { %v166_v63 = vadd.f32 %v164_v42, %v156_v35  ;;  %v193_v8 = vmul.f32 %v192_v34, %v4965_v12  ;;  %v194_v31 = vmul.f32 %v192_v34, %v4978_v16  ;;  %v203_v27 = vmul.f32 %v202_v23, %v7712_v60  ;;  %v7713_v42 = vld [vmem:[#allocation30_spill] sm:$0xff]  ;;  %v7714_v35 = vld [vmem:[#allocation31_spill] sm:$0xff] }
  0x7d   :  { %v629_v19 = vadd.f32 %v5342_v59, %v623_v58  ;;  %v630_v54 = vadd.f32 %v5345_v32, %v624_v46  ;;  %v165_v53 = vadd.f32 %v163_v50, %v155_v33  ;;  %v222_v36 = vstv %s5470_s30  ;;  %s5631_s30 = sld [smem:[#allocation2 + $0x22]] }
  0x7e   :  { %v176_v7 = vadd.f32 %v174_v37, %v166_v63  ;;  %v204_v50 = vmul.f32 %v202_v23, %v4982_v18  ;;  %v213_v26 = vmul.f32 %v212_v20, %v7713_v42  ;;  %v232_v39 = vstv %s5474_s10  ;;  %v7716_v37 = vld [vmem:[#allocation33_spill] sm:$0xff]  ;;  %s5645_s10 = sld [smem:[#allocation2 + $0x2a]] }
  0x7f   :  { %v635_v47 = vadd.f32 %v5348_v30, %v629_v19  ;;  %v636_v59 = vadd.f32 %v5359_v0, %v630_v54  ;;  %v175_v32 = vadd.f32 %v173_v51, %v165_v53  ;;  %v242_v58 = vstv %s5484_s13  ;;  %v7715_v0 = vld [vmem:[#allocation32_spill] sm:$0xff]  ;;  %s5866_s13 = sld [smem:[#allocation2 + $0x102]] }
  0x80   :  { %v186_v30 = vadd.f32 %v184_v6, %v176_v7  ;;  %v214_v19 = vmul.f32 %v212_v20, %v7714_v35  ;;  %v223_v51 = vmul.f32 %v222_v36, %v7715_v0  ;;  %v224_v54 = vmul.f32 %v222_v36, %v7716_v37  ;;  %v7717_v53 = vld [vmem:[#allocation72_spill] sm:$0xff]  ;;  %v7720_v6 = vld [vmem:[#allocation35_spill] sm:$0xff]  ;;  %v7722_v36 = vld [vmem:[#allocation74_spill] sm:$0xff] }
  0x81   :  { %v641_v34 = vadd.f32 %v5362_v29, %v635_v47  ;;  %v642_v46 = vadd.f32 %v5365_v14, %v636_v59  ;;  %v185_v33 = vadd.f32 %v183_v13, %v175_v32  ;;  %v252_v23 = vstv %s5492_s14  ;;  %v7719_v14 = vld [vmem:[#allocation34_spill] sm:$0xff]  ;;  %v7721_v20 = vld [vmem:[#allocation36_spill] sm:$0xff]  ;;  %v7723_v0 = vld [vmem:[#allocation75_spill] sm:$0xff]  ;;  %s5730_s14 = sld [smem:[#allocation2 + $0x6a]] }
  0x82   :  { %v196_v47 = vadd.f32 %v194_v31, %v186_v30  ;;  %v233_v13 = vmul.f32 %v232_v39, %v7719_v14  ;;  %v234_v59 = vmul.f32 %v232_v39, %v7720_v6  ;;  %v243_v32 = vmul.f32 %v242_v58, %v7721_v20  ;;  %v7725_v31 = vld [vmem:[#allocation38_spill] sm:$0xff]  ;;  %v7726_v30 = vld [vmem:[#allocation76_spill] sm:$0xff]  ;;  %v7727_v6 = vld [vmem:[#allocation77_spill] sm:$0xff] }
  0x83   :  { %v647_v63 = vadd.f32 %v7717_v53, %v641_v34  ;;  %v648_v42 = vadd.f32 %v7718_v28, %v642_v46  ;;  %v195_v29 = vadd.f32 %v193_v8, %v185_v33  ;;  %v262_v7 = vstv %s5500_s16  ;;  %v7724_v28 = vld [vmem:[#allocation37_spill] sm:$0xff]  ;;  %s5740_s16 = sld [smem:[#allocation4]] }
  0x84   :  { %v206_v53 = vadd.f32 %v204_v50, %v196_v47  ;;  %v244_v8 = vmul.f32 %v242_v58, %v7724_v28  ;;  %v253_v46 = vmul.f32 %v252_v23, %v7725_v31  ;;  %v272_v33 = vstv %s5504_s17  ;;  %v7730_v58 = vld [vmem:[#allocation41_spill] sm:$0xff]  ;;  %s5820_s17 = sld [smem:[#allocation2 + $0xd2]] }
  0x85   :  { %v653_v37 = vadd.f32 %v7722_v36, %v647_v63  ;;  %v654_v35 = vadd.f32 %v7723_v0, %v648_v42  ;;  %v205_v34 = vadd.f32 %v203_v27, %v195_v29  ;;  %v282_v39 = vstv %s5510_s18  ;;  %v7728_v27 = vld [vmem:[#allocation39_spill] sm:$0xff]  ;;  %v7729_v0 = vld [vmem:[#allocation40_spill] sm:$0xff]  ;;  %s5664_s18 = sld [smem:[#allocation2 + $0x32]] }
  0x86   :  { %v216_v42 = vadd.f32 %v214_v19, %v206_v53  ;;  %v254_v50 = vmul.f32 %v252_v23, %v7728_v27  ;;  %v263_v29 = vmul.f32 %v262_v7, %v7729_v0  ;;  %v264_v47 = vmul.f32 %v262_v7, %v7730_v58  ;;  %v7732_v23 = vld [vmem:[#allocation43_spill] sm:$0xff] }
  0x87   :  { %v659_v20 = vadd.f32 %v7726_v30, %v653_v37  ;;  %v660_v14 = vadd.f32 %v7727_v6, %v654_v35  ;;  %v215_v63 = vadd.f32 %v213_v26, %v205_v34  ;;  %v292_v36 = vstv %s5518_s26  ;;  %v7731_v35 = vld [vmem:[#allocation42_spill] sm:$0xff]  ;;  %v7733_v34 = vld [vmem:[#allocation44_spill] sm:$0xff]  ;;  %s5668_s26 = sld [smem:[#allocation2 + $0x3a]] }
  0x88   :  { %v226_v26 = vadd.f32 %v224_v54, %v216_v42  ;;  %v273_v19 = vmul.f32 %v272_v33, %v7731_v35  ;;  %v274_v6 = vmul.f32 %v272_v33, %v7732_v23  ;;  %v283_v53 = vmul.f32 %v282_v39, %v7733_v34  ;;  %v7736_v42 = vld [vmem:[#allocation47_spill] sm:$0xff] }
  0x89   :  { %v665_v31 = vadd.f32 %v5441_v15, %v659_v20  ;;  %v666_v37 = vadd.f32 %v5444_v2, %v660_v14  ;;  %v225_v30 = vadd.f32 %v223_v51, %v215_v63  ;;  %v302_v7 = vstv %s5526_s12  ;;  %v7734_v14 = vld [vmem:[#allocation45_spill] sm:$0xff]  ;;  %v7735_v63 = vld [vmem:[#allocation46_spill] sm:$0xff]  ;;  %s5917_s12 = sld [smem:[#allocation2 + $0x13]] }
  0x8a   :  { %v236_v54 = vadd.f32 %v234_v59, %v226_v26  ;;  %v284_v20 = vmul.f32 %v282_v39, %v7734_v14  ;;  %v293_v33 = vmul.f32 %v292_v36, %v7735_v63  ;;  %v294_v34 = vmul.f32 %v292_v36, %v7736_v42  ;;  %v7740_v39 = vld [vmem:[#allocation49_spill] sm:$0xff] }
  0x8b   :  { %v671_v15 = vadd.f32 %v5465_v45, %v665_v31  ;;  %v672_v2 = vadd.f32 %v5479_v48, %v666_v37  ;;  %v235_v51 = vadd.f32 %v233_v13, %v225_v30  ;;  %v312_v23 = vstv %s5534_s2  ;;  %v7739_v37 = vld [vmem:[#allocation48_spill] sm:$0xff]  ;;  %s6145_s2 = sld [smem:[#allocation2 + $0xf3]] }
  0x8c   :  { %v7737_v35 = vstv %s5452_s28  ;;  %v246_v31 = vadd.f32 %v244_v8, %v236_v54  ;;  %v322_v48 = vstv %s5538_s0  ;;  %v303_v30 = vmul.f32 %v302_v7, %v7739_v37  ;;  %s5602_s28 = sld [smem:[#allocation2 + $0x12]]  ;;  %v7747_v37 = vld [vmem:[#allocation56_spill] sm:$0xff] }
  0x8d   :  { %v676_v58 = vadd.f32 %v7737_v35, %v672_v2  ;;  %v245_v45 = vadd.f32 %v243_v32, %v235_v51  ;;  %v7738_v13 = vmov %v7737_v35  ;;  %v304_v26 = vmul.f32 %v302_v7, %v7740_v39  ;;  %v7741_v32 = vld [vmem:[#allocation50_spill] sm:$0xff]  ;;  %v7742_v2 = vld [vmem:[#allocation51_spill] sm:$0xff]  ;;  %s5679_s0 = sld [smem:[#allocation2 + $0x42]] }
  0x8e   :  { %v675_v59 = vadd.f32 %v7738_v13, %v671_v15  ;;  %v332_v63 = vstv %s5544_s24  ;;  %v256_v14 = vadd.f32 %v254_v50, %v246_v31  ;;  %v342_v35 = vstv %s5548_s11  ;;  %v7743_v15 = vld [vmem:[#allocation52_spill] sm:$0xff]  ;;  %v7744_v13 = vld [vmem:[#allocation53_spill] sm:$0xff]  ;;  %s5924_s24 = sld [smem:[#allocation2 + $0x1b]] }
  0x8f   :  { %v678_v36 = vmax.f32 %v676_v58, 0.0  ;;  %v255_v42 = vadd.f32 %v253_v46, %v245_v45  ;;  %v313_v8 = vmul.f32 %v312_v23, %v7741_v32  ;;  %v314_v51 = vmul.f32 %v312_v23, %v7742_v2  ;;  %v7745_v32 = vld [vmem:[#allocation54_spill] sm:$0xff]  ;;  %s5936_s11 = sld [smem:[#allocation2 + $0x23]] }
  0x90   :  { %v5594_v54 = vmul.f32 %v322_v48, %v7743_v15  ;;  %v5597_v7 = vmul.f32 %v322_v48, %v7744_v13  ;;  %v266_v50 = vadd.f32 %v264_v47, %v256_v14  ;;  %v352_v45 = vstv %s5554_s15  ;;  %v7746_v15 = vld [vmem:[#allocation55_spill] sm:$0xff]  ;;  %v7748_v47 = vld [vmem:[#allocation57_spill] sm:$0xff]  ;;  %s5686_s15 = sld [smem:[#allocation2 + $0x4a]] }
  0x91   :  { %v680_v58 = vpack.c.bf16 %v678_v36, %v678_v36  ;;  %v265_v46 = vadd.f32 %v263_v29, %v255_v42  ;;  %v677_v31 = vmax.f32 %v675_v59, 0.0  ;;  %v5605_v23 = vmul.f32 %v332_v63, %v7745_v32  ;;  %v7749_v42 = vld [vmem:[#allocation58_spill] sm:$0xff] }
  0x92   :  { %v5608_v2 = vmul.f32 %v332_v63, %v7746_v15  ;;  %v362_v39 = vstv %s5558_s1  ;;  %v276_v13 = vadd.f32 %v274_v6, %v266_v50  ;;  %v5612_v36 = vmul.f32 %v342_v35, %v7747_v37  ;;  %v7751_v6 = vld [vmem:[#allocation60_spill] sm:$0xff]  ;;  %v7752_v50 = vld [vmem:[#allocation61_spill] sm:$0xff]  ;;  %v7754_v37 = vld [vmem:[#allocation63_spill] sm:$0xff]  ;;  %s5775_s1 = sld [smem:[#allocation2 + $0x92]] }
  0x93   :  { %842 = vmatprep.mubr.bf16.mxu0 %v680_v58  ;;  %v275_v48 = vadd.f32 %v273_v19, %v265_v46  ;;  %v372_v29 = vstv %s5564_s19  ;;  %v5618_v14 = vmul.f32 %v342_v35, %v7748_v47  ;;  %v5621_v59 = vmul.f32 %v352_v45, %v7749_v42  ;;  %v7750_v58 = vld [vmem:[#allocation59_spill] sm:$0xff]  ;;  %v7753_v47 = vld [vmem:[#allocation62_spill] sm:$0xff]  ;;  %s5783_s19 = sld [smem:[#allocation2 + $0x9a]] }
  0x94   :  { %v382_v32 = vstv %s5568_s20  ;;  %v392_v0 = vstv %s5574_s21  ;;  %v286_v15 = vadd.f32 %v284_v20, %v276_v13  ;;  %v5626_v19 = vmul.f32 %v352_v45, %v7750_v58  ;;  %s5701_s20 = sld [smem:[#allocation2 + $0x52]] }
  0x95   :  { %v285_v63 = vadd.f32 %v283_v53, %v275_v48  ;;  %v5629_v46 = vmul.f32 %v362_v39, %v7751_v6  ;;  %v5634_v35 = vmul.f32 %v362_v39, %v7752_v50  ;;  %v5637_v42 = vmul.f32 %v372_v29, %v7753_v47  ;;  %v7755_v53 = vld [vmem:[#allocation64_spill] sm:$0xff]  ;;  %v7756_v48 = vld [vmem:[#allocation65_spill] sm:$0xff]  ;;  %v7757_v39 = vld [vmem:[#allocation66_spill] sm:$0xff]  ;;  %s5846_s21 = sld [smem:[#allocation2 + $0xea]] }
  0x96   :  { %v5640_v27 = vmul.f32 %v372_v29, %v7754_v37  ;;  %v5643_v20 = vmul.f32 %v382_v32, %v7755_v53  ;;  %v296_v45 = vadd.f32 %v294_v34, %v286_v15  ;;  %v5648_v6 = vmul.f32 %v382_v32, %v7756_v48  ;;  %v4563_v29 = vld [vmem:[%s7476_s3 + $0x138] sm:$0xff]   ;;  %v4565_v34 = vld [vmem:[%s7476_s3 + $0x170] sm:$0xff]  }
  0x97   :  { %v295_v13 = vadd.f32 %v293_v33, %v285_v63  ;;  %v5651_v50 = vmul.f32 %v392_v0, %v7757_v39  ;;  %v7758_v37 = vld [vmem:[#allocation67_spill] sm:$0xff]  ;;  %v679_v28 = vpack.c.bf16 %v677_v31, %v677_v31  ;;  %v987_v15 = vstv %s5589_s25  ;;  %s5790_s25 = sld [smem:[#allocation2 + $0xa2]] }
  0x98   :  { %v5657_v47 = vmul.f32 %v392_v0, %v7758_v37  ;;  %v306_v32 = vadd.f32 %v304_v26, %v296_v45  ;;  %v993_v63 = vstv %s5599_s27  ;;  %v4567_v0 = vld [vmem:[%s7476_s3 + $0x130] sm:$0xff]   ;;  %v988_v31 = vmul.f32 %v987_v15, %v7694_v43  ;;  %v7759_v37 = vld [vmem:[#allocation11_spill] sm:$0xff]  ;;  %v7761_v43 = vld [vmem:[#allocation13_spill] sm:$0xff]  ;;  %s5708_s27 = sld [smem:[#allocation2 + $0x5a]] }
  0x99   :  { %v305_v33 = vadd.f32 %v303_v30, %v295_v13  ;;  %843 = vmatmul.mubr.bf16.vlgmr.msra.gmra.mxu0 %v679_v28  ;;  %v989_v58 = vmul.f32 %v987_v15, %v7695_v40  ;;  %v994_v53 = vmul.f32 %v993_v63, %v7696_v17  ;;  %v995_v39 = vmul.f32 %v993_v63, %v7759_v37  ;;  %v4569_v28 = vld [vmem:[%s7476_s3 + $0x168] sm:$0xff]   ;;  %v7760_v40 = vld [vmem:[#allocation12_spill] sm:$0xff] }
  0x9a   :  { %v316_v30 = vadd.f32 %v314_v51, %v306_v32  ;;  %4336 = vmatpush3.bf16.msra.mxu0 %v4563_v29  ;;  %v999_v26 = vstv %s5602_s28  ;;  %v1005_v13 = vstv %s5615_s29  ;;  %v4571_v29 = vld [vmem:[%s7476_s3 + $0x128] sm:$0xff]   ;;  %s5716_s28 = sld [smem:[#allocation2 + $0x62]] }
  0x9b   :  { %v315_v48 = vadd.f32 %v313_v8, %v305_v33  ;;  %4337 = vmatprep.subr.bf16.mxu0 %v4565_v34  ;;  %v996_v45 = vadd.f32 %v994_v53, %v988_v31  ;;  %v997_v15 = vadd.f32 %v995_v39, %v989_v58  ;;  %v1000_v17 = vmul.f32 %v999_v26, %v7760_v40  ;;  %v7762_v33 = vld [vmem:[#allocation15_spill] sm:$0xff]  ;;  %s5801_s29 = sld [smem:[#allocation2 + $0xb2]] }
  0x9c   :  { %v1001_v63 = vmul.f32 %v999_v26, %v7761_v43  ;;  %v326_v51 = vadd.f32 %v5597_v7, %v316_v30  ;;  %v1006_v34 = vmul.f32 %v1005_v13, %v7698_v22  ;;  %v1007_v32 = vmul.f32 %v1005_v13, %v7762_v33  ;;  %v7763_v7 = vld [vmem:[#allocation16_spill] sm:$0xff]  ;;  %v7764_v30 = vld [vmem:[#allocation17_spill] sm:$0xff] }
  0x9d   :  { %v325_v8 = vadd.f32 %v5594_v54, %v315_v48  ;;  %v1002_v53 = vadd.f32 %v1000_v17, %v996_v45  ;;  %v1011_v39 = vstv %s5631_s30  ;;  %v1017_v31 = vstv %s5645_s10  ;;  %v4573_v17 = vld [vmem:[%s7476_s3 + $0x160] sm:$0xff]   ;;  %s5805_s30 = sld [smem:[#allocation2 + $0xba]] }
  0x9e   :  { %v1003_v58 = vadd.f32 %v1001_v63, %v997_v15  ;;  %v336_v54 = vadd.f32 %v5608_v2, %v326_v51  ;;  %4338 = vmatpush3.bf16.msra.mxu0 %v4567_v0  ;;  %v1012_v48 = vmul.f32 %v1011_v39, %v7763_v7  ;;  %v1013_v43 = vmul.f32 %v1011_v39, %v7764_v30  ;;  %s6090_s10 = sld [smem:[#allocation2 + $0x93]] }
  0x9f   :  { %v335_v26 = vadd.f32 %v5605_v23, %v325_v8  ;;  %4339 = vmatprep.subr.bf16.mxu0 %v4569_v28  ;;  %v1008_v13 = vadd.f32 %v1006_v34, %v1002_v53  ;;  %v1018_v15 = vmul.f32 %v1017_v31, %v4907_v52  ;;  %v1019_v23 = vmul.f32 %v1017_v31, %v4915_v55 }
  0xa0   :  { %v1009_v45 = vadd.f32 %v1007_v32, %v1003_v58  ;;  %v346_v0 = vadd.f32 %v5618_v14, %v336_v54  ;;  %v1023_v63 = vstv %s5664_s18  ;;  %v1029_v8 = vstv %s5668_s26  ;;  %v4575_v14 = vld [vmem:[%s7476_s3 + $0x120] sm:$0xff]   ;;  %v4577_v58 = vld [vmem:[%s7476_s3 + $0x158] sm:$0xff]   ;;  %s5747_s26 = sld [smem:[#allocation2 + $0x72]] }
  0xa1   :  { %v345_v2 = vadd.f32 %v5612_v36, %v335_v26  ;;  %v1014_v28 = vadd.f32 %v1012_v48, %v1008_v13  ;;  %v1024_v39 = vmul.f32 %v1023_v63, %v4917_v56  ;;  %v1025_v34 = vmul.f32 %v1023_v63, %v4919_v57  ;;  %s6110_s18 = sld [smem:[#allocation2 + $0xb3]] }
  0xa2   :  { %v1015_v51 = vadd.f32 %v1013_v43, %v1009_v45  ;;  %v356_v36 = vadd.f32 %v5626_v19, %v346_v0  ;;  %4340 = vmatpush3.bf16.msra.mxu0 %v4571_v29  ;;  %v1030_v53 = vmul.f32 %v1029_v8, %v7703_v25  ;;  %v1031_v43 = vmul.f32 %v1029_v8, %v4929_v61 }
  0xa3   :  { %v355_v32 = vadd.f32 %v5621_v59, %v345_v2  ;;  %4341 = vmatprep.subr.bf16.mxu0 %v4573_v17  ;;  %v1020_v31 = vadd.f32 %v1018_v15, %v1014_v28  ;;  %v1035_v59 = vstv %s5679_s0  ;;  %v1041_v54 = vstv %s5686_s15  ;;  %v4579_v15 = vld [vmem:[%s7476_s3 + $0x118] sm:$0xff]   ;;  %s5760_s0 = sld [smem:[#allocation2 + $0x82]] }
  0xa4   :  { %v1021_v26 = vadd.f32 %v1019_v23, %v1015_v51  ;;  %v366_v29 = vadd.f32 %v5634_v35, %v356_v36  ;;  %v7765_v48 = vstv %s5579_s22  ;;  %v1036_v0 = vmul.f32 %v1035_v59, %v4931_v62  ;;  %s5753_s22 = sld [smem:[#allocation2 + $0x7a]]  ;;  %v4581_v51 = vld [vmem:[%s7476_s3 + $0x150] sm:$0xff]  }
  0xa5   :  { %v365_v19 = vadd.f32 %v5629_v46, %v355_v32  ;;  %v403_v13 = vmul.f32 %v7765_v48, %v7701_v44  ;;  %v7766_v17 = vmov %v7765_v48  ;;  %v1026_v23 = vadd.f32 %v1024_v39, %v1020_v31  ;;  %v4583_v31 = vld [vmem:[%s7476_s3 + $0x110] sm:$0xff]   ;;  %s5771_s15 = sld [smem:[#allocation2 + $0x8a]] }
  0xa6   :  { %v404_v45 = vmul.f32 %v7766_v17, %v7702_v24  ;;  %v1027_v2 = vadd.f32 %v1025_v34, %v1021_v26  ;;  %v1037_v46 = vmul.f32 %v1035_v59, %v7704_v1  ;;  %v376_v63 = vadd.f32 %v5640_v27, %v366_v29  ;;  %4342 = vmatpush3.bf16.msra.mxu0 %v4575_v14  ;;  %v4585_v17 = vld [vmem:[%s7476_s3 + $0x148] sm:$0xff]  }
  0xa7   :  { %v375_v35 = vadd.f32 %v5637_v42, %v365_v19  ;;  %v1042_v8 = vmul.f32 %v1041_v54, %v7707_v21  ;;  %v1047_v28 = vstv %s5701_s20  ;;  %4343 = vmatprep.subr.bf16.mxu0 %v4577_v58  ;;  %v1032_v39 = vadd.f32 %v1030_v53, %v1026_v23  ;;  %s5842_s20 = sld [smem:[#allocation2 + $0xe2]] }
  0xa8   :  { %v1033_v34 = vadd.f32 %v1031_v43, %v1027_v2  ;;  %v1043_v32 = vmul.f32 %v1041_v54, %v4943_v3  ;;  %v1053_v42 = vstv %s5708_s27  ;;  %v386_v36 = vadd.f32 %v5648_v6, %v376_v63  ;;  %s6082_s27 = sld [smem:[#allocation2 + $0x8b]] }
  0xa9   :  { %v385_v27 = vadd.f32 %v5643_v20, %v375_v35  ;;  %v7767_v14 = vstv %s5586_s23  ;;  %v1048_v53 = vmul.f32 %v1047_v28, %v4945_v4  ;;  %v1038_v43 = vadd.f32 %v1036_v0, %v1032_v39  ;;  %v4587_v35 = vld [vmem:[%s7476_s3 + $0x108] sm:$0xff]   ;;  %s6076_s23 = sld [smem:[#allocation4 + $0x2]] }
  0xaa   :  { %v413_v58 = vmul.f32 %v7767_v14, %v7705_v5  ;;  %v1039_v26 = vadd.f32 %v1037_v46, %v1033_v34  ;;  %v1049_v59 = vmul.f32 %v1047_v28, %v7710_v41  ;;  %v1059_v54 = vstv %s5716_s28  ;;  %4344 = vmatpush3.bf16.msra.mxu0 %v4579_v15  ;;  %s5797_s28 = sld [smem:[#allocation2 + $0xaa]] }
  0xab   :  { %v395_v6 = vadd.f32 %v5651_v50, %v385_v27  ;;  %v396_v20 = vadd.f32 %v5657_v47, %v386_v36  ;;  %v7768_v19 = vmov %v7767_v14  ;;  %v1054_v48 = vmul.f32 %v1053_v42, %v7711_v38  ;;  %4345 = vmatprep.subr.bf16.mxu0 %v4581_v51 }
  0xac   :  { %v414_v29 = vmul.f32 %v7768_v19, %v7708_v49  ;;  %v1044_v23 = vadd.f32 %v1042_v8, %v1038_v43  ;;  %v1045_v2 = vadd.f32 %v1043_v32, %v1039_v26  ;;  %v1055_v50 = vmul.f32 %v1053_v42, %v4959_v9  ;;  %v4589_v42 = vld [vmem:[%s7476_s3 + $0x140] sm:$0xff]  }
  0xad   :  { %v1065_v0 = vstv %s5730_s14  ;;  %v405_v47 = vadd.f32 %v403_v13, %v395_v6  ;;  %v406_v15 = vadd.f32 %v404_v45, %v396_v20  ;;  %v418_v46 = vstv %s5740_s16  ;;  %s5812_s14 = sld [smem:[#allocation2 + $0xc2]]  ;;  %v7769_v6 = vld [vmem:[#allocation30_spill] sm:$0xff] }
  0xae   :  { %v1060_v63 = vmul.f32 %v1059_v54, %v4961_v10  ;;  %v1050_v28 = vadd.f32 %v1048_v53, %v1044_v23  ;;  %v1051_v8 = vadd.f32 %v1049_v59, %v1045_v2  ;;  %v1061_v51 = vmul.f32 %v1059_v54, %v4963_v11  ;;  %4346 = vmatpush3.bf16.msra.mxu0 %v4583_v31  ;;  %s5816_s16 = sld [smem:[#allocation2 + $0xca]]  ;;  %v4591_v23 = vld [vmem:[%s7476_s3 + $0x100] sm:$0xff]   ;;  %v7770_v2 = vld [vmem:[#allocation31_spill] sm:$0xff]  ;;  %v7801_v11 = vld [vmem:[#allocation62_spill] sm:$0xff] }
  0xaf   :  { %v1071_v39 = vstv %s5747_s26  ;;  %v415_v34 = vadd.f32 %v413_v58, %v405_v47  ;;  %v416_v13 = vadd.f32 %v414_v29, %v406_v15  ;;  %v1066_v45 = vmul.f32 %v1065_v0, %v4965_v12  ;;  %4347 = vmatprep.subr.bf16.mxu0 %v4585_v17  ;;  %v4564_v17 = vld [vmem:[%s7476_s3 + $0x1b8] sm:$0xff]   ;;  %s6112_s26 = sld [smem:[#allocation2 + $0xbb]] }
  0xb0   :  { %v1077_v32 = vstv %s5753_s22  ;;  %v1056_v27 = vadd.f32 %v1054_v48, %v1050_v28  ;;  %v1057_v36 = vadd.f32 %v1055_v50, %v1051_v8  ;;  %v1067_v14 = vmul.f32 %v1065_v0, %v4978_v16  ;;  %v7771_v0 = vld [vmem:[#allocation32_spill] sm:$0xff]  ;;  %v4593_v15 = vld [vmem:[%s7476_s3 + $0x278] sm:$0xff]   ;;  %s6012_s22 = sld [smem:[#allocation2 + $0x4b]] }
  0xb1   :  { %v1083_v53 = vstv %s5760_s0  ;;  %v419_v58 = vadd.f32 %v418_v46, %v415_v34  ;;  %v420_v31 = vadd.f32 %v418_v46, %v416_v13  ;;  %v1072_v43 = vmul.f32 %v1071_v39, %v7712_v60  ;;  %v4566_v46 = vld [vmem:[%s7476_s3 + $0x1f0] sm:$0xff]   ;;  %v7772_v34 = vld [vmem:[#allocation33_spill] sm:$0xff]  ;;  %v7798_v60 = vld [vmem:[#allocation59_spill] sm:$0xff]  ;;  %s6040_s0 = sld [smem:[#allocation2 + $0x63]] }
  0xb2   :  { %v1073_v26 = vmul.f32 %v1071_v39, %v4982_v18  ;;  %v1062_v59 = vadd.f32 %v1060_v63, %v1056_v27  ;;  %v1063_v54 = vadd.f32 %v1061_v51, %v1057_v36  ;;  %v1078_v20 = vmul.f32 %v1077_v32, %v7769_v6  ;;  %4348 = vmatpush3.bf16.msra.mxu0 %v4587_v35 }
  0xb3   :  { %v1089_v19 = vstv %s5771_s15  ;;  %v421_v29 = vmax.f32 %v419_v58, 0.0  ;;  %v422_v48 = vmax.f32 %v420_v31, 0.0  ;;  %v1079_v50 = vmul.f32 %v1077_v32, %v7770_v2  ;;  %4349 = vmatprep.subr.bf16.mxu0 %v4589_v42  ;;  %s5838_s15 = sld [smem:[#allocation2 + $0xda]]  ;;  %v7773_v32 = vld [vmem:[#allocation34_spill] sm:$0xff]  ;;  %v7774_v31 = vld [vmem:[#allocation35_spill] sm:$0xff] }
  0xb4   :  { %v1084_v47 = vmul.f32 %v1083_v53, %v7771_v0  ;;  %v1068_v63 = vadd.f32 %v1066_v45, %v1062_v59  ;;  %v1069_v35 = vadd.f32 %v1067_v14, %v1063_v54  ;;  %v1095_v28 = vstv %s5775_s1  ;;  %v7775_v14 = vld [vmem:[#allocation36_spill] sm:$0xff]  ;;  %v7776_v54 = vld [vmem:[#allocation37_spill] sm:$0xff]  ;;  %s5851_s1 = sld [smem:[#allocation2 + $0xf2]] }
  0xb5   :  { %v1101_v8 = vstv %s5783_s19  ;;  %v424_v51 = vpack.c.bf16 %v422_v48, %v422_v48  ;;  %v423_v39 = vpack.c.bf16 %v421_v29, %v421_v29  ;;  %v1085_v13 = vmul.f32 %v1083_v53, %v7772_v34  ;;  %v7777_v53 = vld [vmem:[#allocation38_spill] sm:$0xff]  ;;  %s5855_s19 = sld [smem:[#allocation2 + $0xfa]] }
  0xb6   :  { %v1090_v27 = vmul.f32 %v1089_v19, %v7773_v32  ;;  %v1074_v36 = vadd.f32 %v1072_v43, %v1068_v63  ;;  %v1075_v58 = vadd.f32 %v1073_v26, %v1069_v35  ;;  %v1091_v42 = vmul.f32 %v1089_v19, %v7774_v31  ;;  %4350 = vmatpush3.bf16.msra.mxu0 %v4591_v23  ;;  %v4568_v23 = vld [vmem:[%s7476_s3 + $0x1b0] sm:$0xff]   ;;  %v4570_v63 = vld [vmem:[%s7476_s3 + $0x1e8] sm:$0xff]   ;;  %v7778_v35 = vld [vmem:[#allocation39_spill] sm:$0xff] }
  0xb7   :  { %v1107_v45 = vstv %s5790_s25  ;;  %978 = vmatprep.mubr.bf16.mxu1 %v424_v51  ;;  %v1096_v59 = vmul.f32 %v1095_v28, %v7775_v14  ;;  %v1097_v29 = vmul.f32 %v1095_v28, %v7776_v54  ;;  %v1102_v48 = vmul.f32 %v1101_v8, %v7777_v53  ;;  %v7779_v51 = vld [vmem:[#allocation40_spill] sm:$0xff]  ;;  %4379 = vmatprep.subr.bf16.mxu0 %v4593_v15  ;;  %v7782_v54 = vld [vmem:[#allocation43_spill] sm:$0xff]  ;;  %v7784_v31 = vld [vmem:[#allocation45_spill] sm:$0xff]  ;;  %s5979_s25 = sld [smem:[#allocation2 + $0x43]] }
  0xb8   :  { %979 = vmatmul.mubr.bf16.vlgmr.msra.gmra.mxu1 %v423_v39  ;;  %v1080_v32 = vadd.f32 %v1078_v20, %v1074_v36  ;;  %v1081_v43 = vadd.f32 %v1079_v50, %v1075_v58  ;;  %v1113_v26 = vstv %s5797_s28  ;;  %v1119_v19 = vstv %s5801_s29  ;;  %v7780_v39 = vld [vmem:[#allocation41_spill] sm:$0xff]  ;;  %s5870_s28 = sld [smem:[#allocation2 + $0x10a]]  ;;  %v7785_v34 = vld [vmem:[#allocation46_spill] sm:$0xff] }
  0xb9   :  { %4358 = vmatpush3.bf16.msra.mxu1 %v4564_v17  ;;  %v1103_v28 = vmul.f32 %v1101_v8, %v7778_v35  ;;  %v1108_v20 = vmul.f32 %v1107_v45, %v7779_v51  ;;  %v1109_v50 = vmul.f32 %v1107_v45, %v7780_v39  ;;  %v1125_v58 = vstv %s5805_s30  ;;  %v4572_v8 = vld [vmem:[%s7476_s3 + $0x1a8] sm:$0xff]   ;;  %v7781_v35 = vld [vmem:[#allocation42_spill] sm:$0xff]  ;;  %v7783_v39 = vld [vmem:[#allocation44_spill] sm:$0xff]  ;;  %s5896_s30 = sld [smem:[#allocation2 + $0x3]] }
  0xba   :  { %4359 = vmatprep.subr.bf16.mxu1 %v4566_v46  ;;  %v1086_v17 = vadd.f32 %v1084_v47, %v1080_v32  ;;  %v1087_v36 = vadd.f32 %v1085_v13, %v1081_v43  ;;  %v1131_v53 = vstv %s5812_s14  ;;  %v1114_v51 = vmul.f32 %v1113_v26, %v7781_v35  ;;  %v4574_v47 = vld [vmem:[%s7476_s3 + $0x1e0] sm:$0xff]   ;;  %v7786_v35 = vld [vmem:[#allocation47_spill] sm:$0xff]  ;;  %s5900_s14 = sld [smem:[#allocation2 + $0xb]] }
  0xbb   :  { %v1115_v45 = vmul.f32 %v1113_v26, %v7782_v54  ;;  %v1120_v14 = vmul.f32 %v1119_v19, %v7783_v39  ;;  %v1121_v15 = vmul.f32 %v1119_v19, %v7784_v31  ;;  %v1137_v32 = vstv %s5816_s16  ;;  %v7787_v39 = vld [vmem:[#allocation48_spill] sm:$0xff]  ;;  %v7788_v19 = vld [vmem:[#allocation49_spill] sm:$0xff]  ;;  %s6001_s29 = sld [smem:[#allocation2 + $0x11a]] }
  0xbc   :  { %v1092_v46 = vadd.f32 %v1090_v27, %v1086_v17  ;;  %v1093_v13 = vadd.f32 %v1091_v42, %v1087_v36  ;;  %v1143_v43 = vstv %s5820_s17  ;;  %v5885_v0 = vmul.f32 %v1125_v58, %v7785_v34  ;;  %v4576_v36 = vld [vmem:[%s7476_s3 + $0x1a0] sm:$0xff]   ;;  %s6029_s17 = sld [smem:[#allocation2 + $0x5b]] }
  0xbd   :  { %4360 = vmatpush3.bf16.msra.mxu1 %v4568_v23  ;;  %v5888_v26 = vmul.f32 %v1125_v58, %v7786_v35  ;;  %v5891_v54 = vmul.f32 %v1131_v53, %v7787_v39  ;;  %v5894_v31 = vmul.f32 %v1131_v53, %v7788_v19  ;;  %v1149_v23 = vstv %s5838_s15  ;;  %v7789_v58 = vld [vmem:[#allocation50_spill] sm:$0xff]  ;;  %v7790_v53 = vld [vmem:[#allocation51_spill] sm:$0xff]  ;;  %v7791_v35 = vld [vmem:[#allocation52_spill] sm:$0xff]  ;;  %s5940_s15 = sld [smem:[#allocation2 + $0x2b]] }
  0xbe   :  { %4361 = vmatprep.subr.bf16.mxu1 %v4570_v63  ;;  %v1098_v27 = vadd.f32 %v1096_v59, %v1092_v46  ;;  %v1099_v42 = vadd.f32 %v1097_v29, %v1093_v13  ;;  %v1155_v17 = vstv %s5842_s20  ;;  %v5906_v39 = vmul.f32 %v1137_v32, %v7789_v58  ;;  %v7792_v59 = vld [vmem:[#allocation53_spill] sm:$0xff]  ;;  %v4578_v46 = vld [vmem:[%s7476_s3 + $0x1d8] sm:$0xff]   ;;  %s6129_s16 = sld [smem:[#allocation2 + $0xdb]] }
  0xbf   :  { %v5909_v19 = vmul.f32 %v1137_v32, %v7790_v53  ;;  %v5912_v63 = vmul.f32 %v1143_v43, %v7791_v35  ;;  %v5915_v29 = vmul.f32 %v1143_v43, %v7792_v59  ;;  %v1161_v34 = vstv %s5846_s21  ;;  %v7793_v32 = vld [vmem:[#allocation54_spill] sm:$0xff]  ;;  %v7794_v43 = vld [vmem:[#allocation55_spill] sm:$0xff]  ;;  %v7795_v53 = vld [vmem:[#allocation56_spill] sm:$0xff]  ;;  %s6176_s20 = sld [smem:[#allocation2 + $0xc]] }
  0xc0   :  { %v1104_v13 = vadd.f32 %v1102_v48, %v1098_v27  ;;  %v1105_v58 = vadd.f32 %v1103_v28, %v1099_v42  ;;  %v1167_v2 = vstv %s5851_s1  ;;  %v5927_v35 = vmul.f32 %v1149_v23, %v7793_v32  ;;  %v7796_v32 = vld [vmem:[#allocation57_spill] sm:$0xff]  ;;  %s5957_s1 = sld [smem:[#allocation2 + $0x33]] }
  0xc1   :  { %4362 = vmatpush3.bf16.msra.mxu1 %v4572_v8  ;;  %v5930_v59 = vmul.f32 %v1149_v23, %v7794_v43  ;;  %v5933_v6 = vmul.f32 %v1155_v17, %v7795_v53  ;;  %v1173_v18 = vstv %s5855_s19  ;;  %v1179_v27 = vstv %s5866_s13  ;;  %v4580_v8 = vld [vmem:[%s7476_s3 + $0x198] sm:$0xff]   ;;  %v7797_v43 = vld [vmem:[#allocation58_spill] sm:$0xff]  ;;  %s5965_s19 = sld [smem:[#allocation2 + $0x3b]] }
  0xc2   :  { %4363 = vmatprep.subr.bf16.mxu1 %v4574_v47  ;;  %v1110_v48 = vadd.f32 %v1108_v20, %v1104_v13  ;;  %v1111_v28 = vadd.f32 %v1109_v50, %v1105_v58  ;;  %v1185_v42 = vstv %s5870_s28  ;;  %v5946_v23 = vmul.f32 %v1155_v17, %v7796_v32  ;;  %v7799_v47 = vld [vmem:[#allocation60_spill] sm:$0xff]  ;;  %v7800_v13 = vld [vmem:[#allocation61_spill] sm:$0xff]  ;;  %s5997_s28 = sld [smem:[#allocation2 + $0x112]] }
  0xc3   :  { %v5949_v53 = vmul.f32 %v1161_v34, %v7797_v43  ;;  %v5952_v16 = vmul.f32 %v1161_v34, %v7798_v60  ;;  %v5955_v20 = vmul.f32 %v1167_v2, %v7799_v47  ;;  %v5960_v12 = vmul.f32 %v1167_v2, %v7800_v13  ;;  %v7802_v34 = vld [vmem:[#allocation63_spill] sm:$0xff]  ;;  %v7803_v47 = vld [vmem:[#allocation64_spill] sm:$0xff]  ;;  %v7809_v13 = vld [vmem:[#allocation9_spill] sm:$0xff]  ;;  %s6094_s13 = sld [smem:[#allocation2 + $0x9b]] }
  0xc4   :  { %v1116_v50 = vadd.f32 %v1114_v51, %v1110_v48  ;;  %v1117_v58 = vadd.f32 %v1115_v45, %v1111_v28  ;;  %v5963_v17 = vmul.f32 %v1173_v18, %v7801_v11  ;;  %v5968_v60 = vmul.f32 %v1173_v18, %v7802_v34  ;;  %v7804_v51 = vld [vmem:[#allocation65_spill] sm:$0xff]  ;;  %v7805_v45 = vld [vmem:[#allocation66_spill] sm:$0xff]  ;;  %v7807_v18 = vld [vmem:[#allocation67_spill] sm:$0xff]  ;;  %s6180_s21 = sld [smem:[#allocation2 + $0x14]] }
  0xc5   :  { %4364 = vmatpush3.bf16.msra.mxu1 %v4576_v36  ;;  %v5971_v43 = vmul.f32 %v1179_v27, %v7803_v47  ;;  %v5974_v48 = vmul.f32 %v1179_v27, %v7804_v51  ;;  %v5977_v2 = vmul.f32 %v1185_v42, %v7805_v45  ;;  %v4582_v36 = vld [vmem:[%s7476_s3 + $0x1d0] sm:$0xff]   ;;  %v5985_v34 = vmul.f32 %v1185_v42, %v7807_v18  ;;  %v7808_v45 = vld [vmem:[#allocation8_spill] sm:$0xff] }
  0xc6   :  { %4365 = vmatprep.subr.bf16.mxu1 %v4578_v46  ;;  %v1122_v28 = vadd.f32 %v1120_v14, %v1116_v50  ;;  %v1123_v11 = vadd.f32 %v1121_v15, %v1117_v58  ;;  %v1381_v47 = vstv %s5896_s30  ;;  %v4584_v27 = vld [vmem:[%s7476_s3 + $0x190] sm:$0xff]   ;;  %v1387_v32 = vstv %s5900_s14  ;;  %s6018_s30 = sld [smem:[#allocation2 + $0x53]] }
  0xc7   :  { %7806 = vst [vmem:[#allocation69_spill] sm:$0xff] %v5977_v2  ;;  %v1382_v51 = vmul.f32 %v1381_v47, %v7808_v45  ;;  %v1383_v46 = vmul.f32 %v1381_v47, %v7809_v13  ;;  %v1393_v2 = vstv %s5917_s12  ;;  %v7810_v15 = vld [vmem:[#allocation10_spill] sm:$0xff]  ;;  %v1389_v50 = vmul.f32 %v1387_v32, %v7759_v37  ;;  %v7811_v45 = vld [vmem:[#allocation13_spill] sm:$0xff]  ;;  %s6126_s14 = sld [smem:[#allocation2 + $0xd3]] }
  0xc8   :  { %v1128_v10 = vadd.f32 %v5885_v0, %v1122_v28  ;;  %v1129_v14 = vadd.f32 %v5888_v26, %v1123_v11  ;;  %v1388_v42 = vmul.f32 %v1387_v32, %v7810_v15  ;;  %v1394_v58 = vmul.f32 %v1393_v2, %v7760_v40  ;;  %v4586_v11 = vld [vmem:[%s7476_s3 + $0x1c8] sm:$0xff]   ;;  %s6139_s12 = sld [smem:[#allocation2 + $0xeb]] }
  0xc9   :  { %4366 = vmatpush3.bf16.msra.mxu1 %v4580_v8  ;;  %v1395_v18 = vmul.f32 %v1393_v2, %v7811_v45  ;;  %v1399_v47 = vstv %s5924_s24  ;;  %v1405_v13 = vstv %s5936_s11  ;;  %v1391_v8 = vadd.f32 %v1389_v50, %v1383_v46  ;;  %s6154_s24 = sld [smem:[#allocation2 + $0x103]] }
  0xca   :  { %4367 = vmatprep.subr.bf16.mxu1 %v4582_v36  ;;  %v1134_v0 = vadd.f32 %v5891_v54, %v1128_v10  ;;  %v1135_v26 = vadd.f32 %v5894_v31, %v1129_v14  ;;  %v1390_v32 = vadd.f32 %v1388_v42, %v1382_v51  ;;  %v1400_v2 = vmul.f32 %v1399_v47, %v7698_v22  ;;  %v4588_v10 = vld [vmem:[%s7476_s3 + $0x188] sm:$0xff]   ;;  %s6158_s11 = sld [smem:[#allocation2 + $0x10b]] }
  0xcb   :  { %v1401_v36 = vmul.f32 %v1399_v47, %v7762_v33  ;;  %v1406_v28 = vmul.f32 %v1405_v13, %v7763_v7  ;;  %v1407_v45 = vmul.f32 %v1405_v13, %v7764_v30  ;;  %v1397_v46 = vadd.f32 %v1395_v18, %v1391_v8  ;;  %v4590_v13 = vld [vmem:[%s7476_s3 + $0x1c0] sm:$0xff]  }
  0xcc   :  { %v1140_v31 = vadd.f32 %v5906_v39, %v1134_v0  ;;  %v1141_v54 = vadd.f32 %v5909_v19, %v1135_v26  ;;  %v1396_v51 = vadd.f32 %v1394_v58, %v1390_v32  ;;  %v1411_v14 = vstv %s5940_s15  ;;  %s6051_s15 = sld [smem:[#allocation2 + $0x6b]] }
  0xcd   :  { %4368 = vmatpush3.bf16.msra.mxu1 %v4584_v27  ;;  %v1417_v42 = vstv %s5957_s1  ;;  %v1423_v50 = vstv %s5965_s19  ;;  %v1429_v47 = vstv %s5979_s25  ;;  %v1403_v18 = vadd.f32 %v1401_v36, %v1397_v46  ;;  %s6062_s1 = sld [smem:[#allocation2 + $0x73]] }
  0xce   :  { %4369 = vmatprep.subr.bf16.mxu1 %v4586_v11  ;;  %v1146_v30 = vadd.f32 %v5912_v63, %v1140_v31  ;;  %v1147_v39 = vadd.f32 %v5915_v29, %v1141_v54  ;;  %v1402_v19 = vadd.f32 %v1400_v2, %v1396_v51  ;;  %v1412_v27 = vmul.f32 %v1411_v14, %v4907_v52  ;;  %v4592_v29 = vld [vmem:[%s7476_s3 + $0x180] sm:$0xff]   ;;  %s6066_s19 = sld [smem:[#allocation2 + $0x7b]] }
  0xcf   :  { %v1413_v58 = vmul.f32 %v1411_v14, %v4915_v55  ;;  %v1418_v0 = vmul.f32 %v1417_v42, %v4917_v56  ;;  %v1419_v11 = vmul.f32 %v1417_v42, %v4919_v57  ;;  %v1409_v8 = vadd.f32 %v1407_v45, %v1403_v18  ;;  %s6072_s25 = sld [smem:[#allocation2 + $0x83]] }
  0xd0   :  { %v1152_v26 = vadd.f32 %v5927_v35, %v1146_v30  ;;  %v1153_v32 = vadd.f32 %v5930_v59, %v1147_v39  ;;  %v1408_v63 = vadd.f32 %v1406_v28, %v1402_v19  ;;  %v1191_v2 = vstv %s5997_s28  ;;  %v4594_v28 = vld [vmem:[%s7476_s3 + $0x2f8] sm:$0xff]   ;;  %s6100_s28 = sld [smem:[#allocation2 + $0xa3]] }
  0xd1   :  { %4370 = vmatpush3.bf16.msra.mxu1 %v4588_v10  ;;  %v1197_v36 = vstv %s6001_s29  ;;  %v1424_v31 = vmul.f32 %v1423_v50, %v7703_v25  ;;  %v1425_v54 = vmul.f32 %v1423_v50, %v4929_v61  ;;  %v1415_v45 = vadd.f32 %v1413_v58, %v1409_v8  ;;  %s6104_s29 = sld [smem:[#allocation2 + $0xab]] }
  0xd2   :  { %4371 = vmatprep.subr.bf16.mxu1 %v4590_v13  ;;  %v1158_v30 = vadd.f32 %v5933_v6, %v1152_v26  ;;  %v1159_v35 = vadd.f32 %v5946_v23, %v1153_v32  ;;  %v1414_v59 = vadd.f32 %v1412_v27, %v1408_v63  ;;  %v1430_v10 = vmul.f32 %v1429_v47, %v4931_v62 }
  0xd3   :  { %v1431_v51 = vmul.f32 %v1429_v47, %v7704_v1  ;;  %v1435_v46 = vstv %s6012_s22  ;;  %v1441_v14 = vstv %s6018_s30  ;;  %v1421_v50 = vadd.f32 %v1419_v11, %v1415_v45  ;;  %s6118_s22 = sld [smem:[#allocation2 + $0xc3]] }
  0xd4   :  { %v1164_v42 = vadd.f32 %v5949_v53, %v1158_v30  ;;  %v1165_v6 = vadd.f32 %v5952_v16, %v1159_v35  ;;  %v1420_v23 = vadd.f32 %v1418_v0, %v1414_v59  ;;  %v1192_v13 = vmul.f32 %v1191_v2, %v7701_v44  ;;  %v7812_v59 = vld [vmem:[#allocation24_spill] sm:$0xff]  ;;  %s6120_s30 = sld [smem:[#allocation2 + $0xcb]] }
  0xd5   :  { %4372 = vmatpush3.bf16.msra.mxu1 %v4592_v29  ;;  %v1436_v39 = vmul.f32 %v1435_v46, %v7707_v21  ;;  %v1437_v47 = vmul.f32 %v1435_v46, %v4943_v3  ;;  %v1447_v19 = vstv %s6029_s17  ;;  %v1427_v27 = vadd.f32 %v1425_v54, %v1421_v50  ;;  %v7814_v46 = vld [vmem:[#allocation69_spill] sm:$0xff]  ;;  %s6136_s17 = sld [smem:[#allocation2 + $0xe3]] }
  0xd6   :  { %v1170_v18 = vadd.f32 %v5955_v20, %v1164_v42  ;;  %v1171_v53 = vadd.f32 %v5960_v12, %v1165_v6  ;;  %v1426_v16 = vadd.f32 %v1424_v31, %v1420_v23  ;;  %4401 = vmatprep.subr.bf16.mxu1 %v4594_v28  ;;  %v1193_v58 = vmul.f32 %v1191_v2, %v7702_v24  ;;  %v7813_v28 = vld [vmem:[#allocation25_spill] sm:$0xff]  ;;  %v7815_v6 = vld [vmem:[#allocation26_spill] sm:$0xff] }
  0xd7   :  { %v1442_v0 = vmul.f32 %v1441_v14, %v4945_v4  ;;  %v1443_v11 = vmul.f32 %v1441_v14, %v7710_v41  ;;  %v1453_v26 = vstv %s6040_s0  ;;  %v1433_v63 = vadd.f32 %v1431_v51, %v1427_v27  ;;  %v7817_v27 = vld [vmem:[#allocation28_spill] sm:$0xff]  ;;  %s6148_s0 = sld [smem:[#allocation2 + $0xfb]] }
  0xd8   :  { %v1176_v32 = vadd.f32 %v5963_v17, %v1170_v18  ;;  %v1177_v20 = vadd.f32 %v5968_v60, %v1171_v53  ;;  %v1432_v12 = vadd.f32 %v1430_v10, %v1426_v16  ;;  %v1198_v8 = vmul.f32 %v1197_v36, %v7705_v5 }
  0xd9   :  { %v1448_v29 = vmul.f32 %v1447_v19, %v7711_v38  ;;  %v1449_v2 = vmul.f32 %v1447_v19, %v4959_v9  ;;  %v1459_v31 = vstv %s6051_s15  ;;  %v1439_v60 = vadd.f32 %v1437_v47, %v1433_v63  ;;  %s6166_s15 = sld [smem:[#allocation2 + $0x4]] }
  0xda   :  { %v1182_v54 = vadd.f32 %v5971_v43, %v1176_v32  ;;  %v1183_v30 = vadd.f32 %v5974_v48, %v1177_v20  ;;  %v1438_v17 = vadd.f32 %v1436_v39, %v1432_v12  ;;  %v1199_v35 = vmul.f32 %v1197_v36, %v7708_v49  ;;  %v7816_v36 = vld [vmem:[#allocation27_spill] sm:$0xff] }
  0xdb   :  { %v1454_v45 = vmul.f32 %v1453_v26, %v7812_v59  ;;  %v1455_v10 = vmul.f32 %v1453_v26, %v7813_v28  ;;  %v1465_v51 = vstv %s6062_s1  ;;  %v1445_v42 = vadd.f32 %v1443_v11, %v1439_v60  ;;  %v7818_v11 = vld [vmem:[#allocation29_spill] sm:$0xff]  ;;  %s6194_s1 = sld [smem:[#allocation2 + $0x1c]] }
  0xdc   :  { %v1188_v43 = vadd.f32 %v7814_v46, %v1182_v54  ;;  %v1189_v48 = vadd.f32 %v5985_v34, %v1183_v30  ;;  %v1444_v14 = vadd.f32 %v1442_v0, %v1438_v17  ;;  %v1460_v23 = vmul.f32 %v1459_v31, %v7815_v6  ;;  %v7821_v54 = vld [vmem:[#allocation32_spill] sm:$0xff] }
  0xdd   :  { %v1461_v50 = vmul.f32 %v1459_v31, %v7816_v36  ;;  %v1471_v39 = vstv %s6066_s19  ;;  %v1477_v47 = vstv %s6072_s25  ;;  %v1451_v16 = vadd.f32 %v1449_v2, %v1445_v42  ;;  %v7820_v2 = vld [vmem:[#allocation31_spill] sm:$0xff]  ;;  %s6208_s19 = sld [smem:[#allocation2 + $0x113]] }
  0xde   :  { %v1194_v19 = vadd.f32 %v1192_v13, %v1188_v43  ;;  %v1195_v18 = vadd.f32 %v1193_v58, %v1189_v48  ;;  %v1450_v53 = vadd.f32 %v1448_v29, %v1444_v14  ;;  %v1203_v34 = vstv %s6076_s23  ;;  %v7819_v58 = vld [vmem:[#allocation30_spill] sm:$0xff]  ;;  %s6212_s25 = sld [smem:[#allocation2 + $0x24]]  ;;  %v7856_v36 = vld [vmem:[#allocation67_spill] sm:$0xff] }
  0xdf   :  { %v1466_v0 = vmul.f32 %v1465_v51, %v7817_v27  ;;  %v1467_v26 = vmul.f32 %v1465_v51, %v7818_v11  ;;  %v1483_v32 = vstv %s6082_s27  ;;  %v1457_v13 = vadd.f32 %v1455_v10, %v1451_v16  ;;  %v7823_v43 = vld [vmem:[#allocation34_spill] sm:$0xff]  ;;  %v7826_v16 = vld [vmem:[#allocation37_spill] sm:$0xff]  ;;  %s6226_s23 = sld [smem:[#allocation2 + $0x2c]] }
  0xe0   :  { %v1200_v20 = vadd.f32 %v1198_v8, %v1194_v19  ;;  %v1201_v12 = vadd.f32 %v1199_v35, %v1195_v18  ;;  %v1456_v63 = vadd.f32 %v1454_v45, %v1450_v53  ;;  %v1472_v29 = vmul.f32 %v1471_v39, %v7819_v58  ;;  %v7822_v45 = vld [vmem:[#allocation33_spill] sm:$0xff]  ;;  %v7824_v18 = vld [vmem:[#allocation35_spill] sm:$0xff]  ;;  %s6234_s27 = sld [smem:[#allocation2 + $0x11b]] }
  0xe1   :  { %v1473_v31 = vmul.f32 %v1471_v39, %v7820_v2  ;;  %v1478_v30 = vmul.f32 %v1477_v47, %v7821_v54  ;;  %v1489_v17 = vstv %s6090_s10  ;;  %v1463_v46 = vadd.f32 %v1461_v50, %v1457_v13  ;;  %v7825_v50 = vld [vmem:[#allocation36_spill] sm:$0xff]  ;;  %v7844_v2 = vld [vmem:[#allocation55_spill] sm:$0xff]  ;;  %s6336_s10 = sld [smem:[#allocation2 + $0x6c]] }
  0xe2   :  { %v1205_v60 = vadd.f32 %v1203_v34, %v1201_v12  ;;  %v1462_v51 = vadd.f32 %v1460_v23, %v1456_v63  ;;  %v1495_v8 = vstv %s6094_s13  ;;  %v6131_v35 = vadd.f32 %v1203_v34, %v1200_v20  ;;  %v7827_v20 = vld [vmem:[#allocation38_spill] sm:$0xff]  ;;  %v7837_v54 = vld [vmem:[#allocation48_spill] sm:$0xff]  ;;  %s6340_s13 = sld [smem:[#allocation2 + $0x74]] }
  0xe3   :  { %v1479_v10 = vmul.f32 %v1477_v47, %v7822_v45  ;;  %v1484_v48 = vmul.f32 %v1483_v32, %v7823_v43  ;;  %v1501_v14 = vstv %s6100_s28  ;;  %v1469_v19 = vadd.f32 %v1467_v26, %v1463_v46  ;;  %v7829_v46 = vld [vmem:[#allocation40_spill] sm:$0xff]  ;;  %v7832_v26 = vld [vmem:[#allocation43_spill] sm:$0xff]  ;;  %s6426_s28 = sld [smem:[#allocation2 + $0xcc]] }
  0xe4   :  { %v1207_v42 = vmax.f32 %v1205_v60, 0.0  ;;  %v1468_v39 = vadd.f32 %v1466_v0, %v1462_v51  ;;  %v1485_v23 = vmul.f32 %v1483_v32, %v7824_v18  ;;  %v1490_v53 = vmul.f32 %v1489_v17, %v7825_v50  ;;  %v7828_v32 = vld [vmem:[#allocation39_spill] sm:$0xff]  ;;  %v7834_v18 = vld [vmem:[#allocation45_spill] sm:$0xff] }
  0xe5   :  { %v1491_v34 = vmul.f32 %v1489_v17, %v7826_v16  ;;  %v1496_v12 = vmul.f32 %v1495_v8, %v7827_v20  ;;  %v1507_v47 = vstv %s6104_s29  ;;  %v1475_v60 = vadd.f32 %v1473_v31, %v1469_v19  ;;  %v7830_v16 = vld [vmem:[#allocation41_spill] sm:$0xff]  ;;  %s6430_s29 = sld [smem:[#allocation2 + $0xd4]] }
  0xe6   :  { %v1209_v63 = vpack.c.bf16 %v1207_v42, %v1207_v42  ;;  %v1474_v13 = vadd.f32 %v1472_v29, %v1468_v39  ;;  %v1513_v0 = vstv %s6110_s18  ;;  %v1497_v51 = vmul.f32 %v1495_v8, %v7828_v32  ;;  %v7831_v39 = vld [vmem:[#allocation42_spill] sm:$0xff]  ;;  %v7833_v32 = vld [vmem:[#allocation44_spill] sm:$0xff]  ;;  %s6260_s18 = sld [smem:[#allocation2 + $0x34]] }
  0xe7   :  { %v1502_v17 = vmul.f32 %v1501_v14, %v7829_v46  ;;  %v1503_v20 = vmul.f32 %v1501_v14, %v7830_v16  ;;  %v1481_v42 = vadd.f32 %v1479_v10, %v1475_v60  ;;  %v1519_v29 = vstv %s6112_s26  ;;  %s6266_s26 = sld [smem:[#allocation2 + $0x3c]] }
  0xe8   :  { %1371 = vmatprep.mubr.bf16.mxu0 %v1209_v63  ;;  %v1480_v50 = vadd.f32 %v1478_v30, %v1474_v13  ;;  %v1525_v31 = vstv %s6118_s22  ;;  %v1508_v19 = vmul.f32 %v1507_v47, %v7831_v39  ;;  %v1509_v8 = vmul.f32 %v1507_v47, %v7832_v26  ;;  %v7835_v30 = vld [vmem:[#allocation46_spill] sm:$0xff]  ;;  %v7836_v13 = vld [vmem:[#allocation47_spill] sm:$0xff]  ;;  %v7838_v47 = vld [vmem:[#allocation49_spill] sm:$0xff]  ;;  %s6437_s22 = sld [smem:[#allocation2 + $0xdc]] }
  0xe9   :  { %v1514_v46 = vmul.f32 %v1513_v0, %v7833_v32  ;;  %v1515_v43 = vmul.f32 %v1513_v0, %v7834_v18  ;;  %v1487_v16 = vadd.f32 %v1485_v23, %v1481_v42  ;;  %v1531_v45 = vstv %s6120_s30  ;;  %v7839_v42 = vld [vmem:[#allocation50_spill] sm:$0xff]  ;;  %s6364_s30 = sld [smem:[#allocation2 + $0x84]] }
  0xea   :  { %v1486_v14 = vadd.f32 %v1484_v48, %v1480_v50  ;;  %v1537_v63 = vstv %s6126_s14  ;;  %v1520_v10 = vmul.f32 %v1519_v29, %v7835_v30  ;;  %v1521_v60 = vmul.f32 %v1519_v29, %v7836_v13  ;;  %v7840_v29 = vld [vmem:[#allocation51_spill] sm:$0xff]  ;;  %v7841_v13 = vld [vmem:[#allocation52_spill] sm:$0xff]  ;;  %v7843_v32 = vld [vmem:[#allocation54_spill] sm:$0xff]  ;;  %s6277_s14 = sld [smem:[#allocation2 + $0x44]] }
  0xeb   :  { %v6171_v39 = vmul.f32 %v1525_v31, %v7837_v54  ;;  %v6174_v26 = vmul.f32 %v1525_v31, %v7838_v47  ;;  %v1493_v23 = vadd.f32 %v1491_v34, %v1487_v16  ;;  %v1543_v50 = vstv %s6129_s16  ;;  %v7842_v47 = vld [vmem:[#allocation53_spill] sm:$0xff]  ;;  %s6566_s16 = sld [smem:[#allocation2 + $0x35]] }
  0xec   :  { %v1492_v48 = vadd.f32 %v1490_v53, %v1486_v14  ;;  %v1549_v0 = vstv %s6136_s17  ;;  %v6183_v30 = vmul.f32 %v1531_v45, %v7839_v42  ;;  %v6186_v54 = vmul.f32 %v1531_v45, %v7840_v29  ;;  %v7845_v45 = vld [vmem:[#allocation56_spill] sm:$0xff]  ;;  %s6670_s17 = sld [smem:[#allocation2 + $0x75]] }
  0xed   :  { %v6189_v31 = vmul.f32 %v1537_v63, %v7841_v13  ;;  %v6192_v18 = vmul.f32 %v1537_v63, %v7842_v47  ;;  %v1499_v16 = vadd.f32 %v1497_v51, %v1493_v23  ;;  %v1555_v34 = vstv %s6139_s12  ;;  %s6288_s12 = sld [smem:[#allocation2 + $0x4c]] }
  0xee   :  { %v1498_v53 = vadd.f32 %v1496_v12, %v1492_v48  ;;  %v1561_v14 = vstv %s6145_s2  ;;  %v6199_v42 = vmul.f32 %v1543_v50, %v7843_v32  ;;  %v6202_v58 = vmul.f32 %v1543_v50, %v7844_v2  ;;  %v7846_v12 = vld [vmem:[#allocation57_spill] sm:$0xff]  ;;  %v7847_v48 = vld [vmem:[#allocation58_spill] sm:$0xff]  ;;  %v7848_v50 = vld [vmem:[#allocation59_spill] sm:$0xff]  ;;  %s6578_s2 = sld [smem:[#allocation2 + $0x114]] }
  0xef   :  { %v6205_v29 = vmul.f32 %v1549_v0, %v7845_v45  ;;  %v1567_v13 = vstv %s6148_s0  ;;  %v1505_v47 = vadd.f32 %v1503_v20, %v1499_v16  ;;  %v1573_v11 = vstv %s6154_s24  ;;  %v7849_v45 = vld [vmem:[#allocation60_spill] sm:$0xff]  ;;  %s6299_s24 = sld [smem:[#allocation2 + $0x54]] }
  0xf0   :  { %v1504_v63 = vadd.f32 %v1502_v17, %v1498_v53  ;;  %v1579_v27 = vstv %s6158_s11  ;;  %v6215_v51 = vmul.f32 %v1549_v0, %v7846_v12  ;;  %v6218_v23 = vmul.f32 %v1555_v34, %v7847_v48  ;;  %v7850_v53 = vld [vmem:[#allocation61_spill] sm:$0xff]  ;;  %v7851_v0 = vld [vmem:[#allocation62_spill] sm:$0xff]  ;;  %s6394_s11 = sld [smem:[#allocation2 + $0xa4]] }
  0xf1   :  { %v6221_v2 = vmul.f32 %v1555_v34, %v7848_v50  ;;  %v6224_v32 = vmul.f32 %v1561_v14, %v7849_v45  ;;  %v1511_v20 = vadd.f32 %v1509_v8, %v1505_v47  ;;  %v6229_v16 = vmul.f32 %v1561_v14, %v7850_v53  ;;  %v7852_v34 = vld [vmem:[#allocation63_spill] sm:$0xff]  ;;  %v7853_v45 = vld [vmem:[#allocation64_spill] sm:$0xff]  ;;  %v7855_v8 = vld [vmem:[#allocation66_spill] sm:$0xff]  ;;  %s6589_s0 = sld [smem:[#allocation2 + $0x11c]] }
  0xf2   :  { %v1510_v17 = vadd.f32 %v1508_v19, %v1504_v63  ;;  %v6232_v12 = vmul.f32 %v1567_v13, %v7851_v0  ;;  %v6237_v50 = vmul.f32 %v1567_v13, %v7852_v34  ;;  %v6240_v48 = vmul.f32 %v1573_v11, %v7853_v45  ;;  %v7854_v19 = vld [vmem:[#allocation65_spill] sm:$0xff]  ;;  %v4595_v14 = vld [vmem:[%s7476_s3 + $0x238] sm:$0xff]  }
  0xf3   :  { %v6243_v63 = vmul.f32 %v1573_v11, %v7854_v19  ;;  %v6246_v47 = vmul.f32 %v1579_v27, %v7855_v8  ;;  %v1517_v53 = vadd.f32 %v1515_v43, %v1511_v20  ;;  %v6252_v6 = vmul.f32 %v1579_v27, %v7856_v36  ;;  %v4597_v11 = vld [vmem:[%s7476_s3 + $0x270] sm:$0xff]   ;;  %v7859_v27 = vld [vmem:[#allocation8_spill] sm:$0xff] }
  0xf4   :  { %v1516_v0 = vadd.f32 %v1514_v46, %v1510_v17  ;;  %v7858_v13 = vmax.f32 %v6131_v35, 0.0  ;;  %v1775_v8 = vstv %s6166_s15  ;;  %v1781_v19 = vstv %s6176_s20  ;;  %v7860_v35 = vld [vmem:[#allocation9_spill] sm:$0xff]  ;;  %s6310_s20 = sld [smem:[#allocation2 + $0x5c]] }
  0xf5   :  { %7857 = vst [vmem:[#allocation18_spill] sm:$0xff] %v6252_v6  ;;  %v1787_v34 = vstv %s6180_s21  ;;  %v1793_v28 = vstv %s6194_s1  ;;  %v1523_v46 = vadd.f32 %v1521_v60, %v1517_v53  ;;  %v1776_v17 = vmul.f32 %v1775_v8, %v7859_v27  ;;  %s6317_s21 = sld [smem:[#allocation4 + $0x3]] }
  0xf6   :  { %v1208_v45 = vpack.c.bf16 %v7858_v13, %v7858_v13  ;;  %v1522_v43 = vadd.f32 %v1520_v10, %v1516_v0  ;;  %v1777_v20 = vmul.f32 %v1775_v8, %v7860_v35  ;;  %v4599_v13 = vld [vmem:[%s7476_s3 + $0x230] sm:$0xff]   ;;  %v1782_v36 = vmul.f32 %v1781_v19, %v7810_v15  ;;  %v7861_v10 = vld [vmem:[#allocation13_spill] sm:$0xff]  ;;  %s6471_s15 = sld [smem:[#allocation2 + $0x10c]] }
  0xf7   :  { %v1783_v59 = vmul.f32 %v1781_v19, %v7759_v37  ;;  %v1788_v6 = vmul.f32 %v1787_v34, %v7760_v40  ;;  %v1789_v60 = vmul.f32 %v1787_v34, %v7861_v10  ;;  %v1529_v53 = vadd.f32 %v6174_v26, %v1523_v46  ;;  %v4601_v0 = vld [vmem:[%s7476_s3 + $0x268] sm:$0xff]   ;;  %s6486_s1 = sld [smem:[#allocation2 + $0x5]] }
  0xf8   :  { %1372 = vmatmul.mubr.bf16.vlgmr.msra.gmra.mxu0 %v1208_v45  ;;  %v1528_v45 = vadd.f32 %v6171_v39, %v1522_v43  ;;  %v1794_v8 = vmul.f32 %v1793_v28, %v7698_v22  ;;  %v1795_v19 = vmul.f32 %v1793_v28, %v7762_v33  ;;  %v1799_v37 = vstv %s6212_s25  ;;  %v4603_v43 = vld [vmem:[%s7476_s3 + $0x228] sm:$0xff]   ;;  %s6325_s25 = sld [smem:[#allocation2 + $0x64]] }
  0xf9   :  { %4380 = vmatpush3.bf16.msra.mxu0 %v4595_v14  ;;  %v1784_v14 = vadd.f32 %v1782_v36, %v1776_v17  ;;  %v1785_v40 = vadd.f32 %v1783_v59, %v1777_v20  ;;  %v1805_v34 = vstv %s6226_s23  ;;  %v1535_v26 = vadd.f32 %v6186_v54, %v1529_v53  ;;  %v7862_v46 = vld [vmem:[#allocation17_spill] sm:$0xff]  ;;  %v4605_v20 = vld [vmem:[%s7476_s3 + $0x260] sm:$0xff]   ;;  %s6414_s23 = sld [smem:[#allocation2 + $0xbc]] }
  0xfa   :  { %4381 = vmatprep.subr.bf16.mxu0 %v4597_v11  ;;  %v1534_v10 = vadd.f32 %v6183_v30, %v1528_v45  ;;  %v1585_v39 = vstv %s6208_s19  ;;  %v1591_v11 = vstv %s6234_s27  ;;  %v1800_v59 = vmul.f32 %v1799_v37, %v7763_v7  ;;  %s6419_s27 = sld [smem:[#allocation2 + $0xc4]] }
  0xfb   :  { %v1790_v28 = vadd.f32 %v1788_v6, %v1784_v14  ;;  %v1791_v36 = vadd.f32 %v1789_v60, %v1785_v40  ;;  %v1801_v17 = vmul.f32 %v1799_v37, %v7862_v46  ;;  %v1541_v54 = vadd.f32 %v6192_v18, %v1535_v26  ;;  %s6618_s19 = sld [smem:[#allocation2 + $0x4d]] }
  0xfc   :  { %v1540_v30 = vadd.f32 %v6189_v31, %v1534_v10  ;;  %v1811_v45 = vstv %s6260_s18  ;;  %v1807_v60 = vmul.f32 %v1805_v34, %v4915_v55  ;;  %v1817_v37 = vstv %s6266_s26  ;;  %s6353_s18 = sld [smem:[#allocation2 + $0x7c]] }
  0xfd   :  { %4382 = vmatpush3.bf16.msra.mxu0 %v4599_v13  ;;  %v1806_v13 = vmul.f32 %v1805_v34, %v4907_v52  ;;  %v1796_v40 = vadd.f32 %v1794_v8, %v1790_v28  ;;  %v1797_v6 = vadd.f32 %v1795_v19, %v1791_v36  ;;  %v1547_v18 = vadd.f32 %v6202_v58, %v1541_v54  ;;  %s6651_s26 = sld [smem:[#allocation2 + $0x65]] }
  0xfe   :  { %4383 = vmatprep.subr.bf16.mxu0 %v4601_v0  ;;  %v1546_v31 = vadd.f32 %v6199_v42, %v1540_v30  ;;  %v6315_v10 = vmul.f32 %v1585_v39, %v7701_v44  ;;  %v1812_v53 = vmul.f32 %v1811_v45, %v4917_v56  ;;  %v4607_v0 = vld [vmem:[%s7476_s3 + $0x220] sm:$0xff]   ;;  %v1813_v14 = vmul.f32 %v1811_v45, %v4919_v57 }
  0xff   :  { %v1802_v8 = vadd.f32 %v1800_v59, %v1796_v40  ;;  %v1803_v19 = vadd.f32 %v1801_v17, %v1797_v6  ;;  %v1823_v42 = vstv %s6277_s14  ;;  %v1553_v34 = vadd.f32 %v6215_v51, %v1547_v18  ;;  %s6370_s14 = sld [smem:[#allocation2 + $0x8c]] }
 0x100   :  { %v1552_v58 = vadd.f32 %v6205_v29, %v1546_v31  ;;  %v6330_v26 = vmul.f32 %v1585_v39, %v7702_v24  ;;  %v1818_v28 = vmul.f32 %v1817_v37, %v7703_v25  ;;  %v1819_v17 = vmul.f32 %v1817_v37, %v4929_v61  ;;  %v4613_v37 = vld [vmem:[%s7476_s3 + $0x250] sm:$0xff]  }
 0x101   :  { %4384 = vmatpush3.bf16.msra.mxu0 %v4603_v43  ;;  %v4609_v43 = vld [vmem:[%s7476_s3 + $0x258] sm:$0xff]   ;;  %v1808_v36 = vadd.f32 %v1806_v13, %v1802_v8  ;;  %v1809_v59 = vadd.f32 %v1807_v60, %v1803_v19  ;;  %v1829_v29 = vstv %s6288_s12  ;;  %v1559_v39 = vadd.f32 %v6221_v2, %v1553_v34  ;;  %s6377_s12 = sld [smem:[#allocation2 + $0x94]] }
 0x102   :  { %4385 = vmatprep.subr.bf16.mxu0 %v4605_v20  ;;  %v1558_v51 = vadd.f32 %v6218_v23, %v1552_v58  ;;  %v6345_v30 = vmul.f32 %v1591_v11, %v7705_v5  ;;  %v1824_v54 = vmul.f32 %v1823_v42, %v4931_v62  ;;  %v4611_v20 = vld [vmem:[%s7476_s3 + $0x218] sm:$0xff]   ;;  %v1825_v40 = vmul.f32 %v1823_v42, %v7704_v1 }
 0x103   :  { %v1814_v13 = vadd.f32 %v1812_v53, %v1808_v36  ;;  %v1815_v45 = vadd.f32 %v1813_v14, %v1809_v59  ;;  %v1835_v6 = vstv %s6299_s24  ;;  %v1565_v23 = vadd.f32 %v6229_v16, %v1559_v39  ;;  %v4615_v14 = vld [vmem:[%s7476_s3 + $0x210] sm:$0xff]   ;;  %s6388_s24 = sld [smem:[#allocation2 + $0x9c]] }
 0x104   :  { %v1564_v2 = vadd.f32 %v6224_v32, %v1558_v51  ;;  %v1593_v60 = vmul.f32 %v1591_v11, %v7708_v49  ;;  %v1830_v31 = vmul.f32 %v1829_v29, %v7707_v21  ;;  %v1841_v8 = vstv %s6310_s20  ;;  %s6605_s20 = sld [smem:[#allocation2 + $0x45]] }
 0x105   :  { %4386 = vmatpush3.bf16.msra.mxu0 %v4607_v0  ;;  %v1820_v18 = vadd.f32 %v1818_v28, %v1814_v13  ;;  %v1821_v53 = vadd.f32 %v1819_v17, %v1815_v45  ;;  %v1831_v0 = vmul.f32 %v1829_v29, %v4943_v3  ;;  %v1571_v16 = vadd.f32 %v6237_v50, %v1565_v23  ;;  %v4617_v28 = vld [vmem:[%s7476_s3 + $0x248] sm:$0xff]  }
 0x106   :  { %4387 = vmatprep.subr.bf16.mxu0 %v4609_v43  ;;  %v1570_v32 = vadd.f32 %v6232_v12, %v1564_v2  ;;  %v1597_v11 = vstv %s6317_s21  ;;  %v1836_v19 = vmul.f32 %v1835_v6, %v4945_v4  ;;  %v1837_v34 = vmul.f32 %v1835_v6, %v7710_v41  ;;  %v7865_v45 = vld [vmem:[#allocation25_spill] sm:$0xff]  ;;  %s6401_s21 = sld [smem:[#allocation2 + $0xac]] }
 0x107   :  { %v1826_v42 = vadd.f32 %v1824_v54, %v1820_v18  ;;  %v1827_v58 = vadd.f32 %v1825_v40, %v1821_v53  ;;  %v1847_v43 = vstv %s6325_s25  ;;  %v1577_v50 = vadd.f32 %v6243_v63, %v1571_v16  ;;  %v7863_v54 = vld [vmem:[#allocation18_spill] sm:$0xff]  ;;  %v4619_v6 = vld [vmem:[%s7476_s3 + $0x208] sm:$0xff]   ;;  %v7868_v16 = vld [vmem:[#allocation28_spill] sm:$0xff]  ;;  %s6410_s25 = sld [smem:[#allocation2 + $0xb4]] }
 0x108   :  { %v1576_v12 = vadd.f32 %v6240_v48, %v1570_v32  ;;  %v1842_v36 = vmul.f32 %v1841_v8, %v7711_v38  ;;  %v1853_v59 = vstv %s6336_s10  ;;  %v1843_v51 = vmul.f32 %v1841_v8, %v4959_v9  ;;  %v7867_v8 = vld [vmem:[#allocation27_spill] sm:$0xff]  ;;  %s6513_s10 = sld [smem:[#allocation2 + $0x1d]] }
 0x109   :  { %4388 = vmatpush3.bf16.msra.mxu0 %v4611_v20  ;;  %v1832_v17 = vadd.f32 %v1830_v31, %v1826_v42  ;;  %v1833_v29 = vadd.f32 %v1831_v0, %v1827_v58  ;;  %v1859_v39 = vstv %s6340_s13  ;;  %v1583_v63 = vadd.f32 %v7863_v54, %v1577_v50  ;;  %v7864_v20 = vld [vmem:[#allocation24_spill] sm:$0xff]  ;;  %v7869_v58 = vld [vmem:[#allocation29_spill] sm:$0xff]  ;;  %s6737_s13 = sld [smem:[#allocation2 + $0xcd]] }
 0x10a   :  { %4389 = vmatprep.subr.bf16.mxu0 %v4613_v37  ;;  %v1582_v48 = vadd.f32 %v6246_v47, %v1576_v12  ;;  %v1848_v13 = vmul.f32 %v1847_v43, %v7864_v20  ;;  %v1849_v40 = vmul.f32 %v1847_v43, %v7865_v45  ;;  %v7866_v37 = vld [vmem:[#allocation26_spill] sm:$0xff]  ;;  %v1865_v18 = vstv %s6353_s18  ;;  %v4621_v0 = vld [vmem:[%s7476_s3 + $0x240] sm:$0xff]   ;;  %s6753_s18 = sld [smem:[#allocation2 + $0xe5]] }
 0x10b   :  { %v1838_v2 = vadd.f32 %v1836_v19, %v1832_v17  ;;  %v1839_v23 = vadd.f32 %v1837_v34, %v1833_v29  ;;  %v1854_v31 = vmul.f32 %v1853_v59, %v7866_v37  ;;  %v1589_v53 = vadd.f32 %v6330_v26, %v1583_v63  ;;  %v7870_v12 = vld [vmem:[#allocation30_spill] sm:$0xff]  ;;  %v7871_v29 = vld [vmem:[#allocation31_spill] sm:$0xff]  ;;  %v7873_v63 = vld [vmem:[#allocation33_spill] sm:$0xff] }
 0x10c   :  { %v1588_v47 = vadd.f32 %v6315_v10, %v1582_v48  ;;  %v1855_v32 = vmul.f32 %v1853_v59, %v7867_v8  ;;  %v1860_v19 = vmul.f32 %v1859_v39, %v7868_v16  ;;  %v1861_v34 = vmul.f32 %v1859_v39, %v7869_v58  ;;  %v4623_v59 = vld [vmem:[%s7476_s3 + $0x200] sm:$0xff]   ;;  %v7898_v45 = vld [vmem:[#allocation58_spill] sm:$0xff] }
 0x10d   :  { %4390 = vmatpush3.bf16.msra.mxu0 %v4615_v14  ;;  %v1844_v14 = vadd.f32 %v1842_v36, %v1838_v2  ;;  %v1845_v42 = vadd.f32 %v1843_v51, %v1839_v23  ;;  %v1871_v43 = vstv %s6364_s30  ;;  %v1595_v26 = vadd.f32 %v1593_v60, %v1589_v53  ;;  %v7872_v48 = vld [vmem:[#allocation32_spill] sm:$0xff]  ;;  %v7874_v23 = vld [vmem:[#allocation34_spill] sm:$0xff]  ;;  %s6441_s30 = sld [smem:[#allocation2 + $0xe4]] }
 0x10e   :  { %4391 = vmatprep.subr.bf16.mxu0 %v4617_v28  ;;  %v1594_v10 = vadd.f32 %v6345_v30, %v1588_v47  ;;  %v1866_v50 = vmul.f32 %v1865_v18, %v7870_v12  ;;  %v1877_v28 = vstv %s6370_s14  ;;  %v1867_v51 = vmul.f32 %v1865_v18, %v7871_v29  ;;  %s6445_s14 = sld [smem:[#allocation2 + $0xec]]  ;;  %v7895_v12 = vld [vmem:[#allocation55_spill] sm:$0xff] }
 0x10f   :  { %v1850_v36 = vadd.f32 %v1848_v13, %v1844_v14  ;;  %v1851_v17 = vadd.f32 %v1849_v40, %v1845_v42  ;;  %v1883_v39 = vstv %s6377_s12  ;;  %v1599_v60 = vadd.f32 %v1597_v11, %v1595_v26  ;;  %v4625_v13 = vld [vmem:[%s7476_s3 + $0x378] sm:$0xff]   ;;  %v7876_v42 = vld [vmem:[#allocation36_spill] sm:$0xff]  ;;  %s6452_s12 = sld [smem:[#allocation2 + $0xf4]] }
 0x110   :  { %v1598_v30 = vadd.f32 %v1597_v11, %v1594_v10  ;;  %v1872_v54 = vmul.f32 %v1871_v43, %v7872_v48  ;;  %v1873_v2 = vmul.f32 %v1871_v43, %v7873_v63  ;;  %v1878_v18 = vmul.f32 %v1877_v28, %v7874_v23 }
 0x111   :  { %4392 = vmatpush3.bf16.msra.mxu0 %v4619_v6  ;;  %v1856_v40 = vadd.f32 %v1854_v31, %v1850_v36  ;;  %v1857_v6 = vadd.f32 %v1855_v32, %v1851_v17  ;;  %v1889_v47 = vstv %s6388_s24  ;;  %v1601_v53 = vmax.f32 %v1599_v60, 0.0  ;;  %s6459_s24 = sld [smem:[#allocation2 + $0xfc]] }
 0x112   :  { %4393 = vmatprep.subr.bf16.mxu0 %v4621_v0  ;;  %v1600_v11 = vmax.f32 %v1598_v30, 0.0  ;;  %v7875_v0 = vld [vmem:[#allocation35_spill] sm:$0xff]  ;;  %v1884_v43 = vmul.f32 %v1883_v39, %v7876_v42  ;;  %v1895_v31 = vstv %s6394_s11  ;;  %v1901_v32 = vstv %s6401_s21  ;;  %v7878_v42 = vld [vmem:[#allocation38_spill] sm:$0xff]  ;;  %s6467_s11 = sld [smem:[#allocation2 + $0x104]] }
 0x113   :  { %v1879_v14 = vmul.f32 %v1877_v28, %v7875_v0  ;;  %v1862_v10 = vadd.f32 %v1860_v19, %v1856_v40  ;;  %v1863_v26 = vadd.f32 %v1861_v34, %v1857_v6  ;;  %v1603_v36 = vpack.c.bf16 %v1601_v53, %v1601_v53  ;;  %v4596_v30 = vld [vmem:[%s7476_s3 + $0x2b8] sm:$0xff]   ;;  %v7877_v28 = vld [vmem:[#allocation37_spill] sm:$0xff]  ;;  %v4598_v19 = vld [vmem:[%s7476_s3 + $0x2f0] sm:$0xff]   ;;  %s6700_s21 = sld [smem:[#allocation2 + $0x95]] }
 0x114   :  { %v1602_v17 = vpack.c.bf16 %v1600_v11, %v1600_v11  ;;  %v1885_v60 = vmul.f32 %v1883_v39, %v7877_v28  ;;  %v1890_v0 = vmul.f32 %v1889_v47, %v7878_v42  ;;  %v1907_v40 = vstv %s6410_s25  ;;  %v7879_v11 = vld [vmem:[#allocation39_spill] sm:$0xff]  ;;  %v7880_v53 = vld [vmem:[#allocation40_spill] sm:$0xff]  ;;  %v7881_v28 = vld [vmem:[#allocation41_spill] sm:$0xff]  ;;  %s6720_s25 = sld [smem:[#allocation2 + $0xad]] }
 0x115   :  { %4394 = vmatpush3.bf16.msra.mxu0 %v4623_v59  ;;  %v1868_v34 = vadd.f32 %v1866_v50, %v1862_v10  ;;  %v1869_v59 = vadd.f32 %v1867_v51, %v1863_v26  ;;  %v1913_v6 = vstv %s6414_s23  ;;  %1765 = vmatprep.mubr.bf16.mxu1 %v1603_v36  ;;  %v1891_v39 = vmul.f32 %v1889_v47, %v7879_v11  ;;  %v4600_v47 = vld [vmem:[%s7476_s3 + $0x2b0] sm:$0xff]   ;;  %v7883_v26 = vld [vmem:[#allocation43_spill] sm:$0xff]  ;;  %v7884_v36 = vld [vmem:[#allocation44_spill] sm:$0xff]  ;;  %s6493_s23 = sld [smem:[#allocation2 + $0xd]] }
 0x116   :  { %4423 = vmatprep.subr.bf16.mxu0 %v4625_v13  ;;  %v1896_v42 = vmul.f32 %v1895_v31, %v7880_v53  ;;  %v1897_v23 = vmul.f32 %v1895_v31, %v7881_v28  ;;  %v7882_v13 = vld [vmem:[#allocation42_spill] sm:$0xff]  ;;  %1766 = vmatmul.mubr.bf16.vlgmr.msra.gmra.mxu1 %v1602_v17  ;;  %v1919_v51 = vstv %s6419_s27  ;;  %v1925_v10 = vstv %s6426_s28  ;;  %v7885_v28 = vld [vmem:[#allocation45_spill] sm:$0xff]  ;;  %s6507_s27 = sld [smem:[#allocation2 + $0x15]] }
 0x117   :  { %v6465_v63 = vmul.f32 %v1901_v32, %v7882_v13  ;;  %v1874_v48 = vadd.f32 %v1872_v54, %v1868_v34  ;;  %v1875_v50 = vadd.f32 %v1873_v2, %v1869_v59  ;;  %4402 = vmatpush3.bf16.msra.mxu1 %v4596_v30  ;;  %v1903_v31 = vmul.f32 %v1901_v32, %v7883_v26  ;;  %v7886_v54 = vld [vmem:[#allocation46_spill] sm:$0xff]  ;;  %v4602_v30 = vld [vmem:[%s7476_s3 + $0x2e8] sm:$0xff]   ;;  %s6640_s28 = sld [smem:[#allocation2 + $0x5d]] }
 0x118   :  { %v6478_v13 = vmul.f32 %v1907_v40, %v7884_v36  ;;  %v6481_v17 = vmul.f32 %v1907_v40, %v7885_v28  ;;  %v6484_v2 = vmul.f32 %v1913_v6, %v7886_v54  ;;  %4403 = vmatprep.subr.bf16.mxu1 %v4598_v19  ;;  %v1931_v32 = vstv %s6430_s29  ;;  %v7887_v36 = vld [vmem:[#allocation47_spill] sm:$0xff]  ;;  %v7888_v54 = vld [vmem:[#allocation48_spill] sm:$0xff]  ;;  %v7889_v53 = vld [vmem:[#allocation49_spill] sm:$0xff]  ;;  %s6528_s29 = sld [smem:[#allocation2 + $0x25]] }
 0x119   :  { %v1880_v34 = vadd.f32 %v1878_v18, %v1874_v48  ;;  %v1881_v59 = vadd.f32 %v1879_v14, %v1875_v50  ;;  %v1937_v26 = vstv %s6437_s22  ;;  %v6496_v40 = vmul.f32 %v1913_v6, %v7887_v36  ;;  %v7890_v19 = vld [vmem:[#allocation50_spill] sm:$0xff]  ;;  %v7891_v14 = vld [vmem:[#allocation51_spill] sm:$0xff]  ;;  %s6549_s22 = sld [smem:[#allocation2 + $0x2d]] }
 0x11a   :  { %v6499_v28 = vmul.f32 %v1919_v51, %v7888_v54  ;;  %v6502_v11 = vmul.f32 %v1919_v51, %v7889_v53  ;;  %v6505_v29 = vmul.f32 %v1925_v10, %v7890_v19  ;;  %v6510_v50 = vmul.f32 %v1925_v10, %v7891_v14  ;;  %v4604_v51 = vld [vmem:[%s7476_s3 + $0x2a8] sm:$0xff]   ;;  %v7892_v19 = vld [vmem:[#allocation52_spill] sm:$0xff] }
 0x11b   :  { %v1886_v48 = vadd.f32 %v1884_v43, %v1880_v34  ;;  %v1887_v18 = vadd.f32 %v1885_v60, %v1881_v59  ;;  %v1943_v6 = vstv %s6441_s30  ;;  %4404 = vmatpush3.bf16.msra.mxu1 %v4600_v47  ;;  %v6519_v53 = vmul.f32 %v1931_v32, %v7892_v19  ;;  %v7893_v54 = vld [vmem:[#allocation53_spill] sm:$0xff]  ;;  %v7894_v60 = vld [vmem:[#allocation54_spill] sm:$0xff]  ;;  %v4606_v47 = vld [vmem:[%s7476_s3 + $0x2e0] sm:$0xff]   ;;  %s6765_s30 = sld [smem:[#allocation2 + $0xfd]] }
 0x11c   :  { %v6522_v43 = vmul.f32 %v1931_v32, %v7893_v54  ;;  %v6525_v34 = vmul.f32 %v1937_v26, %v7894_v60  ;;  %v1949_v10 = vstv %s6445_s14  ;;  %4405 = vmatprep.subr.bf16.mxu1 %v4602_v30  ;;  %v1955_v36 = vstv %s6452_s12  ;;  %v7896_v32 = vld [vmem:[#allocation56_spill] sm:$0xff]  ;;  %v7897_v60 = vld [vmem:[#allocation57_spill] sm:$0xff]  ;;  %s6658_s14 = sld [smem:[#allocation4 + $0x4]] }
 0x11d   :  { %v1892_v59 = vadd.f32 %v1890_v0, %v1886_v48  ;;  %v1893_v14 = vadd.f32 %v1891_v39, %v1887_v18  ;;  %v1961_v19 = vstv %s6459_s24  ;;  %v6536_v58 = vmul.f32 %v1937_v26, %v7895_v12  ;;  %v4608_v0 = vld [vmem:[%s7476_s3 + $0x2a0] sm:$0xff]   ;;  %v7899_v39 = vld [vmem:[#allocation59_spill] sm:$0xff]  ;;  %s6683_s24 = sld [smem:[#allocation2 + $0x85]] }
 0x11e   :  { %v6539_v54 = vmul.f32 %v1943_v6, %v7896_v32  ;;  %v6542_v16 = vmul.f32 %v1943_v6, %v7897_v60  ;;  %v1967_v8 = vstv %s6467_s11  ;;  %v6546_v20 = vmul.f32 %v1949_v10, %v7898_v45  ;;  %v7900_v48 = vld [vmem:[#allocation60_spill] sm:$0xff]  ;;  %v7911_v32 = vld [vmem:[#allocation13_spill] sm:$0xff]  ;;  %s6799_s12 = sld [smem:[#allocation2 + $0xe]] }
 0x11f   :  { %v1898_v37 = vadd.f32 %v1896_v42, %v1892_v59  ;;  %v1899_v30 = vadd.f32 %v1897_v23, %v1893_v14  ;;  %v1973_v9 = vstv %s6471_s15  ;;  %4406 = vmatpush3.bf16.msra.mxu1 %v4604_v51  ;;  %v6555_v26 = vmul.f32 %v1949_v10, %v7899_v39  ;;  %v7901_v42 = vld [vmem:[#allocation61_spill] sm:$0xff]  ;;  %v7902_v14 = vld [vmem:[#allocation62_spill] sm:$0xff]  ;;  %v4610_v51 = vld [vmem:[%s7476_s3 + $0x2d8] sm:$0xff]   ;;  %s6599_s15 = sld [smem:[#allocation2 + $0x3d]] }
 0x120   :  { %v6558_v18 = vmul.f32 %v1955_v36, %v7900_v48  ;;  %v6561_v23 = vmul.f32 %v1955_v36, %v7901_v42  ;;  %v6564_v6 = vmul.f32 %v1961_v19, %v7902_v14  ;;  %4407 = vmatprep.subr.bf16.mxu1 %v4606_v47  ;;  %v7903_v39 = vld [vmem:[#allocation63_spill] sm:$0xff]  ;;  %v7904_v45 = vld [vmem:[#allocation64_spill] sm:$0xff]  ;;  %v7905_v14 = vld [vmem:[#allocation65_spill] sm:$0xff]  ;;  %s6845_s11 = sld [smem:[#allocation2 + $0x2e]] }
 0x121   :  { %v1904_v10 = vadd.f32 %v6465_v63, %v1898_v37  ;;  %v1905_v59 = vadd.f32 %v1903_v31, %v1899_v30  ;;  %v6573_v48 = vmul.f32 %v1961_v19, %v7903_v39  ;;  %v6576_v36 = vmul.f32 %v1967_v8, %v7904_v45  ;;  %v7906_v42 = vld [vmem:[#allocation66_spill] sm:$0xff]  ;;  %v7907_v37 = vld [vmem:[#allocation67_spill] sm:$0xff] }
 0x122   :  { %v6581_v47 = vmul.f32 %v1967_v8, %v7905_v14  ;;  %v6584_v60 = vmul.f32 %v1973_v9, %v7906_v42  ;;  %v6587_v63 = vmul.f32 %v1973_v9, %v7907_v37  ;;  %v2169_v31 = vstv %s6486_s1  ;;  %v4612_v19 = vld [vmem:[%s7476_s3 + $0x298] sm:$0xff]   ;;  %s6710_s1 = sld [smem:[#allocation2 + $0x9d]] }
 0x123   :  { %v1910_v30 = vadd.f32 %v6478_v13, %v1904_v10  ;;  %v1911_v45 = vadd.f32 %v6481_v17, %v1905_v59  ;;  %v2170_v8 = vmul.f32 %v2169_v31, %v7859_v27  ;;  %v2171_v14 = vmul.f32 %v2169_v31, %v7860_v35  ;;  %4408 = vmatpush3.bf16.msra.mxu1 %v4608_v0  ;;  %v4614_v13 = vld [vmem:[%s7476_s3 + $0x2d0] sm:$0xff]   ;;  %v7909_v31 = vld [vmem:[#allocation11_spill] sm:$0xff]  ;;  %v7910_v35 = vld [vmem:[#allocation12_spill] sm:$0xff] }
 0x124   :  { %7908 = vst [vmem:[#allocation19_spill] sm:$0xff] %v6587_v63  ;;  %v2175_v9 = vstv %s6493_s23  ;;  %v2181_v37 = vstv %s6507_s27  ;;  %v2187_v42 = vstv %s6513_s10  ;;  %v2193_v39 = vstv %s6528_s29  ;;  %4409 = vmatprep.subr.bf16.mxu1 %v4610_v51  ;;  %s6629_s27 = sld [smem:[#allocation2 + $0x55]] }
 0x125   :  { %v1916_v17 = vadd.f32 %v6484_v2, %v1910_v30  ;;  %v1917_v10 = vadd.f32 %v6496_v40, %v1911_v45  ;;  %v2176_v59 = vmul.f32 %v2175_v9, %v7810_v15  ;;  %v2177_v0 = vmul.f32 %v2175_v9, %v7909_v31  ;;  %v4616_v9 = vld [vmem:[%s7476_s3 + $0x290] sm:$0xff]   ;;  %s6726_s23 = sld [smem:[#allocation2 + $0xb5]] }
 0x126   :  { %v2182_v27 = vmul.f32 %v2181_v37, %v7910_v35  ;;  %v2183_v12 = vmul.f32 %v2181_v37, %v7911_v32  ;;  %v2188_v51 = vmul.f32 %v2187_v42, %v7698_v22  ;;  %v2189_v63 = vmul.f32 %v2187_v42, %v7762_v33  ;;  %s6735_s10 = sld [smem:[#allocation2 + $0xc5]] }
 0x127   :  { %v1922_v2 = vadd.f32 %v6499_v28, %v1916_v17  ;;  %v1923_v45 = vadd.f32 %v6502_v11, %v1917_v10  ;;  %v2178_v40 = vadd.f32 %v2176_v59, %v2170_v8  ;;  %v2179_v30 = vadd.f32 %v2177_v0, %v2171_v14  ;;  %4410 = vmatpush3.bf16.msra.mxu1 %v4612_v19  ;;  %v4618_v28 = vld [vmem:[%s7476_s3 + $0x2c8] sm:$0xff]   ;;  %s6746_s29 = sld [smem:[#allocation2 + $0xdd]] }
 0x128   :  { %v2194_v37 = vmul.f32 %v2193_v39, %v7763_v7  ;;  %v2195_v22 = vmul.f32 %v2193_v39, %v7862_v46  ;;  %v2199_v42 = vstv %s6549_s22  ;;  %v2205_v33 = vstv %s6566_s16  ;;  %4411 = vmatprep.subr.bf16.mxu1 %v4614_v13  ;;  %s6666_s16 = sld [smem:[#allocation2 + $0x6d]] }
 0x129   :  { %v1928_v11 = vadd.f32 %v6505_v29, %v1922_v2  ;;  %v1929_v14 = vadd.f32 %v6510_v50, %v1923_v45  ;;  %v2184_v19 = vadd.f32 %v2182_v27, %v2178_v40  ;;  %v2185_v8 = vadd.f32 %v2183_v12, %v2179_v30  ;;  %v4620_v27 = vld [vmem:[%s7476_s3 + $0x288] sm:$0xff]   ;;  %s6762_s22 = sld [smem:[#allocation2 + $0xf5]] }
 0x12a   :  { %v1979_v17 = vstv %s6578_s2  ;;  %v1985_v10 = vstv %s6589_s0  ;;  %v2200_v39 = vmul.f32 %v2199_v42, %v4907_v52  ;;  %v2201_v59 = vmul.f32 %v2199_v42, %v4915_v55  ;;  %s6679_s0 = sld [smem:[#allocation2 + $0x7d]] }
 0x12b   :  { %v1934_v13 = vadd.f32 %v6519_v53, %v1928_v11  ;;  %v1935_v0 = vadd.f32 %v6522_v43, %v1929_v14  ;;  %v2190_v46 = vadd.f32 %v2188_v51, %v2184_v19  ;;  %v2191_v29 = vadd.f32 %v2189_v63, %v2185_v8  ;;  %4412 = vmatpush3.bf16.msra.mxu1 %v4616_v9  ;;  %v4622_v53 = vld [vmem:[%s7476_s3 + $0x2c0] sm:$0xff]   ;;  %s6811_s2 = sld [smem:[#allocation2 + $0x16]] }
 0x12c   :  { %v2206_v12 = vmul.f32 %v2205_v33, %v4917_v56  ;;  %v2207_v50 = vmul.f32 %v2205_v33, %v4919_v57  ;;  %v2211_v2 = vstv %s6599_s15  ;;  %v2217_v45 = vstv %s6605_s20  ;;  %4413 = vmatprep.subr.bf16.mxu1 %v4618_v28  ;;  %s6692_s20 = sld [smem:[#allocation2 + $0x8d]] }
 0x12d   :  { %v1940_v43 = vadd.f32 %v6525_v34, %v1934_v13  ;;  %v1941_v63 = vadd.f32 %v6536_v58, %v1935_v0  ;;  %v2196_v51 = vadd.f32 %v2194_v37, %v2190_v46  ;;  %v2197_v40 = vadd.f32 %v2195_v22, %v2191_v29  ;;  %v4624_v22 = vld [vmem:[%s7476_s3 + $0x280] sm:$0xff]   ;;  %s7328_s15 = sld [smem:[#allocation2 + $0xd7]] }
 0x12e   :  { %v6661_v33 = vmul.f32 %v1979_v17, %v7701_v44  ;;  %v2212_v30 = vmul.f32 %v2211_v2, %v7703_v25  ;;  %v2213_v9 = vmul.f32 %v2211_v2, %v4929_v61  ;;  %v2223_v42 = vstv %s6618_s19  ;;  %s6716_s19 = sld [smem:[#allocation2 + $0xa5]] }
 0x12f   :  { %v1946_v28 = vadd.f32 %v6539_v54, %v1940_v43  ;;  %v1947_v34 = vadd.f32 %v6542_v16, %v1941_v63  ;;  %v2202_v58 = vadd.f32 %v2200_v39, %v2196_v51  ;;  %v2203_v11 = vadd.f32 %v2201_v59, %v2197_v40  ;;  %4414 = vmatpush3.bf16.msra.mxu1 %v4620_v27 }
 0x130   :  { %v1981_v46 = vmul.f32 %v1979_v17, %v7702_v24  ;;  %v2218_v37 = vmul.f32 %v2217_v45, %v4931_v62  ;;  %v2219_v14 = vmul.f32 %v2217_v45, %v7704_v1  ;;  %v2229_v19 = vstv %s6629_s27  ;;  %4415 = vmatprep.subr.bf16.mxu1 %v4622_v53  ;;  %v4626_v17 = vld [vmem:[%s7476_s3 + $0x3f8] sm:$0xff]   ;;  %s6729_s27 = sld [smem:[#allocation2 + $0xbd]] }
 0x131   :  { %v1952_v16 = vadd.f32 %v6546_v20, %v1946_v28  ;;  %v1953_v54 = vadd.f32 %v6555_v26, %v1947_v34  ;;  %v2208_v8 = vadd.f32 %v2206_v12, %v2202_v58  ;;  %v2209_v39 = vadd.f32 %v2207_v50, %v2203_v11  ;;  %v7914_v11 = vld [vmem:[#allocation25_spill] sm:$0xff] }
 0x132   :  { %v1986_v59 = vmul.f32 %v1985_v10, %v7705_v5  ;;  %v2224_v13 = vmul.f32 %v2223_v42, %v7707_v21  ;;  %v2225_v0 = vmul.f32 %v2223_v42, %v4943_v3  ;;  %v2235_v29 = vstv %s6640_s28  ;;  %s6743_s28 = sld [smem:[#allocation2 + $0xd5]] }
 0x133   :  { %v1958_v20 = vadd.f32 %v6558_v18, %v1952_v16  ;;  %v1959_v26 = vadd.f32 %v6561_v23, %v1953_v54  ;;  %v2214_v27 = vadd.f32 %v2212_v30, %v2208_v8  ;;  %v2215_v12 = vadd.f32 %v2213_v9, %v2209_v39  ;;  %4416 = vmatpush3.bf16.msra.mxu1 %v4624_v22  ;;  %v7915_v16 = vld [vmem:[#allocation19_spill] sm:$0xff]  ;;  %v7916_v8 = vld [vmem:[#allocation26_spill] sm:$0xff] }
 0x134   :  { %v1987_v50 = vmul.f32 %v1985_v10, %v7708_v49  ;;  %v2230_v2 = vmul.f32 %v2229_v19, %v4945_v4  ;;  %v2231_v45 = vmul.f32 %v2229_v19, %v7710_v41  ;;  %v2241_v53 = vstv %s6651_s26  ;;  %4445 = vmatprep.subr.bf16.mxu1 %v4626_v17  ;;  %v7912_v10 = vld [vmem:[#allocation23_spill] sm:$0xff]  ;;  %s6756_s26 = sld [smem:[#allocation2 + $0xed]] }
 0x135   :  { %v1964_v43 = vadd.f32 %v6564_v6, %v1958_v20  ;;  %v1965_v18 = vadd.f32 %v6573_v48, %v1959_v26  ;;  %v2220_v23 = vadd.f32 %v2218_v37, %v2214_v27  ;;  %v2221_v63 = vadd.f32 %v2219_v14, %v2215_v12  ;;  %v7913_v48 = vld [vmem:[#allocation24_spill] sm:$0xff]  ;;  %v7917_v17 = vld [vmem:[#allocation27_spill] sm:$0xff] }
 0x136   :  { %v1991_v51 = vstv %s6658_s14  ;;  %v2236_v40 = vmul.f32 %v2235_v29, %v7711_v38  ;;  %v2237_v30 = vmul.f32 %v2235_v29, %v7912_v10  ;;  %v2247_v9 = vstv %s6666_s16  ;;  %v7918_v12 = vld [vmem:[#allocation28_spill] sm:$0xff]  ;;  %s6771_s14 = sld [smem:[#allocation2 + $0x105]] }
 0x137   :  { %v1970_v42 = vadd.f32 %v6576_v36, %v1964_v43  ;;  %v1971_v28 = vadd.f32 %v6581_v47, %v1965_v18  ;;  %v2226_v34 = vadd.f32 %v2224_v13, %v2220_v23  ;;  %v2227_v6 = vadd.f32 %v2225_v0, %v2221_v63  ;;  %v7920_v43 = vld [vmem:[#allocation30_spill] sm:$0xff]  ;;  %s6775_s16 = sld [smem:[#allocation2 + $0x10d]] }
 0x138   :  { %v2242_v58 = vmul.f32 %v2241_v53, %v7913_v48  ;;  %v2243_v22 = vmul.f32 %v2241_v53, %v7914_v11  ;;  %v2253_v37 = vstv %s6670_s17  ;;  %v2259_v14 = vstv %s6679_s0  ;;  %s6793_s17 = sld [smem:[#allocation2 + $0x6]] }
 0x139   :  { %v1976_v19 = vadd.f32 %v6584_v60, %v1970_v42  ;;  %v1977_v36 = vadd.f32 %v7915_v16, %v1971_v28  ;;  %v2232_v54 = vadd.f32 %v2230_v2, %v2226_v34  ;;  %v2233_v47 = vadd.f32 %v2231_v45, %v2227_v6  ;;  %v7919_v45 = vld [vmem:[#allocation29_spill] sm:$0xff]  ;;  %s6815_s0 = sld [smem:[#allocation2 + $0x1e]] }
 0x13a   :  { %v2248_v39 = vmul.f32 %v2247_v9, %v7916_v8  ;;  %v2249_v13 = vmul.f32 %v2247_v9, %v7917_v17  ;;  %v2265_v0 = vstv %s6683_s24  ;;  %v2271_v29 = vstv %s6692_s20  ;;  %v7923_v34 = vld [vmem:[#allocation33_spill] sm:$0xff]  ;;  %s6831_s24 = sld [smem:[#allocation2 + $0x26]]  ;;  %v7957_v8 = vld [vmem:[#allocation67_spill] sm:$0xff] }
 0x13b   :  { %v1982_v20 = vadd.f32 %v6661_v33, %v1976_v19  ;;  %v1983_v26 = vadd.f32 %v1981_v46, %v1977_v36  ;;  %v2238_v27 = vadd.f32 %v2236_v40, %v2232_v54  ;;  %v2239_v60 = vadd.f32 %v2237_v30, %v2233_v47  ;;  %v7921_v46 = vld [vmem:[#allocation31_spill] sm:$0xff]  ;;  %v7922_v30 = vld [vmem:[#allocation32_spill] sm:$0xff]  ;;  %s6940_s20 = sld [smem:[#allocation2 + $0x6e]] }
 0x13c   :  { %v2254_v2 = vmul.f32 %v2253_v37, %v7918_v12  ;;  %v2255_v53 = vmul.f32 %v2253_v37, %v7919_v45  ;;  %v2260_v18 = vmul.f32 %v2259_v14, %v7920_v43  ;;  %v2277_v23 = vstv %s6700_s21  ;;  %v7924_v37 = vld [vmem:[#allocation34_spill] sm:$0xff]  ;;  %v7926_v54 = vld [vmem:[#allocation36_spill] sm:$0xff]  ;;  %s6950_s21 = sld [smem:[#allocation2 + $0x76]] }
 0x13d   :  { %v1988_v63 = vadd.f32 %v1986_v59, %v1982_v20  ;;  %v1989_v9 = vadd.f32 %v1987_v50, %v1983_v26  ;;  %v2244_v42 = vadd.f32 %v2242_v58, %v2238_v27  ;;  %v2245_v33 = vadd.f32 %v2243_v22, %v2239_v60  ;;  %v7925_v22 = vld [vmem:[#allocation35_spill] sm:$0xff]  ;;  %v7948_v12 = vld [vmem:[#allocation58_spill] sm:$0xff] }
 0x13e   :  { %v2261_v40 = vmul.f32 %v2259_v14, %v7921_v46  ;;  %v2266_v28 = vmul.f32 %v2265_v0, %v7922_v30  ;;  %v2267_v6 = vmul.f32 %v2265_v0, %v7923_v34  ;;  %v2272_v19 = vmul.f32 %v2271_v29, %v7924_v37  ;;  %v7939_v46 = vld [vmem:[#allocation49_spill] sm:$0xff] }
 0x13f   :  { %v1993_v16 = vadd.f32 %v1991_v51, %v1989_v9  ;;  %v2250_v36 = vadd.f32 %v2248_v39, %v2244_v42  ;;  %v2251_v59 = vadd.f32 %v2249_v13, %v2245_v33  ;;  %v2283_v50 = vstv %s6710_s1  ;;  %v7927_v39 = vld [vmem:[#allocation37_spill] sm:$0xff]  ;;  %v7928_v9 = vld [vmem:[#allocation38_spill] sm:$0xff]  ;;  %s7030_s1 = sld [smem:[#allocation2 + $0xc6]] }
 0x140   :  { %v6748_v58 = vadd.f32 %v1991_v51, %v1988_v63  ;;  %v2273_v14 = vmul.f32 %v2271_v29, %v7925_v22  ;;  %v2278_v47 = vmul.f32 %v2277_v23, %v7926_v54  ;;  %v2289_v0 = vstv %s6716_s19  ;;  %v7929_v51 = vld [vmem:[#allocation39_spill] sm:$0xff]  ;;  %s6868_s19 = sld [smem:[#allocation2 + $0x36]] }
 0x141   :  { %v1995_v20 = vmax.f32 %v1993_v16, 0.0  ;;  %v2256_v26 = vadd.f32 %v2254_v2, %v2250_v36  ;;  %v2257_v27 = vadd.f32 %v2255_v53, %v2251_v59  ;;  %v2295_v60 = vstv %s6720_s25  ;;  %v7930_v53 = vld [vmem:[#allocation40_spill] sm:$0xff]  ;;  %s6872_s25 = sld [smem:[#allocation2 + $0x3e]] }
 0x142   :  { %v2279_v13 = vmul.f32 %v2277_v23, %v7927_v39  ;;  %v2284_v42 = vmul.f32 %v2283_v50, %v7928_v9  ;;  %v2285_v63 = vmul.f32 %v2283_v50, %v7929_v51  ;;  %v2301_v29 = vstv %s6726_s23  ;;  %v7931_v23 = vld [vmem:[#allocation41_spill] sm:$0xff]  ;;  %v7932_v9 = vld [vmem:[#allocation42_spill] sm:$0xff]  ;;  %s6874_s23 = sld [smem:[#allocation2 + $0x115]] }
 0x143   :  { %v1997_v33 = vpack.c.bf16 %v1995_v20, %v1995_v20  ;;  %v2262_v54 = vadd.f32 %v2260_v18, %v2256_v26  ;;  %v2263_v22 = vadd.f32 %v2261_v40, %v2257_v27  ;;  %v2307_v16 = vstv %s6729_s27  ;;  %v7933_v26 = vld [vmem:[#allocation43_spill] sm:$0xff]  ;;  %v7935_v39 = vld [vmem:[#allocation45_spill] sm:$0xff]  ;;  %s6964_s27 = sld [smem:[#allocation2 + $0x7e]] }
 0x144   :  { %v1994_v2 = vmax.f32 %v6748_v58, 0.0  ;;  %v2290_v36 = vmul.f32 %v2289_v0, %v7930_v53  ;;  %v2291_v59 = vmul.f32 %v2289_v0, %v7931_v23  ;;  %v2296_v50 = vmul.f32 %v2295_v60, %v7932_v9  ;;  %v7934_v58 = vld [vmem:[#allocation44_spill] sm:$0xff]  ;;  %v7936_v0 = vld [vmem:[#allocation46_spill] sm:$0xff] }
 0x145   :  { %2159 = vmatprep.mubr.bf16.mxu0 %v1997_v33  ;;  %v2268_v51 = vadd.f32 %v2266_v28, %v2262_v54  ;;  %v2269_v20 = vadd.f32 %v2267_v6, %v2263_v22  ;;  %v2313_v18 = vstv %s6735_s10  ;;  %v2319_v40 = vstv %s6737_s13  ;;  %v7937_v28 = vld [vmem:[#allocation47_spill] sm:$0xff]  ;;  %v7938_v22 = vld [vmem:[#allocation48_spill] sm:$0xff]  ;;  %s6885_s13 = sld [smem:[#allocation2 + $0x46]] }
 0x146   :  { %v2297_v27 = vmul.f32 %v2295_v60, %v7933_v26  ;;  %v2302_v53 = vmul.f32 %v2301_v29, %v7934_v58  ;;  %v2303_v37 = vmul.f32 %v2301_v29, %v7935_v39  ;;  %v2308_v23 = vmul.f32 %v2307_v16, %v7936_v0  ;;  %v7940_v26 = vld [vmem:[#allocation50_spill] sm:$0xff]  ;;  %s6969_s10 = sld [smem:[#allocation4 + $0x5]] }
 0x147   :  { %v2274_v34 = vadd.f32 %v2272_v19, %v2268_v51  ;;  %v2275_v9 = vadd.f32 %v2273_v14, %v2269_v20  ;;  %v2325_v30 = vstv %s6743_s28  ;;  %v2331_v33 = vstv %s6746_s29  ;;  %v7941_v51 = vld [vmem:[#allocation51_spill] sm:$0xff]  ;;  %v7942_v20 = vld [vmem:[#allocation52_spill] sm:$0xff]  ;;  %s7051_s28 = sld [smem:[#allocation2 + $0xee]] }
 0x148   :  { %v2309_v6 = vmul.f32 %v2307_v16, %v7937_v28  ;;  %v6785_v54 = vmul.f32 %v2313_v18, %v7938_v22  ;;  %v6788_v60 = vmul.f32 %v2313_v18, %v7939_v46  ;;  %v6791_v58 = vmul.f32 %v2319_v40, %v7940_v26  ;;  %v7943_v18 = vld [vmem:[#allocation53_spill] sm:$0xff]  ;;  %v7944_v28 = vld [vmem:[#allocation54_spill] sm:$0xff]  ;;  %s7161_s29 = sld [smem:[#allocation2 + $0x10e]] }
 0x149   :  { %v2280_v19 = vadd.f32 %v2278_v47, %v2274_v34  ;;  %v2281_v14 = vadd.f32 %v2279_v13, %v2275_v9  ;;  %v6796_v29 = vmul.f32 %v2319_v40, %v7941_v51  ;;  %v2337_v16 = vstv %s6753_s18  ;;  %v7945_v40 = vld [vmem:[#allocation55_spill] sm:$0xff]  ;;  %s6892_s18 = sld [smem:[#allocation2 + $0x4e]] }
 0x14a   :  { %v6802_v22 = vmul.f32 %v2325_v30, %v7942_v20  ;;  %v6805_v46 = vmul.f32 %v2325_v30, %v7943_v18  ;;  %v6808_v26 = vmul.f32 %v2331_v33, %v7944_v28  ;;  %v2343_v0 = vstv %s6756_s26  ;;  %v7946_v20 = vld [vmem:[#allocation56_spill] sm:$0xff]  ;;  %v7947_v30 = vld [vmem:[#allocation57_spill] sm:$0xff]  ;;  %s6896_s26 = sld [smem:[#allocation2 + $0x11d]] }
 0x14b   :  { %v2286_v34 = vadd.f32 %v2284_v42, %v2280_v19  ;;  %v2287_v47 = vadd.f32 %v2285_v63, %v2281_v14  ;;  %v2349_v13 = vstv %s6762_s22  ;;  %v2355_v9 = vstv %s6765_s30  ;;  %v7949_v63 = vld [vmem:[#allocation59_spill] sm:$0xff]  ;;  %s6988_s22 = sld [smem:[#allocation2 + $0x8e]] }
 0x14c   :  { %v6818_v51 = vmul.f32 %v2331_v33, %v7945_v40  ;;  %v6821_v39 = vmul.f32 %v2337_v16, %v7946_v20  ;;  %v6824_v18 = vmul.f32 %v2337_v16, %v7947_v30  ;;  %v2361_v28 = vstv %s6771_s14  ;;  %v7950_v33 = vld [vmem:[#allocation60_spill] sm:$0xff]  ;;  %v7951_v20 = vld [vmem:[#allocation61_spill] sm:$0xff]  ;;  %v7952_v16 = vld [vmem:[#allocation62_spill] sm:$0xff]  ;;  %s6909_s14 = sld [smem:[#allocation2 + $0x56]] }
 0x14d   :  { %v2292_v43 = vadd.f32 %v2290_v36, %v2286_v34  ;;  %v2293_v45 = vadd.f32 %v2291_v59, %v2287_v47  ;;  %v6828_v17 = vmul.f32 %v2343_v0, %v7948_v12  ;;  %v2367_v42 = vstv %s6775_s16  ;;  %v7953_v34 = vld [vmem:[#allocation63_spill] sm:$0xff]  ;;  %s6996_s30 = sld [smem:[#allocation2 + $0x96]] }
 0x14e   :  { %v6834_v19 = vmul.f32 %v2343_v0, %v7949_v63  ;;  %v6837_v14 = vmul.f32 %v2349_v13, %v7950_v33  ;;  %v6840_v40 = vmul.f32 %v2349_v13, %v7951_v20  ;;  %v6843_v30 = vmul.f32 %v2355_v9, %v7952_v16  ;;  %v7954_v0 = vld [vmem:[#allocation64_spill] sm:$0xff]  ;;  %v4627_v13 = vld [vmem:[%s7476_s3 + $0x338] sm:$0xff]   ;;  %v7955_v20 = vld [vmem:[#allocation65_spill] sm:$0xff]  ;;  %s7288_s16 = sld [smem:[#allocation2 + $0x97]] }
 0x14f   :  { %v2298_v36 = vadd.f32 %v2296_v50, %v2292_v43  ;;  %v2299_v59 = vadd.f32 %v2297_v27, %v2293_v45  ;;  %v6848_v47 = vmul.f32 %v2355_v9, %v7953_v34  ;;  %v6851_v63 = vmul.f32 %v2361_v28, %v7954_v0  ;;  %v7956_v16 = vld [vmem:[#allocation66_spill] sm:$0xff] }
 0x150   :  { %v6857_v33 = vmul.f32 %v2361_v28, %v7955_v20  ;;  %v6860_v12 = vmul.f32 %v2367_v42, %v7956_v16  ;;  %v6863_v49 = vmul.f32 %v2367_v42, %v7957_v8  ;;  %v1996_v45 = vpack.c.bf16 %v1994_v2, %v1994_v2  ;;  %v4629_v43 = vld [vmem:[%s7476_s3 + $0x370] sm:$0xff]   ;;  %v7959_v42 = vld [vmem:[#allocation8_spill] sm:$0xff]  ;;  %v7960_v2 = vld [vmem:[#allocation9_spill] sm:$0xff] }
 0x151   :  { %v2304_v50 = vadd.f32 %v2302_v53, %v2298_v36  ;;  %v2305_v27 = vadd.f32 %v2303_v37, %v2299_v59  ;;  %v2563_v9 = vstv %s6793_s17  ;;  %v2569_v28 = vstv %s6799_s12  ;;  %v4631_v37 = vld [vmem:[%s7476_s3 + $0x330] sm:$0xff]   ;;  %v4633_v59 = vld [vmem:[%s7476_s3 + $0x368] sm:$0xff]   ;;  %s6916_s12 = sld [smem:[#allocation2 + $0x5e]] }
 0x152   :  { %7958 = vst [vmem:[#allocation20_spill] sm:$0xff] %v6863_v49  ;;  %2160 = vmatmul.mubr.bf16.vlgmr.msra.gmra.mxu0 %v1996_v45  ;;  %v2564_v16 = vmul.f32 %v2563_v9, %v7959_v42  ;;  %v2565_v8 = vmul.f32 %v2563_v9, %v7960_v2  ;;  %v2570_v20 = vmul.f32 %v2569_v28, %v7810_v15  ;;  %v2575_v53 = vstv %s6811_s2  ;;  %s6924_s2 = sld [smem:[#allocation2 + $0x66]] }
 0x153   :  { %v2571_v0 = vmul.f32 %v2569_v28, %v7909_v31  ;;  %v2310_v34 = vadd.f32 %v2308_v23, %v2304_v50  ;;  %v2311_v49 = vadd.f32 %v2309_v6, %v2305_v27  ;;  %4424 = vmatpush3.bf16.msra.mxu0 %v4627_v13  ;;  %v2581_v36 = vstv %s6815_s0  ;;  %v7961_v27 = vld [vmem:[#allocation14_spill] sm:$0xff]  ;;  %v7962_v28 = vld [vmem:[#allocation15_spill] sm:$0xff]  ;;  %s7005_s17 = sld [smem:[#allocation2 + $0x9e]] }
 0x154   :  { %4425 = vmatprep.subr.bf16.mxu0 %v4629_v43  ;;  %v2572_v45 = vadd.f32 %v2570_v20, %v2564_v16  ;;  %v2576_v23 = vmul.f32 %v2575_v53, %v7910_v35  ;;  %v2577_v6 = vmul.f32 %v2575_v53, %v7911_v32  ;;  %v2582_v43 = vmul.f32 %v2581_v36, %v7961_v27  ;;  %s7012_s0 = sld [smem:[#allocation2 + $0xa6]] }
 0x155   :  { %v2573_v9 = vadd.f32 %v2571_v0, %v2565_v8  ;;  %v2316_v13 = vadd.f32 %v6785_v54, %v2310_v34  ;;  %v2317_v50 = vadd.f32 %v6788_v60, %v2311_v49  ;;  %v2583_v31 = vmul.f32 %v2581_v36, %v7962_v28  ;;  %v4635_v49 = vld [vmem:[%s7476_s3 + $0x328] sm:$0xff]  }
 0x156   :  { %v2578_v15 = vadd.f32 %v2576_v23, %v2572_v45  ;;  %v2587_v20 = vstv %s6831_s24  ;;  %v2593_v8 = vstv %s6845_s11  ;;  %v7963_v60 = vld [vmem:[#allocation17_spill] sm:$0xff]  ;;  %v2599_v23 = vstv %s6868_s19  ;;  %s7016_s24 = sld [smem:[#allocation2 + $0xae]] }
 0x157   :  { %v2579_v2 = vadd.f32 %v2577_v6, %v2573_v9  ;;  %v2322_v16 = vadd.f32 %v6791_v58, %v2316_v13  ;;  %v2323_v0 = vadd.f32 %v6796_v29, %v2317_v50  ;;  %4426 = vmatpush3.bf16.msra.mxu0 %v4631_v37  ;;  %v2588_v54 = vmul.f32 %v2587_v20, %v7763_v7  ;;  %v4637_v58 = vld [vmem:[%s7476_s3 + $0x360] sm:$0xff]   ;;  %s7020_s11 = sld [smem:[#allocation2 + $0xb6]] }
 0x158   :  { %v2589_v34 = vmul.f32 %v2587_v20, %v7963_v60  ;;  %4427 = vmatprep.subr.bf16.mxu0 %v4633_v59  ;;  %v2584_v53 = vadd.f32 %v2582_v43, %v2578_v15  ;;  %v2594_v29 = vmul.f32 %v2593_v8, %v4907_v52  ;;  %v2595_v37 = vmul.f32 %v2593_v8, %v4915_v55  ;;  %v4641_v8 = vld [vmem:[%s7476_s3 + $0x358] sm:$0xff]   ;;  %s7033_s19 = sld [smem:[#allocation2 + $0xce]] }
 0x159   :  { %v2585_v36 = vadd.f32 %v2583_v31, %v2579_v2  ;;  %v2328_v45 = vadd.f32 %v6802_v22, %v2322_v16  ;;  %v2329_v9 = vadd.f32 %v6805_v46, %v2323_v0  ;;  %v2605_v6 = vstv %s6872_s25  ;;  %v6926_v31 = vpop.f32.mrf.mxu0  ;;  %v4639_v46 = vld [vmem:[%s7476_s3 + $0x320] sm:$0xff]   ;;  %s7037_s25 = sld [smem:[#allocation2 + $0xd6]] }
 0x15a   :  { %v2590_v13 = vadd.f32 %v2588_v54, %v2584_v53  ;;  %v2600_v50 = vmul.f32 %v2599_v23, %v4917_v56  ;;  %v2601_v15 = vmul.f32 %v2599_v23, %v4919_v57  ;;  %7964 = vst [vmem:[#allocation21_spill] sm:$0xff] %v6926_v31  ;;  %v2606_v43 = vmul.f32 %v2605_v6, %v7703_v25 }
 0x15b   :  { %v2591_v59 = vadd.f32 %v2589_v34, %v2585_v36  ;;  %v2334_v2 = vadd.f32 %v6808_v26, %v2328_v45  ;;  %v2335_v22 = vadd.f32 %v6818_v51, %v2329_v9  ;;  %4428 = vmatpush3.bf16.msra.mxu0 %v4635_v49  ;;  %v2607_v20 = vmul.f32 %v2605_v6, %v4929_v61  ;;  %v6942_v51 = vpop.f32.mrf.mxu0 }
 0x15c   :  { %4429 = vmatprep.subr.bf16.mxu0 %v4637_v58  ;;  %v2596_v16 = vadd.f32 %v2594_v29, %v2590_v13  ;;  %v2611_v0 = vstv %s6885_s13  ;;  %v2617_v54 = vstv %s6892_s18  ;;  %7965 = vst [vmem:[#allocation22_spill] sm:$0xff] %v6942_v51  ;;  %v2373_v53 = vstv %s6874_s23  ;;  %s6974_s13 = sld [smem:[#allocation2 + $0x86]] }
 0x15d   :  { %v2597_v26 = vadd.f32 %v2595_v37, %v2591_v59  ;;  %v2340_v49 = vadd.f32 %v6821_v39, %v2334_v2  ;;  %v2341_v34 = vadd.f32 %v6824_v18, %v2335_v22  ;;  %v2379_v36 = vstv %s6896_s26  ;;  %v4310_v37 = vpop.f32.mrf.mxu0  ;;  %v4643_v39 = vld [vmem:[%s7476_s3 + $0x318] sm:$0xff]   ;;  %v4645_v59 = vld [vmem:[%s7476_s3 + $0x350] sm:$0xff]   ;;  %s7040_s23 = sld [smem:[#allocation2 + $0xde]] }
 0x15e   :  { %v2602_v58 = vadd.f32 %v2600_v50, %v2596_v16  ;;  %v2612_v9 = vmul.f32 %v2611_v0, %v4931_v62  ;;  %v2613_v29 = vmul.f32 %v2611_v0, %v7704_v1  ;;  %v2618_v18 = vmul.f32 %v2617_v54, %v7707_v21  ;;  %s7058_s26 = sld [smem:[#allocation2 + $0xf6]] }
 0x15f   :  { %v2603_v45 = vadd.f32 %v2601_v15, %v2597_v26  ;;  %v2346_v23 = vadd.f32 %v6828_v17, %v2340_v49  ;;  %v2347_v6 = vadd.f32 %v6834_v19, %v2341_v34  ;;  %4430 = vmatpush3.bf16.msra.mxu0 %v4639_v46  ;;  %v2623_v13 = vstv %s6909_s14  ;;  %v4311_v19 = vpop.f32.mrf.mxu0  ;;  %v4647_v49 = vld [vmem:[%s7476_s3 + $0x310] sm:$0xff]   ;;  %s7175_s14 = sld [smem:[#allocation2 + $0x47]] }
 0x160   :  { %4431 = vmatprep.subr.bf16.mxu0 %v4641_v8  ;;  %v2608_v50 = vadd.f32 %v2606_v43, %v2602_v58  ;;  %v2619_v17 = vmul.f32 %v2617_v54, %v4943_v3  ;;  %v2629_v2 = vstv %s6916_s12  ;;  %v2374_v16 = vmul.f32 %v2373_v53, %v7701_v44  ;;  %v4649_v58 = vld [vmem:[%s7476_s3 + $0x348] sm:$0xff]   ;;  %s7186_s12 = sld [smem:[#allocation2 + $0x4f]] }
 0x161   :  { %v2609_v15 = vadd.f32 %v2607_v20, %v2603_v45  ;;  %v2352_v22 = vadd.f32 %v6837_v14, %v2346_v23  ;;  %v2353_v46 = vadd.f32 %v6840_v40, %v2347_v6  ;;  %v2624_v8 = vmul.f32 %v2623_v13, %v4945_v4 }
 0x162   :  { %v2614_v26 = vadd.f32 %v2612_v9, %v2608_v50  ;;  %v2625_v20 = vmul.f32 %v2623_v13, %v7710_v41  ;;  %v2635_v0 = vstv %s6924_s2  ;;  %v2375_v40 = vmul.f32 %v2373_v53, %v7702_v24  ;;  %v7966_v50 = vld [vmem:[#allocation20_spill] sm:$0xff]  ;;  %s7188_s2 = sld [smem:[#allocation2 + $0x116]] }
 0x163   :  { %v2615_v43 = vadd.f32 %v2613_v29, %v2609_v15  ;;  %v2358_v54 = vadd.f32 %v6843_v30, %v2352_v22  ;;  %v2359_v14 = vadd.f32 %v6848_v47, %v2353_v46  ;;  %4432 = vmatpush3.bf16.msra.mxu0 %v4643_v39  ;;  %v2630_v34 = vmul.f32 %v2629_v2, %v7711_v38 }
 0x164   :  { %4433 = vmatprep.subr.bf16.mxu0 %v4645_v59  ;;  %v2620_v45 = vadd.f32 %v2618_v18, %v2614_v26  ;;  %v2631_v30 = vmul.f32 %v2629_v2, %v7912_v10  ;;  %v2641_v47 = vstv %s6940_s20  ;;  %v2380_v37 = vmul.f32 %v2379_v36, %v7705_v5  ;;  %v7968_v2 = vld [vmem:[#allocation26_spill] sm:$0xff]  ;;  %s7333_s20 = sld [smem:[#allocation2 + $0xdf]] }
 0x165   :  { %v2621_v9 = vadd.f32 %v2619_v17, %v2615_v43  ;;  %v2364_v53 = vadd.f32 %v6851_v63, %v2358_v54  ;;  %v2365_v29 = vadd.f32 %v6857_v33, %v2359_v14  ;;  %v2636_v23 = vmul.f32 %v2635_v0, %v7913_v48  ;;  %v7967_v63 = vld [vmem:[#allocation71_spill] sm:$0xff]  ;;  %v4651_v33 = vld [vmem:[%s7476_s3 + $0x308] sm:$0xff]   ;;  %v7970_v54 = vld [vmem:[#allocation28_spill] sm:$0xff] }
 0x166   :  { %v2626_v6 = vadd.f32 %v2624_v8, %v2620_v45  ;;  %v2637_v13 = vmul.f32 %v2635_v0, %v7914_v11  ;;  %v2647_v18 = vstv %s6950_s21  ;;  %v2381_v17 = vmul.f32 %v2379_v36, %v7967_v63  ;;  %v7969_v8 = vld [vmem:[#allocation27_spill] sm:$0xff]  ;;  %v7971_v45 = vld [vmem:[#allocation29_spill] sm:$0xff]  ;;  %s7026_s21 = sld [smem:[#allocation2 + $0xbe]] }
 0x167   :  { %v2627_v39 = vadd.f32 %v2625_v20, %v2621_v9  ;;  %v2370_v59 = vadd.f32 %v6860_v12, %v2364_v53  ;;  %v2371_v15 = vadd.f32 %v7966_v50, %v2365_v29  ;;  %4434 = vmatpush3.bf16.msra.mxu0 %v4647_v49  ;;  %v2642_v19 = vmul.f32 %v2641_v47, %v7968_v2  ;;  %v4653_v12 = vld [vmem:[%s7476_s3 + $0x340] sm:$0xff]  }
 0x168   :  { %4435 = vmatprep.subr.bf16.mxu0 %v4649_v58  ;;  %v2632_v22 = vadd.f32 %v2630_v34, %v2626_v6  ;;  %v2643_v26 = vmul.f32 %v2641_v47, %v7969_v8  ;;  %v2653_v36 = vstv %s6964_s27  ;;  %v2385_v0 = vstv %s6969_s10  ;;  %v7973_v6 = vld [vmem:[#allocation31_spill] sm:$0xff]  ;;  %s7044_s27 = sld [smem:[#allocation2 + $0xe6]] }
 0x169   :  { %v2633_v46 = vadd.f32 %v2631_v30, %v2627_v39  ;;  %v2376_v43 = vadd.f32 %v2374_v16, %v2370_v59  ;;  %v2377_v20 = vadd.f32 %v2375_v40, %v2371_v15  ;;  %v2648_v14 = vmul.f32 %v2647_v18, %v7970_v54  ;;  %v4655_v16 = vld [vmem:[%s7476_s3 + $0x300] sm:$0xff]   ;;  %v7972_v40 = vld [vmem:[#allocation30_spill] sm:$0xff]  ;;  %s7143_s10 = sld [smem:[#allocation2 + $0x37]] }
 0x16a   :  { %v2638_v49 = vadd.f32 %v2636_v23, %v2632_v22  ;;  %v2649_v9 = vmul.f32 %v2647_v18, %v7971_v45  ;;  %v2659_v53 = vstv %s6974_s13  ;;  %v2654_v47 = vmul.f32 %v2653_v36, %v7972_v40  ;;  %v7974_v59 = vld [vmem:[#allocation32_spill] sm:$0xff]  ;;  %s7238_s13 = sld [smem:[#allocation2 + $0x6f]] }
 0x16b   :  { %v2639_v58 = vadd.f32 %v2637_v13, %v2633_v46  ;;  %v2382_v34 = vadd.f32 %v2380_v37, %v2376_v43  ;;  %v2383_v30 = vadd.f32 %v2381_v17, %v2377_v20  ;;  %4436 = vmatpush3.bf16.msra.mxu0 %v4651_v33  ;;  %v2655_v39 = vmul.f32 %v2653_v36, %v7973_v6  ;;  %v7975_v33 = vld [vmem:[#allocation33_spill] sm:$0xff]  ;;  %v7999_v6 = vld [vmem:[#allocation55_spill] sm:$0xff] }
 0x16c   :  { %4437 = vmatprep.subr.bf16.mxu0 %v4653_v12  ;;  %v2644_v29 = vadd.f32 %v2642_v19, %v2638_v49  ;;  %v2665_v13 = vstv %s6988_s22  ;;  %v2660_v50 = vmul.f32 %v2659_v53, %v7974_v59  ;;  %v2661_v22 = vmul.f32 %v2659_v53, %v7975_v33  ;;  %v4628_v53 = vld [vmem:[%s7476_s3 + $0x3b8] sm:$0xff]   ;;  %s7062_s22 = sld [smem:[#allocation2 + $0xfe]] }
 0x16d   :  { %v2645_v23 = vadd.f32 %v2643_v26, %v2639_v58  ;;  %v2386_v37 = vadd.f32 %v2385_v0, %v2382_v34  ;;  %v2387_v18 = vadd.f32 %v2385_v0, %v2383_v30  ;;  %v2671_v46 = vstv %s6996_s30  ;;  %v7976_v26 = vld [vmem:[#allocation34_spill] sm:$0xff]  ;;  %v7977_v0 = vld [vmem:[#allocation35_spill] sm:$0xff]  ;;  %v7978_v34 = vld [vmem:[#allocation36_spill] sm:$0xff]  ;;  %s7066_s30 = sld [smem:[#allocation2 + $0x106]] }
 0x16e   :  { %v2650_v15 = vadd.f32 %v2648_v14, %v2644_v29  ;;  %v2666_v36 = vmul.f32 %v2665_v13, %v7976_v26  ;;  %v2667_v49 = vmul.f32 %v2665_v13, %v7977_v0  ;;  %v2677_v14 = vstv %s7005_s17  ;;  %s7075_s17 = sld [smem:[#allocation2 + $0x7]] }
 0x16f   :  { %v2651_v17 = vadd.f32 %v2649_v9, %v2645_v23  ;;  %v2388_v19 = vmax.f32 %v2386_v37, 0.0  ;;  %v2389_v12 = vmax.f32 %v2387_v18, 0.0  ;;  %4438 = vmatpush3.bf16.msra.mxu0 %v4655_v16  ;;  %v2672_v30 = vmul.f32 %v2671_v46, %v7978_v34  ;;  %v7979_v16 = vld [vmem:[#allocation37_spill] sm:$0xff]  ;;  %v7980_v18 = vld [vmem:[#allocation38_spill] sm:$0xff] }
 0x170   :  { %v2656_v43 = vadd.f32 %v2654_v47, %v2650_v15  ;;  %v2673_v29 = vmul.f32 %v2671_v46, %v7979_v16  ;;  %v4630_v47 = vld [vmem:[%s7476_s3 + $0x3f0] sm:$0xff]   ;;  %v2683_v13 = vstv %s7012_s0  ;;  %v2689_v37 = vstv %s7016_s24  ;;  %s7082_s0 = sld [smem:[#allocation2 + $0xf]]  ;;  %v7989_v16 = vld [vmem:[#allocation47_spill] sm:$0xff] }
 0x171   :  { %v2657_v20 = vadd.f32 %v2655_v39, %v2651_v17  ;;  %v2391_v58 = vpack.c.bf16 %v2389_v12, %v2389_v12  ;;  %v2390_v9 = vpack.c.bf16 %v2388_v19, %v2388_v19  ;;  %v2678_v15 = vmul.f32 %v2677_v14, %v7980_v18  ;;  %v7981_v17 = vld [vmem:[#allocation39_spill] sm:$0xff]  ;;  %s7088_s24 = sld [smem:[#allocation2 + $0x17]] }
 0x172   :  { %v2662_v23 = vadd.f32 %v2660_v50, %v2656_v43  ;;  %v2679_v19 = vmul.f32 %v2677_v14, %v7981_v17  ;;  %v2695_v51 = vstv %s7020_s11  ;;  %v2701_v31 = vstv %s7026_s21  ;;  %v4632_v50 = vld [vmem:[%s7476_s3 + $0x3b0] sm:$0xff]   ;;  %s7092_s11 = sld [smem:[#allocation2 + $0x1f]] }
 0x173   :  { %v2663_v39 = vadd.f32 %v2661_v22, %v2657_v20  ;;  %2553 = vmatprep.mubr.bf16.mxu1 %v2391_v58  ;;  %v7982_v22 = vld [vmem:[#allocation40_spill] sm:$0xff]  ;;  %v7983_v20 = vld [vmem:[#allocation41_spill] sm:$0xff]  ;;  %v7984_v58 = vld [vmem:[#allocation42_spill] sm:$0xff]  ;;  %v2713_v18 = vstv %s7033_s19  ;;  %v2703_v34 = vmul.f32 %v2701_v31, %v7989_v16  ;;  %v2719_v26 = vstv %s7037_s25  ;;  %s7103_s21 = sld [smem:[#allocation2 + $0x27]] }
 0x174   :  { %2554 = vmatmul.mubr.bf16.vlgmr.msra.gmra.mxu1 %v2390_v9  ;;  %v2668_v46 = vadd.f32 %v2666_v36, %v2662_v23  ;;  %v2684_v43 = vmul.f32 %v2683_v13, %v7982_v22  ;;  %v2685_v14 = vmul.f32 %v2683_v13, %v7983_v20  ;;  %v2690_v17 = vmul.f32 %v2689_v37, %v7984_v58  ;;  %v7985_v9 = vld [vmem:[#allocation43_spill] sm:$0xff]  ;;  %v7986_v13 = vld [vmem:[#allocation44_spill] sm:$0xff]  ;;  %v7987_v58 = vld [vmem:[#allocation45_spill] sm:$0xff]  ;;  %s7126_s25 = sld [smem:[#allocation2 + $0x2f]] }
 0x175   :  { %v2669_v12 = vadd.f32 %v2667_v49, %v2663_v39  ;;  %4446 = vmatpush3.bf16.msra.mxu1 %v4628_v53  ;;  %v2691_v36 = vmul.f32 %v2689_v37, %v7985_v9  ;;  %v4634_v49 = vld [vmem:[%s7476_s3 + $0x3e8] sm:$0xff]   ;;  %v2707_v39 = vstv %s7030_s1  ;;  %v2696_v20 = vmul.f32 %v2695_v51, %v7986_v13  ;;  %v7988_v37 = vld [vmem:[#allocation46_spill] sm:$0xff]  ;;  %s7216_s1 = sld [smem:[#allocation2 + $0x5f]] }
 0x176   :  { %4447 = vmatprep.subr.bf16.mxu1 %v4630_v47  ;;  %v2674_v53 = vadd.f32 %v2672_v30, %v2668_v46  ;;  %v2697_v22 = vmul.f32 %v2695_v51, %v7987_v58  ;;  %v2702_v9 = vmul.f32 %v2701_v31, %v7988_v37  ;;  %v2725_v30 = vstv %s7040_s23  ;;  %v4636_v51 = vld [vmem:[%s7476_s3 + $0x3a8] sm:$0xff]   ;;  %v7991_v46 = vld [vmem:[#allocation48_spill] sm:$0xff]  ;;  %s7345_s19 = sld [smem:[#allocation2 + $0xf7]] }
 0x177   :  { %v2675_v23 = vadd.f32 %v2673_v29, %v2669_v12  ;;  %v2708_v31 = vmul.f32 %v2707_v39, %v7991_v46  ;;  %v7992_v12 = vld [vmem:[#allocation49_spill] sm:$0xff]  ;;  %v2731_v58 = vstv %s7044_s27  ;;  %v2737_v13 = vstv %s7051_s28  ;;  %v7996_v46 = vld [vmem:[#allocation52_spill] sm:$0xff]  ;;  %s7360_s23 = sld [smem:[#allocation2 + $0x107]] }
 0x178   :  { %v2680_v47 = vadd.f32 %v2678_v15, %v2674_v53  ;;  %v7094_v29 = vpop.f32.mrf.mxu1  ;;  %v2709_v16 = vmul.f32 %v2707_v39, %v7992_v12  ;;  %v7993_v15 = vld [vmem:[#allocation50_spill] sm:$0xff]  ;;  %v7994_v53 = vld [vmem:[#allocation51_spill] sm:$0xff]  ;;  %v7113_v39 = vmul.f32 %v2719_v26, %v7996_v46  ;;  %v7123_v40 = vmul.f32 %v2725_v30, %v7999_v6  ;;  %v8004_v6 = vld [vmem:[#allocation60_spill] sm:$0xff]  ;;  %s7366_s27 = sld [smem:[#allocation2 + $0x10f]] }
 0x179   :  { %v2681_v0 = vadd.f32 %v2679_v19, %v2675_v23  ;;  %7990 = vst [vmem:[#allocation72_spill] sm:$0xff] %v7094_v29  ;;  %4448 = vmatpush3.bf16.msra.mxu1 %v4632_v50  ;;  %v2714_v19 = vmul.f32 %v2713_v18, %v7993_v15  ;;  %v2715_v23 = vmul.f32 %v2713_v18, %v7994_v53  ;;  %v4638_v50 = vld [vmem:[%s7476_s3 + $0x3e0] sm:$0xff]   ;;  %v7997_v15 = vld [vmem:[#allocation53_spill] sm:$0xff]  ;;  %v7998_v18 = vld [vmem:[#allocation54_spill] sm:$0xff] }
 0x17a   :  { %4449 = vmatprep.subr.bf16.mxu1 %v4634_v49  ;;  %v2686_v29 = vadd.f32 %v2684_v43, %v2680_v47  ;;  %v7110_v33 = vpop.f32.mrf.mxu1  ;;  %v7116_v12 = vmul.f32 %v2719_v26, %v7997_v15  ;;  %v7119_v53 = vmul.f32 %v2725_v30, %v7998_v18  ;;  %v2743_v49 = vstv %s7058_s26  ;;  %v4640_v26 = vld [vmem:[%s7476_s3 + $0x3a0] sm:$0xff]   ;;  %v8001_v18 = vld [vmem:[#allocation57_spill] sm:$0xff]  ;;  %v8003_v30 = vld [vmem:[#allocation59_spill] sm:$0xff]  ;;  %s7263_s26 = sld [smem:[#allocation2 + $0x7f]] }
 0x17b   :  { %v2687_v37 = vadd.f32 %v2685_v14, %v2681_v0  ;;  %7995 = vst [vmem:[#allocation73_spill] sm:$0xff] %v7110_v33  ;;  %v2749_v0 = vstv %s7062_s22  ;;  %v8000_v14 = vld [vmem:[#allocation56_spill] sm:$0xff]  ;;  %v7149_v15 = vmul.f32 %v2743_v49, %v8004_v6  ;;  %s7169_s22 = sld [smem:[#allocation2 + $0x3f]]  ;;  %v2981_v33 = vstv %s7103_s21  ;;  %v4646_v6 = vld [vmem:[%s7476_s3 + $0x3d0] sm:$0xff]  }
 0x17c   :  { %v2692_v59 = vadd.f32 %v2690_v17, %v2686_v29  ;;  %v4332_v43 = vpop.f32.mrf.mxu1  ;;  %v7132_v47 = vmul.f32 %v2731_v58, %v8000_v14  ;;  %v7135_v17 = vmul.f32 %v2731_v58, %v8001_v18  ;;  %v7141_v29 = vmul.f32 %v2737_v13, %v8003_v30  ;;  %v8005_v58 = vld [vmem:[#allocation61_spill] sm:$0xff]  ;;  %v8006_v30 = vld [vmem:[#allocation62_spill] sm:$0xff]  ;;  %s7210_s21 = sld [smem:[#allocation2 + $0x11e]] }
 0x17d   :  { %v2693_v5 = vadd.f32 %v2691_v36, %v2687_v37  ;;  %4450 = vmatpush3.bf16.msra.mxu1 %v4636_v51  ;;  %v8002_v36 = vld [vmem:[#allocation58_spill] sm:$0xff]  ;;  %v4642_v51 = vld [vmem:[%s7476_s3 + $0x3d8] sm:$0xff]   ;;  %v7155_v18 = vmul.f32 %v2749_v0, %v8006_v30  ;;  %v2963_v30 = vstv %s7082_s0  ;;  %s7313_s0 = sld [smem:[#allocation2 + $0xbf]] }
 0x17e   :  { %v7138_v37 = vmul.f32 %v2737_v13, %v8002_v36  ;;  %4451 = vmatprep.subr.bf16.mxu1 %v4638_v50  ;;  %v2698_v43 = vadd.f32 %v2696_v20, %v2692_v59  ;;  %v7152_v36 = vmul.f32 %v2743_v49, %v8005_v58  ;;  %v4333_v13 = vpop.f32.mrf.mxu1  ;;  %v8007_v50 = vld [vmem:[#allocation63_spill] sm:$0xff] }
 0x17f   :  { %v2699_v14 = vadd.f32 %v2697_v22, %v2693_v5  ;;  %v7158_v46 = vmul.f32 %v2749_v0, %v8007_v50  ;;  %v2957_v5 = vstv %s7075_s17  ;;  %v4644_v59 = vld [vmem:[%s7476_s3 + $0x398] sm:$0xff]   ;;  %v8008_v13 = vld [vmem:[#allocation9_spill] sm:$0xff]  ;;  %v2969_v0 = vstv %s7088_s24  ;;  %s7298_s17 = sld [smem:[#allocation2 + $0xa7]] }
 0x180   :  { %v2704_v22 = vadd.f32 %v2702_v9, %v2698_v43  ;;  %v2958_v49 = vmul.f32 %v2957_v5, %v7959_v42  ;;  %v2959_v58 = vmul.f32 %v2957_v5, %v8008_v13  ;;  %v2975_v50 = vstv %s7092_s11  ;;  %v8010_v43 = vld [vmem:[#allocation11_spill] sm:$0xff]  ;;  %s7197_s11 = sld [smem:[#allocation2 + $0x57]] }
 0x181   :  { %v2705_v20 = vadd.f32 %v2703_v34, %v2699_v14  ;;  %4452 = vmatpush3.bf16.msra.mxu1 %v4640_v26  ;;  %v8009_v14 = vld [vmem:[#allocation10_spill] sm:$0xff]  ;;  %v2965_v5 = vmul.f32 %v2963_v30, %v8010_v43  ;;  %v2970_v26 = vmul.f32 %v2969_v0, %v7910_v35  ;;  %v2971_v13 = vmul.f32 %v2969_v0, %v7911_v32  ;;  %s7318_s24 = sld [smem:[#allocation2 + $0xc7]] }
 0x182   :  { %4453 = vmatprep.subr.bf16.mxu1 %v4642_v51  ;;  %v2710_v9 = vadd.f32 %v2708_v31, %v2704_v22  ;;  %v2964_v42 = vmul.f32 %v2963_v30, %v8009_v14  ;;  %v2976_v45 = vmul.f32 %v2975_v50, %v7961_v27  ;;  %v2977_v51 = vmul.f32 %v2975_v50, %v7962_v28  ;;  %v4648_v35 = vld [vmem:[%s7476_s3 + $0x390] sm:$0xff]   ;;  %v8011_v22 = vld [vmem:[#allocation64_spill] sm:$0xff] }
 0x183   :  { %v2711_v34 = vadd.f32 %v2709_v16, %v2705_v20  ;;  %v2967_v31 = vadd.f32 %v2965_v5, %v2959_v58  ;;  %v2982_v32 = vmul.f32 %v2981_v33, %v7763_v7  ;;  %v2983_v27 = vmul.f32 %v2981_v33, %v7963_v60 }
 0x184   :  { %v2716_v54 = vadd.f32 %v2714_v19, %v2710_v9  ;;  %v2966_v16 = vadd.f32 %v2964_v42, %v2958_v49  ;;  %v2987_v28 = vstv %s7126_s25  ;;  %v2993_v30 = vstv %s7143_s10  ;;  %v4650_v19 = vld [vmem:[%s7476_s3 + $0x3c8] sm:$0xff]   ;;  %s7230_s10 = sld [smem:[#allocation2 + $0x67]] }
 0x185   :  { %v2717_v44 = vadd.f32 %v2715_v23, %v2711_v34  ;;  %4454 = vmatpush3.bf16.msra.mxu1 %v4644_v59  ;;  %v2973_v59 = vadd.f32 %v2971_v13, %v2967_v31  ;;  %v8012_v7 = vstv %s7066_s30  ;;  %v2761_v33 = vstv %s7161_s29  ;;  %s7249_s30 = sld [smem:[#allocation2 + $0x77]] }
 0x186   :  { %4455 = vmatprep.subr.bf16.mxu1 %v4646_v6  ;;  %v2722_v23 = vadd.f32 %v7113_v39, %v2716_v54  ;;  %v2972_v50 = vadd.f32 %v2970_v26, %v2966_v16  ;;  %v7207_v60 = vmul.f32 %v8012_v7, %v8011_v22  ;;  %v2988_v6 = vmul.f32 %v2987_v28, %v4907_v52  ;;  %v4652_v39 = vld [vmem:[%s7476_s3 + $0x388] sm:$0xff]   ;;  %v4656_v16 = vld [vmem:[%s7476_s3 + $0x380] sm:$0xff]   ;;  %s7294_s29 = sld [smem:[#allocation2 + $0x9f]] }
 0x187   :  { %v2723_v58 = vadd.f32 %v7116_v12, %v2717_v44  ;;  %v2989_v20 = vmul.f32 %v2987_v28, %v4915_v55  ;;  %v2979_v12 = vadd.f32 %v2977_v51, %v2973_v59  ;;  %v2994_v0 = vmul.f32 %v2993_v30, %v4917_v56  ;;  %v8013_v56 = vld [vmem:[#allocation65_spill] sm:$0xff]  ;;  %v8015_v28 = vld [vmem:[#allocation67_spill] sm:$0xff]  ;;  %s7355_s25 = sld [smem:[#allocation2 + $0xff]] }
 0x188   :  { %v2728_v49 = vadd.f32 %v7119_v53, %v2722_v23  ;;  %v2978_v44 = vadd.f32 %v2976_v45, %v2972_v50  ;;  %v2995_v52 = vmul.f32 %v2993_v30, %v4919_v57  ;;  %v2999_v55 = vstv %s7169_s22  ;;  %v4654_v45 = vld [vmem:[%s7476_s3 + $0x3c0] sm:$0xff]   ;;  %s7257_s3 = sld [smem:[#allocation4 + $0x6]] }
 0x189   :  { %v2729_v54 = vadd.f32 %v7123_v40, %v2723_v58  ;;  %4456 = vmatpush3.bf16.msra.mxu1 %v4648_v35  ;;  %v3005_v9 = vstv %s7175_s14  ;;  %v2985_v14 = vadd.f32 %v2983_v27, %v2979_v12  ;;  %v8014_v42 = vmov %v8012_v7  ;;  %s7270_s22 = sld [smem:[#allocation2 + $0x87]] }
 0x18a   :  { %4457 = vmatprep.subr.bf16.mxu1 %v4650_v19  ;;  %v2734_v40 = vadd.f32 %v7132_v47, %v2728_v49  ;;  %v2984_v34 = vadd.f32 %v2982_v32, %v2978_v44  ;;  %v2757_v57 = vmul.f32 %v8014_v42, %v8013_v56  ;;  %v3000_v43 = vmul.f32 %v2999_v55, %v7703_v25  ;;  %s7282_s14 = sld [smem:[#allocation2 + $0x8f]] }
 0x18b   :  { %v2735_v53 = vadd.f32 %v7135_v17, %v2729_v54  ;;  %v3001_v5 = vmul.f32 %v2999_v55, %v4929_v61  ;;  %v3011_v26 = vstv %s7186_s12  ;;  %v2991_v51 = vadd.f32 %v2989_v20, %v2985_v14  ;;  %s7304_s12 = sld [smem:[#allocation2 + $0xaf]] }
 0x18c   :  { %v2740_v47 = vadd.f32 %v7138_v37, %v2734_v40  ;;  %v2990_v13 = vadd.f32 %v2988_v6, %v2984_v34  ;;  %v2767_v31 = vstv %s7188_s2  ;;  %v3006_v25 = vmul.f32 %v3005_v9, %v4931_v62  ;;  %s7308_s2 = sld [smem:[#allocation2 + $0xb7]] }
 0x18d   :  { %v2741_v17 = vadd.f32 %v7141_v29, %v2735_v53  ;;  %4458 = vmatpush3.bf16.msra.mxu1 %v4652_v39  ;;  %v3007_v61 = vmul.f32 %v3005_v9, %v7704_v1  ;;  %v3017_v35 = vstv %s7197_s11  ;;  %v2997_v27 = vadd.f32 %v2995_v52, %v2991_v51  ;;  %s7323_s11 = sld [smem:[#allocation2 + $0xcf]] }
 0x18e   :  { %4459 = vmatprep.subr.bf16.mxu1 %v4654_v45  ;;  %v2746_v37 = vadd.f32 %v7149_v15, %v2740_v47  ;;  %v2996_v32 = vadd.f32 %v2994_v0, %v2990_v13  ;;  %v2763_v30 = vmul.f32 %v2761_v33, %v8015_v28  ;;  %v2773_v19 = vstv %s7210_s21  ;;  %v8016_v0 = vld [vmem:[#allocation66_spill] sm:$0xff]  ;;  %s7338_s21 = sld [smem:[#allocation2 + $0xe7]] }
 0x18f   :  { %v2747_v29 = vadd.f32 %v7152_v36, %v2741_v17  ;;  %v3012_v62 = vmul.f32 %v3011_v26, %v7707_v21  ;;  %v3013_v1 = vmul.f32 %v3011_v26, %v4943_v3  ;;  %v3003_v15 = vadd.f32 %v3001_v5, %v2997_v27  ;;  %v8018_v26 = vld [vmem:[#allocation28_spill] sm:$0xff]  ;;  %v8019_v17 = vld [vmem:[#allocation29_spill] sm:$0xff]  ;;  %v8022_v27 = vld [vmem:[#allocation70_spill] sm:$0xff] }
 0x190   :  { %v3002_v58 = vadd.f32 %v3000_v43, %v2996_v32  ;;  %v3023_v50 = vstv %s7216_s1  ;;  %v2752_v36 = vadd.f32 %v7155_v18, %v2746_v37  ;;  %v2769_v59 = vmul.f32 %v2767_v31, %v7702_v24  ;;  %v8017_v43 = vld [vmem:[#allocation68_spill] sm:$0xff]  ;;  %s7342_s1 = sld [smem:[#allocation2 + $0xef]] }
 0x191   :  { %v2753_v23 = vadd.f32 %v7158_v46, %v2747_v29  ;;  %4460 = vmatpush3.bf16.msra.mxu1 %v4656_v16  ;;  %v3018_v7 = vmul.f32 %v3017_v35, %v4945_v4  ;;  %v3019_v21 = vmul.f32 %v3017_v35, %v7710_v41  ;;  %v3009_v46 = vadd.f32 %v3007_v61, %v3003_v15  ;;  %v8020_v16 = vld [vmem:[#allocation30_spill] sm:$0xff] }
 0x192   :  { %v3008_v6 = vadd.f32 %v3006_v25, %v3002_v58  ;;  %v3029_v20 = vstv %s7230_s10  ;;  %v2775_v49 = vmul.f32 %v2773_v19, %v7967_v63  ;;  %v3024_v54 = vmul.f32 %v3023_v50, %v7711_v38  ;;  %s7372_s10 = sld [smem:[#allocation2 + $0x117]] }
 0x193   :  { %v2759_v3 = vadd.f32 %v2757_v57, %v2753_v23  ;;  %v3035_v18 = vstv %s7238_s13  ;;  %v3015_v39 = vadd.f32 %v3013_v1, %v3009_v46  ;;  %v3025_v4 = vmul.f32 %v3023_v50, %v7912_v10  ;;  %v8026_v46 = vld [vmem:[#allocation35_spill] sm:$0xff]  ;;  %s7378_s13 = sld [smem:[#allocation2 + $0x11f]] }
 0x194   :  { %v3014_v12 = vadd.f32 %v3012_v62, %v3008_v6  ;;  %v2758_v41 = vadd.f32 %v7207_v60, %v2752_v36  ;;  %v2762_v52 = vmul.f32 %v2761_v33, %v8016_v0  ;;  %v3030_v55 = vmul.f32 %v3029_v20, %v7913_v48  ;;  %v8023_v62 = vld [vmem:[#allocation32_spill] sm:$0xff]  ;;  %v8024_v36 = vld [vmem:[#allocation33_spill] sm:$0xff]  ;;  %v8025_v6 = vld [vmem:[#allocation34_spill] sm:$0xff] }
 0x195   :  { %v2765_v44 = vadd.f32 %v2763_v30, %v2759_v3  ;;  %v3041_v9 = vstv %s7249_s30  ;;  %v3021_v38 = vadd.f32 %v3019_v21, %v3015_v39  ;;  %v3031_v53 = vmul.f32 %v3029_v20, %v7914_v11 }
 0x196   :  { %v3020_v40 = vadd.f32 %v3018_v7, %v3014_v12  ;;  %v2779_v34 = vstv %s7257_s3  ;;  %v3036_v10 = vmul.f32 %v3035_v18, %v7968_v2  ;;  %v3037_v60 = vmul.f32 %v3035_v18, %v7969_v8  ;;  %v8027_v12 = vld [vmem:[#allocation36_spill] sm:$0xff] }
 0x197   :  { %v2771_v45 = vadd.f32 %v2769_v59, %v2765_v44  ;;  %v3027_v42 = vadd.f32 %v3025_v4, %v3021_v38  ;;  %v3047_v48 = vstv %s7263_s26  ;;  %v2764_v57 = vadd.f32 %v2762_v52, %v2758_v41  ;;  %v8028_v4 = vld [vmem:[#allocation37_spill] sm:$0xff]  ;;  %v8030_v38 = vld [vmem:[#allocation39_spill] sm:$0xff]  ;;  %s4223_s26 = sld [smem:[#allocation4 + $0x7]] }
 0x198   :  { %v3026_v33 = vadd.f32 %v3024_v54, %v3020_v40  ;;  %v2768_v5 = vmul.f32 %v2767_v31, %v8017_v43  ;;  %v3042_v47 = vmul.f32 %v3041_v9, %v8018_v26  ;;  %v3043_v11 = vmul.f32 %v3041_v9, %v8019_v17  ;;  %v8021_v31 = vld [vmem:[#allocation31_spill] sm:$0xff] }
 0x199   :  { %v2777_v14 = vadd.f32 %v2775_v49, %v2771_v45  ;;  %v3033_v51 = vadd.f32 %v3031_v53, %v3027_v42  ;;  %v3053_v8 = vstv %s7270_s22  ;;  %v3048_v25 = vmul.f32 %v3047_v48, %v8020_v16  ;;  %v8029_v45 = vld [vmem:[#allocation38_spill] sm:$0xff]  ;;  %v8031_v42 = vld [vmem:[#allocation40_spill] sm:$0xff] }
 0x19a   :  { %v3032_v2 = vadd.f32 %v3030_v55, %v3026_v33  ;;  %v3049_v29 = vmul.f32 %v3047_v48, %v8021_v31  ;;  %v2770_v32 = vadd.f32 %v2768_v5, %v2764_v57  ;;  %v2774_v30 = vmul.f32 %v2773_v19, %v8022_v27  ;;  %v8032_v57 = vld [vmem:[#allocation41_spill] sm:$0xff] }
 0x19b   :  { %v2781_v13 = vadd.f32 %v2779_v34, %v2777_v14  ;;  %v3039_v37 = vadd.f32 %v3037_v60, %v3033_v51  ;;  %v3054_v1 = vmul.f32 %v3053_v8, %v8023_v62  ;;  %v3059_v23 = vstv %s7282_s14  ;;  %v8037_v62 = vld [vmem:[#allocation46_spill] sm:$0xff] }
 0x19c   :  { %v3038_v35 = vadd.f32 %v3036_v10, %v3032_v2  ;;  %v3055_v59 = vmul.f32 %v3053_v8, %v8024_v36  ;;  %v3065_v7 = vstv %s7288_s16  ;;  %v3060_v19 = vmul.f32 %v3059_v23, %v8025_v6  ;;  %v8034_v2 = vld [vmem:[#allocation43_spill] sm:$0xff]  ;;  %v8039_v36 = vld [vmem:[#allocation72_spill] sm:$0xff] }
 0x19d   :  { %v2783_v61 = vmax.f32 %v2781_v13, 0.0  ;;  %v3045_v50 = vadd.f32 %v3043_v11, %v3039_v37  ;;  %v3061_v20 = vmul.f32 %v3059_v23, %v8026_v46  ;;  %v2776_v49 = vadd.f32 %v2774_v30, %v2770_v32  ;;  %v8033_v11 = vld [vmem:[#allocation42_spill] sm:$0xff]  ;;  %v8036_v37 = vld [vmem:[#allocation45_spill] sm:$0xff]  ;;  %v8038_v23 = vld [vmem:[#allocation47_spill] sm:$0xff] }
 0x19e   :  { %v3044_v15 = vadd.f32 %v3042_v47, %v3038_v35  ;;  %v3071_v54 = vstv %s7294_s29  ;;  %v3066_v39 = vmul.f32 %v3065_v7, %v8027_v12  ;;  %v3067_v41 = vmul.f32 %v3065_v7, %v8028_v4  ;;  %v8041_v6 = vld [vmem:[#allocation48_spill] sm:$0xff]  ;;  %v8042_v46 = vld [vmem:[#allocation49_spill] sm:$0xff] }
 0x19f   :  { %v2785_v58 = vpack.c.bf16 %v2783_v61, %v2783_v61  ;;  %v3051_v3 = vadd.f32 %v3049_v29, %v3045_v50  ;;  %v3077_v52 = vstv %s7298_s17  ;;  %v3072_v40 = vmul.f32 %v3071_v54, %v8029_v45  ;;  %v8035_v61 = vld [vmem:[#allocation44_spill] sm:$0xff] }
 0x1a0   :  { %v3050_v21 = vadd.f32 %v3048_v25, %v3044_v15  ;;  %v3073_v53 = vmul.f32 %v3071_v54, %v8030_v38  ;;  %v2780_v10 = vadd.f32 %v2779_v34, %v2776_v49  ;;  %v3083_v60 = vstv %s7304_s12 }
 0x1a1   :  { %2947 = vmatprep.mubr.bf16.mxu0 %v2785_v58  ;;  %v3057_v44 = vadd.f32 %v3055_v59, %v3051_v3  ;;  %v3078_v48 = vmul.f32 %v3077_v52, %v8031_v42  ;;  %v3079_v5 = vmul.f32 %v3077_v52, %v8032_v57  ;;  %v3089_v26 = vstv %s7308_s2  ;;  %v8040_v59 = vld [vmem:[#allocation73_spill] sm:$0xff]  ;;  %v8048_v42 = vld [vmem:[#allocation55_spill] sm:$0xff] }
 0x1a2   :  { %v3056_v18 = vadd.f32 %v3054_v1, %v3050_v21  ;;  %v3084_v13 = vmul.f32 %v3083_v60, %v8033_v11  ;;  %v3085_v34 = vmul.f32 %v3083_v60, %v8034_v2  ;;  %v2782_v51 = vmax.f32 %v2780_v10, 0.0  ;;  %v8051_v2 = vld [vmem:[#allocation56_spill] sm:$0xff] }
 0x1a3   :  { %v3063_v9 = vadd.f32 %v3061_v20, %v3057_v44  ;;  %v3095_v8 = vstv %s7313_s0  ;;  %v3090_v35 = vmul.f32 %v3089_v26, %v8035_v61  ;;  %v3091_v31 = vmul.f32 %v3089_v26, %v8036_v37  ;;  %v8043_v44 = vld [vmem:[#allocation50_spill] sm:$0xff]  ;;  %v8049_v26 = vld [vmem:[#allocation21_spill] sm:$0xff] }
 0x1a4   :  { %v3062_v55 = vadd.f32 %v3060_v19, %v3056_v18  ;;  %v3101_v29 = vstv %s7318_s24  ;;  %v3096_v1 = vmul.f32 %v3095_v8, %v8037_v62  ;;  %v3097_v58 = vmul.f32 %v3095_v8, %v8038_v23 }
 0x1a5   :  { %v3069_v33 = vadd.f32 %v3067_v41, %v3063_v9  ;;  %v3107_v15 = vstv %s7323_s11  ;;  %v2784_v50 = vpack.c.bf16 %v2782_v51, %v2782_v51  ;;  %v4331_v7 = vadd.f32 %v8040_v59, %v8039_v36  ;;  %v8045_v9 = vld [vmem:[#allocation52_spill] sm:$0xff]  ;;  %v8052_v51 = vld [vmem:[#allocation57_spill] sm:$0xff] }
 0x1a6   :  { %v3068_v14 = vadd.f32 %v3066_v39, %v3062_v55  ;;  %v3102_v19 = vmul.f32 %v3101_v29, %v8041_v6  ;;  %v3103_v20 = vmul.f32 %v3101_v29, %v8042_v46  ;;  %v3113_v49 = vstv %s7328_s15  ;;  %v8044_v39 = vld [vmem:[#allocation51_spill] sm:$0xff]  ;;  %v8056_v36 = vld [vmem:[#allocation61_spill] sm:$0xff] }
 0x1a7   :  { %v3075_v17 = vadd.f32 %v3073_v53, %v3069_v33  ;;  %2948 = vmatmul.mubr.bf16.vlgmr.msra.gmra.mxu0 %v2784_v50  ;;  %v3108_v12 = vmul.f32 %v3107_v15, %v8043_v44  ;;  %v3109_v4 = vmul.f32 %v3107_v15, %v8044_v39  ;;  %v3119_v41 = vstv %s7333_s20  ;;  %v4658_v39 = vld [vmem:[%s7478_s5 + $0x30] sm:$0xff]  }
 0x1a8   :  { %v3074_v47 = vadd.f32 %v3072_v40, %v3068_v14  ;;  %v3114_v45 = vmul.f32 %v3113_v49, %v8045_v9  ;;  %v8046_v40 = vld [vmem:[#allocation53_spill] sm:$0xff]  ;;  %v3125_v53 = vstv %s7338_s21  ;;  %v8047_v14 = vld [vmem:[#allocation54_spill] sm:$0xff]  ;;  %v3131_v57 = vstv %s7342_s1 }
 0x1a9   :  { %v3081_v25 = vadd.f32 %v3079_v5, %v3075_v17  ;;  %v3115_v38 = vmul.f32 %v3113_v49, %v8046_v40  ;;  %v3120_v33 = vmul.f32 %v3119_v41, %v8047_v14  ;;  %v3137_v5 = vstv %s7345_s19  ;;  %v8057_v49 = vld [vmem:[#allocation62_spill] sm:$0xff] }
 0x1aa   :  { %v3080_v16 = vadd.f32 %v3078_v48, %v3074_v47  ;;  %v3121_v48 = vmul.f32 %v3119_v41, %v8048_v42  ;;  %v8050_v47 = vld [vmem:[#allocation22_spill] sm:$0xff]  ;;  %v3127_v8 = vmul.f32 %v3125_v53, %v8052_v51  ;;  %v3139_v59 = vmul.f32 %v3137_v5, %v8056_v36 }
 0x1ab   :  { %v3087_v30 = vadd.f32 %v3085_v34, %v3081_v25  ;;  %v4309_v17 = vadd.f32 %v8050_v47, %v8049_v26  ;;  %v3126_v34 = vmul.f32 %v3125_v53, %v8051_v2  ;;  %v3149_v6 = vstv %s7360_s23  ;;  %v4666_v36 = vld [vmem:[%s7480_s7 + $0x30] sm:$0xff]  }
 0x1ac   :  { %v3086_v32 = vadd.f32 %v3084_v13, %v3080_v16  ;;  %v4703_v46 = vmov 0.0   ;;  %v3151_v9 = vmul.f32 %v3149_v6, %v8013_v56  ;;  %v3167_v14 = vstv %s7378_s13 }
 0x1ad   :  { %v3093_v3 = vadd.f32 %v3091_v31, %v3087_v30  ;;  %v8054_v31 = vld [vmem:[#allocation59_spill] sm:$0xff]  ;;  %v8055_v30 = vld [vmem:[#allocation60_spill] sm:$0xff]  ;;  %v981_v23 = vadd.f32 %v4331_v7, %v4309_v17  ;;  %4485 = vmatprep.subr.bf16.mxu0 %v4703_v46  ;;  %4505 = vmatprep.subr.bf16.mxu1 %v4703_v46  ;;  %v3173_v17 = vstv %s4223_s26 }
 0x1ae   :  { %v3092_v21 = vadd.f32 %v3090_v35, %v3086_v32  ;;  %v8053_v35 = vld [vmem:[#allocation58_spill] sm:$0xff]  ;;  %v3133_v29 = vmul.f32 %v3131_v57, %v8054_v31  ;;  %v3138_v62 = vmul.f32 %v3137_v5, %v8055_v30  ;;  %v4660_v5 = vld [vmem:[%s7478_s5 + $0x20] sm:$0xff]   ;;  %4501 = vmatprep.mubr.msk.bf16.mxu0 %vm4704_vm0, %v4703_v46 }
 0x1af   :  { %v3099_v18 = vadd.f32 %v3097_v58, %v3093_v3  ;;  %v3132_v37 = vmul.f32 %v3131_v57, %v8053_v35  ;;  %v4657_v3 = vld [vmem:[%s7478_s5 + $0x38] sm:$0xff]  }
 0x1b0   :  { %v3098_v54 = vadd.f32 %v3096_v1, %v3092_v21  ;;  %v3143_v1 = vstv %s7355_s25  ;;  %4486 = vmatpush3.bf16.msra.mxu0 %v4657_v3  ;;  %v4669_v3 = vld [vmem:[%s7480_s7 + $0x18] sm:$0xff]  }
 0x1b1   :  { %v3105_v55 = vadd.f32 %v3103_v20, %v3099_v18  ;;  %v8058_v18 = vld [vmem:[#allocation63_spill] sm:$0xff]  ;;  %4487 = vmatprep.subr.bf16.mxu0 %v4703_v46 }
 0x1b2   :  { %v3104_v52 = vadd.f32 %v3102_v19, %v3098_v54  ;;  %v3144_v54 = vmul.f32 %v3143_v1, %v8057_v49  ;;  %v3145_v44 = vmul.f32 %v3143_v1, %v8058_v18 }
 0x1b3   :  { %v3111_v60 = vadd.f32 %v3109_v4, %v3105_v55  ;;  %v3155_v4 = vstv %s7366_s27  ;;  %v3150_v55 = vmul.f32 %v3149_v6, %v8011_v22  ;;  %v4670_v6 = vld [vmem:[%s7480_s7 + $0x10] sm:$0xff]  }
 0x1b4   :  { %v3110_v10 = vadd.f32 %v3108_v12, %v3104_v52  ;;  %v3156_v53 = vmul.f32 %v3155_v4, %v8016_v0  ;;  %4488 = vmatpush3.bf16.msra.mxu0 %v4658_v39  ;;  %v3168_v0 = vmul.f32 %v3167_v14, %v8022_v27 }
 0x1b5   :  { %v3117_v13 = vadd.f32 %v3115_v38, %v3111_v60  ;;  %v4659_v60 = vld [vmem:[%s7478_s5 + $0x28] sm:$0xff]   ;;  %4489 = vmatprep.subr.bf16.mxu0 %v4703_v46 }
 0x1b6   :  { %v3116_v11 = vadd.f32 %v3114_v45, %v3110_v10  ;;  %v3161_v45 = vstv %s7372_s10  ;;  %v3157_v10 = vmul.f32 %v3155_v4, %v8015_v28  ;;  %v3169_v28 = vmul.f32 %v3167_v14, %v7967_v63 }
 0x1b7   :  { %v3123_v61 = vadd.f32 %v3121_v48, %v3117_v13  ;;  %v3162_v56 = vmul.f32 %v3161_v45, %v8017_v43  ;;  %v3163_v42 = vmul.f32 %v3161_v45, %v7702_v24 }
 0x1b8   :  { %v4351_v16 = vpop.f32.mrf.mxu0  ;;  %v3122_v25 = vadd.f32 %v3120_v33, %v3116_v11  ;;  %4490 = vmatpush3.bf16.msra.mxu0 %v4659_v60 }
 0x1b9   :  { %v3129_v50 = vadd.f32 %v3127_v8, %v3123_v61  ;;  %4491 = vmatprep.subr.bf16.mxu0 %v4703_v46 }
 0x1ba   :  { %v4352_v32 = vpop.f32.mrf.mxu0  ;;  %v3128_v15 = vadd.f32 %v3126_v34, %v3122_v25 }
 0x1bb   :  { %v4353_v58 = vadd.f32 %v4352_v32, %v4351_v16  ;;  %v3135_v20 = vadd.f32 %v3133_v29, %v3129_v50  ;;  %v4662_v29 = vld [vmem:[%s7478_s5 + $0x10] sm:$0xff]   ;;  %v4665_v50 = vld [vmem:[%s7480_s7 + $0x38] sm:$0xff]  }
 0x1bc   :  { %v4354_v21 = vpop.f32.mrf.mxu0  ;;  %v3134_v7 = vadd.f32 %v3132_v37, %v3128_v15  ;;  %4492 = vmatpush3.bf16.msra.mxu0 %v4660_v5  ;;  %v4661_v37 = vld [vmem:[%s7478_s5 + $0x18] sm:$0xff]   ;;  %v4664_v15 = vld [vmem:[%s7478_s5] sm:$0xff]  }
 0x1bd   :  { %v1379_v19 = vadd.f32 %v4353_v58, %v981_v23  ;;  %v3141_v52 = vadd.f32 %v3139_v59, %v3135_v20  ;;  %4493 = vmatprep.subr.bf16.mxu0 %v4703_v46  ;;  %v4663_v23 = vld [vmem:[%s7478_s5 + $0x8] sm:$0xff]   ;;  %v4668_v21 = vld [vmem:[%s7480_s7 + $0x20] sm:$0xff]  }
 0x1be   :  { %v4355_v12 = vpop.f32.mrf.mxu0  ;;  %v3140_v41 = vadd.f32 %v3138_v62, %v3134_v7  ;;  %v4667_v59 = vld [vmem:[%s7480_s7 + $0x28] sm:$0xff]  }
 0x1bf   :  { %v3147_v38 = vadd.f32 %v3145_v44, %v3141_v52 }
 0x1c0   :  { %v3146_v40 = vadd.f32 %v3144_v54, %v3140_v41  ;;  %4494 = vmatpush3.bf16.msra.mxu0 %v4661_v37 }
 0x1c1   :  { %v3153_v22 = vadd.f32 %v3151_v9, %v3147_v38  ;;  %4495 = vmatprep.subr.bf16.mxu0 %v4703_v46 }
 0x1c2   :  { %v3152_v33 = vadd.f32 %v3150_v55, %v3146_v40  ;;  %v4272_v40 = vld [vmem:[%s7477_s4] ss:$0 sm:$0xff] }
 0x1c3   :  { %v3159_v57 = vadd.f32 %v3157_v10, %v3153_v22  ;;  %v4671_v22 = vld [vmem:[%s7480_s7 + $0x8] sm:$0xff]  }
 0x1c4   :  { %v3158_v48 = vadd.f32 %v3156_v53, %v3152_v33  ;;  %4496 = vmatpush3.bf16.msra.mxu0 %v4662_v29 }
 0x1c5   :  { %v3165_v47 = vadd.f32 %v3163_v42, %v3159_v57  ;;  %4497 = vmatprep.subr.bf16.mxu0 %v4703_v46  ;;  %v4273_v42 = vld [vmem:[%s7479_s6] ss:$0 sm:$0xff] }
 0x1c6   :  { %v3164_v26 = vadd.f32 %v3162_v56, %v3158_v48  ;;  %v4672_v56 = vld [vmem:[%s7480_s7] sm:$0xff]  }
 0x1c7   :  { %v3171_v43 = vadd.f32 %v3169_v28, %v3165_v47 }
 0x1c8   :  { %v3170_v11 = vadd.f32 %v3168_v0, %v3164_v26  ;;  %4498 = vmatpush3.bf16.msra.mxu0 %v4663_v23 }
 0x1c9   :  { %v3175_v13 = vadd.f32 %v3173_v17, %v3171_v43  ;;  %4499 = vmatprep.subr.bf16.mxu0 %v4703_v46 }
 0x1ca   :  { %v3174_v24 = vadd.f32 %v3173_v17, %v3170_v11 }
 0x1cb   :  { %v3177_v2 = vmax.f32 %v3175_v13, 0.0 }
 0x1cc   :  { %v3176_v27 = vmax.f32 %v3174_v24, 0.0  ;;  %4500 = vmatpush3.bf16.msra.mxu0 %v4664_v15 }
 0x1cd   :  { %v3179_v63 = vpack.c.bf16 %v3177_v2, %v3177_v2 }
 0x1ce   :  { %v3178_v34 = vpack.c.bf16 %v3176_v27, %v3176_v27 }
 0x1cf   :  { %3341 = vmatprep.mubr.bf16.mxu1 %v3179_v63 }
 0x1d0   :  { %3342 = vmatmul.mubr.bf16.vlgmr.msra.gmra.mxu1 %v3178_v34 }
 0x1d1   :  { %4521 = vmatprep.mubr.msk.bf16.mxu1 %vm4704_vm0, %v4703_v46  ;;  %4506 = vmatpush3.bf16.msra.mxu1 %v4665_v50 }
 0x1d2   :  { %4507 = vmatprep.subr.bf16.mxu1 %v4703_v46 }
 0x1d5   :  { %4508 = vmatpush3.bf16.msra.mxu1 %v4666_v36 }
 0x1d6   :  { %v4373_v51 = vpop.f32.mrf.mxu1  ;;  %4509 = vmatprep.subr.bf16.mxu1 %v4703_v46 }
 0x1d8   :  { %v4374_v8 = vpop.f32.mrf.mxu1 }
 0x1d9   :  { %v4375_v16 = vadd.f32 %v4374_v8, %v4373_v51  ;;  %4510 = vmatpush3.bf16.msra.mxu1 %v4667_v59 }
 0x1da   :  { %v4376_v25 = vpop.f32.mrf.mxu1  ;;  %4511 = vmatprep.subr.bf16.mxu1 %v4703_v46 }
 0x1db   :  { %v1773_v61 = vadd.f32 %v4375_v16, %v1379_v19 }
 0x1dc   :  { %v4377_v35 = vpop.f32.mrf.mxu1 }
 0x1dd   :  { %4512 = vmatpush3.bf16.msra.mxu1 %v4668_v21 }
 0x1de   :  { %4513 = vmatprep.subr.bf16.mxu1 %v4703_v46 }
 0x1e1   :  { %4514 = vmatpush3.bf16.msra.mxu1 %v4669_v3 }
 0x1e2   :  { %4515 = vmatprep.subr.bf16.mxu1 %v4703_v46 }
 0x1e5   :  { %4516 = vmatpush3.bf16.msra.mxu1 %v4670_v6 }
 0x1e6   :  { %4517 = vmatprep.subr.bf16.mxu1 %v4703_v46 }
 0x1e9   :  { %4518 = vmatpush3.bf16.msra.mxu1 %v4671_v22 }
 0x1ea   :  { %4519 = vmatprep.subr.bf16.mxu1 %v4703_v46  ;;  %v4282_v46 = vld [vmem:[%s7481_s8] ss:$0 sm:$0xff] }
 0x1ed   :  { %4520 = vmatpush3.bf16.msra.mxu1 %v4672_v56 }
 0x212   :  { %v4395_v31 = vpop.f32.mrf.mxu0 }
 0x214   :  { %v4396_v32 = vpop.f32.mrf.mxu0 }
 0x215   :  { %v4397_v30 = vadd.f32 %v4396_v32, %v4395_v31 }
 0x216   :  { %v4398_v62 = vpop.f32.mrf.mxu0 }
 0x217   :  { %v2167_v1 = vadd.f32 %v4397_v30, %v1773_v61 }
 0x218   :  { %v4399_v58 = vpop.f32.mrf.mxu0 }
 0x234   :  { %v4417_v19 = vpop.f32.mrf.mxu1 }
 0x236   :  { %v4418_v7 = vpop.f32.mrf.mxu1 }
 0x237   :  { %v4419_v20 = vadd.f32 %v4418_v7, %v4417_v19 }
 0x238   :  { %v4420_v49 = vpop.f32.mrf.mxu1 }
 0x239   :  { %v2561_v54 = vadd.f32 %v4419_v20, %v2167_v1 }
 0x23a   :  { %v4421_v18 = vpop.f32.mrf.mxu1 }
 0x267   :  { %v4439_v44 = vpop.f32.mrf.mxu0 }
 0x269   :  { %v4440_v12 = vpop.f32.mrf.mxu0 }
 0x26a   :  { %v4441_v41 = vadd.f32 %v4440_v12, %v4439_v44 }
 0x26b   :  { %v4442_v39 = vpop.f32.mrf.mxu0 }
 0x26c   :  { %v2955_v55 = vadd.f32 %v4441_v41, %v2561_v54 }
 0x26d   :  { %v4443_v4 = vpop.f32.mrf.mxu0 }
 0x290   :  { %v4461_v52 = vpop.f32.mrf.mxu1 }
 0x292   :  { %v4462_v9 = vpop.f32.mrf.mxu1 }
 0x293   :  { %v4463_v45 = vadd.f32 %v4462_v9, %v4461_v52 }
 0x294   :  { %v4464_v38 = vpop.f32.mrf.mxu1 }
 0x295   :  { %v3349_v53 = vadd.f32 %v4463_v45, %v2955_v55 }
 0x296   :  { %v4465_v10 = vpop.f32.mrf.mxu1 }
 0x297   :  { %v3357_v60 = vadd.f32 %v4272_v40, %v3349_v53 }
 0x299   :  { %v3358_v14 = vmax.f32 %v3357_v60, 0.0 }
 0x29b   :  { %v3359_v33 = vpack.c.bf16 %v3358_v14, %v3358_v14 }
 0x29d   :  { %4502 = vmatmul.mubr.bf16.vlgmr.msra.gmra.mxu0 %v3359_v33 }
 0x35d   :  { %v3465_v48 = vpop.f32.mrf.mxu0 }
 0x35e   :  { %v3466_v57 = vadd.f32 %v4273_v42, %v3465_v48 }
 0x35f   :  { %v4503_v0 = vpop.f32.mrf.mxu0 }
 0x360   :  { %v3471_v28 = vmax.f32 %v3466_v57, 0.0 }
 0x361   :  { %v3468_v5 = vpop.f32.mrf.mxu0 }
 0x362   :  { %v3472_v26 = vpack.c.bf16 %v3471_v28, %v3471_v28 }
 0x363   :  { %v4504_v47 = vpop.f32.mrf.mxu0 }
 0x364   :  { %4522 = vmatmul.mubr.bf16.vlgmr.msra.gmra.mxu1 %v3472_v26 }
 0x424   :  { %v3578_v17 = vpop.f32.mrf.mxu1 }
 0x425   :  { %v3579_v11 = vadd.f32 %v4282_v46, %v3578_v17 }
 0x426   :  { %v4523_v43 = vpop.f32.mrf.mxu1 }
 0x427   :  { %3584 = vst [vmem:[%s7482_s9] sm:$0xff] %v3579_v11 }
 0x428   :  { %v3581_v24 = vpop.f32.mrf.mxu1 }
 0x42a   :  { %v4524_v13 = vpop.f32.mrf.mxu1 }
 0x42b   :  { %3589 = vsyncpa [#allocation3], 1 }
 0x42c   :  { %3590 = vsyncpa [#allocation5], 1 }

</bundles_post_ra>
